<compile_context>
chip_gen: v7x
topology: tpu7x:2x2x1
jax: 0.10.0
libtpu: 0.0.40
codegen_flags: <defaults>
</compile_context>

<pallas_src>
import functools

import jax
import jax.numpy as jnp
from jax.experimental import pallas as pl
from jax.experimental.pallas import tpu as pltpu


# ----------------------------------------------------------------------------
# In-kernel helpers
# ----------------------------------------------------------------------------
def _group_norm_silu(v, gamma, beta, gmat, gmat_t, eps):
    """GroupNorm over (pixels x channels-in-group), then SiLU.

    v: (M, C) f32.  gmat: (C, G) 0/1 fold matrix (precomputed), gmat_t: (G, C).
    """
    M, C = v.shape
    G = gmat.shape[1]
    n = jnp.float32(M * (C // G))
    ch_sum = jnp.sum(v, axis=0, keepdims=True)              # (1, C)
    ch_sq = jnp.sum(v * v, axis=0, keepdims=True)           # (1, C)
    mean_g = jnp.dot(ch_sum, gmat, preferred_element_type=jnp.float32) / n
    # TODO(synk): single-pass E[x^2]-E[x]^2 can cancel for large-mean activations;
    # use a two-pass variance if the surrounding model feeds unnormalized data.
    var_g = jnp.dot(ch_sq, gmat, preferred_element_type=jnp.float32) / n - mean_g * mean_g
    mean_c = jnp.dot(mean_g, gmat_t, preferred_element_type=jnp.float32)   # (1, C)
    var_c = jnp.dot(var_g, gmat_t, preferred_element_type=jnp.float32)     # (1, C)
    h = (v - mean_c) * jax.lax.rsqrt(var_c + eps) * gamma + beta
    return h * jax.nn.sigmoid(h)                             # SiLU (f32, EUP)


def _conv3x3_im2col(a, w_ref, pbuf, left_ok, right_ok, W, pad):
    """Zero-padded ("SAME") 3x3 conv as a single K-dense im2col matmul.

    a: (H*W, C) f32 (row index y*W + x).  w_ref: (9*C, Cout) bf16, rows ordered
    (ky, kx, cin) (PyTorch cross-correlation).  pbuf: (pad + M + pad, C) bf16
    scratch whose pad rows are already zero.  Returns (H*W, Cout) f32.
    """
    M, C = a.shape
    # bf16-early: everything downstream of this store (slices, selects, concat,
    # MXU operands) moves half the bytes; f32 accumulation happens at the dot.
    pbuf[pad:pad + M, :] = a.astype(jnp.bfloat16)
    p = pbuf[...]                                            # (pad+M+pad, C) bf16

    pieces = []
    for dy in (-1, 0, 1):
        for dx in (-1, 0, 1):
            off = dy * W + dx
            # TODO(synk): if the bundle dump shows these unaligned sublane slices
            # lowering to generic copy loops, rebuild them with pltpu.roll(p, -off, 0)
            # so the shifts stay on the XLU slot.
            shifted = p[pad + off:pad + off + M, :]          # row i -> a[i+off] (or 0)
            # Vertically-OOB reads land in the zero pad rows (pad >= W+1), so only
            # the horizontal wrap of the dx != 0 taps needs masking.
            if dx == -1:
                shifted = jnp.where(left_ok, shifted, 0)
            elif dx == 1:
                shifted = jnp.where(right_ok, shifted, 0)
            pieces.append(shifted)

    patches = jnp.concatenate(pieces, axis=1)                # (M, 9*C) bf16
    return jnp.dot(patches, w_ref[...], preferred_element_type=jnp.float32)


# ----------------------------------------------------------------------------
# Fused ResBlock kernel (one sample per grid step)
# ----------------------------------------------------------------------------
def _resblock_kernel(x_ref, emb_ref, g1_ref, bt1_ref, g2_ref, bt2_ref,
                     gmat_ref, gmatt_ref, w1_ref, bc1_ref, w2_ref, bc2_ref,
                     o_ref, pbuf, *, H, W, C, eps, pad):
    M = H * W

    # Re-zero only the pad rows every step (cheap: 2*pad rows).  Done per-step, not
    # under program_id==0, so a megacore "parallel" split of the grid stays correct.
    zero_rows = jnp.zeros((pad, C), jnp.bfloat16)
    pbuf[0:pad, :] = zero_rows
    pbuf[pad + M:pad + M + pad, :] = zero_rows

    gmat = gmat_ref[...]
    gmat_t = gmatt_ref[...]
    col = jax.lax.broadcasted_iota(jnp.int32, (M, 1), 0) % W
    left_ok = col >= 1            # x-1 in range
    right_ok = col < (W - 1)      # x+1 in range

    # in_layers: GroupNorm -> SiLU -> 3x3 conv, then + emb (broadcast over pixels)
    a1 = _group_norm_silu(x_ref[0].astype(jnp.float32), g1_ref[...], bt1_ref[...],
                          gmat, gmat_t, eps)
    h = (_conv3x3_im2col(a1, w1_ref, pbuf, left_ok, right_ok, W, pad)
         + bc1_ref[...] + emb_ref[0].astype(jnp.float32))    # (M, Cout) f32

    # out_layers: GroupNorm -> SiLU -> Dropout -> 3x3 conv
    # TODO(synk): nn.Dropout treated as identity (inference/eval semantics).
    a2 = _group_norm_silu(h, g2_ref[...], bt2_ref[...], gmat, gmat_t, eps)
    h2 = _conv3x3_im2col(a2, w2_ref, pbuf, left_ok, right_ok, W, pad) + bc2_ref[...]

    # skip_connection = Identity; x is re-read here so the f32 copy is not live
    # across both convs (less vreg/VMEM pressure).
    # TODO(synk): with Cout < 128 this store is lane-masked; production configs
    # should use channel counts that are multiples of 128 (or present a lane-dense
    # (H, W*C) output layout).
    o_ref[0] = (x_ref[0].astype(jnp.float32) + h2).astype(o_ref.dtype)


# ----------------------------------------------------------------------------
# Wrappers
# ----------------------------------------------------------------------------
def prepare_params(params, num_groups=32):
    """One-time parameter prep (transpose / flatten / bf16 cast), off the hot path."""
    Cout, Cin = params["conv1_w"].shape[:2]
    G = num_groups
    gsz = Cin // G
    gmat = (jnp.arange(Cin)[:, None] // gsz ==
            jnp.arange(G)[None, :]).astype(jnp.float32)               # (C, G)
    w1 = jnp.transpose(params["conv1_w"], (2, 3, 1, 0)).reshape(9 * Cin, Cout)
    w2 = jnp.transpose(params["conv2_w"], (2, 3, 1, 0)).reshape(9 * Cout, Cout)
    return dict(
        gn1_gamma=params["gn1_gamma"].reshape(1, Cin).astype(jnp.float32),
        gn1_beta=params["gn1_beta"].reshape(1, Cin).astype(jnp.float32),
        gn2_gamma=params["gn2_gamma"].reshape(1, Cout).astype(jnp.float32),
        gn2_beta=params["gn2_beta"].reshape(1, Cout).astype(jnp.float32),
        gmat=gmat,
        gmat_t=gmat.T.copy(),
        w1=w1.astype(jnp.bfloat16),
        b1=params["conv1_b"].reshape(1, Cout).astype(jnp.float32),
        lin_w_t=params["lin_w"].T.astype(jnp.float32),
        lin_b=params["lin_b"].astype(jnp.float32),
        w2=w2.astype(jnp.bfloat16),
        b2=params["conv2_b"].reshape(1, Cout).astype(jnp.float32),
    )


def resblock_forward_nhwc(prep, x_nhwc, emb, num_groups=32, eps=1e-5):
    """Main entry point: NHWC activations (no layout transposes around the kernel)."""
    N, H, W, C = x_nhwc.shape
    Cout = prep["b1"].shape[1]
    assert C == Cout, "only the Identity skip path is implemented"
    # TODO(synk): skip_connection conv variants (out_channels != channels) not implemented.
    assert C % num_groups == 0
    M = H * W
    pad = ((W + 1 + 15) // 16) * 16       # zero pad rows (16-aligned for bf16 packing)
    P = pad + M + pad

    x_flat = x_nhwc.reshape(N, M, C)
    # emb_layers (SiLU + Linear): tiny GEMM, left to plain JAX / XLA.
    emb_out = (jax.nn.silu(emb.astype(jnp.float32)) @ prep["lin_w_t"]
               + prep["lin_b"]).reshape(N, 1, Cout).astype(x_flat.dtype)

    # Scoped-VMEM budget sized from the actual block + patch footprint (with headroom).
    itemsize = jnp.dtype(x_flat.dtype).itemsize
    est = (2 * 2 * M * C * itemsize        # x + out blocks, double-buffered
           + 2 * 2 * 2 * 9 * C * C         # both bf16 conv weights, double-buffered
           + P * C * 2                     # padded bf16 scratch
           + 2 * M * 9 * C * 2             # bf16 patch matrix + shifted pieces
           + 6 * M * C * 4)                # f32 activation temporaries
    vmem_limit = int(min(max(2 * est, 32 << 20), 128 << 20))

    kernel = functools.partial(_resblock_kernel, H=H, W=W, C=C, eps=eps, pad=pad)
    rep = lambda n: (0, 0)
    out = pl.pallas_call(
        kernel,
        out_shape=jax.ShapeDtypeStruct((N, M, Cout), x_nhwc.dtype),
        grid_spec=pltpu.PrefetchScalarGridSpec(
            num_scalar_prefetch=0,
            grid=(N,),
            in_specs=[
                pl.BlockSpec((1, M, C), lambda n: (n, 0, 0)),        # x
                pl.BlockSpec((1, 1, Cout), lambda n: (n, 0, 0)),     # emb_out
                # TODO(synk): the constant-index inputs below are double-buffered by
                # default; single-buffer them (pipeline_mode=pl.Buffered(1)) once
                # confirmed supported, to halve their VMEM at large C.
                pl.BlockSpec((1, C), rep),                           # gn1 gamma
                pl.BlockSpec((1, C), rep),                           # gn1 beta
                pl.BlockSpec((1, Cout), rep),                        # gn2 gamma
                pl.BlockSpec((1, Cout), rep),                        # gn2 beta
                pl.BlockSpec((C, num_groups), rep),                  # group fold (C,G)
                pl.BlockSpec((num_groups, C), rep),                  # group fold (G,C)
                pl.BlockSpec((9 * C, Cout), rep),                    # conv1 weight bf16
                pl.BlockSpec((1, Cout), rep),                        # conv1 bias
                pl.BlockSpec((9 * Cout, Cout), rep),                 # conv2 weight bf16
                pl.BlockSpec((1, Cout), rep),                        # conv2 bias
            ],
            out_specs=pl.BlockSpec((1, M, Cout), lambda n: (n, 0, 0)),
            scratch_shapes=[pltpu.VMEM((P, C), jnp.bfloat16)],       # padded row buffer
        ),
        compiler_params=pltpu.CompilerParams(
            dimension_semantics=("parallel",),
            vmem_limit_bytes=vmem_limit),
    )(x_flat, emb_out, prep["gn1_gamma"], prep["gn1_beta"],
      prep["gn2_gamma"], prep["gn2_beta"], prep["gmat"], prep["gmat_t"],
      prep["w1"], prep["b1"], prep["w2"], prep["b2"])
    # TODO(synk): at production UNet sizes add an H-tile grid axis (1-row halo +
    # two-pass GroupNorm stats) so a block fits v7x's 64 MiB VMEM and both v7x
    # TensorCores get work even when N == 1.
    return out.reshape(N, H, W, Cout)


def resblock_forward(prep, x_nchw, emb, num_groups=32, eps=1e-5):
    """PyTorch-layout (NCHW) convenience wrapper.  In a real model keep activations
    NHWC end-to-end and call resblock_forward_nhwc directly (saves two full HBM
    read+write transposes per block)."""
    x_nhwc = jnp.transpose(x_nchw, (0, 2, 3, 1))
    out = resblock_forward_nhwc(prep, x_nhwc, emb, num_groups, eps)
    return jnp.transpose(out, (0, 3, 1, 2))


# ----------------------------------------------------------------------------
# Pure-JAX f32 reference (NCHW, mirrors the PyTorch module) for verification.
# ----------------------------------------------------------------------------
def _ref_group_norm(x, gamma, beta, G, eps=1e-5):
    N, C, H, W = x.shape
    xg = x.reshape(N, G, -1)
    mean = xg.mean(-1, keepdims=True)
    var = xg.var(-1, keepdims=True)
    xn = ((xg - mean) * jax.lax.rsqrt(var + eps)).reshape(N, C, H, W)
    return xn * gamma[None, :, None, None] + beta[None, :, None, None]


def _ref_conv3x3(x, w, b):
    y = jax.lax.conv_general_dilated(x, w, (1, 1), "SAME",
                                     dimension_numbers=("NCHW", "OIHW", "NCHW"))
    return y + b[None, :, None, None]


def ref_forward(params, x, emb, G=32):
    h = jax.nn.silu(_ref_group_norm(x, params["gn1_gamma"], params["gn1_beta"], G))
    h = _ref_conv3x3(h, params["conv1_w"], params["conv1_b"])
    eo = jax.nn.silu(emb) @ params["lin_w"].T + params["lin_b"]
    h = h + eo[:, :, None, None]
    h2 = jax.nn.silu(_ref_group_norm(h, params["gn2_gamma"], params["gn2_beta"], G))
    h2 = _ref_conv3x3(h2, params["conv2_w"], params["conv2_b"])
    return x + h2


if __name__ == "__main__":
    N, C, H, W = 2, 32, 16, 16   # channels must be divisible by num_groups=32
    E = 64                       # emb_channels
    Cout = C                     # out_channels defaults to channels -> Identity skip

    key = jax.random.PRNGKey(0)
    ks = jax.random.split(key, 12)
    x = jax.random.normal(ks[0], (N, C, H, W), jnp.float32)
    emb = jax.random.normal(ks[1], (N, E), jnp.float32)

    # NOTE: the real module zero-inits conv2 (zero_module); random weights are used
    # here so the whole out_layers path is actually exercised by the check
    # (forward semantics are identical).
    params = dict(
        gn1_gamma=1.0 + 0.1 * jax.random.normal(ks[2], (C,), jnp.float32),
        gn1_beta=0.1 * jax.random.normal(ks[3], (C,), jnp.float32),
        conv1_w=0.1 * jax.random.normal(ks[4], (Cout, C, 3, 3), jnp.float32),
        conv1_b=0.1 * jax.random.normal(ks[5], (Cout,), jnp.float32),
        lin_w=0.1 * jax.random.normal(ks[6], (Cout, E), jnp.float32),
        lin_b=0.1 * jax.random.normal(ks[7], (Cout,), jnp.float32),
        gn2_gamma=1.0 + 0.1 * jax.random.normal(ks[8], (Cout,), jnp.float32),
        gn2_beta=0.1 * jax.random.normal(ks[9], (Cout,), jnp.float32),
        conv2_w=0.1 * jax.random.normal(ks[10], (Cout, Cout, 3, 3), jnp.float32),
        conv2_b=0.1 * jax.random.normal(ks[11], (Cout,), jnp.float32),
    )

    prep = prepare_params(params)
    out = jax.jit(resblock_forward)(prep, x, emb)
    jax.block_until_ready(out)

    ref = ref_forward(params, x, emb)
    assert out.shape == (N, Cout, H, W)
    err_max = float(jnp.max(jnp.abs(out - ref)))
    err_rel = float(jnp.linalg.norm(out - ref) / jnp.linalg.norm(ref))
    if err_max < 1e-1 and err_rel < 3e-2:   # bf16 matmul operands vs f32 reference
        print("KERNEL_OK")
    else:
        raise SystemExit(f"mismatch: max_err={err_max} rel_err={err_rel}")
</pallas_src>

<mosaic_0001>
module attributes {stable_mosaic.version = 11 : i64} {
  func.func @_resblock_kernel(%arg0: i32, %arg1: memref<1x256x32xf32, #tpu.memory_space<vmem>>, %arg2: memref<1x1x32xf32, #tpu.memory_space<vmem>>, %arg3: memref<1x32xf32, #tpu.memory_space<vmem>>, %arg4: memref<1x32xf32, #tpu.memory_space<vmem>>, %arg5: memref<1x32xf32, #tpu.memory_space<vmem>>, %arg6: memref<1x32xf32, #tpu.memory_space<vmem>>, %arg7: memref<32x32xf32, #tpu.memory_space<vmem>>, %arg8: memref<32x32xf32, #tpu.memory_space<vmem>>, %arg9: memref<288x32xbf16, #tpu.memory_space<vmem>>, %arg10: memref<1x32xf32, #tpu.memory_space<vmem>>, %arg11: memref<288x32xbf16, #tpu.memory_space<vmem>>, %arg12: memref<1x32xf32, #tpu.memory_space<vmem>>, %arg13: memref<1x256x32xf32, #tpu.memory_space<vmem>>, %arg14: memref<320x32xbf16, #tpu.memory_space<vmem>>) attributes {dimension_semantics = [#tpu.dimension_semantics<parallel>], iteration_bounds = array<i64: 2>, scalar_prefetch = 0 : i64, scratch_operands = 1 : i64, tpu.core_type = #tpu.core_type<tc>, window_params = [{transform_indices = @transform_0, window_bounds = array<i64: 1, 256, 32>}, {transform_indices = @transform_1, window_bounds = array<i64: 1, 1, 32>}, {pipeline_mode = #tpu.pipeline_mode<synchronous>, transform_indices = @transform_2, window_bounds = array<i64: 1, 32>}, {pipeline_mode = #tpu.pipeline_mode<synchronous>, transform_indices = @transform_3, window_bounds = array<i64: 1, 32>}, {pipeline_mode = #tpu.pipeline_mode<synchronous>, transform_indices = @transform_4, window_bounds = array<i64: 1, 32>}, {pipeline_mode = #tpu.pipeline_mode<synchronous>, transform_indices = @transform_5, window_bounds = array<i64: 1, 32>}, {pipeline_mode = #tpu.pipeline_mode<synchronous>, transform_indices = @transform_6, window_bounds = array<i64: 32, 32>}, {pipeline_mode = #tpu.pipeline_mode<synchronous>, transform_indices = @transform_7, window_bounds = array<i64: 32, 32>}, {pipeline_mode = #tpu.pipeline_mode<synchronous>, transform_indices = @transform_8, window_bounds = array<i64: 288, 32>}, {pipeline_mode = #tpu.pipeline_mode<synchronous>, transform_indices = @transform_9, window_bounds = array<i64: 1, 32>}, {pipeline_mode = #tpu.pipeline_mode<synchronous>, transform_indices = @transform_10, window_bounds = array<i64: 288, 32>}, {pipeline_mode = #tpu.pipeline_mode<synchronous>, transform_indices = @transform_11, window_bounds = array<i64: 1, 32>}, {transform_indices = @transform_12, window_bounds = array<i64: 1, 256, 32>}]} {
    %cst = arith.constant 0.000000e+00 : bf16
    %0 = vector.broadcast %cst : bf16 to vector<32x32xbf16>
    %c0 = arith.constant 0 : index
    %c0_0 = arith.constant 0 : index
    %1 = vector.load %arg14[%c0, %c0_0] : memref<320x32xbf16, #tpu.memory_space<vmem>>, vector<32x32xbf16>
    tpu.vector_store %arg14[%c0, %c0_0], %0 {strides = array<i32>} : memref<320x32xbf16, #tpu.memory_space<vmem>>, vector<32x32xbf16>,
    %c288 = arith.constant 288 : index
    %c0_1 = arith.constant 0 : index
    %2 = vector.load %arg14[%c288, %c0_1] : memref<320x32xbf16, #tpu.memory_space<vmem>>, vector<32x32xbf16>
    tpu.vector_store %arg14[%c288, %c0_1], %0 {strides = array<i32>} : memref<320x32xbf16, #tpu.memory_space<vmem>>, vector<32x32xbf16>,
    %c0_2 = arith.constant 0 : index
    %c0_3 = arith.constant 0 : index
    %3 = vector.load %arg7[%c0_2, %c0_3] : memref<32x32xf32, #tpu.memory_space<vmem>>, vector<32x32xf32>
    %c0_4 = arith.constant 0 : index
    %c0_5 = arith.constant 0 : index
    %4 = vector.load %arg8[%c0_4, %c0_5] : memref<32x32xf32, #tpu.memory_space<vmem>>, vector<32x32xf32>
    %5 = tpu.iota {dimensions = array<i32: 0>} : vector<256x1xi32>
    %c16_i32 = arith.constant 16 : i32
    %c0_i32 = arith.constant 0 : i32
    %6 = arith.cmpi eq, %c16_i32, %c0_i32 : i32
    %c1_i32 = arith.constant 1 : i32
    %7 = arith.select %6, %c1_i32, %c16_i32 : i32
    %8 = vector.broadcast %7 : i32 to vector<256x1xi32>
    %9 = arith.remsi %5, %8 : vector<256x1xi32>
    %c0_i32_6 = arith.constant 0 : i32
    %10 = vector.broadcast %c0_i32_6 : i32 to vector<256x1xi32>
    %11 = arith.cmpi ne, %9, %10 : vector<256x1xi32>
    %c0_i32_7 = arith.constant 0 : i32
    %12 = vector.broadcast %c0_i32_7 : i32 to vector<256x1xi32>
    %13 = arith.cmpi slt, %9, %12 : vector<256x1xi32>
    %c0_i32_8 = arith.constant 0 : i32
    %14 = arith.cmpi slt, %7, %c0_i32_8 : i32
    %15 = vector.broadcast %14 : i1 to vector<256x1xi1>
    %16 = vector.broadcast %15 : vector<256x1xi1> to vector<256x1xi1>
    %17 = arith.xori %13, %16 : vector<256x1xi1>
    %18 = arith.andi %17, %11 : vector<256x1xi1>
    %19 = vector.broadcast %7 : i32 to vector<256x1xi32>
    %20 = arith.addi %9, %19 : vector<256x1xi32>
    %21 = arith.select %18, %20, %9 : vector<256x1xi1>, vector<256x1xi32>
    %c1_i32_9 = arith.constant 1 : i32
    %22 = vector.broadcast %c1_i32_9 : i32 to vector<256x1xi32>
    %23 = arith.cmpi sge, %21, %22 : vector<256x1xi32>
    %c15_i32 = arith.constant 15 : i32
    %24 = vector.broadcast %c15_i32 : i32 to vector<256x1xi32>
    %25 = arith.cmpi slt, %21, %24 : vector<256x1xi32>
    %c0_10 = arith.constant 0 : index
    %c0_11 = arith.constant 0 : index
    %c0_12 = arith.constant 0 : index
    %26 = vector.load %arg1[%c0_10, %c0_11, %c0_12] : memref<1x256x32xf32, #tpu.memory_space<vmem>>, vector<1x256x32xf32>
    %27 = vector.shape_cast %26 : vector<1x256x32xf32> to vector<256x32xf32>
    %c0_13 = arith.constant 0 : index
    %c0_14 = arith.constant 0 : index
    %28 = vector.load %arg3[%c0_13, %c0_14] : memref<1x32xf32, #tpu.memory_space<vmem>>, vector<1x32xf32>
    %c0_15 = arith.constant 0 : index
    %c0_16 = arith.constant 0 : index
    %29 = vector.load %arg4[%c0_15, %c0_16] : memref<1x32xf32, #tpu.memory_space<vmem>>, vector<1x32xf32>
    %cst_17 = arith.constant dense<0.000000e+00> : vector<32xf32>
    %30 = vector.multi_reduction <add>, %27, %cst_17 [0] : vector<256x32xf32> to vector<32xf32>
    %31 = vector.shape_cast %30 : vector<32xf32> to vector<1x32xf32>
    %32 = arith.mulf %27, %27 : vector<256x32xf32>
    %cst_18 = arith.constant dense<0.000000e+00> : vector<32xf32>
    %33 = vector.multi_reduction <add>, %32, %cst_18 [0] : vector<256x32xf32> to vector<32xf32>
    %34 = vector.shape_cast %33 : vector<32xf32> to vector<1x32xf32>
    %cst_19 = arith.constant dense<0.000000e+00> : vector<1x32xf32>
    %35 = tpu.matmul %31, %3, %cst_19 {dimension_numbers = #tpu.dot_dimension_numbers<[1], [0], [0], [1], [0, 0, 1, 1], [], []>} : vector<1x32xf32>, vector<32x32xf32>, vector<1x32xf32> -> vector<1x32xf32>
    %cst_20 = arith.constant 2.560000e+02 : f32
    %36 = vector.broadcast %cst_20 : f32 to vector<1x32xf32>
    %37 = arith.divf %35, %36 : vector<1x32xf32>
    %cst_21 = arith.constant dense<0.000000e+00> : vector<1x32xf32>
    %38 = tpu.matmul %34, %3, %cst_21 {dimension_numbers = #tpu.dot_dimension_numbers<[1], [0], [0], [1], [0, 0, 1, 1], [], []>} : vector<1x32xf32>, vector<32x32xf32>, vector<1x32xf32> -> vector<1x32xf32>
    %cst_22 = arith.constant 2.560000e+02 : f32
    %39 = vector.broadcast %cst_22 : f32 to vector<1x32xf32>
    %40 = arith.divf %38, %39 : vector<1x32xf32>
    %41 = arith.mulf %37, %37 : vector<1x32xf32>
    %42 = arith.subf %40, %41 : vector<1x32xf32>
    %cst_23 = arith.constant dense<0.000000e+00> : vector<1x32xf32>
    %43 = tpu.matmul %37, %4, %cst_23 {dimension_numbers = #tpu.dot_dimension_numbers<[1], [0], [0], [1], [0, 0, 1, 1], [], []>} : vector<1x32xf32>, vector<32x32xf32>, vector<1x32xf32> -> vector<1x32xf32>
    %cst_24 = arith.constant dense<0.000000e+00> : vector<1x32xf32>
    %44 = tpu.matmul %42, %4, %cst_24 {dimension_numbers = #tpu.dot_dimension_numbers<[1], [0], [0], [1], [0, 0, 1, 1], [], []>} : vector<1x32xf32>, vector<32x32xf32>, vector<1x32xf32> -> vector<1x32xf32>
    %45 = vector.broadcast %43 : vector<1x32xf32> to vector<256x32xf32>
    %46 = arith.subf %27, %45 : vector<256x32xf32>
    %cst_25 = arith.constant 9.99999974E-6 : f32
    %47 = vector.broadcast %cst_25 : f32 to vector<1x32xf32>
    %48 = arith.addf %44, %47 : vector<1x32xf32>
    %49 = math.rsqrt %48 : vector<1x32xf32>
    %50 = vector.broadcast %49 : vector<1x32xf32> to vector<256x32xf32>
    %51 = arith.mulf %46, %50 : vector<256x32xf32>
    %52 = vector.broadcast %28 : vector<1x32xf32> to vector<256x32xf32>
    %53 = arith.mulf %51, %52 : vector<256x32xf32>
    %54 = vector.broadcast %29 : vector<1x32xf32> to vector<256x32xf32>
    %55 = arith.addf %53, %54 : vector<256x32xf32>
    %56 = arith.negf %55 : vector<256x32xf32>
    %57 = math.exp %56 : vector<256x32xf32>
    %cst_26 = arith.constant 1.000000e+00 : f32
    %58 = vector.broadcast %cst_26 : f32 to vector<256x32xf32>
    %59 = arith.addf %58, %57 : vector<256x32xf32>
    %60 = arith.divf %58, %59 : vector<256x32xf32>
    %61 = arith.mulf %55, %60 : vector<256x32xf32>
    %62 = arith.truncf %61 : vector<256x32xf32> to vector<256x32xbf16>
    %c32 = arith.constant 32 : index
    %c0_27 = arith.constant 0 : index
    %63 = vector.load %arg14[%c32, %c0_27] : memref<320x32xbf16, #tpu.memory_space<vmem>>, vector<256x32xbf16>
    tpu.vector_store %arg14[%c32, %c0_27], %62 {strides = array<i32>} : memref<320x32xbf16, #tpu.memory_space<vmem>>, vector<256x32xbf16>,
    %c0_28 = arith.constant 0 : index
    %c0_29 = arith.constant 0 : index
    %64 = vector.load %arg14[%c0_28, %c0_29] : memref<320x32xbf16, #tpu.memory_space<vmem>>, vector<320x32xbf16>
    %65 = vector.extract_strided_slice %64 {offsets = [15, 0], sizes = [256, 32], strides = [1, 1]} : vector<320x32xbf16> to vector<256x32xbf16>
    %c0_i32_30 = arith.constant 0 : i32
    %66 = arith.sitofp %c0_i32_30 : i32 to bf16
    %67 = vector.shape_cast %23 : vector<256x1xi1> to vector<256x1xi1>
    %68 = vector.broadcast %67 : vector<256x1xi1> to vector<256x32xi1>
    %69 = vector.broadcast %66 : bf16 to vector<256x32xbf16>
    %70 = arith.select %68, %65, %69 : vector<256x32xi1>, vector<256x32xbf16>
    %71 = vector.extract_strided_slice %64 {offsets = [16, 0], sizes = [256, 32], strides = [1, 1]} : vector<320x32xbf16> to vector<256x32xbf16>
    %72 = vector.extract_strided_slice %64 {offsets = [17, 0], sizes = [256, 32], strides = [1, 1]} : vector<320x32xbf16> to vector<256x32xbf16>
    %c0_i32_31 = arith.constant 0 : i32
    %73 = arith.sitofp %c0_i32_31 : i32 to bf16
    %74 = vector.shape_cast %25 : vector<256x1xi1> to vector<256x1xi1>
    %75 = vector.broadcast %74 : vector<256x1xi1> to vector<256x32xi1>
    %76 = vector.broadcast %73 : bf16 to vector<256x32xbf16>
    %77 = arith.select %75, %72, %76 : vector<256x32xi1>, vector<256x32xbf16>
    %78 = vector.extract_strided_slice %64 {offsets = [31, 0], sizes = [256, 32], strides = [1, 1]} : vector<320x32xbf16> to vector<256x32xbf16>
    %c0_i32_32 = arith.constant 0 : i32
    %79 = arith.sitofp %c0_i32_32 : i32 to bf16
    %80 = vector.shape_cast %23 : vector<256x1xi1> to vector<256x1xi1>
    %81 = vector.broadcast %80 : vector<256x1xi1> to vector<256x32xi1>
    %82 = vector.broadcast %79 : bf16 to vector<256x32xbf16>
    %83 = arith.select %81, %78, %82 : vector<256x32xi1>, vector<256x32xbf16>
    %84 = vector.extract_strided_slice %64 {offsets = [32, 0], sizes = [256, 32], strides = [1, 1]} : vector<320x32xbf16> to vector<256x32xbf16>
    %85 = vector.extract_strided_slice %64 {offsets = [33, 0], sizes = [256, 32], strides = [1, 1]} : vector<320x32xbf16> to vector<256x32xbf16>
    %c0_i32_33 = arith.constant 0 : i32
    %86 = arith.sitofp %c0_i32_33 : i32 to bf16
    %87 = vector.shape_cast %25 : vector<256x1xi1> to vector<256x1xi1>
    %88 = vector.broadcast %87 : vector<256x1xi1> to vector<256x32xi1>
    %89 = vector.broadcast %86 : bf16 to vector<256x32xbf16>
    %90 = arith.select %88, %85, %89 : vector<256x32xi1>, vector<256x32xbf16>
    %91 = vector.extract_strided_slice %64 {offsets = [47, 0], sizes = [256, 32], strides = [1, 1]} : vector<320x32xbf16> to vector<256x32xbf16>
    %c0_i32_34 = arith.constant 0 : i32
    %92 = arith.sitofp %c0_i32_34 : i32 to bf16
    %93 = vector.shape_cast %23 : vector<256x1xi1> to vector<256x1xi1>
    %94 = vector.broadcast %93 : vector<256x1xi1> to vector<256x32xi1>
    %95 = vector.broadcast %92 : bf16 to vector<256x32xbf16>
    %96 = arith.select %94, %91, %95 : vector<256x32xi1>, vector<256x32xbf16>
    %97 = vector.extract_strided_slice %64 {offsets = [48, 0], sizes = [256, 32], strides = [1, 1]} : vector<320x32xbf16> to vector<256x32xbf16>
    %98 = vector.extract_strided_slice %64 {offsets = [49, 0], sizes = [256, 32], strides = [1, 1]} : vector<320x32xbf16> to vector<256x32xbf16>
    %c0_i32_35 = arith.constant 0 : i32
    %99 = arith.sitofp %c0_i32_35 : i32 to bf16
    %100 = vector.shape_cast %25 : vector<256x1xi1> to vector<256x1xi1>
    %101 = vector.broadcast %100 : vector<256x1xi1> to vector<256x32xi1>
    %102 = vector.broadcast %99 : bf16 to vector<256x32xbf16>
    %103 = arith.select %101, %98, %102 : vector<256x32xi1>, vector<256x32xbf16>
    %104 = tpu.concatenate %70, %71, %77, %83, %84, %90, %96, %97, %103 in 1 : vector<256x32xbf16>, vector<256x32xbf16>, vector<256x32xbf16>, vector<256x32xbf16>, vector<256x32xbf16>, vector<256x32xbf16>, vector<256x32xbf16>, vector<256x32xbf16>, vector<256x32xbf16> -> vector<256x288xbf16>
    %c0_36 = arith.constant 0 : index
    %c0_37 = arith.constant 0 : index
    %105 = vector.load %arg9[%c0_36, %c0_37] : memref<288x32xbf16, #tpu.memory_space<vmem>>, vector<288x32xbf16>
    %cst_38 = arith.constant dense<0.000000e+00> : vector<256x32xf32>
    %106 = tpu.matmul %104, %105, %cst_38 {dimension_numbers = #tpu.dot_dimension_numbers<[1], [0], [0], [1], [0, 0, 1, 1], [], []>} : vector<256x288xbf16>, vector<288x32xbf16>, vector<256x32xf32> -> vector<256x32xf32>
    %c0_39 = arith.constant 0 : index
    %c0_40 = arith.constant 0 : index
    %107 = vector.load %arg10[%c0_39, %c0_40] : memref<1x32xf32, #tpu.memory_space<vmem>>, vector<1x32xf32>
    %108 = vector.broadcast %107 : vector<1x32xf32> to vector<256x32xf32>
    %109 = arith.addf %106, %108 : vector<256x32xf32>
    %c0_41 = arith.constant 0 : index
    %c0_42 = arith.constant 0 : index
    %c0_43 = arith.constant 0 : index
    %110 = vector.load %arg2[%c0_41, %c0_42, %c0_43] : memref<1x1x32xf32, #tpu.memory_space<vmem>>, vector<1x1x32xf32>
    %111 = vector.shape_cast %110 : vector<1x1x32xf32> to vector<1x32xf32>
    %112 = vector.broadcast %111 : vector<1x32xf32> to vector<256x32xf32>
    %113 = arith.addf %109, %112 : vector<256x32xf32>
    %c0_44 = arith.constant 0 : index
    %c0_45 = arith.constant 0 : index
    %114 = vector.load %arg5[%c0_44, %c0_45] : memref<1x32xf32, #tpu.memory_space<vmem>>, vector<1x32xf32>
    %c0_46 = arith.constant 0 : index
    %c0_47 = arith.constant 0 : index
    %115 = vector.load %arg6[%c0_46, %c0_47] : memref<1x32xf32, #tpu.memory_space<vmem>>, vector<1x32xf32>
    %cst_48 = arith.constant dense<0.000000e+00> : vector<32xf32>
    %116 = vector.multi_reduction <add>, %113, %cst_48 [0] : vector<256x32xf32> to vector<32xf32>
    %117 = vector.shape_cast %116 : vector<32xf32> to vector<1x32xf32>
    %118 = arith.mulf %113, %113 : vector<256x32xf32>
    %cst_49 = arith.constant dense<0.000000e+00> : vector<32xf32>
    %119 = vector.multi_reduction <add>, %118, %cst_49 [0] : vector<256x32xf32> to vector<32xf32>
    %120 = vector.shape_cast %119 : vector<32xf32> to vector<1x32xf32>
    %cst_50 = arith.constant dense<0.000000e+00> : vector<1x32xf32>
    %121 = tpu.matmul %117, %3, %cst_50 {dimension_numbers = #tpu.dot_dimension_numbers<[1], [0], [0], [1], [0, 0, 1, 1], [], []>} : vector<1x32xf32>, vector<32x32xf32>, vector<1x32xf32> -> vector<1x32xf32>
    %cst_51 = arith.constant 2.560000e+02 : f32
    %122 = vector.broadcast %cst_51 : f32 to vector<1x32xf32>
    %123 = arith.divf %121, %122 : vector<1x32xf32>
    %cst_52 = arith.constant dense<0.000000e+00> : vector<1x32xf32>
    %124 = tpu.matmul %120, %3, %cst_52 {dimension_numbers = #tpu.dot_dimension_numbers<[1], [0], [0], [1], [0, 0, 1, 1], [], []>} : vector<1x32xf32>, vector<32x32xf32>, vector<1x32xf32> -> vector<1x32xf32>
    %cst_53 = arith.constant 2.560000e+02 : f32
    %125 = vector.broadcast %cst_53 : f32 to vector<1x32xf32>
    %126 = arith.divf %124, %125 : vector<1x32xf32>
    %127 = arith.mulf %123, %123 : vector<1x32xf32>
    %128 = arith.subf %126, %127 : vector<1x32xf32>
    %cst_54 = arith.constant dense<0.000000e+00> : vector<1x32xf32>
    %129 = tpu.matmul %123, %4, %cst_54 {dimension_numbers = #tpu.dot_dimension_numbers<[1], [0], [0], [1], [0, 0, 1, 1], [], []>} : vector<1x32xf32>, vector<32x32xf32>, vector<1x32xf32> -> vector<1x32xf32>
    %cst_55 = arith.constant dense<0.000000e+00> : vector<1x32xf32>
    %130 = tpu.matmul %128, %4, %cst_55 {dimension_numbers = #tpu.dot_dimension_numbers<[1], [0], [0], [1], [0, 0, 1, 1], [], []>} : vector<1x32xf32>, vector<32x32xf32>, vector<1x32xf32> -> vector<1x32xf32>
    %131 = vector.broadcast %129 : vector<1x32xf32> to vector<256x32xf32>
    %132 = arith.subf %113, %131 : vector<256x32xf32>
    %cst_56 = arith.constant 9.99999974E-6 : f32
    %133 = vector.broadcast %cst_56 : f32 to vector<1x32xf32>
    %134 = arith.addf %130, %133 : vector<1x32xf32>
    %135 = math.rsqrt %134 : vector<1x32xf32>
    %136 = vector.broadcast %135 : vector<1x32xf32> to vector<256x32xf32>
    %137 = arith.mulf %132, %136 : vector<256x32xf32>
    %138 = vector.broadcast %114 : vector<1x32xf32> to vector<256x32xf32>
    %139 = arith.mulf %137, %138 : vector<256x32xf32>
    %140 = vector.broadcast %115 : vector<1x32xf32> to vector<256x32xf32>
    %141 = arith.addf %139, %140 : vector<256x32xf32>
    %142 = arith.negf %141 : vector<256x32xf32>
    %143 = math.exp %142 : vector<256x32xf32>
    %cst_57 = arith.constant 1.000000e+00 : f32
    %144 = vector.broadcast %cst_57 : f32 to vector<256x32xf32>
    %145 = arith.addf %144, %143 : vector<256x32xf32>
    %146 = arith.divf %144, %145 : vector<256x32xf32>
    %147 = arith.mulf %141, %146 : vector<256x32xf32>
    %148 = arith.truncf %147 : vector<256x32xf32> to vector<256x32xbf16>
    %c32_58 = arith.constant 32 : index
    %c0_59 = arith.constant 0 : index
    %149 = vector.load %arg14[%c32_58, %c0_59] : memref<320x32xbf16, #tpu.memory_space<vmem>>, vector<256x32xbf16>
    tpu.vector_store %arg14[%c32_58, %c0_59], %148 {strides = array<i32>} : memref<320x32xbf16, #tpu.memory_space<vmem>>, vector<256x32xbf16>,
    %c0_60 = arith.constant 0 : index
    %c0_61 = arith.constant 0 : index
    %150 = vector.load %arg14[%c0_60, %c0_61] : memref<320x32xbf16, #tpu.memory_space<vmem>>, vector<320x32xbf16>
    %151 = vector.extract_strided_slice %150 {offsets = [15, 0], sizes = [256, 32], strides = [1, 1]} : vector<320x32xbf16> to vector<256x32xbf16>
    %c0_i32_62 = arith.constant 0 : i32
    %152 = arith.sitofp %c0_i32_62 : i32 to bf16
    %153 = vector.shape_cast %23 : vector<256x1xi1> to vector<256x1xi1>
    %154 = vector.broadcast %153 : vector<256x1xi1> to vector<256x32xi1>
    %155 = vector.broadcast %152 : bf16 to vector<256x32xbf16>
    %156 = arith.select %154, %151, %155 : vector<256x32xi1>, vector<256x32xbf16>
    %157 = vector.extract_strided_slice %150 {offsets = [16, 0], sizes = [256, 32], strides = [1, 1]} : vector<320x32xbf16> to vector<256x32xbf16>
    %158 = vector.extract_strided_slice %150 {offsets = [17, 0], sizes = [256, 32], strides = [1, 1]} : vector<320x32xbf16> to vector<256x32xbf16>
    %c0_i32_63 = arith.constant 0 : i32
    %159 = arith.sitofp %c0_i32_63 : i32 to bf16
    %160 = vector.shape_cast %25 : vector<256x1xi1> to vector<256x1xi1>
    %161 = vector.broadcast %160 : vector<256x1xi1> to vector<256x32xi1>
    %162 = vector.broadcast %159 : bf16 to vector<256x32xbf16>
    %163 = arith.select %161, %158, %162 : vector<256x32xi1>, vector<256x32xbf16>
    %164 = vector.extract_strided_slice %150 {offsets = [31, 0], sizes = [256, 32], strides = [1, 1]} : vector<320x32xbf16> to vector<256x32xbf16>
    %c0_i32_64 = arith.constant 0 : i32
    %165 = arith.sitofp %c0_i32_64 : i32 to bf16
    %166 = vector.shape_cast %23 : vector<256x1xi1> to vector<256x1xi1>
    %167 = vector.broadcast %166 : vector<256x1xi1> to vector<256x32xi1>
    %168 = vector.broadcast %165 : bf16 to vector<256x32xbf16>
    %169 = arith.select %167, %164, %168 : vector<256x32xi1>, vector<256x32xbf16>
    %170 = vector.extract_strided_slice %150 {offsets = [32, 0], sizes = [256, 32], strides = [1, 1]} : vector<320x32xbf16> to vector<256x32xbf16>
    %171 = vector.extract_strided_slice %150 {offsets = [33, 0], sizes = [256, 32], strides = [1, 1]} : vector<320x32xbf16> to vector<256x32xbf16>
    %c0_i32_65 = arith.constant 0 : i32
    %172 = arith.sitofp %c0_i32_65 : i32 to bf16
    %173 = vector.shape_cast %25 : vector<256x1xi1> to vector<256x1xi1>
    %174 = vector.broadcast %173 : vector<256x1xi1> to vector<256x32xi1>
    %175 = vector.broadcast %172 : bf16 to vector<256x32xbf16>
    %176 = arith.select %174, %171, %175 : vector<256x32xi1>, vector<256x32xbf16>
    %177 = vector.extract_strided_slice %150 {offsets = [47, 0], sizes = [256, 32], strides = [1, 1]} : vector<320x32xbf16> to vector<256x32xbf16>
    %c0_i32_66 = arith.constant 0 : i32
    %178 = arith.sitofp %c0_i32_66 : i32 to bf16
    %179 = vector.shape_cast %23 : vector<256x1xi1> to vector<256x1xi1>
    %180 = vector.broadcast %179 : vector<256x1xi1> to vector<256x32xi1>
    %181 = vector.broadcast %178 : bf16 to vector<256x32xbf16>
    %182 = arith.select %180, %177, %181 : vector<256x32xi1>, vector<256x32xbf16>
    %183 = vector.extract_strided_slice %150 {offsets = [48, 0], sizes = [256, 32], strides = [1, 1]} : vector<320x32xbf16> to vector<256x32xbf16>
    %184 = vector.extract_strided_slice %150 {offsets = [49, 0], sizes = [256, 32], strides = [1, 1]} : vector<320x32xbf16> to vector<256x32xbf16>
    %c0_i32_67 = arith.constant 0 : i32
    %185 = arith.sitofp %c0_i32_67 : i32 to bf16
    %186 = vector.shape_cast %25 : vector<256x1xi1> to vector<256x1xi1>
    %187 = vector.broadcast %186 : vector<256x1xi1> to vector<256x32xi1>
    %188 = vector.broadcast %185 : bf16 to vector<256x32xbf16>
    %189 = arith.select %187, %184, %188 : vector<256x32xi1>, vector<256x32xbf16>
    %190 = tpu.concatenate %156, %157, %163, %169, %170, %176, %182, %183, %189 in 1 : vector<256x32xbf16>, vector<256x32xbf16>, vector<256x32xbf16>, vector<256x32xbf16>, vector<256x32xbf16>, vector<256x32xbf16>, vector<256x32xbf16>, vector<256x32xbf16>, vector<256x32xbf16> -> vector<256x288xbf16>
    %c0_68 = arith.constant 0 : index
    %c0_69 = arith.constant 0 : index
    %191 = vector.load %arg11[%c0_68, %c0_69] : memref<288x32xbf16, #tpu.memory_space<vmem>>, vector<288x32xbf16>
    %cst_70 = arith.constant dense<0.000000e+00> : vector<256x32xf32>
    %192 = tpu.matmul %190, %191, %cst_70 {dimension_numbers = #tpu.dot_dimension_numbers<[1], [0], [0], [1], [0, 0, 1, 1], [], []>} : vector<256x288xbf16>, vector<288x32xbf16>, vector<256x32xf32> -> vector<256x32xf32>
    %c0_71 = arith.constant 0 : index
    %c0_72 = arith.constant 0 : index
    %193 = vector.load %arg12[%c0_71, %c0_72] : memref<1x32xf32, #tpu.memory_space<vmem>>, vector<1x32xf32>
    %194 = vector.broadcast %193 : vector<1x32xf32> to vector<256x32xf32>
    %195 = arith.addf %192, %194 : vector<256x32xf32>
    %c0_73 = arith.constant 0 : index
    %c0_74 = arith.constant 0 : index
    %c0_75 = arith.constant 0 : index
    %196 = vector.load %arg1[%c0_73, %c0_74, %c0_75] : memref<1x256x32xf32, #tpu.memory_space<vmem>>, vector<1x256x32xf32>
    %197 = vector.shape_cast %196 : vector<1x256x32xf32> to vector<256x32xf32>
    %198 = arith.addf %197, %195 : vector<256x32xf32>
    %c0_76 = arith.constant 0 : index
    %c0_77 = arith.constant 0 : index
    %c0_78 = arith.constant 0 : index
    %199 = vector.load %arg13[%c0_76, %c0_77, %c0_78] : memref<1x256x32xf32, #tpu.memory_space<vmem>>, vector<1x256x32xf32>
    %200 = vector.shape_cast %199 : vector<1x256x32xf32> to vector<256x32xf32>
    %201 = vector.shape_cast %198 : vector<256x32xf32> to vector<1x256x32xf32>
    tpu.vector_store %arg13[%c0_76, %c0_77, %c0_78], %201 {strides = array<i32>} : memref<1x256x32xf32, #tpu.memory_space<vmem>>, vector<1x256x32xf32>,
    return
  }
  func.func @transform_0(%arg0: i32) -> (i32, i32, i32) {
    %c0_i32 = arith.constant 0 : i32
    %c0_i32_0 = arith.constant 0 : i32
    %c0_i32_1 = arith.constant 0 : i32
    return %arg0, %c0_i32, %c0_i32_0 : i32, i32, i32
  }
  func.func @transform_1(%arg0: i32) -> (i32, i32, i32) {
    %c0_i32 = arith.constant 0 : i32
    %c0_i32_0 = arith.constant 0 : i32
    %c0_i32_1 = arith.constant 0 : i32
    return %arg0, %c0_i32, %c0_i32_0 : i32, i32, i32
  }
  func.func @transform_2(%arg0: i32) -> (i32, i32) {
    %c0_i32 = arith.constant 0 : i32
    %c0_i32_0 = arith.constant 0 : i32
    %c0_i32_1 = arith.constant 0 : i32
    return %c0_i32, %c0_i32_0 : i32, i32
  }
  func.func @transform_3(%arg0: i32) -> (i32, i32) {
    %c0_i32 = arith.constant 0 : i32
    %c0_i32_0 = arith.constant 0 : i32
    %c0_i32_1 = arith.constant 0 : i32
    return %c0_i32, %c0_i32_0 : i32, i32
  }
  func.func @transform_4(%arg0: i32) -> (i32, i32) {
    %c0_i32 = arith.constant 0 : i32
    %c0_i32_0 = arith.constant 0 : i32
    %c0_i32_1 = arith.constant 0 : i32
    return %c0_i32, %c0_i32_0 : i32, i32
  }
  func.func @transform_5(%arg0: i32) -> (i32, i32) {
    %c0_i32 = arith.constant 0 : i32
    %c0_i32_0 = arith.constant 0 : i32
    %c0_i32_1 = arith.constant 0 : i32
    return %c0_i32, %c0_i32_0 : i32, i32
  }
  func.func @transform_6(%arg0: i32) -> (i32, i32) {
    %c0_i32 = arith.constant 0 : i32
    %c0_i32_0 = arith.constant 0 : i32
    %c0_i32_1 = arith.constant 0 : i32
    return %c0_i32, %c0_i32_0 : i32, i32
  }
  func.func @transform_7(%arg0: i32) -> (i32, i32) {
    %c0_i32 = arith.constant 0 : i32
    %c0_i32_0 = arith.constant 0 : i32
    %c0_i32_1 = arith.constant 0 : i32
    return %c0_i32, %c0_i32_0 : i32, i32
  }
  func.func @transform_8(%arg0: i32) -> (i32, i32) {
    %c0_i32 = arith.constant 0 : i32
    %c0_i32_0 = arith.constant 0 : i32
    %c0_i32_1 = arith.constant 0 : i32
    return %c0_i32, %c0_i32_0 : i32, i32
  }
  func.func @transform_9(%arg0: i32) -> (i32, i32) {
    %c0_i32 = arith.constant 0 : i32
    %c0_i32_0 = arith.constant 0 : i32
    %c0_i32_1 = arith.constant 0 : i32
    return %c0_i32, %c0_i32_0 : i32, i32
  }
  func.func @transform_10(%arg0: i32) -> (i32, i32) {
    %c0_i32 = arith.constant 0 : i32
    %c0_i32_0 = arith.constant 0 : i32
    %c0_i32_1 = arith.constant 0 : i32
    return %c0_i32, %c0_i32_0 : i32, i32
  }
  func.func @transform_11(%arg0: i32) -> (i32, i32) {
    %c0_i32 = arith.constant 0 : i32
    %c0_i32_0 = arith.constant 0 : i32
    %c0_i32_1 = arith.constant 0 : i32
    return %c0_i32, %c0_i32_0 : i32, i32
  }
  func.func @transform_12(%arg0: i32) -> (i32, i32, i32) {
    %c0_i32 = arith.constant 0 : i32
    %c0_i32_0 = arith.constant 0 : i32
    %c0_i32_1 = arith.constant 0 : i32
    return %arg0, %c0_i32, %c0_i32_0 : i32, i32, i32
  }
}

</mosaic_0001>

<bundles_post_ra>
// kernel: resblock_forward.1
= control target key start
LH: loop header
LB: loop body
LE: loop exit
PB: predicated region body
PF: predicated region fallthrough
CT: control target
= control target key end

     0   :  { %17 = vsyncpa [#allocation4], 0  ;;  %s13422_s0 = inlined_call_operand.hbm [shape: f32[2,256,32], index: 0, kind: input, shape index: {}]   ;;  %s13423_s1 = inlined_call_operand.vmem [shape: f32[2,1,32], index: 1, kind: input, shape index: {}]   ;;  %s13424_s2 = inlined_call_operand.vmem [shape: f32[1,32], index: 2, kind: input, shape index: {}]   ;;  %s13425_s3 = inlined_call_operand.vmem [shape: f32[1,32], index: 3, kind: input, shape index: {}]   ;;  %s13426_s4 = inlined_call_operand.vmem [shape: f32[1,32], index: 4, kind: input, shape index: {}]   ;;  %s13427_s5 = inlined_call_operand.vmem [shape: f32[1,32], index: 5, kind: input, shape index: {}]   ;;  %s13428_s6 = inlined_call_operand.vmem [shape: f32[32,32], index: 6, kind: input, shape index: {}]   ;;  %s13429_s7 = inlined_call_operand.vmem [shape: f32[32,32], index: 7, kind: input, shape index: {}]   ;;  %s13430_s8 = inlined_call_operand.vmem [shape: bf16[288,32], index: 8, kind: input, shape index: {}]   ;;  %s13431_s9 = inlined_call_operand.vmem [shape: f32[1,32], index: 9, kind: input, shape index: {}]   ;;  %s13432_s10 = inlined_call_operand.vmem [shape: bf16[288,32], index: 10, kind: input, shape index: {}]   ;;  %s13433_s11 = inlined_call_operand.vmem [shape: f32[1,32], index: 11, kind: input, shape index: {}]   ;;  %s13434_s12 = inlined_call_operand.hbm [shape: f32[2,256,32], index: 12, kind: output, shape index: {}]  }
   0x1   :  { %19 = vsyncpa [#allocation4 + $0x1], 0 }
   0x2   :  { %20 = vsyncpa [#allocation5], 0 }
   0x3   :  { %22 = vsyncpa [#allocation5 + $0x1], 0  ;;  %s8482_s21 = smov 0   ;;  %s8484_s22 = smov 0  }
   0x4   :  { %s8486_s23 = smov 0   ;;  %s8488_s24 = smov 0  }
   0x5 LB: > { %13630 = sst [smem:[#allocation9_spill]] %s8397_s23  ;;  %s8503_s25 = sadd.s32 4294967295, %s8401_s24   ;;  %s8401_s24 = sphi %s8488_s24, %s14157_s24   ;;  %s8397_s23 = sphi %s8486_s23, %s14162_s23   ;;  %s8393_s22 = sphi %s8484_s22, %s14161_s22   ;;  %s8389_s21 = sphi %s8482_s21, %s14160_s21  }
   0x6   : > { %s7210_s26 = sadd.s32 4294967294, %s8401_s24   ;;  %s8507_s27 = sadd.s32 1, %s8401_s24  }
   0x7   : > { %13631 = sst [smem:[#allocation10_spill]] %s8507_s27  ;;  %s35_s28 = sadd.s32 1, %s8397_s23 }
   0x8   : > { %s32_s29 = ssub.s32 %s8401_s24, %s8507_s27  ;;  %p42_p0 = scmp.ne.s32.totalorder %s8397_s23, %s8393_s22 }
   0x9   : > { %p33_p1 = scmp.eq.s32.totalorder %s32_s29, 0  ;;  %p43_p2 = scmp.eq.s32.totalorder %s8401_s24, 0 }
   0xa   : > { %p48_p3 = scmp.ne.s32.totalorder %s8393_s22, %s8389_s21  ;;  %p49_p4 = scmp.eq.s32.totalorder %s8503_s25, 0 }
   0xb   : > { %s8519_s30 = scalar_select %p33_p1, %s8397_s23, %s35_s28  }
   0xc   : > { %p8521_p5 = por %p43_p2, %p42_p0  ;;  %p8525_p6 = por %p49_p4, %p48_p3 }
   0xd   : > { %13632 = sst [smem:[#allocation11_spill]] %s8519_s30  ;;  %p308_p7 = scmp.eq.s32.totalorder %s8503_s25, 1 }
   0xe   : > { %p314_p8 = scmp.eq.s32.totalorder %s7210_s26, 1  ;;  %p7929_p10 = scmp.lt.s32.totalorder %s8401_s24, 2 }
   0xf   : > { %p8532_p11 = por %p308_p7, %p42_p0  ;;  %s364_s17 = sand.u32 1, %s8397_s23  }
  0x10   : > { %p8536_p12 = por %p314_p8, %p48_p3  ;;  %s7403_s18 = sshll.u32 %s8401_s24, 12 }
  0x11   : > { %s13635_s15 = scalar_select %p8532_p11, 1, 0 }
  0x12   : > { %s13636_s16 = scalar_select %p8536_p12, 1, 0 }
  0x13   : > { %s7213_s19 = sshll.u32 %s364_s17, 8  ;;  %s8545_s29 = scalar_lea.hbm %s13422_s0, %s7403_s18 }
  0x14   : > { %s368_s26 = scalar_lea.vmem [#allocation3], %s7213_s19  ;;  %p8549_p13 = pnand %p7929_p10, %p8521_p5 }
  0x15   : > { %s375_s30 = sshll.u32 %s368_s26, 4  ;;  %s8555_s23 = scalar_lea.sflag [#allocation4], %s364_s17  ;;  %s8553_s30 = int_to_ptr.vmem [resolvable:$true] %s375_s30 }
  0x16   : > { %s8305_s20 = scalar_lea.hbm %s8545_s29, 4096  ;;  %p8307_p1 = pneg %p8549_p13 }
  0x17   : > { %p8306_p0 = scmp.ne.s32.totalorder %s8545_s29, %s8305_s20  ;;  %s8310_s19 = scalar_lea.hbm %s13422_s0, 8192 }
  0x18   : > { %p8311_p4 = scmp.lt.u32.totalorder %s8545_s29, %s13422_s0  ;;  %p8312_p5 = scmp.lt.u32.totalorder %s8310_s19, %s8305_s20 }
  0x19   : > { %p8308_p2 = pnand %p8307_p1, %p8306_p0  ;;  %p8314_p8 = scmp.lt.u32.totalorder %s8305_s20, %s8545_s29 }
  0x1a   : > { %p8313_p7 = por %p8312_p5, %p8311_p4 }
  0x1b   : > { %p8309_p3 = pneg %p8308_p2 }
  0x1c   : > { %p8315_p10 = por %p8314_p8, %p8313_p7 }
  0x1e   : > { %p8316_p9 = pnand %p8315_p10, %p8309_p3 }
  0x20   : > { %8319 = shalt.err (!%p8316_p9)
}
  0x21   : > { %s8320_s17 = scalar_lea.vmem %s8553_s30, 4096  ;;  %s8403_s18 = smov [#allocation3]  }
  0x22   : > { %p8321_p0 = scmp.ne.s32.totalorder %s8553_s30, %s8320_s17  ;;  %s8325_s13 = sshll.u32 %s8403_s18, 4  ;;  %s8326_s13 = int_to_ptr.vmem [resolvable:$false] %s8325_s13 }
  0x23   : > { %s8327_s28 = scalar_lea.vmem %s8326_s13, 8192  ;;  %p8328_p11 = scmp.lt.s32.totalorder %s8553_s30, %s8326_s13 }
  0x24   : > { %p8323_p2 = pnand %p8321_p0, %p8307_p1  ;;  %p8329_p4 = scmp.lt.s32.totalorder %s8327_s28, %s8320_s17 }
  0x26   : > { %p8324_p12 = pneg %p8323_p2  ;;  %p8330_p5 = por %p8329_p4, %p8328_p11 }
  0x28   : > { %p8331_p7 = pnand %p8330_p5, %p8324_p12 }
  0x2a   : > { %8334 = shalt.err (!%p8331_p7)
}
  0x2b   : > { %s8404_s20 = smov 128   ;;  %s8405_s19 = smov 8  }
  0x2c   : > { %7924 = dma.hbm_to_vmem [thread:$0]  (!%p8549_p13), %s8545_s29, 4096, %s8553_s30, %s8555_s23, %s8404_s20, %s8404_s20, %s8405_s19  }
  0x2d   : > { %p7216_p9 = scmp.ge.s32.totalorder %s8401_s24, 1  ;;  %p389_p1 = scmp.lt.s32.totalorder %s8401_s24, 3 }
  0x2f   : > { %p390_p3 = pnand %p7216_p9, %p389_p1 }
  0x31   : > { %393 = sbr.rel (%p390_p3) target bundleno = 2421 (0x975), region = 68 }
  0x38   : > { %s8586_s26 = sand.u32 1, %s8393_s22  }
  0x39   : > { %s7217_s17 = sshll.u32 %s8586_s26, 8  ;;  %s396_s18 = scalar_lea.sflag [#allocation4], %s8586_s26 }
  0x3a   : > { %s8592_s13 = scalar_lea.vmem [#allocation3], %s7217_s17 }
  0x3b   : > { %8380 = dma.done.wait (%p8525_p6), %s396_s18, 4096  }
  0x3c   : > { %8382 = vsyncadd (%p8525_p6), %s396_s18, 4294963200  ;;  %v13442_v0 = vmov 0.0|0.0   ;;  %vm13485_vm0 = vmmov 0   ;;  %v13439_v1 = vmov 0.0   ;;  %vm449_vm1 = vcmask 261120   ;;  %v454_v2 = vld [vmem:[%s13428_s6] sm:$0xff] }
  0x3d   : > { %7865 = vmatprep.subr.bf16.mxu0 %v13442_v0  ;;  %7871 = vmatprep.subr.bf16.mxu1 %v13442_v0  ;;  %v455_v3 = vld [vmem:[%s13428_s6 + $0x8] sm:$0xff]  ;;  %v456_v4 = vld [vmem:[%s13428_s6 + $0x10] sm:$0xff]  ;;  %v457_v6 = vld [vmem:[%s13428_s6 + $0x18] sm:$0xff]  ;;  %vm8410_vm2 = vmmov 1   ;;  %s8411_s19 = smov 96   ;;  %s8412_s18 = smov 32  }
  0x3e   : > { %7713 = vmatprep.mubr.msk.f32.mxu0 %vm13485_vm0, %v13439_v1  ;;  %7724 = vmatprep.mubr.msk.f32.mxu1 %vm13485_vm0, %v13439_v1  ;;  %v8613_v5 = vpack.c.bf16 %v455_v3, %v454_v2  ;;  %v8619_v7 = vld [vmem:[%s8592_s13] sm:$0xff]  ;;  %v8622_v8 = vld [vmem:[%s8592_s13 + $0x8] sm:$0xff]  ;;  %v8625_v9 = vld [vmem:[%s8592_s13 + $0x10] sm:$0xff]  ;;  %v8636_v13 = vpack.c.bf16 %v457_v6, %v456_v4  ;;  %s8413_s23 = smov 64   ;;  %vm2045_vm12 = vsmask.f32 7424 }
  0x3f   : > { %v8628_v10 = vld [vmem:[%s8592_s13 + $0x18] sm:$0xff]  ;;  %v977_v11 = vsel %vm449_vm1, %v8619_v7, 0.0  ;;  %v978_v12 = vsel %vm449_vm1, %v8622_v8, 0.0  ;;  %v8639_v14 = vld [vmem:[%s8592_s13 + $0x20] sm:$0xff]  ;;  %v980_v16 = vsel %vm449_vm1, %v8625_v9, 0.0  ;;  %v8648_v18 = vld [vmem:[%s8592_s13 + $0x28] sm:$0xff]  ;;  %v1046_v44 = vmul.f32 %v8619_v7, %v8619_v7 }
  0x40   : > { %13638 = vst [vmem:[#allocation12_spill] sm:$0xff] %v8613_v5  ;;  %7867 = vmatpush3.bf16.msra.mxu0 %v8613_v5  ;;  %7873 = vmatpush3.bf16.msra.mxu1 %v8613_v5  ;;  %13639 = vst [vmem:[#allocation13_spill] sm:$0xff] %v8636_v13  ;;  %v979_v15 = vadd.f32 %v978_v12, %v977_v11  ;;  %v982_v17 = vsel %vm449_vm1, %v8628_v10, 0.0  ;;  %v984_v20 = vsel %vm449_vm1, %v8639_v14, 0.0  ;;  %v8655_v21 = vld [vmem:[%s8592_s13 + $0x30] sm:$0xff]  ;;  %v8658_v23 = vld [vmem:[%s8592_s13 + $0x38] sm:$0xff] }
  0x41   : > { %7868 = vmatprep.subr.bf16.mxu0 %v13442_v0  ;;  %7874 = vmatprep.subr.bf16.mxu1 %v13442_v0  ;;  %v986_v24 = vsel %vm449_vm1, %v8648_v18, 0.0  ;;  %v8665_v25 = vld [vmem:[%s8592_s13 + $0x40] sm:$0xff]  ;;  %v8668_v26 = vld [vmem:[%s8592_s13 + $0x48] sm:$0xff]  ;;  %v8671_v27 = vld [vmem:[%s8592_s13 + $0x50] sm:$0xff]  ;;  %v988_v32 = vsel %vm449_vm1, %v8655_v21, 0.0  ;;  %v990_v34 = vsel %vm449_vm1, %v8658_v23, 0.0  ;;  %v1047_v45 = vmul.f32 %v8622_v8, %v8622_v8 }
  0x42   : > { %v981_v19 = vadd.f32 %v980_v16, %v979_v15  ;;  %v8674_v29 = vld [vmem:[%s8592_s13 + $0x58] sm:$0xff]  ;;  %v8677_v30 = vld [vmem:[%s8592_s13 + $0x60] sm:$0xff]  ;;  %v8680_v31 = vld [vmem:[%s8592_s13 + $0x68] sm:$0xff]  ;;  %v992_v35 = vsel %vm449_vm1, %v8665_v25, 0.0  ;;  %v994_v36 = vsel %vm449_vm1, %v8668_v26, 0.0  ;;  %v996_v37 = vsel %vm449_vm1, %v8671_v27, 0.0 }
  0x43   : > { %v998_v39 = vsel %vm449_vm1, %v8674_v29, 0.0  ;;  %v1000_v40 = vsel %vm449_vm1, %v8677_v30, 0.0  ;;  %v1002_v41 = vsel %vm449_vm1, %v8680_v31, 0.0  ;;  %v8699_v43 = vld [vmem:[%s8592_s13 + $0x70] sm:$0xff]  ;;  %v8706_v46 = vld [vmem:[%s8592_s13 + $0x78] sm:$0xff]  ;;  %v8709_v47 = vld [vmem:[%s8592_s13 + $0x80] sm:$0xff]  ;;  %v1048_v49 = vmul.f32 %v8625_v9, %v8625_v9 }
  0x44   : > { %7870 = vmatpush3.bf16.msra.mxu0 %v8636_v13  ;;  %7876 = vmatpush3.bf16.msra.mxu1 %v8636_v13  ;;  %v983_v22 = vadd.f32 %v982_v17, %v981_v19  ;;  %v8714_v50 = vld [vmem:[%s8592_s13 + $0x88] sm:$0xff]  ;;  %v8717_v51 = vld [vmem:[%s8592_s13 + $0x90] sm:$0xff]  ;;  %v1049_v52 = vmul.f32 %v8628_v10, %v8628_v10  ;;  %v1050_v54 = vmul.f32 %v8639_v14, %v8639_v14  ;;  %v1078_v55 = vsel %vm449_vm1, %v1046_v44, 0.0  ;;  %v8729_v61 = vld [vmem:[%s8592_s13 + $0x98] sm:$0xff]  ;;  %p443_p6 = scmp.lt.s32.totalorder %s8503_s25, 1  ;;  %p14154_p12 = scmp.ne.s32.totalorder %s13635_s15, 0 }
  0x45   : > { %7877 = vmatprep.subr.bf16.mxu0 %v13442_v0  ;;  %7883 = vmatprep.subr.bf16.mxu1 %v13442_v0  ;;  %v1079_v56 = vsel %vm449_vm1, %v1047_v45, 0.0  ;;  %v1004_v58 = vsel %vm449_vm1, %v8699_v43, 0.0  ;;  %v1081_v60 = vsel %vm449_vm1, %v1048_v49, 0.0  ;;  %v1006_v62 = vsel %vm449_vm1, %v8706_v46, 0.0  ;;  %v8743_v15 = vld [vmem:[%s8592_s13 + $0xa0] sm:$0xff]  ;;  %v8746_v16 = vld [vmem:[%s8592_s13 + $0xa8] sm:$0xff]  ;;  %vm1934_vm3 = vmpackc.low %vm8410_vm2, %vm8410_vm2 }
  0x46   : > { %v985_v28 = vadd.f32 %v984_v20, %v983_v22  ;;  %v1080_v59 = vadd.f32 %v1079_v56, %v1078_v55  ;;  %v1008_v63 = vsel %vm449_vm1, %v8709_v47, 0.0  ;;  %v1051_v2 = vmul.f32 %v8648_v18, %v8648_v18  ;;  %s444_s28 = scalar_select %p443_p6, %s8503_s25, 1 }
  0x47   : > { %v1083_v3 = vsel %vm449_vm1, %v1049_v52, 0.0  ;;  %v1010_v6 = vsel %vm449_vm1, %v8714_v50, 0.0  ;;  %v1012_v11 = vsel %vm449_vm1, %v8717_v51, 0.0  ;;  %v1052_v17 = vmul.f32 %v8655_v21, %v8655_v21 }
  0x48   : > { %v987_v33 = vadd.f32 %v986_v24, %v985_v28  ;;  %v1082_v12 = vadd.f32 %v1081_v60, %v1080_v59  ;;  %v1053_v19 = vmul.f32 %v8658_v23, %v8658_v23  ;;  %v1054_v20 = vmul.f32 %v8665_v25, %v8665_v25  ;;  %v8756_v24 = vld [vmem:[%s8592_s13 + $0xb0] sm:$0xff]  ;;  %s445_s30 = scalar_lea.vmem %s13423_s1, %s444_s28  ;;  %s8414_s28 = smov [#allocation6]  }
  0x49   : > { %v1085_v22 = vsel %vm449_vm1, %v1050_v54, 0.0  ;;  %v1018_v45 = vsel %vm449_vm1, %v8746_v16, 0.0  ;;  %v1089_v49 = vsel %vm449_vm1, %v1052_v17, 0.0  ;;  %s8339_s20 = sshll.u32 %s8414_s28, 4  ;;  %s8340_s20 = int_to_ptr.vmem [resolvable:$false] %s8339_s20 }
  0x4a   : > { %v989_v38 = vadd.f32 %v988_v32, %v987_v33  ;;  %v1055_v32 = vmul.f32 %v8668_v26, %v8668_v26  ;;  %v1056_v33 = vmul.f32 %v8671_v27, %v8671_v27  ;;  %v1091_v52 = vsel %vm449_vm1, %v1053_v19, 0.0 }
  0x4b   : > { %v1093_v54 = vsel %vm449_vm1, %v1054_v20, 0.0 }
  0x4c   : > { %v991_v42 = vadd.f32 %v990_v34, %v989_v38  ;;  %v1084_v34 = vadd.f32 %v1083_v3, %v1082_v12  ;;  %v1087_v38 = vsel %vm449_vm1, %v1051_v2, 0.0  ;;  %v1095_v55 = vsel %vm449_vm1, %v1055_v32, 0.0 }
  0x4d   : > { %v1097_v56 = vsel %vm449_vm1, %v1056_v33, 0.0  ;;  %v1060_v33 = vmul.f32 %v8699_v43, %v8699_v43 }
  0x4e   : > { %v993_v48 = vadd.f32 %v992_v35, %v991_v42  ;;  %v1057_v35 = vmul.f32 %v8674_v29, %v8674_v29  ;;  %v1016_v42 = vsel %vm449_vm1, %v8743_v15, 0.0  ;;  %v1086_v44 = vadd.f32 %v1085_v22, %v1084_v34  ;;  %v8786_v22 = vld [vmem:[%s8592_s13 + $0xb8] sm:$0xff] }
  0x50   : > { %v995_v53 = vadd.f32 %v994_v36, %v993_v48  ;;  %v1058_v36 = vmul.f32 %v8677_v30, %v8677_v30  ;;  %v1020_v48 = vsel %vm449_vm1, %v8756_v24, 0.0 }
  0x52   : > { %v997_v57 = vadd.f32 %v996_v37, %v995_v53  ;;  %v1059_v37 = vmul.f32 %v8680_v31, %v8680_v31  ;;  %v1101_v59 = vsel %vm449_vm1, %v1058_v36, 0.0 }
  0x54   : > { %v999_v4 = vadd.f32 %v998_v39, %v997_v57  ;;  %v1099_v57 = vsel %vm449_vm1, %v1057_v35, 0.0  ;;  %v1103_v60 = vsel %vm449_vm1, %v1059_v37, 0.0  ;;  %v1062_v37 = vmul.f32 %v8709_v47, %v8709_v47 }
  0x56   : > { %v1001_v28 = vadd.f32 %v1000_v40, %v999_v4  ;;  %v1014_v40 = vsel %vm449_vm1, %v8729_v61, 0.0 }
  0x58   : > { %v1003_v39 = vadd.f32 %v1002_v41, %v1001_v28  ;;  %v1088_v41 = vadd.f32 %v1087_v38, %v1086_v44  ;;  %v1105_v38 = vsel %vm449_vm1, %v1060_v33, 0.0 }
  0x5a   : > { %v1005_v53 = vadd.f32 %v1004_v58, %v1003_v39  ;;  %v1090_v3 = vadd.f32 %v1089_v49, %v1088_v41  ;;  %v8801_v39 = vld [vmem:[%s8592_s13 + $0xc8] sm:$0xff] }
  0x5c   : > { %v1007_v2 = vadd.f32 %v1006_v62, %v1005_v53  ;;  %v1092_v12 = vadd.f32 %v1091_v52, %v1090_v3  ;;  %v1061_v62 = vmul.f32 %v8706_v46, %v8706_v46  ;;  %v8809_v52 = vld [vmem:[%s8592_s13 + $0xd0] sm:$0xff] }
  0x5e   : > { %v1009_v4 = vadd.f32 %v1008_v63, %v1007_v2  ;;  %v1094_v17 = vadd.f32 %v1093_v54, %v1092_v12  ;;  %v8793_v63 = vld [vmem:[%s8592_s13 + $0xc0] sm:$0xff]  ;;  %v1107_v49 = vsel %vm449_vm1, %v1061_v62, 0.0  ;;  %v1026_v54 = vsel %vm449_vm1, %v8801_v39, 0.0 }
  0x5f   : > { %v1024_v44 = vsel %vm449_vm1, %v8793_v63, 0.0  ;;  %v1065_v2 = vmul.f32 %v8729_v61, %v8729_v61 }
  0x60   : > { %v1011_v58 = vadd.f32 %v1010_v6, %v1009_v4  ;;  %v1096_v20 = vadd.f32 %v1095_v55, %v1094_v17  ;;  %v1109_v55 = vsel %vm449_vm1, %v1062_v37, 0.0  ;;  %v8825_v4 = vld [vmem:[%s8592_s13 + $0xe0] sm:$0xff] }
  0x61   : > { %v1115_v62 = vsel %vm449_vm1, %v1065_v2, 0.0 }
  0x62   : > { %v1013_v19 = vadd.f32 %v1012_v11, %v1011_v58  ;;  %v1098_v32 = vadd.f32 %v1097_v56, %v1096_v20  ;;  %v1022_v11 = vsel %vm449_vm1, %v8786_v22, 0.0  ;;  %v8817_v56 = vld [vmem:[%s8592_s13 + $0xd8] sm:$0xff] }
  0x63   : > { %v1030_v17 = vsel %vm449_vm1, %v8817_v56, 0.0 }
  0x64   : > { %v1015_v28 = vadd.f32 %v1014_v40, %v1013_v19  ;;  %v1100_v35 = vadd.f32 %v1099_v57, %v1098_v32  ;;  %v1066_v19 = vmul.f32 %v8743_v15, %v8743_v15 }
  0x66   : > { %v1017_v34 = vadd.f32 %v1016_v42, %v1015_v28  ;;  %v1102_v36 = vadd.f32 %v1101_v59, %v1100_v35  ;;  %v8833_v28 = vld [vmem:[%s8592_s13 + $0xe8] sm:$0xff]  ;;  %v1067_v35 = vmul.f32 %v8746_v16, %v8746_v16 }
  0x67   : > { %v1034_v37 = vsel %vm449_vm1, %v8833_v28, 0.0 }
  0x68   : > { %v1019_v6 = vadd.f32 %v1018_v45, %v1017_v34  ;;  %v1104_v42 = vadd.f32 %v1103_v60, %v1102_v36  ;;  %v1063_v45 = vmul.f32 %v8714_v50, %v8714_v50  ;;  %v1028_v60 = vsel %vm449_vm1, %v8809_v52, 0.0 }
  0x69   : > { %v1032_v34 = vsel %vm449_vm1, %v8825_v4, 0.0 }
  0x6a   : > { %v1021_v40 = vadd.f32 %v1020_v48, %v1019_v6  ;;  %v1106_v41 = vadd.f32 %v1105_v38, %v1104_v42  ;;  %v1064_v48 = vmul.f32 %v8717_v51, %v8717_v51  ;;  %v1111_v3 = vsel %vm449_vm1, %v1063_v45, 0.0  ;;  %v8841_v6 = vld [vmem:[%s8592_s13 + $0xf0] sm:$0xff]  ;;  %v8849_v42 = vld [vmem:[%s8592_s13 + $0xf8] sm:$0xff] }
  0x6b   : > { %v1068_v38 = vmul.f32 %v8756_v24, %v8756_v24 }
  0x6c   : > { %v1023_v53 = vadd.f32 %v1022_v11, %v1021_v40  ;;  %v1108_v59 = vadd.f32 %v1107_v49, %v1106_v41  ;;  %v1113_v20 = vsel %vm449_vm1, %v1064_v48, 0.0  ;;  %v1117_v40 = vsel %vm449_vm1, %v1066_v19, 0.0 }
  0x6d   : > { %v1036_v49 = vsel %vm449_vm1, %v8841_v6, 0.0  ;;  %v1119_v41 = vsel %vm449_vm1, %v1067_v35, 0.0  ;;  %v1072_v19 = vmul.f32 %v8809_v52, %v8809_v52 }
  0x6e   : > { %v1025_v57 = vadd.f32 %v1024_v44, %v1023_v53  ;;  %v1110_v58 = vadd.f32 %v1109_v55, %v1108_v59  ;;  %v1069_v53 = vmul.f32 %v8786_v22, %v8786_v22  ;;  %v1038_v55 = vsel %vm449_vm1, %v8849_v42, 0.0 }
  0x6f   : > { %v1121_v59 = vsel %vm449_vm1, %v1068_v38, 0.0 }
  0x70   : > { %v1027_v12 = vadd.f32 %v1026_v54, %v1025_v57  ;;  %v1112_v33 = vadd.f32 %v1111_v3, %v1110_v58  ;;  %v1070_v57 = vmul.f32 %v8793_v63, %v8793_v63  ;;  %v1071_v3 = vmul.f32 %v8801_v39, %v8801_v39 }
  0x72   : > { %v1029_v32 = vadd.f32 %v1028_v60, %v1027_v12  ;;  %v1114_v11 = vadd.f32 %v1113_v20, %v1112_v33  ;;  %v1123_v12 = vsel %vm449_vm1, %v1069_v53, 0.0  ;;  %v1125_v20 = vsel %vm449_vm1, %v1070_v57, 0.0 }
  0x73   : > { %v1127_v35 = vsel %vm449_vm1, %v1071_v3, 0.0 }
  0x74   : > { %v1031_v36 = vadd.f32 %v1030_v17, %v1029_v32  ;;  %v1116_v45 = vadd.f32 %v1115_v62, %v1114_v11  ;;  %v1074_v11 = vmul.f32 %v8825_v4, %v8825_v4 }
  0x76   : > { %v1033_v44 = vadd.f32 %v1032_v34, %v1031_v36  ;;  %v1118_v48 = vadd.f32 %v1117_v40, %v1116_v45  ;;  %v1073_v34 = vmul.f32 %v8817_v56, %v8817_v56 }
  0x78   : > { %v1035_v54 = vadd.f32 %v1034_v37, %v1033_v44  ;;  %v1120_v2 = vadd.f32 %v1119_v41, %v1118_v48  ;;  %v1129_v37 = vsel %vm449_vm1, %v1072_v19, 0.0  ;;  %v1075_v44 = vmul.f32 %v8833_v28, %v8833_v28  ;;  %v458_v41 = vld [vmem:[%s13429_s7] sm:$0xff] }
  0x79   : > { %v1131_v45 = vsel %vm449_vm1, %v1073_v34, 0.0  ;;  %v1076_v48 = vmul.f32 %v8841_v6, %v8841_v6 }
  0x7a   : > { %v1037_v60 = vadd.f32 %v1036_v49, %v1035_v54  ;;  %v1122_v17 = vadd.f32 %v1121_v59, %v1120_v2  ;;  %v459_v54 = vld [vmem:[%s13429_s7 + $0x8] sm:$0xff]  ;;  %v1135_v2 = vsel %vm449_vm1, %v1075_v44, 0.0 }
  0x7b   : > { %v8888_v3 = vpack.c.bf16 %v459_v54, %v458_v41 }
  0x7c   : > { %v1039_v58 = vadd.f32 %v1038_v55, %v1037_v60  ;;  %v1124_v33 = vadd.f32 %v1123_v12, %v1122_v17  ;;  %v1133_v55 = vsel %vm449_vm1, %v1074_v11, 0.0  ;;  %v1077_v60 = vmul.f32 %v8849_v42, %v8849_v42 }
  0x7d   : > { %13640 = vst [vmem:[#allocation14_spill] sm:$0xff] %v8888_v3  ;;  %v1137_v17 = vsel %vm449_vm1, %v1076_v48, 0.0 }
  0x7e   : > { %v1040_v32 = vrot.slane %v1039_v58, 4  ;;  %v1126_v36 = vadd.f32 %v1125_v20, %v1124_v33  ;;  %v1139_v20 = vsel %vm449_vm1, %v1077_v60, 0.0 }
  0x80   : > { %v1041_v62 = vadd.f32 %v1040_v32, %v1039_v58  ;;  %v1128_v40 = vadd.f32 %v1127_v35, %v1126_v36 }
  0x82   : > { %v1042_v38 = vrot.slane %v1041_v62, 2  ;;  %v1130_v53 = vadd.f32 %v1129_v37, %v1128_v40  ;;  %v461_v40 = vld [vmem:[%s13429_s7 + $0x18] sm:$0xff] }
  0x84   : > { %v1043_v49 = vadd.f32 %v1042_v38, %v1041_v62  ;;  %v1132_v59 = vadd.f32 %v1131_v45, %v1130_v53  ;;  %v460_v38 = vld [vmem:[%s13429_s7 + $0x10] sm:$0xff] }
  0x85   : > { %v8908_v44 = vpack.c.bf16 %v461_v40, %v460_v38 }
  0x86   : > { %v1044_v57 = vrot.slane %v1043_v49, 1  ;;  %v1134_v58 = vadd.f32 %v1133_v55, %v1132_v59  ;;  %v462_v59 = vlaneseq }
  0x87   : > { %13641 = vst [vmem:[#allocation15_spill] sm:$0xff] %v8908_v44 }
  0x88   : > { %v1045_v12 = vadd.f32 %v1044_v57, %v1043_v49  ;;  %v1136_v19 = vadd.f32 %v1135_v2, %v1134_v58  ;;  %v8914_v60 = vshrl.u32 %v462_v59, 7 }
  0x8a   : > { %7714 = vmatmul.mubr.msk.f32.vlgmr.msra.gmra.mrb[0].mxu0 %vm449_vm1, %v1045_v12  ;;  %v1138_v32 = vadd.f32 %v1137_v17, %v1136_v19  ;;  %v499_v2 = vand.u32 15, %v8914_v60  ;;  %v13444_v12 = vmov 0  }
  0x8b   : > { %7879 = vmatpush3.bf16.msra.mxu0 %v8888_v3  ;;  %7735 = vmatprep.mubr.msk.f32.mxu0 %vm13485_vm0, %v13439_v1  ;;  %451 = vst.msk [vmem:[#allocation2 + $0x8] sm:$0xff] %vm449_vm1, %v13444_v12  ;;  %450 = vst.msk [vmem:[#allocation2] sm:$0xff] %vm449_vm1, %v13444_v12  ;;  %v8926_v58 = vsel %vm1934_vm3, 65537, %v13444_v12 }
  0x8c   : > { %7880 = vmatprep.subr.bf16.mxu0 %v13442_v0  ;;  %v1140_v33 = vadd.f32 %v1139_v20, %v1138_v32  ;;  %452 = vst.msk [vmem:[#allocation2 + $0x90] sm:$0xff] %vm449_vm1, %v13444_v12  ;;  %453 = vst.msk [vmem:[#allocation2 + $0x98] sm:$0xff] %vm449_vm1, %v13444_v12  ;;  %vm879_vm4 = vcmp.ge.s32.totalorder %v499_v2, 1  ;;  %v7975_v2 = vld [vmem:[%s13430_s8 + $0x80] sm:$0xff]  }
  0x8d   : > { %vm1933_vm5 = vmpackc.low %vm879_vm4, %vm879_vm4 }
  0x8e   : > { %v1141_v34 = vrot.slane %v1140_v33, 4  ;;  %v1965_v17 = vsel %vm1933_vm5, 65537, %v13444_v12 }
  0x8f   : > { %7882 = vmatpush3.bf16.msra.mxu0 %v8908_v44  ;;  %v7257_v19 = vcombine.low %v1965_v17, %v8926_v58 }
  0x90   : > { %v1142_v35 = vadd.f32 %v1141_v34, %v1140_v33 }
  0x91   : > { %v2047_v20 = vshll.u32 %v7257_v19, 16  ;;  %v2050_v32 = vshrl.u32 %v7257_v19, 16 }
  0x92   : > { %v1143_v62 = vrot.slane %v1142_v35, 2  ;;  %v1850_v33 = vld [vmem:[#allocation2 + $0x8] sm:$0xff] }
  0x93   : > { %v8930_v34 = vrot.slane %v2047_v20, 1 }
  0x94   : > { %v1144_v36 = vadd.f32 %v1143_v62, %v1142_v35  ;;  %v2614_v35 = vshll.u32 %v1850_v33, 16 }
  0x95   : > { %13642 = vst [vmem:[#allocation16_spill] sm:$0xff] %v8930_v34  ;;  %v2052_v62 = vor.u32 %v2050_v32, %v8930_v34  ;;  %vm13489_vm6 = vcmp.ne.s16.totalorder %v8930_v34, 0 }
  0x96   : > { %v1145_v11 = vrot.slane %v1144_v36, 1 }
  0x98   : > { %v1146_v37 = vadd.f32 %v1145_v11, %v1144_v36  ;;  %v8934_v36 = vrot.slane %v2614_v35, 1  ;;  %v2545_v11 = vsel %vm13489_vm6, %v1850_v33, 0  ;;  %v8968_v35 = vsub.s32 0, %v8914_v60 }
  0x99   : > { %2876 = vrot.lane.b32.xlu1 %v2545_v11, %s8411_s19 }
  0x9a   : > { %7725 = vmatmul.mubr.msk.f32.vlgmr.msra.gmra.mrb[0].mxu1 %vm449_vm1, %v1146_v37  ;;  %13643 = vst [vmem:[#allocation17_spill] sm:$0xff] %v8934_v36  ;;  %2740 = vrot.lane.b32.xlu0 %v8934_v36, %s8412_s18  ;;  %v464_v37 = vadd.s32 8, %v8914_v60  ;;  %13647 = vst [vmem:[#allocation21_spill] sm:$0xff] %v8968_v35  ;;  %v471_v36 = vadd.s32 64, %v8914_v60 }
  0x9b   : > { %7885 = vmatpush3.bf16.msra.mxu1 %v8888_v3  ;;  %7746 = vmatprep.mubr.msk.f32.mxu1 %vm13485_vm0, %v13439_v1 }
  0x9c   : > { %7886 = vmatprep.subr.bf16.mxu1 %v13442_v0  ;;  %v506_v38 = vand.u32 15, %v464_v37 }
  0x9e   : > { %vm912_vm7 = vcmp.lt.s32.totalorder %v506_v38, 15 }
  0x9f   : > { %7888 = vmatpush3.bf16.msra.mxu1 %v8908_v44  ;;  %vm2272_vm8 = vmpackc.low %vm912_vm7, %vm912_vm7 }
  0xa0   : > { %v2304_v40 = vsel %vm2272_vm8, 65537, %v13444_v12  ;;  %7913 = vmatprep.subr.bf16.mxu1 %v7975_v2 }
 0x15d   : > { %v1216_v45 = vpop.f32.mrb[0].mxu0 }
 0x15e   : > { %v1221_v49 = vmul.f32 0.00390625, %v1216_v45  ;;  %v7715_v53 = vpop.f32.mrb[1].mxu0  ;;  %v7273_v45 = vcombine.low %v8926_v58, %v2304_v40 }
 0x160   : > { %7736 = vmatmul.mubr.msk.f32.vlgmr.msra.gmra.mrb[2].mxu0 %vm449_vm1, %v1221_v49  ;;  %v1296_v41 = vmul.f32 %v1221_v49, %v1221_v49  ;;  %v2385_v49 = vshrl.u32 %v7273_v45, 16  ;;  %v2388_v53 = vshll.u32 %v7273_v45, 16 }
 0x16d   : > { %v1291_v54 = vpop.f32.mrb[0].mxu1 }
 0x16e   : > { %v1295_v48 = vmul.f32 0.00390625, %v1291_v54  ;;  %v7726_v55 = vpop.f32.mrb[1].mxu1 }
 0x170   : > { %v1297_v57 = vsub.f32 %v1295_v48, %v1296_v41  ;;  %v8944_v41 = vrot.slane %v2385_v49, 7  ;;  %v469_v49 = vadd.s32 48, %v8914_v60 }
 0x172   : > { %7747 = vmatmul.mubr.msk.f32.vlgmr.msra.gmra.mrb[2].mxu1 %vm449_vm1, %v1297_v57  ;;  %13644 = vst [vmem:[#allocation18_spill] sm:$0xff] %v8944_v41  ;;  %v8947_v54 = vor.u32 %v2388_v53, %v8944_v41  ;;  %v465_v57 = vadd.s32 16, %v8914_v60  ;;  %v468_v53 = vadd.s32 40, %v8914_v60 }
 0x173   : > { %7915 = vmatpush3.bf16.msra.mxu1 %v7975_v2  ;;  %v474_v2 = vadd.s32 88, %v8914_v60 }
 0x174   : > { %13645 = vst [vmem:[#allocation19_spill] sm:$0xff] %v8947_v54  ;;  %vm13525_vm9 = vcmp.ne.s16.totalorder %v8947_v54, 0  ;;  %v513_v59 = vand.u32 15, %v465_v57  ;;  %v470_v57 = vadd.s32 56, %v8914_v60  ;;  %v534_v45 = vand.u32 15, %v468_v53 }
 0x175   : > { %v8952_v48 = vsel %vm13525_vm9, %v1850_v33, 0  ;;  %v467_v33 = vadd.s32 32, %v8914_v60  ;;  %v576_v0 = vand.u32 15, %v474_v2  ;;  %v478_v2 = vadd.s32 120, %v8914_v60 }
 0x176   : > { %13646 = vst [vmem:[#allocation20_spill] sm:$0xff] %v8952_v48  ;;  %v13441_v55 = vrot.slane %v8952_v48, 1  ;;  %vm881_vm10 = vcmp.ge.s32.totalorder %v513_v59, 1  ;;  %v472_v59 = vadd.s32 72, %v8914_v60  ;;  %v548_v1 = vand.u32 15, %v470_v57 }
 0x177   : > { %vm1935_vm11 = vmpackc.low %vm881_vm10, %vm881_vm10  ;;  %v527_v37 = vand.u32 15, %v467_v33  ;;  %vm9025_vm5 = vcmp.lt.s32.totalorder %v576_v0, 15 }
 0x178   : > { %2825 = vrot.lane.b32.xlu1 %v13441_v55, %s8413_s23  ;;  %v1967_v19 = vsel %vm1935_vm11, 65537, %v13444_v12  ;;  %v562_v55 = vand.u32 15, %v472_v59  ;;  %vm9009_vm2 = vcmp.lt.s32.totalorder %v548_v1, 15  ;;  %vm9054_vm11 = vcmp.lt.s32.totalorder %v534_v45, 15  ;;  %v7976_v45 = vld [vmem:[%s13430_s8 + $0x88] sm:$0xff]  }
 0x179   : > { %v8964_v32 = vcombine.low %v1967_v19, %v8926_v58  ;;  %vm8976_vm13 = vcmp.ge.s32.totalorder %v527_v37, 1  ;;  %vm2278_vm7 = vmpackc.low %vm9009_vm2, %vm9009_vm2  ;;  %7914 = vmatprep.subr.bf16.mxu1 %v7976_v45 }
 0x17a   : > { %vm1937_vm14 = vmpackc.low %vm8976_vm13, %vm8976_vm13  ;;  %vm9013_vm3 = vcmp.lt.s32.totalorder %v562_v55, 15  ;;  %7916 = vmatpush3.bf16.msra.mxu1 %v7976_v45  ;;  %v13666_v45 = vmov 0.0|0.0  }
 0x17b   : > { %v2054_v11 = vshll.u32 %v8964_v32, 16  ;;  %vm2280_vm8 = vmpackc.low %vm9013_vm3, %vm9013_vm3  ;;  %7889 = vmatprep.subr.bf16.mxu1 %v13666_v45 }
 0x17c   : > { %vm2282_vm13 = vmpackc.low %vm9025_vm5, %vm9025_vm5 }
 0x17d   : > { %v8974_v40 = vrot.slane %v2054_v11, 1  ;;  %v541_v11 = vand.u32 15, %v469_v49 }
 0x17f   : > { %v8992_v33 = vsel %vm2045_vm12, %v2052_v62, %v8974_v40  ;;  %vm9003_vm15 = vcmp.ge.s32.totalorder %v541_v11, 1  ;;  %v13657_v11 = vmov 0  }
 0x180   : > { %13650 = vst [vmem:[#allocation22_spill] sm:$0xff] %v8992_v33  ;;  %vm1939_vm4 = vmpackc.low %vm9003_vm15, %vm9003_vm15  ;;  %v2310_v53 = vsel %vm2278_vm7, 65537, %v13657_v11  ;;  %v2312_v57 = vsel %vm2280_vm8, 65537, %v13657_v11  ;;  %v2314_v12 = vsel %vm2282_vm13, 65537, %v13657_v11  ;;  %vm2383_vm7 = vsmask.f32 256 }
 0x181   : > { %v7276_v44 = vcombine.low %v8926_v58, %v2310_v53  ;;  %v7277_v1 = vcombine.low %v8926_v58, %v2312_v57  ;;  %vm2276_vm15 = vmpackc.low %vm9054_vm11, %vm9054_vm11 }
 0x183   : > { %v2408_v0 = vshrl.u32 %v7276_v44, 16  ;;  %v2416_v57 = vshrl.u32 %v7277_v1, 16 }
 0x185   : > { %v9129_v45 = vrot.slane %v2408_v0, 7  ;;  %v555_v0 = vand.u32 15, %v471_v36 }
 0x233   : > { %v1367_v17 = vpop.f32.mrb[2].mxu0 }
 0x234   : > { %v7737_v20 = vpop.f32.mrb[3].mxu0  ;;  %v8972_v38 = vrot.slane %v1367_v17, %v8968_v35  ;;  %v476_v17 = vadd.s32 104, %v8914_v60 }
 0x236   : > { %v590_v49 = vand.u32 15, %v476_v17  ;;  %v1969_v17 = vsel %vm1937_vm14, 65537, %v13657_v11  ;;  %v1406_v48 = vsub.f32 %v8849_v42, %v8972_v38  ;;  %v2419_v42 = vshll.u32 %v7277_v1, 16 }
 0x237   : > { %v7259_v20 = vcombine.low %v1969_v17, %v8926_v58  ;;  %v1971_v17 = vsel %vm1939_vm4, 65537, %v13657_v11  ;;  %vm9164_vm4 = vcmp.ge.s32.totalorder %v555_v0, 1  ;;  %v13673_v0 = vsub.f32 %v8674_v29, %v8972_v38 }
 0x238   : > { %vm9047_vm10 = vcmp.lt.s32.totalorder %v590_v49, 15  ;;  %v1405_v49 = vsub.f32 %v8841_v6, %v8972_v38  ;;  %v2411_v6 = vshll.u32 %v7276_v44, 16  ;;  %v13677_v29 = vsub.f32 %v8706_v46, %v8972_v38  ;;  %vm1941_vm5 = vmpackc.low %vm9164_vm4, %vm9164_vm4 }
 0x239   : > { %vm2284_vm14 = vmpackc.low %vm9047_vm10, %vm9047_vm10  ;;  %v2062_v53 = vshll.u32 %v7259_v20, 16  ;;  %v2066_v41 = vshrl.u32 %v7259_v20, 16  ;;  %v13681_v46 = vsub.f32 %v8729_v61, %v8972_v38  ;;  %v13685_v61 = vsub.f32 %v8786_v22, %v8972_v38 }
 0x23b   : > { %v9123_v54 = vrot.slane %v2062_v53, 1  ;;  %v2413_v53 = vor.u32 %v2411_v6, %v9129_v45  ;;  %v13670_v6 = vsub.f32 %v8665_v25, %v8972_v38  ;;  %v13674_v25 = vsub.f32 %v8677_v30, %v8972_v38 }
 0x23c   : > { %v13678_v30 = vsub.f32 %v8709_v47, %v8972_v38  ;;  %v13682_v47 = vsub.f32 %v8743_v15, %v8972_v38  ;;  %v13686_v15 = vsub.f32 %v8793_v63, %v8972_v38  ;;  %v13690_v63 = vsub.f32 %v8825_v4, %v8972_v38 }
 0x23d   : > { %v9276_v4 = vadd.s32 80, %v8914_v60 }
 0x245   : > { %v1476_v55 = vpop.f32.mrb[2].mxu1 }
 0x246   : > { %v1477_v37 = vadd.f32 1e-05, %v1476_v55  ;;  %v7748_v19 = vpop.f32.mrb[3].mxu1  ;;  %v7278_v55 = vcombine.low %v8926_v58, %v2314_v12  ;;  %v2308_v12 = vsel %vm2276_vm15, 65537, %v13657_v11 }
 0x247   : > { %v604_v19 = vand.u32 15, %v478_v2  ;;  %v2316_v2 = vsel %vm2284_vm14, 65537, %v13657_v11 }
 0x248   : > { %8011 = vrsqrt.f32 %v1477_v37  ;;  %v9098_v37 = vcombine.low %v1971_v17, %v8926_v58  ;;  %v2424_v62 = vshrl.u32 %v7278_v55, 16  ;;  %v1404_v17 = vsub.f32 %v8833_v28, %v8972_v38 }
 0x249   : > { %vm9107_vm2 = vcmp.lt.s32.totalorder %v604_v19, 15  ;;  %v9117_v59 = vcombine.low %v8926_v58, %v2316_v2  ;;  %v2058_v19 = vshrl.u32 %v8964_v32, 16  ;;  %v9127_v28 = vcombine.low %v8926_v58, %v2308_v12 }
 0x24a   : > { %v2070_v13 = vshll.u32 %v9098_v37, 16  ;;  %vm2286_vm3 = vmpackc.low %vm9107_vm2, %vm9107_vm2  ;;  %v9134_v2 = vrot.slane %v2416_v57, 7  ;;  %v9136_v5 = vrot.slane %v2424_v62, 7  ;;  %v2427_v32 = vshll.u32 %v7278_v55, 16 }
 0x24b   : > { %13667 = vst [vmem:[#allocation23_spill] sm:$0xff] %v9127_v28  ;;  %v2432_v12 = vshrl.u32 %v9117_v59, 16  ;;  %v2060_v1 = vor.u32 %v2058_v19, %v8974_v40  ;;  %v2318_v62 = vsel %vm2286_vm3, 65537, %v13657_v11  ;;  %v2068_v57 = vor.u32 %v2066_v41, %v9123_v54 }
 0x24c   : > { %v2072_v20 = vrot.slane %v2070_v13, 1  ;;  %v2400_v34 = vshrl.u32 %v9127_v28, 16  ;;  %v2421_v3 = vor.u32 %v2419_v42, %v9134_v2  ;;  %v2429_v33 = vor.u32 %v2427_v32, %v9136_v5 }
 0x24d   : > { %v2074_v44 = vshrl.u32 %v9098_v37, 16  ;;  %v9158_v40 = vrot.slane %v2432_v12, 7  ;;  %v2435_v19 = vshll.u32 %v9117_v59, 16  ;;  %v9162_v41 = vcombine.low %v8926_v58, %v2318_v62 }
 0x24e   : > { %v13671_v32 = vsub.f32 %v8668_v26, %v8972_v38  ;;  %v13672_v59 = vsub.f32 %v8671_v27, %v8972_v38  ;;  %v13675_v26 = vsub.f32 %v8680_v31, %v8972_v38  ;;  %v13676_v27 = vsub.f32 %v8699_v43, %v8972_v38 }
 0x24f   : > { %v13679_v31 = vsub.f32 %v8714_v50, %v8972_v38  ;;  %v13680_v43 = vsub.f32 %v8717_v51, %v8972_v38  ;;  %v13683_v50 = vsub.f32 %v8746_v16, %v8972_v38  ;;  %v13684_v51 = vsub.f32 %v8756_v24, %v8972_v38 }
 0x250   : > { %v13689_v13 = vsub.f32 %v8817_v56, %v8972_v38  ;;  %v2440_v56 = vshrl.u32 %v9162_v41, 16 }
 0x252   : > { %v8012_v55 = vpop.eup %8011 }
 0x253   : > { %v9153_v36 = vrot.slane %v8012_v55, %v8968_v35  ;;  %v569_v35 = vand.u32 15, %v9276_v4 }
 0x255   : > { %v1493_v42 = vmul.f32 %v9153_v36, %v13670_v6  ;;  %v1494_v37 = vmul.f32 %v9153_v36, %v13671_v32  ;;  %v1495_v12 = vmul.f32 %v9153_v36, %v13672_v59  ;;  %v1496_v62 = vmul.f32 %v9153_v36, %v13673_v0 }
 0x256   : > { %v1497_v55 = vmul.f32 %v9153_v36, %v13674_v25  ;;  %v1498_v6 = vmul.f32 %v9153_v36, %v13675_v26  ;;  %v1499_v32 = vmul.f32 %v9153_v36, %v13676_v27  ;;  %v1500_v59 = vmul.f32 %v9153_v36, %v13677_v29 }
 0x257   : > { %v1501_v0 = vmul.f32 %v9153_v36, %v13678_v30  ;;  %v1502_v25 = vmul.f32 %v9153_v36, %v13679_v31  ;;  %v1503_v26 = vmul.f32 %v9153_v36, %v13680_v43  ;;  %v1504_v27 = vmul.f32 %v9153_v36, %v13681_v46 }
 0x258   : > { %v1505_v29 = vmul.f32 %v9153_v36, %v13682_v47  ;;  %v1506_v30 = vmul.f32 %v9153_v36, %v13683_v50  ;;  %v1507_v31 = vmul.f32 %v9153_v36, %v13684_v51  ;;  %v1508_v43 = vmul.f32 %v9153_v36, %v13685_v61 }
 0x259   : > { %v1509_v16 = vmul.f32 %v9153_v36, %v13686_v15  ;;  %v13687_v46 = vsub.f32 %v8801_v39, %v8972_v38  ;;  %v13688_v47 = vsub.f32 %v8809_v52, %v8972_v38  ;;  %v9253_v50 = vmul.f32 %v9153_v36, %v13689_v13 }
 0x25a   : > { %v9259_v51 = vmul.f32 %v9153_v36, %v13690_v63  ;;  %v9262_v39 = vmul.f32 %v9153_v36, %v1404_v17  ;;  %v9265_v52 = vmul.f32 %v9153_v36, %v1405_v49  ;;  %v9268_v61 = vmul.f32 %v9153_v36, %v1406_v48  ;;  %v9281_v17 = vld [vmem:[%s13424_s2] ss:$0 sm:$0xff] }
 0x25b   : > { %v1510_v24 = vmul.f32 %v9153_v36, %v13687_v46  ;;  %v9247_v22 = vmul.f32 %v9153_v36, %v13688_v47  ;;  %v9272_v15 = vrot.slane %v2400_v34, 7  ;;  %v1973_v46 = vsel %vm1941_vm5, 65537, %v13657_v11 }
 0x25c   : > { %v9287_v48 = vsel %vm2045_vm12, %v2060_v1, %v9123_v54  ;;  %v9292_v47 = vsel %vm2045_vm12, %v2068_v57, %v2072_v20  ;;  %v2437_v63 = vor.u32 %v2435_v19, %v9158_v40  ;;  %v9302_v49 = vsel %vm2383_vm7, %v9129_v45, %v2421_v3  ;;  %v9320_v45 = vld [vmem:[%s13425_s3] ss:$0 sm:$0xff] }
 0x25d   : > { %13691 = vst [vmem:[#allocation24_spill] sm:$0xff] %v9272_v15  ;;  %13692 = vst [vmem:[#allocation25_spill] sm:$0xff] %v9287_v48  ;;  %v9296_v13 = vsel %vm2383_vm7, %v9272_v15, %v2413_v53  ;;  %v9306_v54 = vsel %vm2383_vm7, %v9134_v2, %v2429_v33  ;;  %v9309_v1 = vcombine.low %v1973_v46, %v8926_v58  ;;  %v9328_v3 = vadd.s32 152, %v8914_v60 }
 0x25e   : > { %13693 = vst [vmem:[#allocation26_spill] sm:$0xff] %v9292_v47  ;;  %13694 = vst [vmem:[#allocation27_spill] sm:$0xff] %v9296_v13  ;;  %v9311_v57 = vor.u32 %v2074_v44, %v2072_v20  ;;  %v1531_v53 = vmul.f32 %v9281_v17, %v1493_v42  ;;  %v1532_v34 = vmul.f32 %v9281_v17, %v1494_v37  ;;  %v9325_v20 = vadd.s32 136, %v8914_v60 }
 0x25f   : > { %13695 = vst [vmem:[#allocation28_spill] sm:$0xff] %v9302_v49  ;;  %13696 = vst [vmem:[#allocation29_spill] sm:$0xff] %v9306_v54  ;;  %v1533_v19 = vmul.f32 %v9281_v17, %v1495_v12  ;;  %v1534_v33 = vmul.f32 %v9281_v17, %v1496_v62  ;;  %v1535_v44 = vmul.f32 %v9281_v17, %v1497_v55  ;;  %v9335_v37 = vrot.slane %v2440_v56, 7 }
 0x260   : > { %v9333_v42 = vsel %vm2383_vm7, %v9136_v5, %v2437_v63  ;;  %v9338_v12 = vadd.s32 96, %v8914_v60  ;;  %v1536_v62 = vmul.f32 %v9281_v17, %v1498_v6  ;;  %v1537_v46 = vmul.f32 %v9281_v17, %v1499_v32 }
 0x261   : > { %13697 = vst [vmem:[#allocation30_spill] sm:$0xff] %v9333_v42  ;;  %v1538_v4 = vmul.f32 %v9281_v17, %v1500_v59  ;;  %v1539_v15 = vmul.f32 %v9281_v17, %v1501_v0  ;;  %v9346_v55 = vadd.f32 %v9320_v45, %v1531_v53  ;;  %v9349_v5 = vadd.f32 %v9320_v45, %v1532_v34 }
 0x262   : > { %v9352_v56 = vadd.f32 %v9320_v45, %v1533_v19  ;;  %v1540_v63 = vmul.f32 %v9281_v17, %v1502_v25  ;;  %v1541_v6 = vmul.f32 %v9281_v17, %v1503_v26  ;;  %v1542_v32 = vmul.f32 %v9281_v17, %v1504_v27 }
 0x263   : > { %v9358_v59 = vadd.f32 %v9320_v45, %v1534_v33  ;;  %v1543_v0 = vmul.f32 %v9281_v17, %v1505_v29  ;;  %v1544_v53 = vmul.f32 %v9281_v17, %v1506_v30  ;;  %v1545_v2 = vmul.f32 %v9281_v17, %v1507_v31 }
 0x264   : > { %v9364_v34 = vadd.f32 %v9320_v45, %v1535_v44  ;;  %v1546_v19 = vmul.f32 %v9281_v17, %v1508_v43  ;;  %v1547_v25 = vmul.f32 %v9281_v17, %v1509_v16  ;;  %v9369_v26 = vadd.f32 %v9320_v45, %v1536_v62 }
 0x265   : > { %v9372_v27 = vadd.f32 %v9320_v45, %v1537_v46  ;;  %v7233_v33 = vmul.f32 -1.442695, %v9346_v55  ;;  %v7234_v29 = vmul.f32 -1.442695, %v9349_v5  ;;  %v7235_v30 = vmul.f32 -1.442695, %v9352_v56 }
 0x266   : > { %v13698_v31 = vsub.f32 %v8619_v7, %v8972_v38  ;;  %v1548_v43 = vmul.f32 %v9281_v17, %v1510_v24  ;;  %v9383_v16 = vadd.f32 %v9320_v45, %v1538_v4  ;;  %v7236_v62 = vmul.f32 -1.442695, %v9358_v59 }
 0x267   : > { %v13699_v46 = vsub.f32 %v8622_v8, %v8972_v38  ;;  %v1549_v47 = vmul.f32 %v9281_v17, %v9247_v22  ;;  %v9393_v48 = vadd.f32 %v9320_v45, %v1539_v15  ;;  %v7237_v7 = vmul.f32 -1.442695, %v9364_v34 }
 0x268   : > { %v1485_v44 = vmul.f32 %v9153_v36, %v13698_v31  ;;  %8013 = vpow2.f32 %v7233_v33  ;;  %v1550_v24 = vmul.f32 %v9281_v17, %v9253_v50  ;;  %v9399_v4 = vadd.f32 %v9320_v45, %v1540_v63 }
 0x269   : > { %v1486_v28 = vmul.f32 %v9153_v36, %v13699_v46  ;;  %v7238_v31 = vmul.f32 -1.442695, %v9369_v26  ;;  %8015 = vpow2.f32 %v7234_v29  ;;  %v9403_v8 = vadd.f32 %v9320_v45, %v1541_v6 }
 0x26a   : > { %13700 = vst [vmem:[#allocation31_spill] sm:$0xff] %v9399_v4  ;;  %v9406_v22 = vadd.f32 %v9320_v45, %v1542_v32  ;;  %v7239_v15 = vmul.f32 -1.442695, %v9372_v27  ;;  %8017 = vpow2.f32 %v7235_v30  ;;  %v1551_v33 = vmul.f32 %v9281_v17, %v9259_v51 }
 0x26b   : > { %13701 = vst [vmem:[#allocation32_spill] sm:$0xff] %v9403_v8  ;;  %v1552_v50 = vmul.f32 %v9281_v17, %v9262_v39  ;;  %v7240_v63 = vmul.f32 -1.442695, %v9383_v16  ;;  %8019 = vpow2.f32 %v7236_v62  ;;  %v9415_v29 = vadd.f32 %v9320_v45, %v1543_v0 }
 0x26c   : > { %13702 = vst [vmem:[#allocation33_spill] sm:$0xff] %v9406_v22  ;;  %v9418_v6 = vadd.f32 %v9320_v45, %v1544_v53  ;;  %v7241_v32 = vmul.f32 -1.442695, %v9393_v48  ;;  %8021 = vpow2.f32 %v7237_v7  ;;  %v9422_v30 = vadd.f32 %v9320_v45, %v1545_v2 }
 0x26d   : > { %13703 = vst [vmem:[#allocation34_spill] sm:$0xff] %v9415_v29  ;;  %v9425_v51 = vadd.f32 %v9320_v45, %v1546_v19  ;;  %v7242_v39 = vmul.f32 -1.442695, %v9399_v4  ;;  %8023 = vpow2.f32 %v7238_v31  ;;  %vm9428_vm8 = vcmp.ge.s32.totalorder %v569_v35, 1 }
 0x26e   : > { %13704 = vst [vmem:[#allocation35_spill] sm:$0xff] %v9418_v6  ;;  %13705 = vst [vmem:[#allocation36_spill] sm:$0xff] %v9422_v30  ;;  %v7243_v0 = vmul.f32 -1.442695, %v9403_v8  ;;  %v7244_v53 = vmul.f32 -1.442695, %v9406_v22  ;;  %8025 = vpow2.f32 %v7239_v15  ;;  %v13709_v46 = vsub.f32 %v8625_v9, %v8972_v38 }
 0x26f   : > { %13706 = vst [vmem:[#allocation37_spill] sm:$0xff] %v9425_v51  ;;  %8027 = vpow2.f32 %v7240_v63  ;;  %v13710_v19 = vsub.f32 %v8628_v10, %v8972_v38  ;;  %v13711_v35 = vsub.f32 %v8639_v14, %v8972_v38  ;;  %v13712_v22 = vsub.f32 %v8648_v18, %v8972_v38  ;;  %vm1943_vm10 = vmpackc.low %vm9428_vm8, %vm9428_vm8 }
 0x270   : > { %v1487_v2 = vmul.f32 %v9153_v36, %v13709_v46  ;;  %v1553_v9 = vmul.f32 %v9281_v17, %v9265_v52  ;;  %v9453_v63 = vadd.f32 %v9320_v45, %v1547_v25  ;;  %v7245_v10 = vmul.f32 -1.442695, %v9415_v29 }
 0x271   : > { %v1488_v7 = vmul.f32 %v9153_v36, %v13710_v19  ;;  %v1489_v31 = vmul.f32 %v9153_v36, %v13711_v35  ;;  %v1490_v15 = vmul.f32 %v9153_v36, %v13712_v22  ;;  %8029 = vpow2.f32 %v7241_v32 }
 0x272   : > { %13713 = vst [vmem:[#allocation38_spill] sm:$0xff] %v9453_v63  ;;  %v1554_v46 = vmul.f32 %v9281_v17, %v9268_v61  ;;  %v9459_v14 = vadd.f32 %v9320_v45, %v1548_v43  ;;  %v7246_v19 = vmul.f32 -1.442695, %v9418_v6  ;;  %8031 = vpow2.f32 %v7242_v39  ;;  %v8014_v18 = vpop.eup %8013 }
 0x273   : > { %v9463_v22 = vadd.f32 %v9320_v45, %v1549_v47  ;;  %v9466_v52 = vadd.f32 %v9320_v45, %v1550_v24  ;;  %v7247_v25 = vmul.f32 -1.442695, %v9422_v30  ;;  %8033 = vpow2.f32 %v7243_v0  ;;  %v8016_v32 = vpop.eup %8015 }
 0x274   : > { %13714 = vst [vmem:[#allocation39_spill] sm:$0xff] %v9459_v14  ;;  %v9470_v35 = vadd.f32 %v9320_v45, %v1551_v33  ;;  %v9473_v61 = vadd.f32 %v9320_v45, %v1552_v50  ;;  %v7248_v43 = vmul.f32 -1.442695, %v9425_v51  ;;  %8035 = vpow2.f32 %v7244_v53  ;;  %v8018_v39 = vpop.eup %8017 }
 0x275   : > { %13715 = vst [vmem:[#allocation40_spill] sm:$0xff] %v9463_v22  ;;  %13716 = vst [vmem:[#allocation41_spill] sm:$0xff] %v9466_v52  ;;  %v7249_v47 = vmul.f32 -1.442695, %v9453_v63  ;;  %8037 = vpow2.f32 %v7245_v10  ;;  %v1523_v24 = vmul.f32 %v9281_v17, %v1485_v44  ;;  %v1524_v6 = vmul.f32 %v9281_v17, %v1486_v28  ;;  %v8020_v30 = vpop.eup %8019 }
 0x276   : > { %13717 = vst [vmem:[#allocation42_spill] sm:$0xff] %v9470_v35  ;;  %13718 = vst [vmem:[#allocation43_spill] sm:$0xff] %v9473_v61  ;;  %v9480_v0 = vadd.f32 %v9320_v45, %v1553_v9  ;;  %v9483_v33 = vadd.f32 %v9320_v45, %v1554_v46  ;;  %v7250_v50 = vmul.f32 -1.442695, %v9459_v14  ;;  %8039 = vpow2.f32 %v7246_v19  ;;  %v8022_v51 = vpop.eup %8021 }
 0x277   : > { %v7251_v53 = vmul.f32 -1.442695, %v9463_v22  ;;  %8041 = vpow2.f32 %v7247_v25  ;;  %v1525_v10 = vmul.f32 %v9281_v17, %v1487_v2  ;;  %v13721_v44 = vsub.f32 %v8655_v21, %v8972_v38  ;;  %v8024_v63 = vpop.eup %8023 }
 0x278   : > { %13719 = vst [vmem:[#allocation44_spill] sm:$0xff] %v9480_v0  ;;  %13720 = vst [vmem:[#allocation45_spill] sm:$0xff] %v9483_v33  ;;  %v7252_v9 = vmul.f32 -1.442695, %v9466_v52  ;;  %8043 = vpow2.f32 %v7248_v43  ;;  %v1526_v46 = vmul.f32 %v9281_v17, %v1488_v7  ;;  %v13722_v19 = vsub.f32 %v8658_v23, %v8972_v38  ;;  %v8026_v22 = vpop.eup %8025 }
 0x279   : > { %v1491_v28 = vmul.f32 %v9153_v36, %v13721_v44  ;;  %v7253_v25 = vmul.f32 -1.442695, %v9470_v35  ;;  %8045 = vpow2.f32 %v7249_v47  ;;  %v9500_v2 = vadd.f32 %v9320_v45, %v1523_v24  ;;  %v8028_v7 = vpop.eup %8027 }
 0x27a   : > { %v1492_v14 = vmul.f32 %v9153_v36, %v13722_v19  ;;  %v9503_v21 = vadd.f32 %v9320_v45, %v1524_v6  ;;  %v7254_v43 = vmul.f32 -1.442695, %v9473_v61  ;;  %8047 = vpow2.f32 %v7250_v50 }
 0x27b   : > { %v1527_v23 = vmul.f32 %v9281_v17, %v1489_v31  ;;  %v1528_v38 = vmul.f32 %v9281_v17, %v1490_v15  ;;  %v8030_v36 = vpop.eup %8029  ;;  %v7255_v47 = vmul.f32 -1.442695, %v9480_v0  ;;  %8049 = vpow2.f32 %v7251_v53 }
 0x27c   : > { %v9513_v24 = vadd.f32 %v9320_v45, %v1525_v10  ;;  %v618_v6 = vand.u32 15, %v9325_v20  ;;  %v8032_v62 = vpop.eup %8031  ;;  %v7256_v44 = vmul.f32 -1.442695, %v9483_v33  ;;  %8051 = vpow2.f32 %v7252_v9 }
 0x27d   : > { %v9518_v19 = vadd.f32 %v9320_v45, %v1526_v46  ;;  %v1975_v31 = vsel %vm1943_vm10, 65537, %v13657_v11  ;;  %v8034_v50 = vpop.eup %8033  ;;  %8053 = vpow2.f32 %v7253_v25  ;;  %v7225_v15 = vmul.f32 -1.442695, %v9500_v2 }
 0x27e   : > { %v7226_v53 = vmul.f32 -1.442695, %v9503_v21  ;;  %v8036_v0 = vpop.eup %8035  ;;  %8055 = vpow2.f32 %v7254_v43  ;;  %v1697_v20 = vadd.f32 1.0, %v8014_v18  ;;  %v9525_v61 = vadd.f32 %v9320_v45, %v1527_v23 }
 0x27f   : > { %v9528_v9 = vadd.f32 %v9320_v45, %v1528_v38  ;;  %v8038_v46 = vpop.eup %8037  ;;  %8057 = vpow2.f32 %v7255_v47  ;;  %v1698_v33 = vadd.f32 1.0, %v8016_v32  ;;  %v7227_v25 = vmul.f32 -1.442695, %v9513_v24 }
 0x280   : > { %vm9531_vm11 = vcmp.lt.s32.totalorder %v618_v6, 15  ;;  %v8040_v52 = vpop.eup %8039  ;;  %8059 = vpow2.f32 %v7256_v44  ;;  %v7228_v43 = vmul.f32 -1.442695, %v9518_v19  ;;  %v1529_v18 = vmul.f32 %v9281_v17, %v1491_v28 }
 0x281   : > { %v632_v23 = vand.u32 15, %v9328_v3  ;;  %v8042_v10 = vpop.eup %8041  ;;  %8061 = vpow2.f32 %v7225_v15  ;;  %v1699_v38 = vadd.f32 1.0, %v8018_v39  ;;  %v1530_v47 = vmul.f32 %v9281_v17, %v1492_v14  ;;  %vm2288_vm13 = vmpackc.low %vm9531_vm11, %vm9531_vm11 }
 0x282   : > { %v13725_v32 = vshll.u32 %v9162_v41, 16  ;;  %v8044_v29 = vpop.eup %8043  ;;  %8063 = vpow2.f32 %v7226_v53  ;;  %v1700_v8 = vadd.f32 1.0, %v8020_v30  ;;  %v9543_v44 = vmul.f32 -1.442695, %v9525_v61 }
 0x283   : > { %v9546_v4 = vmul.f32 -1.442695, %v9528_v9  ;;  %v8046_v3 = vpop.eup %8045  ;;  %v1701_v39 = vadd.f32 1.0, %v8022_v51  ;;  %v1702_v17 = vadd.f32 1.0, %v8024_v63  ;;  %8065 = vpow2.f32 %v7227_v25 }
 0x284   : > { %v2445_v6 = vor.u32 %v13725_v32, %v9335_v37  ;;  %vm9551_vm14 = vcmp.lt.s32.totalorder %v632_v23, 15  ;;  %v8048_v14 = vpop.eup %8047  ;;  %v1703_v30 = vadd.f32 1.0, %v8026_v22  ;;  %8067 = vpow2.f32 %v7228_v43 }
 0x285   : > { %v9556_v28 = vadd.f32 %v9320_v45, %v1529_v18  ;;  %v13729_v15 = vshll.u32 %v9309_v1, 16  ;;  %vm2290_vm15 = vmpackc.low %vm9551_vm14, %vm9551_vm14  ;;  %v8050_v51 = vpop.eup %8049  ;;  %8069 = vrcp.f32 %v1697_v20  ;;  %v9564_v63 = vadd.f32 %v9320_v45, %v1530_v47 }
 0x286   : > { %v9568_v25 = vsel %vm2383_vm7, %v9158_v40, %v2445_v6  ;;  %v2320_v22 = vsel %vm2288_vm13, 65537, %v13657_v11  ;;  %v8052_v43 = vpop.eup %8051  ;;  %v1704_v18 = vadd.f32 1.0, %v8028_v7  ;;  %v1705_v23 = vadd.f32 1.0, %v8030_v36 }
 0x287   : > { %13728 = vst [vmem:[#allocation46_spill] sm:$0xff] %v9556_v28  ;;  %v2080_v53 = vrot.slane %v13729_v15, 1  ;;  %13730 = vst [vmem:[#allocation47_spill] sm:$0xff] %v9564_v63  ;;  %8071 = vrcp.f32 %v1698_v33  ;;  %v8054_v45 = vpop.eup %8053  ;;  %v9581_v40 = vcombine.low %v1975_v31, %v8926_v58  ;;  %v2322_v47 = vsel %vm2290_vm15, 65537, %v13657_v11 }
 0x288   : > { %13731 = vst [vmem:[#allocation48_spill] sm:$0xff] %v9568_v25  ;;  %8073 = vrcp.f32 %v1699_v38  ;;  %v583_v32 = vand.u32 15, %v9338_v12  ;;  %v9585_v35 = vpop.eup %8055  ;;  %v1706_v6 = vadd.f32 1.0, %v8032_v62  ;;  %v9588_v7 = vmul.f32 -1.442695, %v9556_v28 }
 0x289   : > { %v9578_v20 = vsel %vm2045_vm12, %v9311_v57, %v2080_v53  ;;  %8075 = vrcp.f32 %v1700_v8  ;;  %v9591_v33 = vcombine.low %v8926_v58, %v2320_v22  ;;  %v9593_v57 = vpop.eup %8057  ;;  %v1707_v36 = vadd.f32 1.0, %v8034_v50 }
 0x28a   : > { %13732 = vst [vmem:[#allocation49_spill] sm:$0xff] %v9578_v20  ;;  %v1708_v38 = vadd.f32 1.0, %v8036_v0  ;;  %8077 = vrcp.f32 %v1701_v39  ;;  %v9596_v31 = vmul.f32 -1.442695, %v9564_v63  ;;  %v9598_v41 = vpop.eup %8059  ;;  %v1709_v12 = vadd.f32 1.0, %v8038_v46 }
 0x28b   : > { %8079 = vrcp.f32 %v1702_v17  ;;  %v13733_v8 = vshrl.u32 %v9309_v1, 16  ;;  %v9605_v15 = vcombine.low %v8926_v58, %v2322_v47  ;;  %v8062_v22 = vpop.eup %8061  ;;  %v1710_v28 = vadd.f32 1.0, %v8040_v52 }
 0x28c   : > { %8081 = vrcp.f32 %v1703_v30  ;;  %vm9608_vm2 = vcmp.ge.s32.totalorder %v583_v32, 1  ;;  %v8064_v39 = vpop.eup %8063  ;;  %v1689_v63 = vadd.f32 1.0, %v8062_v22  ;;  %v1711_v46 = vadd.f32 1.0, %v8042_v10 }
 0x28d   : > { %v9602_v62 = vor.u32 %v13733_v8, %v2080_v53  ;;  %8083 = vrcp.f32 %v1704_v18  ;;  %v2448_v1 = vshrl.u32 %v9591_v33, 16  ;;  %v8066_v17 = vpop.eup %8065  ;;  %v1690_v53 = vadd.f32 1.0, %v8064_v39  ;;  %vm1945_vm3 = vmpackc.low %vm9608_vm2, %vm9608_vm2 }
 0x28e   : > { %v1712_v8 = vadd.f32 1.0, %v8044_v29  ;;  %v9613_v47 = vadd.f32 1.0, %v8046_v3  ;;  %8085 = vrcp.f32 %v1705_v23  ;;  %v8068_v52 = vpop.eup %8067  ;;  %v9615_v30 = vadd.f32 1.0, %v8048_v14 }
 0x28f   : > { %8087 = vrcp.f32 %v1689_v63  ;;  %v1691_v32 = vadd.f32 1.0, %v8066_v17  ;;  %v2456_v0 = vshrl.u32 %v9605_v15, 16  ;;  %v8070_v10 = vpop.eup %8069  ;;  %v9621_v18 = vadd.f32 1.0, %v8050_v51 }
 0x290   : > { %8089 = vrcp.f32 %v1690_v53  ;;  %v1692_v22 = vadd.f32 1.0, %v8068_v52  ;;  %v2451_v29 = vshll.u32 %v9591_v33, 16  ;;  %v9624_v23 = vadd.f32 1.0, %v8052_v43 }
 0x291   : > { %v8072_v3 = vpop.eup %8071  ;;  %8091 = vrcp.f32 %v1691_v32  ;;  %v1793_v14 = vmul.f32 %v8070_v10, %v9346_v55  ;;  %v2450_v63 = vrot.slane %v2448_v1, 7  ;;  %v2459_v17 = vshll.u32 %v9605_v15, 16 }
 0x292   : > { %v8074_v39 = vpop.eup %8073  ;;  %8093 = vrcp.f32 %v1692_v22  ;;  %v1794_v50 = vmul.f32 %v8072_v3, %v9349_v5  ;;  %v1977_v53 = vsel %vm1945_vm3, 65537, %v13657_v11  ;;  %vm13521_vm4 = vcmp.ne.s16.totalorder %v9296_v13, 0 }
 0x293   : > { %v8076_v51 = vpop.eup %8075  ;;  %8095 = vrcp.f32 %v1706_v6  ;;  %v1795_v52 = vmul.f32 %v8074_v39, %v9352_v56  ;;  %v9632_v43 = vrot.slane %v2456_v0, 7  ;;  %v484_v33 = vadd.s32 168, %v8914_v60 }
 0x294   : > { %v8078_v55 = vpop.eup %8077  ;;  %v1717_v1 = vadd.f32 1.0, %v8054_v45  ;;  %8097 = vrcp.f32 %v1707_v36  ;;  %v1796_v32 = vmul.f32 %v8076_v51, %v9358_v59  ;;  %v1821_v5 = vpack.c.bf16 %v1794_v50, %v1793_v14 }
 0x295   : > { %v8080_v10 = vpop.eup %8079  ;;  %8099 = vrcp.f32 %v1708_v38  ;;  %v1797_v15 = vmul.f32 %v8078_v55, %v9364_v34  ;;  %vm13522_vm5 = vcmp.ne.s16.totalorder %v9302_v49, 0  ;;  %v2453_v6 = vor.u32 %v2451_v29, %v2450_v63 }
 0x296   : > { %v646_v56 = vand.u32 15, %v484_v33  ;;  %v8082_v22 = vpop.eup %8081  ;;  %8101 = vrcp.f32 %v1709_v12  ;;  %v1798_v0 = vmul.f32 %v8080_v10, %v9369_v26  ;;  %v1822_v3 = vpack.c.bf16 %v1796_v32, %v1795_v52  ;;  %1837 = vst.msk [vmem:[#allocation2 + $0x30] sm:$0xff] %vm449_vm1, %v1821_v5 }
 0x297   : > { %v9641_v45 = vcombine.low %v1977_v53, %v8926_v58  ;;  %v8084_v59 = vpop.eup %8083  ;;  %8103 = vrcp.f32 %v1710_v28  ;;  %v1799_v36 = vmul.f32 %v8082_v22, %v9372_v27  ;;  %vm13523_vm8 = vcmp.ne.s16.totalorder %v9306_v54, 0  ;;  %v13744_v22 = vld [vmem:[#allocation33_spill] sm:$0xff] }
 0x298   : > { %v2461_v34 = vor.u32 %v2459_v17, %v9632_v43  ;;  %v9647_v38 = vadd.s32 112, %v8914_v60  ;;  %v8086_v12 = vpop.eup %8085  ;;  %8105 = vrcp.f32 %v1711_v46  ;;  %v1800_v26 = vmul.f32 %v8084_v59, %v9383_v16  ;;  %1838 = vst.msk [vmem:[#allocation2 + $0x38] sm:$0xff] %vm449_vm1, %v1822_v3  ;;  %v13745_v59 = vld [vmem:[#allocation25_spill] sm:$0xff] }
 0x299   : > { %v1823_v29 = vpack.c.bf16 %v1798_v0, %v1797_v15  ;;  %vm9651_vm10 = vcmp.lt.s32.totalorder %v646_v56, 15  ;;  %v8088_v28 = vpop.eup %8087  ;;  %v1718_v27 = vadd.f32 1.0, %v9585_v35  ;;  %v1719_v39 = vadd.f32 1.0, %v9593_v57 }
 0x29a   : > { %8107 = vrcp.f32 %v1712_v8  ;;  %v9658_v50 = vadd.s32 184, %v8914_v60  ;;  %v8090_v17 = vpop.eup %8089  ;;  %v1785_v46 = vmul.f32 %v8088_v28, %v9500_v2  ;;  %v1824_v16 = vpack.c.bf16 %v1800_v26, %v1799_v36  ;;  %vm2292_vm14 = vmpackc.low %vm9651_vm10, %vm9651_vm10 }
 0x29b   : > { %8109 = vrcp.f32 %v9613_v47  ;;  %1839 = vst.msk [vmem:[#allocation2 + $0x40] sm:$0xff] %vm449_vm1, %v1823_v29  ;;  %vm13592_vm11 = vcmask 1046528   ;;  %vm13487_vm13 = vcmp.ne.s16.totalorder %v9333_v42, 0  ;;  %v9666_v35 = vsel %vm2383_vm7, %v9335_v37, %v2453_v6  ;;  %v8092_v57 = vpop.eup %8091 }
 0x29c   : > { %13738 = vst [vmem:[#allocation50_spill] sm:$0xff] %v9666_v35  ;;  %v1786_v8 = vmul.f32 %v8090_v17, %v9503_v21  ;;  %v1720_v53 = vadd.f32 1.0, %v9598_v41  ;;  %8111 = vrcp.f32 %v9615_v30  ;;  %v9672_v2 = vsel %vm2383_vm7, %v2450_v63, %v2461_v34  ;;  %v8094_v47 = vpop.eup %8093  ;;  %1840 = vst.msk [vmem:[#allocation2 + $0x48] sm:$0xff] %vm449_vm1, %v1824_v16  ;;  %v13748_v16 = vld [vmem:[#allocation36_spill] sm:$0xff] }
 0x29d   : > { %13739 = vst [vmem:[#allocation51_spill] sm:$0xff] %v9672_v2  ;;  %v1787_v51 = vmul.f32 %v8092_v57, %v9513_v24  ;;  %8113 = vrcp.f32 %v9621_v18  ;;  %v1801_v37 = vmul.f32 %v8086_v12, %v9393_v48  ;;  %v597_v21 = vand.u32 15, %v9647_v38  ;;  %v8096_v41 = vpop.eup %8095  ;;  %v9684_v52 = vld [vmem:[#allocation2 + $0x30] sm:$0xff]  ;;  %v13741_v18 = vld [vmem:[#allocation31_spill] sm:$0xff] }
 0x29e   : > { %v1817_v30 = vpack.c.bf16 %v1786_v8, %v1785_v46  ;;  %v1788_v63 = vmul.f32 %v8094_v47, %v9518_v19  ;;  %8115 = vrcp.f32 %v9624_v23  ;;  %v660_v33 = vand.u32 15, %v9658_v50  ;;  %v8098_v55 = vpop.eup %8097  ;;  %v13740_v24 = vld [vmem:[#allocation22_spill] sm:$0xff] }
 0x29f   : > { %vm13488_vm15 = vcmp.ne.s16.totalorder %v13740_v24, 0  ;;  %8117 = vrcp.f32 %v1717_v1  ;;  %v1802_v48 = vmul.f32 %v8096_v41, %v13741_v18  ;;  %v9692_v32 = vsel %vm13521_vm4, %v9684_v52, 0  ;;  %v8100_v23 = vpop.eup %8099  ;;  %v13743_v1 = vld [vmem:[#allocation32_spill] sm:$0xff]  ;;  %v9702_v15 = vld [vmem:[#allocation2 + $0x38] sm:$0xff]  ;;  %v13746_v38 = vld [vmem:[#allocation34_spill] sm:$0xff] }
 0x2a0   : > { %13742 = vst [vmem:[#allocation31_spill] sm:$0xff] %v9692_v32  ;;  %v2324_v19 = vsel %vm2292_vm14, 65537, %v13657_v11  ;;  %1833 = vst.msk [vmem:[#allocation2 + $0x10] sm:$0xff] %vm449_vm1, %v1817_v30  ;;  %v1818_v5 = vpack.c.bf16 %v1788_v63, %v1787_v51  ;;  %8119 = vrcp.f32 %v1718_v27  ;;  %v1803_v10 = vmul.f32 %v8098_v55, %v13743_v1  ;;  %v8102_v56 = vpop.eup %8101  ;;  %v13747_v27 = vld [vmem:[#allocation35_spill] sm:$0xff]  ;;  %v13750_v51 = vld [vmem:[#allocation37_spill] sm:$0xff] }
 0x2a1   : > { %v13490_v6 = vrot.slane %v9692_v32, 1  ;;  %8121 = vrcp.f32 %v1719_v39  ;;  %v1804_v0 = vmul.f32 %v8100_v23, %v13744_v22  ;;  %v1825_v3 = vpack.c.bf16 %v1802_v48, %v1801_v37  ;;  %v8104_v34 = vpop.eup %8103 }
 0x2a2   : > { %vm13500_vm2 = vcmp.ne.s16.totalorder %v13745_v59, 0  ;;  %v2600_v36 = vsel %vm13522_vm5, %v9702_v15, 0  ;;  %vm13496_vm3 = vcmp.ne.s16.totalorder %v9568_v25, 0  ;;  %1834 = vst.msk [vmem:[#allocation2 + $0x18] sm:$0xff] %vm449_vm1, %v1818_v5  ;;  %8123 = vrcp.f32 %v1720_v53  ;;  %v9713_v26 = vld [vmem:[#allocation2 + $0x40] sm:$0xff]  ;;  %v8106_v28 = vpop.eup %8105 }
 0x2a3   : > { %v1805_v12 = vmul.f32 %v8102_v56, %v13746_v38  ;;  %v3119_v29 = vrot.slane %v2600_v36, 1  ;;  %v9716_v14 = vcombine.low %v8926_v58, %v2324_v19  ;;  %v1806_v39 = vmul.f32 %v8104_v34, %v13747_v27  ;;  %1841 = vst.msk [vmem:[#allocation2 + $0x50] sm:$0xff] %vm449_vm1, %v1825_v3  ;;  %v13758_v3 = vld [vmem:[#allocation40_spill] sm:$0xff] }
 0x2a4   : > { %v1826_v50 = vpack.c.bf16 %v1804_v0, %v1803_v10  ;;  %8125 = vpow2.f32 %v9543_v44  ;;  %v2601_v17 = vsel %vm13523_vm8, %v9713_v26, 0  ;;  %vm13494_vm10 = vcmp.ne.s16.totalorder %v9666_v35, 0  ;;  %v8108_v46 = vpop.eup %8107  ;;  %v9732_v44 = vld [vmem:[#allocation2 + $0x48] sm:$0xff]  ;;  %v13757_v0 = vld [vmem:[#allocation16_spill] sm:$0xff] }
 0x2a5   : > { %v1807_v57 = vmul.f32 %v8106_v28, %v13748_v16  ;;  %8127 = vpow2.f32 %v9546_v4  ;;  %v9730_v8 = vsel %vm13592_vm11, %v13490_v6, %v3119_v29  ;;  %v3121_v53 = vrot.slane %v2601_v17, 1  ;;  %v8110_v47 = vpop.eup %8109  ;;  %v13751_v4 = vld [vmem:[#allocation38_spill] sm:$0xff] }
 0x2a6   : > { %13749 = vst [vmem:[#allocation32_spill] sm:$0xff] %v9730_v8  ;;  %v1808_v37 = vmul.f32 %v8108_v46, %v13750_v51  ;;  %v1827_v41 = vpack.c.bf16 %v1806_v39, %v1805_v12  ;;  %1842 = vst.msk [vmem:[#allocation2 + $0x58] sm:$0xff] %vm449_vm1, %v1826_v50  ;;  %8129 = vpow2.f32 %v9588_v7  ;;  %v3519_v30 = vshrl.u32 %v9730_v8, 16  ;;  %v8112_v63 = vpop.eup %8111  ;;  %v13754_v7 = vld [vmem:[#allocation39_spill] sm:$0xff]  ;;  %v13760_v16 = vld [vmem:[#allocation42_spill] sm:$0xff] }
 0x2a7   : > { %v1809_v55 = vmul.f32 %v8110_v47, %v13751_v4  ;;  %8131 = vpow2.f32 %v9596_v31  ;;  %v3122_v18 = vsel %vm13592_vm11, %v3119_v29, %v3121_v53  ;;  %v2602_v48 = vsel %vm13487_vm13, %v9732_v44, 0  ;;  %v8114_v23 = vpop.eup %8113  ;;  %v9748_v5 = vld [vmem:[#allocation2 + $0x10] sm:$0xff]  ;;  %v13765_v31 = vld [vmem:[#allocation12_spill] sm:$0xff] }
 0x2a8   : > { %vm9744_vm14 = vcmp.ge.s32.totalorder %v597_v21, 1  ;;  %v1810_v1 = vmul.f32 %v8112_v63, %v13754_v7  ;;  %v1828_v10 = vpack.c.bf16 %v1808_v37, %v1807_v57  ;;  %1843 = vst.msk [vmem:[#allocation2 + $0x60] sm:$0xff] %vm449_vm1, %v1827_v41  ;;  %v3541_v56 = vshrl.u32 %v3122_v18, 16  ;;  %v8116_v22 = vpop.eup %8115  ;;  %v13762_v63 = vld [vmem:[#allocation43_spill] sm:$0xff]  ;;  %v13763_v7 = vld [vmem:[#allocation44_spill] sm:$0xff] }
 0x2a9   : > { %vm9752_vm0 = vcmp.lt.s32.totalorder %v660_v33, 15  ;;  %v2579_v21 = vsel %vm13489_vm6, %v9748_v5, 0  ;;  %v1811_v36 = vmul.f32 %v8114_v23, %v13758_v3  ;;  %v3544_v34 = vshll.u32 %v3122_v18, 16  ;;  %v8118_v12 = vpop.eup %8117  ;;  %v9763_v29 = vld [vmem:[#allocation2 + $0x18] sm:$0xff]  ;;  %v13759_v33 = vld [vmem:[#allocation41_spill] sm:$0xff]  ;;  %v13792_v8 = vld [vmem:[#allocation20_spill] sm:$0xff] }
 0x2aa   : > { %vm13493_vm13 = vcmp.ne.s16.totalorder %v9672_v2, 0  ;;  %v2464_v38 = vshrl.u32 %v9716_v14, 16  ;;  %3019 = vrot.lane.b32.xlu0 %v2579_v21, %s8413_s23  ;;  %v1812_v28 = vmul.f32 %v8116_v22, %v13759_v33  ;;  %v1829_v27 = vpack.c.bf16 %v1810_v1, %v1809_v55  ;;  %1844 = vst.msk [vmem:[#allocation2 + $0x68] sm:$0xff] %vm449_vm1, %v1828_v10  ;;  %v8120_v17 = vpop.eup %8119  ;;  %v9776_v37 = vld [vmem:[#allocation2 + $0x50] sm:$0xff]  ;;  %v13764_v3 = vld [vmem:[#allocation45_spill] sm:$0xff]  ;;  %vm2294_vm6 = vmpackc.low %vm9752_vm0, %vm9752_vm0 }
 0x2ab   : > { %v3543_v39 = vrot.slane %v3541_v56, 7  ;;  %v3123_v50 = vrot.slane %v2602_v48, 1  ;;  %v2580_v46 = vsel %vm13488_vm15, %v9763_v29, 0  ;;  %v1813_v57 = vmul.f32 %v8118_v12, %v13760_v16  ;;  %v8122_v41 = vpop.eup %8121 }
 0x2ac   : > { %v2546_v47 = vsel %vm13488_vm15, %v9748_v5, 0  ;;  %v9774_v51 = vrot.slane %v3519_v30, 7  ;;  %3021 = vrot.lane.b32.xlu1 %v2580_v46, %s8413_s23  ;;  %v1814_v4 = vmul.f32 %v8120_v17, %v13762_v63  ;;  %v1830_v55 = vpack.c.bf16 %v1812_v28, %v1811_v36  ;;  %1845 = vst.msk [vmem:[#allocation2 + $0x70] sm:$0xff] %vm449_vm1, %v1829_v27  ;;  %v8124_v23 = vpop.eup %8123  ;;  %vm1947_vm15 = vmpackc.low %vm9744_vm14, %vm9744_vm14 }
 0x2ad   : > { %v3546_v18 = vor.u32 %v3544_v34, %v3543_v39  ;;  %v3124_v48 = vsel %vm13592_vm11, %v3121_v53, %v3123_v50  ;;  %v1815_v1 = vmul.f32 %v8122_v41, %v13763_v7  ;;  %v2547_v30 = vsel %vm13500_vm2, %v9763_v29, 0  ;;  %v9789_v22 = vld [vmem:[#allocation2 + $0x58] sm:$0xff] }
 0x2ae   : > { %13761 = vst [vmem:[#allocation33_spill] sm:$0xff] %v9774_v51  ;;  %v3563_v10 = vshrl.u32 %v3124_v48, 16  ;;  %v2603_v56 = vsel %vm13496_vm3, %v9776_v37, 0  ;;  %v8126_v21 = vpop.eup %8125  ;;  %v1816_v36 = vmul.f32 %v8124_v23, %v13764_v3  ;;  %v1831_v34 = vpack.c.bf16 %v1814_v4, %v1813_v57  ;;  %1846 = vst.msk [vmem:[#allocation2 + $0x78] sm:$0xff] %vm449_vm1, %v1830_v55  ;;  %v10530_v13 = vld [vmem:[#allocation2 + $0x58] sm:$0xff] }
 0x2af   : > { %v3547_v53 = vsel %vm2383_vm7, %v9774_v51, %v3546_v18  ;;  %v3125_v12 = vrot.slane %v2603_v56, 1  ;;  %v8128_v33 = vpop.eup %8127  ;;  %v1693_v28 = vadd.f32 1.0, %v8126_v21  ;;  %v3566_v17 = vshll.u32 %v3124_v48, 16  ;;  %v9802_v48 = vld [vmem:[#allocation2 + $0x60] sm:$0xff]  ;;  %13827 = vst [vmem:[#allocation55_spill] sm:$0xff] %v10530_v13 }
 0x2b0   : > { %7761 = vmatprep.mubr.msk.bf16.mxu1 %vm449_vm1, %v3547_v53  ;;  %v3565_v27 = vrot.slane %v3563_v10, 7  ;;  %v2604_v46 = vsel %vm13494_vm10, %v9789_v22, 0  ;;  %v8130_v16 = vpop.eup %8129  ;;  %v1832_v41 = vpack.c.bf16 %v1816_v36, %v1815_v1  ;;  %v1694_v63 = vadd.f32 1.0, %v8128_v33  ;;  %1847 = vst.msk [vmem:[#allocation2 + $0x80] sm:$0xff] %vm449_vm1, %v1831_v34  ;;  %2878 = vrot.lane.b32.xlu1 %v2546_v47, %s8411_s19 }
 0x2b1   : > { %v3126_v57 = vsel %vm13592_vm11, %v3123_v50, %v3125_v12  ;;  %v3127_v4 = vrot.slane %v2604_v46, 1  ;;  %v8132_v55 = vpop.eup %8131  ;;  %8133 = vrcp.f32 %v1693_v28  ;;  %v1695_v18 = vadd.f32 1.0, %v8130_v16 }
 0x2b2   : > { %v3568_v23 = vor.u32 %v3566_v17, %v3565_v27  ;;  %v3585_v7 = vshrl.u32 %v3126_v57, 16  ;;  %8135 = vrcp.f32 %v1694_v63  ;;  %1848 = vst.msk [vmem:[#allocation2 + $0x88] sm:$0xff] %vm449_vm1, %v1832_v41  ;;  %v1696_v10 = vadd.f32 1.0, %v8132_v55 }
 0x2b3   : > { %v3588_v1 = vshll.u32 %v3126_v57, 16  ;;  %v3128_v56 = vsel %vm13592_vm11, %v3125_v12, %v3127_v4  ;;  %8137 = vrcp.f32 %v1695_v18  ;;  %v2605_v3 = vsel %vm13493_vm13, %v9802_v48, 0 }
 0x2b4   : > { %v3569_v50 = vsel %vm2383_vm7, %v3543_v39, %v3568_v23  ;;  %v3587_v47 = vrot.slane %v3585_v7, 7  ;;  %v3607_v21 = vshrl.u32 %v3128_v56, 16  ;;  %8139 = vrcp.f32 %v1696_v10  ;;  %2880 = vrot.lane.b32.xlu1 %v2547_v30, %s8411_s19 }
 0x2b5   : > { %7762 = vmatmul.mubr.msk.bf16.vlgmr.msra.gmra.mrb[4].mxu1 %vm449_vm1, %v3569_v50  ;;  %v2094_v36 = vshll.u32 %v9641_v45, 16  ;;  %v2467_v34 = vshll.u32 %v9716_v14, 16  ;;  %v3610_v12 = vshll.u32 %v3128_v56, 16  ;;  %v3129_v33 = vrot.slane %v2605_v3, 1  ;;  %v13769_v56 = vld [vmem:[#allocation13_spill] sm:$0xff] }
 0x2b6   : > { %v3590_v39 = vor.u32 %v3588_v1, %v3587_v47  ;;  %v3609_v53 = vrot.slane %v3607_v21, 7  ;;  %7891 = vmatpush3.bf16.msra.mxu1 %v13765_v31  ;;  %v13766_v28 = vshll.u32 %v9581_v40, 16  ;;  %v1979_v30 = vsel %vm1947_vm15, 65537, %v13657_v11  ;;  %v13784_v31 = vld [vmem:[#allocation18_spill] sm:$0xff] }
 0x2b7   : > { %v2466_v46 = vrot.slane %v2464_v38, 7  ;;  %v2326_v16 = vsel %vm2294_vm6, 65537, %v13657_v11  ;;  %v13767_v41 = vmov 0.0|0.0   ;;  %v3130_v55 = vsel %vm13592_vm11, %v3127_v4, %v3129_v33 }
 0x2b8   : > { %v2088_v17 = vrot.slane %v13766_v28, 1  ;;  %7892 = vmatprep.subr.bf16.mxu1 %v13767_v41  ;;  %v3591_v63 = vsel %vm2383_vm7, %v3565_v27, %v3590_v39  ;;  %v3612_v57 = vor.u32 %v3610_v12, %v3609_v53  ;;  %v7284_v18 = vcombine.low %v8926_v58, %v2326_v16  ;;  %v9847_v27 = vld [vmem:[#allocation2 + $0x68] sm:$0xff] }
 0x2b9   : > { %7765 = vmatprep.mubr.msk.bf16.mxu1 %vm449_vm1, %v3591_v63  ;;  %v3629_v23 = vshrl.u32 %v3130_v55, 16  ;;  %v2090_v14 = vshrl.u32 %v9581_v40, 16  ;;  %v2469_v38 = vor.u32 %v2467_v34, %v2466_v46  ;;  %v9842_v7 = vrot.slane %v2094_v36, 1 }
 0x2ba   : > { %v9839_v19 = vsel %vm2045_vm12, %v9602_v62, %v2088_v17  ;;  %v9845_v10 = vcombine.low %v1979_v30, %v8926_v58  ;;  %v2472_v4 = vshrl.u32 %v7284_v18, 16  ;;  %v2475_v1 = vshll.u32 %v7284_v18, 16  ;;  %7894 = vmatpush3.bf16.msra.mxu1 %v13769_v56  ;;  %v13773_v56 = vld [vmem:[#allocation47_spill] sm:$0xff] }
 0x2bb   : > { %13768 = vst [vmem:[#allocation34_spill] sm:$0xff] %v9839_v19  ;;  %v9850_v50 = vrot.slane %v3629_v23, 7  ;;  %v3632_v21 = vshll.u32 %v3130_v55, 16  ;;  %v9854_v62 = vsel %vm2383_vm7, %v9632_v43, %v2469_v38  ;;  %v479_v40 = vadd.s32 128, %v8914_v60  ;;  %7895 = vmatprep.subr.bf16.mxu1 %v13767_v41  ;;  %v8134_v3 = vpop.eup %8133 }
 0x2bc   : > { %13770 = vst [vmem:[#allocation35_spill] sm:$0xff] %v9854_v62  ;;  %vm13498_vm0 = vcmp.ne.s16.totalorder %v9578_v20, 0  ;;  %v3613_v36 = vsel %vm2383_vm7, %v3587_v47, %v3612_v57  ;;  %vm13492_vm6 = vcmp.ne.s16.totalorder %v9854_v62, 0  ;;  %v9861_v34 = vrot.slane %v2472_v4, 7  ;;  %v8136_v12 = vpop.eup %8135  ;;  %v13772_v4 = vld [vmem:[#allocation26_spill] sm:$0xff] }
 0x2bd   : > { %v488_v39 = vadd.s32 200, %v8914_v60  ;;  %v1789_v28 = vmul.f32 %v8134_v3, %v9525_v61  ;;  %7766 = vmatmul.mubr.msk.bf16.gmra.mrb[8].mxu1 %vm449_vm1, %v3613_v36  ;;  %v3634_v43 = vor.u32 %v3632_v21, %v9850_v50  ;;  %v2098_v30 = vshrl.u32 %v9641_v45, 16  ;;  %v8138_v47 = vpop.eup %8137  ;;  %v13771_v61 = vld [vmem:[#allocation46_spill] sm:$0xff] }
 0x2be   : > { %v2606_v16 = vsel %vm13492_vm6, %v9847_v27, 0  ;;  %v1790_v63 = vmul.f32 %v8136_v12, %v9528_v9  ;;  %v2102_v57 = vshll.u32 %v9845_v10, 16  ;;  %v2477_v18 = vor.u32 %v2475_v1, %v9861_v34  ;;  %v8140_v23 = vpop.eup %8139  ;;  %v9877_v45 = vld [vmem:[#allocation2 + $0x70] sm:$0xff] }
 0x2bf   : > { %v3131_v55 = vrot.slane %v2606_v16, 1  ;;  %v1791_v38 = vmul.f32 %v8138_v47, %v13771_v61  ;;  %vm13499_vm15 = vcmp.ne.s16.totalorder %v13772_v4, 0  ;;  %v3635_v21 = vsel %vm2383_vm7, %v3609_v53, %v3634_v43 }
 0x2c0   : > { %v611_v3 = vand.u32 15, %v479_v40  ;;  %v674_v36 = vand.u32 15, %v488_v39  ;;  %v1819_v6 = vpack.c.bf16 %v1790_v63, %v1789_v28  ;;  %v1792_v41 = vmul.f32 %v8140_v23, %v13773_v56  ;;  %7769 = vmatprep.mubr.msk.bf16.mxu1 %vm449_vm1, %v3635_v21 }
 0x2c1   : > { %v3132_v9 = vsel %vm13592_vm11, %v3129_v33, %v3131_v55  ;;  %v9883_v1 = vsel %vm2383_vm7, %v2466_v46, %v2477_v18  ;;  %v2092_v12 = vor.u32 %v2090_v14, %v2088_v17  ;;  %v2100_v16 = vor.u32 %v2098_v30, %v9842_v7 }
 0x2c2   : > { %13774 = vst [vmem:[#allocation36_spill] sm:$0xff] %v9883_v1  ;;  %v3651_v47 = vshrl.u32 %v3132_v9, 16  ;;  %vm13495_vm14 = vcmp.ne.s16.totalorder %v9883_v1, 0  ;;  %1835 = vst.msk [vmem:[#allocation2 + $0x20] sm:$0xff] %vm449_vm1, %v1819_v6  ;;  %v1820_v53 = vpack.c.bf16 %v1792_v41, %v1791_v38  ;;  %vm936_vm6 = vcmp.lt.s32.totalorder %v674_v36, 15 }
 0x2c3   : > { %v9891_v56 = vsel %vm13495_vm14, %v9877_v45, 0  ;;  %v490_v33 = vadd.s32 216, %v8914_v60  ;;  %v3654_v46 = vshll.u32 %v3132_v9, 16  ;;  %vm9895_vm13 = vcmp.ge.s32.totalorder %v611_v3, 1  ;;  %vm2296_vm10 = vmpackc.low %vm936_vm6, %vm936_vm6 }
 0x2c4   : > { %v3653_v40 = vrot.slane %v3651_v47, 7  ;;  %v13497_v17 = vrot.slane %v9891_v56, 1  ;;  %1836 = vst.msk [vmem:[#allocation2 + $0x28] sm:$0xff] %vm449_vm1, %v1820_v53  ;;  %v9900_v6 = vrot.slane %v2102_v57, 1  ;;  %v2328_v41 = vsel %vm2296_vm10, 65537, %v13657_v11  ;;  %vm1949_vm10 = vmpackc.low %vm9895_vm13, %vm9895_vm13 }
 0x2c5   : > { %v688_v39 = vand.u32 15, %v490_v33  ;;  %v466_v28 = vadd.s32 24, %v8914_v60  ;;  %vm13504_vm14 = vcmp.ne.s16.totalorder %v9839_v19, 0  ;;  %v7285_v63 = vcombine.low %v8926_v58, %v2328_v41 }
 0x2c6   : > { %v3656_v43 = vor.u32 %v3654_v46, %v3653_v40  ;;  %v3134_v30 = vsel %vm13592_vm11, %v3131_v55, %v13497_v17  ;;  %v9911_v18 = vsel %vm2045_vm12, %v2092_v12, %v9842_v7  ;;  %v9915_v57 = vsel %vm2045_vm12, %v2100_v16, %v9900_v6 }
 0x2c7   : > { %13777 = vst [vmem:[#allocation37_spill] sm:$0xff] %v9911_v18  ;;  %13778 = vst [vmem:[#allocation38_spill] sm:$0xff] %v9915_v57  ;;  %v3673_v23 = vshrl.u32 %v3134_v30, 16  ;;  %vm938_vm6 = vcmp.lt.s32.totalorder %v688_v39, 15  ;;  %v2583_v55 = vsel %vm13498_vm0, %v9684_v52, 0  ;;  %v3676_v38 = vshll.u32 %v3134_v30, 16 }
 0x2c8   : > { %v3657_v61 = vsel %vm2383_vm7, %v9850_v50, %v3656_v43  ;;  %v2480_v7 = vshrl.u32 %v7285_v63, 16  ;;  %vm2298_vm3 = vmpackc.low %vm938_vm6, %vm938_vm6  ;;  %v2483_v3 = vshll.u32 %v7285_v63, 16  ;;  %v520_v9 = vand.u32 15, %v466_v28 }
 0x2c9   : > { %7770 = vmatmul.mubr.msk.bf16.gmra.mrb[12].mxu1 %vm449_vm1, %v3657_v61  ;;  %v9926_v21 = vrot.slane %v3673_v23, 7  ;;  %v2330_v36 = vsel %vm2298_vm3, 65537, %v13657_v11  ;;  %v9929_v12 = vld [vmem:[#allocation2 + $0x20] sm:$0xff]  ;;  %v1981_v16 = vsel %vm1949_vm10, 65537, %v13657_v11  ;;  %v2106_v47 = vshrl.u32 %v9845_v10, 16  ;;  %v9951_v23 = vld [vmem:[#allocation2 + $0x78] sm:$0xff] }
 0x2ca   : > { %v2482_v53 = vrot.slane %v2480_v7, 7  ;;  %v7286_v50 = vcombine.low %v8926_v58, %v2330_v36  ;;  %v2581_v33 = vsel %vm13500_vm2, %v9929_v12, 0  ;;  %v2548_v46 = vsel %vm13499_vm15, %v9929_v12, 0 }
 0x2cb   : > { %v3678_v14 = vor.u32 %v3676_v38, %v9926_v21  ;;  %vm914_vm13 = vcmp.lt.s32.totalorder %v520_v9, 15  ;;  %3023 = vrot.lane.b32.xlu0 %v2581_v33, %s8413_s23  ;;  %v9942_v41 = vld [vmem:[#allocation2 + $0x28] sm:$0xff]  ;;  %2882 = vrot.lane.b32.xlu1 %v2548_v46, %s8411_s19  ;;  %vm13503_vm3 = vcmp.ne.s16.totalorder %v9911_v18, 0  ;;  %v492_v43 = vadd.s32 232, %v8914_v60  ;;  %v13779_v38 = vld [vmem:[#allocation23_spill] sm:$0xff] }
 0x2cc   : > { %v2485_v10 = vor.u32 %v2483_v3, %v2482_v53  ;;  %v2488_v39 = vshrl.u32 %v7286_v50, 16  ;;  %v2491_v28 = vshll.u32 %v7286_v50, 16  ;;  %vm2274_vm10 = vmpackc.low %vm914_vm13, %vm914_vm13  ;;  %v9949_v63 = vcombine.low %v1981_v16, %v8926_v58 }
 0x2cd   : > { %v3679_v30 = vsel %vm2383_vm7, %v3653_v40, %v3678_v14  ;;  %v2306_v61 = vsel %vm2274_vm10, 65537, %v13657_v11  ;;  %v2403_v7 = vshll.u32 %v13779_v38, 16  ;;  %vm13502_vm6 = vcmp.ne.s16.totalorder %v9915_v57, 0 }
 0x2ce   : > { %7773 = vmatprep.mubr.msk.bf16.mxu1 %vm449_vm1, %v3679_v30  ;;  %v9959_v3 = vsel %vm2383_vm7, %v9861_v34, %v2485_v10  ;;  %v9961_v36 = vrot.slane %v2488_v39, 7  ;;  %v7274_v40 = vcombine.low %v8926_v58, %v2306_v61  ;;  %v702_v9 = vand.u32 15, %v492_v43  ;;  %v9981_v30 = vld [vmem:[#allocation2 + $0x80] sm:$0xff] }
 0x2cf   : > { %13780 = vst [vmem:[#allocation39_spill] sm:$0xff] %v9959_v3  ;;  %v2582_v16 = vsel %vm13499_vm15, %v9942_v41, 0  ;;  %v2549_v50 = vsel %vm13498_vm0, %v9942_v41, 0  ;;  %vm13536_vm13 = vcmp.ne.s16.totalorder %v9959_v3, 0  ;;  %v494_v33 = vadd.s32 248, %v8914_v60 }
 0x2d0   : > { %3025 = vrot.lane.b32.xlu0 %v2582_v16, %s8413_s23  ;;  %2884 = vrot.lane.b32.xlu1 %v2549_v50, %s8411_s19  ;;  %v2608_v34 = vsel %vm13536_vm13, %v9951_v23, 0  ;;  %v2493_v46 = vor.u32 %v2491_v28, %v9961_v36  ;;  %v2392_v14 = vshrl.u32 %v7274_v40, 16  ;;  %v2395_v10 = vshll.u32 %v7274_v40, 16 }
 0x2d1   : > { %v2550_v39 = vsel %vm13504_vm14, %v9684_v52, 0  ;;  %v3135_v43 = vrot.slane %v2608_v34, 1  ;;  %vm940_vm10 = vcmp.lt.s32.totalorder %v702_v9, 15  ;;  %v716_v61 = vand.u32 15, %v494_v33  ;;  %v13783_v9 = vld [vmem:[#allocation24_spill] sm:$0xff] }
 0x2d2   : > { %v2108_v38 = vor.u32 %v2106_v47, %v9900_v6  ;;  %v2110_v16 = vshll.u32 %v9949_v63, 16  ;;  %v9986_v50 = vsel %vm2383_vm7, %v2482_v53, %v2493_v46  ;;  %v2394_v17 = vrot.slane %v2392_v14, 7  ;;  %vm2300_vm0 = vmpackc.low %vm940_vm10, %vm940_vm10 }
 0x2d3   : > { %13781 = vst [vmem:[#allocation40_spill] sm:$0xff] %v9986_v50  ;;  %v13782_v28 = vrot.slane %v9891_v56, 1  ;;  %vm13555_vm15 = vcmp.ne.s16.totalorder %v9986_v50, 0  ;;  %v2332_v34 = vsel %vm2300_vm0, 65537, %v13657_v11  ;;  %vm942_vm2 = vcmp.lt.s32.totalorder %v716_v61, 15 }
 0x2d4   : > { %3027 = vrot.lane.b32.xlu0 %v2583_v55, %s8413_s23  ;;  %2886 = vrot.lane.b32.xlu1 %v2550_v39, %s8411_s19  ;;  %v9998_v47 = vsel %vm13555_vm15, %v9981_v30, 0  ;;  %v2397_v53 = vor.u32 %v2395_v10, %v2394_v17  ;;  %v2405_v56 = vor.u32 %v2403_v7, %v13783_v9  ;;  %vm2302_vm10 = vmpackc.low %vm942_vm2, %vm942_vm2  ;;  %v2584_v33 = vsel %vm13504_vm14, %v9702_v15, 0 }
 0x2d5   : > { %v3136_v40 = vsel %vm13592_vm11, %v13782_v28, %v3135_v43  ;;  %v13505_v46 = vrot.slane %v9998_v47, 1  ;;  %v7287_v55 = vcombine.low %v8926_v58, %v2332_v34  ;;  %v2334_v14 = vsel %vm2302_vm10, 65537, %v13657_v11 }
 0x2d6   : > { %v3695_v6 = vshrl.u32 %v3136_v40, 16  ;;  %v10007_v39 = vrot.slane %v2110_v16, 1  ;;  %v3698_v28 = vshll.u32 %v3136_v40, 16  ;;  %v10011_v10 = vsel %vm2383_vm7, %v13784_v31, %v2397_v53 }
 0x2d7   : > { %13785 = vst [vmem:[#allocation41_spill] sm:$0xff] %v10011_v10  ;;  %v2551_v7 = vsel %vm13503_vm3, %v9702_v15, 0  ;;  %v3138_v9 = vsel %vm13592_vm11, %v3135_v43, %v13505_v46  ;;  %v2496_v51 = vshrl.u32 %v7287_v55, 16  ;;  %v7288_v34 = vcombine.low %v8926_v58, %v2334_v14 }
 0x2d8   : > { %v3697_v61 = vrot.slane %v3695_v6, 7  ;;  %3029 = vrot.lane.b32.xlu0 %v2584_v33, %s8413_s23  ;;  %2888 = vrot.lane.b32.xlu1 %v2551_v7, %s8411_s19  ;;  %v10024_v16 = vsel %vm2045_vm12, %v2108_v38, %v10007_v39  ;;  %v3717_v40 = vshrl.u32 %v3138_v9, 16  ;;  %v10027_v6 = vsel %vm2383_vm7, %v2394_v17, %v2405_v56 }
 0x2d9   : > { %13786 = vst [vmem:[#allocation42_spill] sm:$0xff] %v10024_v16  ;;  %13787 = vst [vmem:[#allocation43_spill] sm:$0xff] %v10027_v6  ;;  %v2585_v43 = vsel %vm13503_vm3, %v9713_v26, 0  ;;  %v2552_v53 = vsel %vm13502_vm6, %v9713_v26, 0  ;;  %vm13524_vm2 = vcmp.ne.s16.totalorder %v10011_v10, 0  ;;  %v2498_v33 = vrot.slane %v2496_v51, 7 }
 0x2da   : > { %v3700_v31 = vor.u32 %v3698_v28, %v3697_v61  ;;  %v10038_v14 = vrot.slane %v3717_v40, 7  ;;  %v3720_v28 = vshll.u32 %v3138_v9, 16  ;;  %v2499_v7 = vshll.u32 %v7287_v55, 16 }
 0x2db   : > { %vm2181_vm0 = vcmp.ne.s16.totalorder %v10024_v16, 0  ;;  %vm13520_vm10 = vcmp.ne.s16.totalorder %v10027_v6, 0  ;;  %v2504_v17 = vshrl.u32 %v7288_v34, 16  ;;  %v2507_v56 = vshll.u32 %v7288_v34, 16 }
 0x2dc   : > { %v3701_v38 = vsel %vm2383_vm7, %v9926_v21, %v3700_v31  ;;  %3031 = vrot.lane.b32.xlu0 %v2585_v43, %s8413_s23  ;;  %2890 = vrot.lane.b32.xlu1 %v2552_v53, %s8411_s19  ;;  %v3722_v51 = vor.u32 %v3720_v28, %v10038_v14  ;;  %v2529_v21 = vsel %vm13524_vm2, %v9748_v5, 0  ;;  %v2501_v9 = vor.u32 %v2499_v7, %v2498_v33  ;;  %v1868_v31 = vld [vmem:[#allocation2 + $0x98] sm:$0xff] }
 0x2dd   : > { %7774 = vmatmul.mubr.msk.bf16.gmra.mrb[16].mxu1 %vm449_vm1, %v3701_v38  ;;  %v10049_v55 = vrot.slane %v2504_v17, 7  ;;  %v2586_v40 = vsel %vm13502_vm6, %v9732_v44, 0  ;;  %v2553_v34 = vsel %vm2181_vm0, %v9732_v44, 0  ;;  %v2530_v53 = vsel %vm13520_vm10, %v9763_v29, 0  ;;  %v10061_v38 = vld [vmem:[#allocation2 + $0x88] sm:$0xff] }
 0x2de   : > { %v3723_v43 = vsel %vm2383_vm7, %v3697_v61, %v3722_v51  ;;  %v2793_v28 = vrot.slane %v2529_v21, 1  ;;  %v10066_v7 = vsel %vm2383_vm7, %v9961_v36, %v2501_v9  ;;  %v10073_v61 = vld [vmem:[#allocation2 + $0x90] sm:$0xff]  ;;  %v2562_v36 = vsel %vm13525_vm9, %v9748_v5, 0 }
 0x2df   : > { %13788 = vst [vmem:[#allocation44_spill] sm:$0xff] %v10049_v55  ;;  %7777 = vmatprep.mubr.msk.bf16.mxu1 %vm449_vm1, %v3723_v43  ;;  %13789 = vst [vmem:[#allocation45_spill] sm:$0xff] %v10066_v7  ;;  %v2509_v17 = vor.u32 %v2507_v56, %v10049_v55  ;;  %vm13591_vm6 = vcmp.ne.s16.totalorder %v10049_v55, 0  ;;  %vm13582_vm3 = vcmp.ne.s16.totalorder %v10066_v7, 0  ;;  %v2563_v46 = vsel %vm13524_vm2, %v9763_v29, 0 }
 0x2e0   : > { %3033 = vrot.lane.b32.xlu0 %v2586_v40, %s8413_s23  ;;  %2892 = vrot.lane.b32.xlu1 %v2553_v34, %s8411_s19  ;;  %v2612_v51 = vsel %vm13591_vm6, %v1868_v31, 0  ;;  %v2610_v56 = vsel %vm13582_vm3, %v10061_v38, 0  ;;  %v2795_v40 = vrot.slane %v2530_v53, 1  ;;  %v2587_v31 = vsel %vm2181_vm0, %v9776_v37, 0 }
 0x2e1   : > { %v10084_v9 = vsel %vm2383_vm7, %v2498_v33, %v2509_v17  ;;  %v3139_v34 = vrot.slane %v2610_v56, 1  ;;  %v3143_v43 = vrot.slane %v2612_v51, 1  ;;  %v13793_v32 = vrot.slane %v13792_v8, 1 }
 0x2e2   : > { %13791 = vst [vmem:[#allocation46_spill] sm:$0xff] %v10084_v9  ;;  %vm13583_vm14 = vcmp.ne.s16.totalorder %v10084_v9, 0  ;;  %v13794_v53 = vrot.slane %v9998_v47, 1  ;;  %v2935_v56 = vrot.slane %v2562_v36, 1  ;;  %v2531_v8 = vsel %vm13521_vm4, %v9929_v12, 0 }
 0x2e3   : > { %v2794_v21 = vsel %vm13592_vm11, %v13793_v32, %v2793_v28  ;;  %v2611_v33 = vsel %vm13583_vm14, %v10073_v61, 0  ;;  %v2936_v32 = vrot.slane %v2563_v46, 1  ;;  %v2796_v16 = vsel %vm13592_vm11, %v2793_v28, %v2795_v40 }
 0x2e4   : > { %3035 = vrot.lane.b32.xlu0 %v2587_v31, %s8413_s23  ;;  %2827 = vrot.lane.b32.xlu1 %v2794_v21, %s8413_s23  ;;  %v3140_v17 = vsel %vm13592_vm11, %v13794_v53, %v3139_v34  ;;  %v3141_v51 = vrot.slane %v2611_v33, 1  ;;  %v2797_v36 = vrot.slane %v2531_v8, 1  ;;  %v2532_v46 = vsel %vm13522_vm5, %v9942_v41, 0 }
 0x2e5   : > { %v3739_v10 = vshrl.u32 %v3140_v17, 16  ;;  %v3742_v21 = vshll.u32 %v3140_v17, 16  ;;  %v2937_v28 = vsel %vm13592_vm11, %v2935_v56, %v2936_v32  ;;  %v2533_v8 = vsel %vm13523_vm8, %v9684_v52, 0 }
 0x2e6   : > { %v3142_v57 = vsel %vm13592_vm11, %v3139_v34, %v3141_v51  ;;  %v3144_v31 = vsel %vm13592_vm11, %v3141_v51, %v3143_v43  ;;  %v2629_v34 = vshll.u32 %v9763_v29, 16  ;;  %vm13802_vm2 = vcmp.ne.s16.totalorder %v9333_v42, 0 }
 0x2e7   : > { %v3741_v18 = vrot.slane %v3739_v10, 7  ;;  %v3761_v19 = vshrl.u32 %v3142_v57, 16  ;;  %v3783_v47 = vshrl.u32 %v3144_v31, 16  ;;  %v3764_v20 = vshll.u32 %v3142_v57, 16 }
 0x2e8   : > { %2968 = vrot.lane.b32.xlu0 %v2935_v56, %s8412_s18  ;;  %2829 = vrot.lane.b32.xlu1 %v2796_v16, %s8413_s23  ;;  %v3786_v51 = vshll.u32 %v3144_v31, 16  ;;  %v2798_v57 = vsel %vm13592_vm11, %v2795_v40, %v2797_v36  ;;  %v2799_v16 = vrot.slane %v2532_v46, 1  ;;  %v7977_v56 = vld [vmem:[%s13430_s8 + $0x40] sm:$0xff]   ;;  %v10136_v31 = vrot.slane %v2629_v34, 1  ;;  %v7980_v34 = vld [vmem:[%s13430_s8 + $0x8] sm:$0xff]  }
 0x2e9   : > { %v3744_v33 = vor.u32 %v3742_v21, %v3741_v18  ;;  %v3763_v53 = vrot.slane %v3761_v19, 7  ;;  %v3785_v17 = vrot.slane %v3783_v47, 7  ;;  %v2564_v19 = vsel %vm13520_vm10, %v9929_v12, 0  ;;  %7425 = vmatprep.subr.bf16.mxu0 %v7977_v56 }
 0x2ea   : > { %v2938_v40 = vrot.slane %v2564_v19, 1  ;;  %v481_v47 = vadd.s32 144, %v8914_v60  ;;  %v2801_v46 = vrot.slane %v2533_v8, 1  ;;  %vm13795_vm10 = vcmp.ne.s16.totalorder %v9333_v42, 0 }
 0x2eb   : > { %v3745_v10 = vsel %vm2383_vm7, %v10038_v14, %v3744_v33  ;;  %v3766_v43 = vor.u32 %v3764_v20, %v3763_v53  ;;  %v7978_v20 = vld [vmem:[%s13430_s8] sm:$0xff]   ;;  %v3788_v21 = vor.u32 %v3786_v51, %v3785_v17  ;;  %v2800_v33 = vsel %vm13592_vm11, %v2797_v36, %v2799_v16 }
 0x2ec   : > { %2970 = vrot.lane.b32.xlu0 %v2937_v28, %s8412_s18  ;;  %7778 = vmatmul.mubr.msk.bf16.gmra.mrb[20].mxu1 %vm449_vm1, %v3745_v10  ;;  %v7979_v28 = vld [vmem:[%s13430_s8 + $0x48] sm:$0xff]   ;;  %v2534_v10 = vsel %vm13795_vm10, %v9702_v15, 0  ;;  %v625_v51 = vand.u32 15, %v481_v47  ;;  %v2566_v19 = vsel %vm13522_vm5, %v9684_v52, 0  ;;  %vm13796_vm10 = vcmp.ne.s16.totalorder %v9568_v25, 0 }
 0x2ed   : > { %v3767_v14 = vsel %vm2383_vm7, %v3741_v18, %v3766_v43  ;;  %2831 = vrot.lane.b32.xlu1 %v2798_v57, %s8413_s23  ;;  %7426 = vmatpush3.bf16.msra.mxu0 %v7978_v20  ;;  %v2565_v18 = vsel %vm13521_vm4, %v9942_v41, 0  ;;  %v2939_v43 = vsel %vm13592_vm11, %v2936_v32, %v2938_v40  ;;  %v3789_v36 = vsel %vm2383_vm7, %v3763_v53, %v3788_v21  ;;  %v7981_v32 = vld [vmem:[%s13430_s8 + $0x50] sm:$0xff]  }
 0x2ee   : > { %7781 = vmatprep.mubr.msk.bf16.mxu1 %vm449_vm1, %v3767_v14  ;;  %7427 = vmatprep.subr.bf16.mxu0 %v7979_v28  ;;  %v2940_v17 = vrot.slane %v2565_v18, 1  ;;  %v2802_v57 = vsel %vm13592_vm11, %v2799_v16, %v2801_v46  ;;  %v2803_v56 = vrot.slane %v2534_v10, 1  ;;  %v7982_v53 = vld [vmem:[%s13430_s8 + $0x10] sm:$0xff]   ;;  %v2535_v20 = vsel %vm13796_vm10, %v9713_v26, 0 }
 0x2ef   : > { %v13797_v14 = vmov 0.0   ;;  %vm13798_vm4 = vmmov 0   ;;  %v2942_v16 = vrot.slane %v2566_v19, 1  ;;  %vm10177_vm5 = vcmp.ge.s32.totalorder %v625_v51, 1  ;;  %v7986_v51 = vld [vmem:[%s13430_s8 + $0x20] sm:$0xff]  }
 0x2f0   : > { %3061 = vrot.lane.b32.xlu0 %v10136_v31, %s8411_s19  ;;  %v2941_v52 = vsel %vm13592_vm11, %v2938_v40, %v2940_v17  ;;  %v2567_v21 = vsel %vm13523_vm8, %v9702_v15, 0  ;;  %v2804_v47 = vsel %vm13592_vm11, %v2801_v46, %v2803_v56  ;;  %v2805_v18 = vrot.slane %v2535_v20, 1  ;;  %v7984_v40 = vld [vmem:[%s13430_s8 + $0x18] sm:$0xff]   ;;  %vm1951_vm8 = vmpackc.low %vm10177_vm5, %vm10177_vm5 }
 0x2f1   : > { %2833 = vrot.lane.b32.xlu1 %v2800_v33, %s8413_s23  ;;  %7428 = vmatpush3.bf16.msra.mxu0 %v7980_v34  ;;  %v7983_v33 = vld [vmem:[%s13430_s8 + $0x58] sm:$0xff]   ;;  %vm13801_vm10 = vcmp.ne.s16.totalorder %v9666_v35, 0  ;;  %v2943_v15 = vsel %vm13592_vm11, %v2940_v17, %v2942_v16  ;;  %v2944_v46 = vrot.slane %v2567_v21, 1  ;;  %v2568_v34 = vsel %vm13802_vm2, %v9713_v26, 0 }
 0x2f2   : > { %7429 = vmatprep.subr.bf16.mxu0 %v7981_v32  ;;  %v2536_v28 = vsel %vm13801_vm10, %v9732_v44, 0  ;;  %v2806_v10 = vsel %vm13592_vm11, %v2803_v56, %v2805_v18  ;;  %v1983_v17 = vsel %vm1951_vm8, 65537, %v13657_v11  ;;  %v2633_v19 = vshrl.u32 %v9763_v29, 16  ;;  %vm13805_vm2 = vmmov %vm13801_vm10 }
 0x2f3   : > { %v2945_v26 = vsel %vm13592_vm11, %v2942_v16, %v2944_v46  ;;  %v2946_v56 = vrot.slane %v2568_v34, 1  ;;  %vm13803_vm5 = vcmp.ne.s16.totalorder %v9568_v25, 0  ;;  %v2621_v29 = vshll.u32 %v9748_v5, 16  ;;  %v7987_v16 = vld [vmem:[%s13430_s8 + $0x68] sm:$0xff]  }
 0x2f4   : > { %2972 = vrot.lane.b32.xlu0 %v2939_v43, %s8412_s18  ;;  %7782 = vmatmul.mubr.msk.bf16.gmra.mrb[24].mxu1 %vm449_vm1, %v3789_v36  ;;  %v2807_v43 = vrot.slane %v2536_v28, 1  ;;  %v7985_v36 = vld [vmem:[%s13430_s8 + $0x60] sm:$0xff]   ;;  %v2569_v32 = vsel %vm13803_vm5, %v9732_v44, 0  ;;  %v10225_v8 = vcombine.low %v1983_v17, %v8926_v58  ;;  %v7988_v44 = vld [vmem:[%s13430_s8 + $0x28] sm:$0xff]   ;;  %vm13804_vm8 = vcmp.ne.s16.totalorder %v9672_v2, 0 }
 0x2f5   : > { %2835 = vrot.lane.b32.xlu1 %v2802_v57, %s8413_s23  ;;  %7793 = vmatprep.mubr.msk.f32.mxu1 %vm13798_vm4, %v13797_v14  ;;  %v2637_v57 = vshll.u32 %v9929_v12, 16  ;;  %v10237_v21 = vsel %vm13804_vm8, %v9776_v37, 0  ;;  %v2570_v28 = vsel %vm13805_vm2, %v9776_v37, 0  ;;  %v10259_v17 = vld [vmem:[#allocation2 + $0x8] sm:$0xff]  ;;  %v10472_v2 = vsel %vm13536_vm13, %v9877_v45, 0 }
 0x2f6   : > { %7430 = vmatpush3.bf16.msra.mxu0 %v7982_v53  ;;  %v483_v53 = vadd.s32 160, %v8914_v60  ;;  %v2808_v20 = vsel %vm13592_vm11, %v2805_v18, %v2807_v43  ;;  %v2114_v18 = vshrl.u32 %v9949_v63, 16  ;;  %v2809_v63 = vrot.slane %v10237_v21, 1  ;;  %v7992_v21 = vld [vmem:[%s13430_s8 + $0x38] sm:$0xff]  }
 0x2f7   : > { %7431 = vmatprep.subr.bf16.mxu0 %v7983_v33  ;;  %v2947_v33 = vsel %vm13592_vm11, %v2944_v46, %v2946_v56  ;;  %v2625_v46 = vshrl.u32 %v9748_v5, 16  ;;  %v10515_v49 = vsel %vm13555_vm15, %v9877_v45, 0  ;;  %v2693_v14 = vshll.u32 %v10530_v13, 16 }
 0x2f8   : > { %2974 = vrot.lane.b32.xlu0 %v2941_v52, %s8412_s18  ;;  %v2635_v52 = vor.u32 %v2633_v19, %v10136_v31  ;;  %v2617_v19 = vshrl.u32 %v10259_v17, 16 }
 0x2f9   : > { %2837 = vrot.lane.b32.xlu1 %v2804_v47, %s8413_s23  ;;  %v10239_v47 = vrot.slane %v2637_v57, 1 }
 0x2fa   : > { %7432 = vmatpush3.bf16.msra.mxu0 %v7984_v40  ;;  %v2948_v40 = vrot.slane %v2569_v32, 1 }
 0x2fb   : > { %7433 = vmatprep.subr.bf16.mxu0 %v7985_v36  ;;  %v10249_v34 = vsel %vm2045_vm12, %v2635_v52, %v10239_v47  ;;  %v2118_v36 = vshll.u32 %v10225_v8, 16  ;;  %v7991_v52 = vld [vmem:[%s13430_s8 + $0x78] sm:$0xff]  }
 0x2fc   : > { %2976 = vrot.lane.b32.xlu0 %v2943_v15, %s8412_s18  ;;  %v639_v15 = vand.u32 15, %v483_v53  ;;  %v2949_v57 = vsel %vm13592_vm11, %v2946_v56, %v2948_v40  ;;  %v2810_v53 = vsel %vm13592_vm11, %v2807_v43, %v2809_v63  ;;  %v7990_v56 = vld [vmem:[%s13430_s8 + $0x30] sm:$0xff]   ;;  %v13809_v43 = vld [vmem:[#allocation17_spill] sm:$0xff] }
 0x2fd   : > { %2839 = vrot.lane.b32.xlu1 %v2806_v10, %s8413_s23  ;;  %v10251_v10 = vrot.slane %v2621_v29, 1  ;;  %v2120_v5 = vrot.slane %v2118_v36, 1  ;;  %v485_v36 = vadd.s32 176, %v8914_v60 }
 0x2fe   : > { %7434 = vmatpush3.bf16.msra.mxu0 %v7986_v51  ;;  %v2116_v51 = vor.u32 %v2114_v18, %v10007_v39  ;;  %vm10263_vm10 = vcmp.ge.s32.totalorder %v639_v15, 1  ;;  %v7989_v39 = vld [vmem:[%s13430_s8 + $0x70] sm:$0xff]   ;;  %v2571_v18 = vsel %vm13804_vm8, %v9789_v22, 0 }
 0x2ff   : > { %7435 = vmatprep.subr.bf16.mxu0 %v7987_v16  ;;  %vm1953_vm5 = vmpackc.low %vm10263_vm10, %vm10263_vm10  ;;  %v2619_v16 = vor.u32 %v2617_v19, %v13809_v43  ;;  %v2952_v15 = vrot.slane %v2571_v18, 1  ;;  %vm13810_vm10 = vcmp.ne.s16.totalorder %v9854_v62, 0 }
 0x300   : > { %2978 = vrot.lane.b32.xlu0 %v2945_v26, %s8412_s18  ;;  %v2950_v26 = vrot.slane %v2570_v28, 1  ;;  %v10281_v29 = vsel %vm2045_vm12, %v2116_v51, %v2120_v5  ;;  %v10314_v51 = vld [vmem:[%s13430_s8 + $0x80] sm:$0xff]   ;;  %v2538_v19 = vsel %vm13810_vm10, %v9789_v22, 0  ;;  %vm13813_vm8 = vmmov %vm13810_vm10 }
 0x301   : > { %2841 = vrot.lane.b32.xlu1 %v2808_v20, %s8413_s23  ;;  %v2627_v20 = vor.u32 %v2625_v46, %v10251_v10  ;;  %13808 = vst [vmem:[#allocation47_spill] sm:$0xff] %v10281_v29  ;;  %vm2182_vm2 = vcmp.ne.s16.totalorder %v10281_v29, 0  ;;  %v2624_v28 = vsel %vm2045_vm12, %v2619_v16, %v10251_v10 }
 0x302   : > { %7436 = vmatpush3.bf16.msra.mxu0 %v7988_v44  ;;  %v2951_v44 = vsel %vm13592_vm11, %v2948_v40, %v2950_v26  ;;  %v1985_v40 = vsel %vm1953_vm5, 65537, %v13657_v11  ;;  %v2953_v32 = vsel %vm13592_vm11, %v2950_v26, %v2952_v15  ;;  %v2588_v43 = vsel %vm2182_vm2, %v9789_v22, 0  ;;  %v10383_v26 = vld [vmem:[#allocation2 + $0x38] sm:$0xff] }
 0x303   : > { %7437 = vmatprep.subr.bf16.mxu0 %v7989_v39  ;;  %v7267_v46 = vcombine.low %v1985_v40, %v8926_v58  ;;  %v2641_v39 = vshrl.u32 %v9929_v12, 16  ;;  %v2572_v12 = vsel %vm13813_vm8, %v9802_v48, 0  ;;  %v10354_v40 = vld [vmem:[#allocation2 + $0x30] sm:$0xff] }
 0x304   : > { %2980 = vrot.lane.b32.xlu0 %v2947_v33, %s8412_s18  ;;  %v10297_v33 = vsel %vm2045_vm12, %v2627_v20, %v10136_v31  ;;  %v2554_v31 = vsel %vm2182_vm2, %v9776_v37, 0  ;;  %v653_v37 = vand.u32 15, %v485_v36  ;;  %v2954_v18 = vrot.slane %v2572_v12, 1 }
 0x305   : > { %3063 = vrot.lane.b32.xlu1 %v10249_v34, %s8411_s19  ;;  %v2126_v20 = vshll.u32 %v7267_v46, 16  ;;  %v2661_v12 = vshll.u32 %v10383_v26, 16 }
 0x306   : > { %7438 = vmatpush3.bf16.msra.mxu0 %v7990_v56  ;;  %v2645_v56 = vshll.u32 %v9942_v41, 16  ;;  %vm10332_vm5 = vcmp.ge.s32.totalorder %v653_v37, 1 }
 0x307   : > { %7439 = vmatprep.subr.bf16.mxu0 %v7991_v52  ;;  %vm1955_vm10 = vmpackc.low %vm10332_vm5, %vm10332_vm5  ;;  %vm13815_vm5 = vcmp.ne.s16.totalorder %v9883_v1, 0 }
 0x308   : > { %2982 = vrot.lane.b32.xlu0 %v2949_v57, %s8412_s18  ;;  %v2122_v57 = vshrl.u32 %v10225_v8, 16  ;;  %v2643_v8 = vor.u32 %v2641_v39, %v10239_v47  ;;  %v1987_v36 = vsel %vm1955_vm10, 65537, %v13657_v11  ;;  %v2130_v39 = vshrl.u32 %v7267_v46, 16 }
 0x309   : > { %2843 = vrot.lane.b32.xlu1 %v2810_v53, %s8413_s23  ;;  %v2811_v53 = vrot.slane %v2538_v19, 1  ;;  %v7268_v37 = vcombine.low %v1987_v36, %v8926_v58  ;;  %v10401_v36 = vsel %vm13815_vm5, %v9847_v27, 0 }
 0x30a   : > { %7440 = vmatpush3.bf16.msra.mxu0 %v7992_v21  ;;  %v2124_v52 = vor.u32 %v2122_v57, %v2120_v5  ;;  %v2647_v5 = vrot.slane %v2645_v56, 1  ;;  %v487_v57 = vadd.s32 192, %v8914_v60 }
 0x30b   : > { %7749 = vmatprep.subr.bf16.mxu0 %v10314_v51  ;;  %v2812_v16 = vsel %vm13592_vm11, %v2809_v63, %v2811_v53  ;;  %v2649_v63 = vshrl.u32 %v9942_v41, 16 }
 0x30c   : > { %2984 = vrot.lane.b32.xlu0 %v2951_v44, %s8412_s18  ;;  %v2128_v44 = vrot.slane %v2126_v20, 1  ;;  %v10349_v47 = vsel %vm2045_vm12, %v2643_v8, %v2647_v5  ;;  %v2657_v8 = vshrl.u32 %v10354_v40, 16 }
 0x30d   : > { %2744 = vrot.lane.b32.xlu1 %v10297_v33, %s8412_s18  ;;  %v2651_v19 = vor.u32 %v2649_v63, %v2647_v5 }
 0x30e   : > { %v10343_v21 = vsel %vm2045_vm12, %v2124_v52, %v2128_v44  ;;  %v667_v52 = vand.u32 15, %v487_v57 }
 0x30f   : > { %13814 = vst [vmem:[#allocation23_spill] sm:$0xff] %v10343_v21  ;;  %vm2183_vm8 = vcmp.ne.s16.totalorder %v10343_v21, 0  ;;  %v10550_v21 = vsel %vm13555_vm15, %v9951_v23, 0 }
 0x310   : > { %2742 = vrot.lane.b32.xlu0 %v2624_v28, %s8412_s18  ;;  %v2653_v28 = vshll.u32 %v10354_v40, 16  ;;  %v2555_v41 = vsel %vm2183_vm8, %v9789_v22, 0  ;;  %v2589_v5 = vsel %vm2183_vm8, %v9802_v48, 0  ;;  %vm10393_vm10 = vcmp.ge.s32.totalorder %v667_v52, 1 }
 0x311   : > { %2894 = vrot.lane.b32.xlu1 %v2554_v31, %s8411_s19  ;;  %v2955_v31 = vsel %vm13592_vm11, %v2952_v15, %v2954_v18  ;;  %v10374_v15 = vsel %vm13815_vm5, %v9802_v48, 0  ;;  %vm1957_vm9 = vmpackc.low %vm10393_vm10, %vm10393_vm10 }
 0x312   : > { %v2655_v20 = vrot.slane %v2653_v28, 1  ;;  %v2813_v22 = vrot.slane %v10374_v15, 1  ;;  %v2665_v15 = vshrl.u32 %v10383_v26, 16 }
 0x314   : > { %2986 = vrot.lane.b32.xlu0 %v2953_v32, %s8412_s18  ;;  %v10367_v32 = vpop.permute.xlu1 %2876  ;;  %v10377_v56 = vsel %vm2045_vm12, %v2651_v19, %v2655_v20  ;;  %v2659_v63 = vor.u32 %v2657_v8, %v2655_v20  ;;  %v2956_v20 = vrot.slane %v10401_v36, 1  ;;  %v10440_v36 = vsel %vm13536_vm13, %v9847_v27, 0 }
 0x315   : > { %2746 = vrot.lane.b32.xlu1 %v10249_v34, %s8412_s18 }
 0x316   : > { %v2957_v8 = vsel %vm13592_vm11, %v2954_v18, %v2956_v20  ;;  %v10442_v18 = vpop.permute.xlu0 %2740 }
 0x318   : > { %3037 = vrot.lane.b32.xlu0 %v2588_v43, %s8413_s23  ;;  %v2134_v43 = vshll.u32 %v7268_v37, 16  ;;  %v10388_v46 = vpop.permute.xlu1 %2825 }
 0x319   : > { %2845 = vrot.lane.b32.xlu1 %v2812_v16, %s8413_s23  ;;  %v2132_v16 = vor.u32 %v2130_v39, %v2128_v44  ;;  %v2663_v44 = vrot.slane %v2661_v12, 1  ;;  %v10420_v39 = vld [vmem:[#allocation2 + $0x40] sm:$0xff] }
 0x31a   : > { %v2136_v19 = vrot.slane %v2134_v43, 1  ;;  %13819 = vst [vmem:[#allocation18_spill] sm:$0xff] %v10420_v39  ;;  %v2669_v52 = vshll.u32 %v10420_v39, 16  ;;  %v1989_v43 = vsel %vm1957_vm9, 65537, %v13657_v11 }
 0x31b   : > { %v2667_v12 = vor.u32 %v2665_v15, %v2663_v44 }
 0x31c   : > { %3065 = vrot.lane.b32.xlu0 %v10349_v47, %s8411_s19  ;;  %v10406_v57 = vsel %vm2045_vm12, %v2132_v16, %v2136_v19  ;;  %v489_v16 = vadd.s32 208, %v8914_v60  ;;  %v2671_v28 = vrot.slane %v2669_v52, 1  ;;  %v2815_v52 = vrot.slane %v10440_v36, 1  ;;  %v10467_v36 = vpop.permute.xlu0 %3019 }
 0x31d   : > { %2748 = vrot.lane.b32.xlu1 %v10349_v47, %s8412_s18  ;;  %13818 = vst [vmem:[#allocation24_spill] sm:$0xff] %v10406_v57  ;;  %vm2184_vm10 = vcmp.ne.s16.totalorder %v10406_v57, 0 }
 0x31e   : > { %v10447_v15 = vsel %vm2045_vm12, %v2667_v12, %v2671_v28  ;;  %v2590_v12 = vsel %vm2184_vm10, %v9847_v27, 0 }
 0x320   : > { %2988 = vrot.lane.b32.xlu0 %v2955_v31, %s8412_s18  ;;  %v2814_v31 = vsel %vm13592_vm11, %v2811_v53, %v2813_v22  ;;  %v10417_v53 = vpop.permute.xlu1 %3021 }
 0x321   : > { %2896 = vrot.lane.b32.xlu1 %v2555_v41, %s8411_s19  ;;  %v10412_v41 = vsel %vm2045_vm12, %v2659_v63, %v2663_v44  ;;  %v10434_v63 = vcombine.low %v1989_v43, %v8926_v58  ;;  %v2138_v44 = vshrl.u32 %v7268_v37, 16 }
 0x323   : > { %v2142_v43 = vshll.u32 %v10434_v63, 16  ;;  %v2140_v37 = vor.u32 %v2138_v44, %v2136_v19  ;;  %v2816_v19 = vsel %vm13592_vm11, %v2813_v22, %v2815_v52 }
 0x324   : > { %3067 = vrot.lane.b32.xlu0 %v10377_v56, %s8411_s19 }
 0x325   : > { %2750 = vrot.lane.b32.xlu1 %v10377_v56, %s8412_s18  ;;  %v2144_v35 = vrot.slane %v2142_v43, 1 }
 0x328   : > { %3039 = vrot.lane.b32.xlu0 %v2589_v5, %s8413_s23  ;;  %v2556_v5 = vsel %vm2184_vm10, %v9802_v48, 0  ;;  %v681_v48 = vand.u32 15, %v489_v16 }
 0x329   : > { %2847 = vrot.lane.b32.xlu1 %v2814_v31, %s8413_s23  ;;  %v10444_v31 = vpop.permute.xlu1 %2878 }
 0x32a   : > { %vm10462_vm9 = vcmp.ge.s32.totalorder %v681_v48, 1 }
 0x32b   : > { %vm1959_vm5 = vmpackc.low %vm10462_vm9, %vm10462_vm9 }
 0x32c   : > { %3069 = vrot.lane.b32.xlu0 %v10412_v41, %s8411_s19  ;;  %v1991_v62 = vsel %vm1959_vm5, 65537, %v13657_v11 }
 0x32d   : > { %2752 = vrot.lane.b32.xlu1 %v10412_v41, %s8412_s18  ;;  %v10475_v44 = vpop.permute.xlu1 %2880  ;;  %v10509_v42 = vcombine.low %v1991_v62, %v8926_v58 }
 0x330   : > { %2990 = vrot.lane.b32.xlu0 %v2957_v8, %s8412_s18  ;;  %v2673_v8 = vshrl.u32 %v10420_v39, 16 }
 0x331   : > { %2898 = vrot.lane.b32.xlu1 %v2556_v5, %s8411_s19  ;;  %v10454_v5 = vld [vmem:[#allocation2 + $0x48] sm:$0xff] }
 0x332   : > { %13820 = vst [vmem:[#allocation20_spill] sm:$0xff] %v10454_v5  ;;  %v2677_v1 = vshll.u32 %v10454_v5, 16  ;;  %v2675_v16 = vor.u32 %v2673_v8, %v2671_v28  ;;  %v10479_v28 = vsel %vm2045_vm12, %v2140_v37, %v2144_v35  ;;  %v2958_v8 = vrot.slane %v10472_v2, 1 }
 0x333   : > { %13823 = vst [vmem:[#allocation17_spill] sm:$0xff] %v10479_v28  ;;  %v2681_v22 = vshrl.u32 %v10454_v5, 16  ;;  %vm2185_vm13 = vcmp.ne.s16.totalorder %v10479_v28, 0 }
 0x334   : > { %3071 = vrot.lane.b32.xlu0 %v10447_v15, %s8411_s19  ;;  %v2679_v25 = vrot.slane %v2677_v1, 1  ;;  %v10491_v1 = vld [vmem:[#allocation2 + $0x50] sm:$0xff]  ;;  %v2959_v2 = vsel %vm13592_vm11, %v2956_v20, %v2958_v8  ;;  %v2557_v3 = vsel %vm2185_vm13, %v9847_v27, 0 }
 0x335   : > { %2754 = vrot.lane.b32.xlu1 %v10447_v15, %s8412_s18  ;;  %13825 = vst [vmem:[#allocation53_spill] sm:$0xff] %v10491_v1  ;;  %v2685_v43 = vshll.u32 %v10491_v1, 16  ;;  %v2689_v62 = vshrl.u32 %v10491_v1, 16  ;;  %v13830_v1 = vrot.slane %v10515_v49, 1 }
 0x336   : > { %v10485_v48 = vsel %vm2045_vm12, %v2675_v16, %v2679_v25  ;;  %v2683_v16 = vor.u32 %v2681_v22, %v2679_v25  ;;  %v2146_v22 = vshrl.u32 %v10434_v63, 16 }
 0x337   : > { %13824 = vst [vmem:[#allocation52_spill] sm:$0xff] %v10485_v48  ;;  %v2687_v54 = vrot.slane %v2685_v43, 1  ;;  %v2150_v43 = vshll.u32 %v10509_v42, 16 }
 0x338   : > { %3041 = vrot.lane.b32.xlu0 %v2590_v12, %s8413_s23 }
 0x339   : > { %2849 = vrot.lane.b32.xlu1 %v2816_v19, %s8413_s23  ;;  %v491_v19 = vadd.s32 224, %v8914_v60  ;;  %v2691_v6 = vor.u32 %v2689_v62, %v2687_v54 }
 0x33b   : > { %v695_v27 = vand.u32 15, %v491_v19  ;;  %v2148_v19 = vor.u32 %v2146_v22, %v2144_v35  ;;  %v2818_v35 = vsel %vm13592_vm11, %v2815_v52, %v13830_v1  ;;  %v2152_v22 = vrot.slane %v2150_v43, 1  ;;  %v10573_v1 = vld [vmem:[#allocation2 + $0x60] sm:$0xff] }
 0x33c   : > { %3073 = vrot.lane.b32.xlu0 %v10485_v48, %s8411_s19  ;;  %v2960_v52 = vrot.slane %v10550_v21, 1  ;;  %13833 = vst [vmem:[#allocation58_spill] sm:$0xff] %v10573_v1  ;;  %v2701_v43 = vshll.u32 %v10573_v1, 16 }
 0x33d   : > { %2756 = vrot.lane.b32.xlu1 %v10485_v48, %s8412_s18  ;;  %v10498_v37 = vpop.permute.xlu0 %3023  ;;  %v10500_v12 = vpop.permute.xlu1 %2882  ;;  %vm10542_vm9 = vcmp.ge.s32.totalorder %v695_v27, 1  ;;  %v10561_v62 = vsel %vm2045_vm12, %v2148_v19, %v2152_v22 }
 0x33e   : > { %13831 = vst [vmem:[#allocation56_spill] sm:$0xff] %v10561_v62  ;;  %vm1961_vm5 = vmpackc.low %vm10542_vm9, %vm10542_vm9  ;;  %vm2186_vm15 = vcmp.ne.s16.totalorder %v10561_v62, 0 }
 0x33f   : > { %v1993_v57 = vsel %vm1961_vm5, 65537, %v13657_v11  ;;  %v2558_v28 = vsel %vm2186_vm15, %v9877_v45, 0 }
 0x340   : > { %2992 = vrot.lane.b32.xlu0 %v2959_v2, %s8412_s18  ;;  %v10523_v2 = vsel %vm2045_vm12, %v2683_v16, %v2687_v54 }
 0x341   : > { %2900 = vrot.lane.b32.xlu1 %v2557_v3, %s8411_s19  ;;  %13826 = vst [vmem:[#allocation54_spill] sm:$0xff] %v10523_v2  ;;  %v2591_v3 = vsel %vm2185_vm13, %v9877_v45, 0 }
 0x342   : > { %v10517_v25 = vpop.permute.xlu0 %3025  ;;  %v10519_v20 = vpop.permute.xlu1 %2884 }
 0x344   : > { %3075 = vrot.lane.b32.xlu0 %v10523_v2, %s8411_s19 }
 0x345   : > { %2758 = vrot.lane.b32.xlu1 %v10523_v2, %s8412_s18  ;;  %v2695_v2 = vrot.slane %v2693_v14, 1  ;;  %v2697_v14 = vshrl.u32 %v10530_v13, 16  ;;  %v10591_v13 = vcombine.low %v1993_v57, %v8926_v58  ;;  %v2705_v57 = vshrl.u32 %v10573_v1, 16 }
 0x346   : > { %v10535_v63 = vpop.permute.xlu0 %3027  ;;  %v10537_v16 = vpop.permute.xlu1 %2886  ;;  %v2592_v1 = vsel %vm2186_vm15, %v9951_v23, 0 }
 0x347   : > { %v2699_v50 = vor.u32 %v2697_v14, %v2695_v2  ;;  %v2154_v14 = vshrl.u32 %v10509_v42, 16 }
 0x348   : > { %3043 = vrot.lane.b32.xlu0 %v2591_v3, %s8413_s23  ;;  %v10567_v3 = vsel %vm2045_vm12, %v2691_v6, %v2695_v2  ;;  %v493_v6 = vadd.s32 240, %v8914_v60  ;;  %v10597_v60 = vsel %vm13582_vm3, %v9951_v23, 0 }
 0x349   : > { %2851 = vrot.lane.b32.xlu1 %v2818_v35, %s8413_s23  ;;  %13832 = vst [vmem:[#allocation57_spill] sm:$0xff] %v10567_v3  ;;  %v2961_v35 = vsel %vm13592_vm11, %v2958_v8, %v2960_v52 }
 0x34a   : > { %v10556_v54 = vpop.permute.xlu0 %3029  ;;  %v10558_v27 = vpop.permute.xlu1 %2888  ;;  %v709_v29 = vand.u32 15, %v493_v6 }
 0x34c   : > { %3077 = vrot.lane.b32.xlu0 %v10567_v3, %s8411_s19  ;;  %vm10617_vm9 = vcmp.ge.s32.totalorder %v709_v29, 1  ;;  %v13843_v29 = vrot.slane %v10515_v49, 1 }
 0x34d   : > { %2760 = vrot.lane.b32.xlu1 %v10567_v3, %s8412_s18  ;;  %v2703_v3 = vrot.slane %v2701_v43, 1  ;;  %v2158_v43 = vshll.u32 %v10591_v13, 16  ;;  %vm1963_vm5 = vmpackc.low %vm10617_vm9, %vm10617_vm9 }
 0x34e   : > { %v10581_v19 = vpop.permute.xlu0 %3031  ;;  %v10583_v21 = vpop.permute.xlu1 %2890 }
 0x34f   : > { %13834 = vst [vmem:[#allocation59_spill] sm:$0xff] %v10581_v19  ;;  %13835 = vst [vmem:[#allocation60_spill] sm:$0xff] %v10583_v21  ;;  %v10605_v45 = vsel %vm2045_vm12, %v2699_v50, %v2703_v3  ;;  %v2160_v48 = vrot.slane %v2158_v43, 1 }
 0x350   : > { %2994 = vrot.lane.b32.xlu0 %v2961_v35, %s8412_s18  ;;  %13838 = vst [vmem:[#allocation63_spill] sm:$0xff] %v10605_v45  ;;  %v10612_v35 = vld [vmem:[#allocation2 + $0x68] sm:$0xff] }
 0x351   : > { %2902 = vrot.lane.b32.xlu1 %v2558_v28, %s8411_s19  ;;  %v2819_v28 = vrot.slane %v10597_v60, 1  ;;  %13839 = vst [vmem:[#allocation64_spill] sm:$0xff] %v10612_v35  ;;  %v2709_v6 = vshll.u32 %v10612_v35, 16  ;;  %v2156_v60 = vor.u32 %v2154_v14, %v2152_v22  ;;  %v2713_v43 = vshrl.u32 %v10612_v35, 16 }
 0x352   : > { %v10599_v8 = vpop.permute.xlu0 %3033  ;;  %v10601_v2 = vpop.permute.xlu1 %2892  ;;  %v10671_v35 = vsel %vm13583_vm14, %v9981_v30, 0 }
 0x353   : > { %13836 = vst [vmem:[#allocation61_spill] sm:$0xff] %v10599_v8  ;;  %13837 = vst [vmem:[#allocation62_spill] sm:$0xff] %v10601_v2  ;;  %v2707_v2 = vor.u32 %v2705_v57, %v2703_v3  ;;  %v2820_v8 = vsel %vm13592_vm11, %v13843_v29, %v2819_v28  ;;  %v2711_v22 = vrot.slane %v2709_v6, 1  ;;  %v1995_v29 = vsel %vm1963_vm5, 65537, %v13657_v11  ;;  %v10651_v6 = vld [vmem:[#allocation2 + $0x70] sm:$0xff] }
 0x354   : > { %3079 = vrot.lane.b32.xlu0 %v10605_v45, %s8411_s19  ;;  %13846 = vst [vmem:[#allocation68_spill] sm:$0xff] %v10651_v6 }
 0x355   : > { %2762 = vrot.lane.b32.xlu1 %v10605_v45, %s8412_s18  ;;  %v2576_v45 = vsel %vm13582_vm3, %v9981_v30, 0  ;;  %v10645_v57 = vsel %vm2045_vm12, %v2707_v2, %v2711_v22  ;;  %v10658_v2 = vcombine.low %v1995_v29, %v8926_v58  ;;  %vm3196_vm3 = vcmask 523264  }
 0x356   : > { %v10621_v50 = vpop.permute.xlu0 %3035  ;;  %v10623_v5 = vpop.permute.xlu1 %2827  ;;  %13845 = vst [vmem:[#allocation67_spill] sm:$0xff] %v10645_v57  ;;  %v2962_v49 = vrot.slane %v2576_v45, 1  ;;  %v2715_v45 = vor.u32 %v2713_v43, %v2711_v22 }
 0x357   : > { %13842 = vst [vmem:[#allocation65_spill] sm:$0xff] %v10621_v50  ;;  %v2166_v22 = vshll.u32 %v10658_v2, 16 }
 0x358   : > { %3045 = vrot.lane.b32.xlu0 %v2592_v1, %s8413_s23  ;;  %v10642_v1 = vsel %vm2045_vm12, %v2156_v60, %v2160_v48  ;;  %v2963_v11 = vsel %vm13592_vm11, %v2960_v52, %v2962_v49  ;;  %v2162_v52 = vshrl.u32 %v10591_v13, 16 }
 0x359   : > { %2853 = vrot.lane.b32.xlu1 %v2820_v8, %s8413_s23  ;;  %13844 = vst [vmem:[#allocation66_spill] sm:$0xff] %v10642_v1  ;;  %v2717_v8 = vshll.u32 %v10651_v6, 16  ;;  %vm13585_vm9 = vcmp.ne.s16.totalorder %v10642_v1, 0  ;;  %v2168_v50 = vrot.slane %v2166_v22, 1 }
 0x35a   : > { %v2969_v14 = vpop.permute.xlu0 %2968  ;;  %v10639_v3 = vpop.permute.xlu1 %2829  ;;  %v2559_v7 = vsel %vm13585_vm9, %v9951_v23, 0 }
 0x35b   : > { %v2719_v62 = vrot.slane %v2717_v8, 1  ;;  %v2721_v8 = vshrl.u32 %v10651_v6, 16  ;;  %v13848_v6 = vrot.slane %v10671_v35, 1 }
 0x35c   : > { %3081 = vrot.lane.b32.xlu0 %v10645_v57, %s8411_s19 }
 0x35d   : > { %2764 = vrot.lane.b32.xlu1 %v10645_v57, %s8412_s18  ;;  %v10676_v29 = vsel %vm2045_vm12, %v2715_v45, %v2719_v62  ;;  %v2164_v57 = vor.u32 %v2162_v52, %v2160_v48  ;;  %v2593_v45 = vsel %vm13585_vm9, %v9981_v30, 0  ;;  %v2723_v39 = vor.u32 %v2721_v8, %v2719_v62 }
 0x35e   : > { %v2971_v42 = vpop.permute.xlu0 %2970  ;;  %13847 = vst [vmem:[#allocation69_spill] sm:$0xff] %v10676_v29  ;;  %vm13853_vm9 = vcmp.ne.s16.totalorder %v13757_v0, 0 }
 0x35f   : > { %v10661_v60 = vpop.permute.xlu1 %2831  ;;  %v10707_v62 = vsel %vm2045_vm12, %v2164_v57, %v2168_v50 }
 0x360   : > { %2996 = vrot.lane.b32.xlu0 %v2963_v11, %s8412_s18  ;;  %v2725_v11 = vshll.u32 %v9951_v23, 16  ;;  %13849 = vst [vmem:[#allocation70_spill] sm:$0xff] %v10707_v62  ;;  %vm2188_vm5 = vcmp.ne.s16.totalorder %v10707_v62, 0 }
 0x361   : > { %2904 = vrot.lane.b32.xlu1 %v2559_v7, %s8411_s19  ;;  %v10698_v7 = vsel %vm13583_vm14, %v10061_v38, 0  ;;  %vm13611_vm14 = vcmask 785408  }
 0x362   : > { %v3062_v58 = vpop.permute.xlu0 %3061  ;;  %v2727_v48 = vrot.slane %v2725_v11, 1  ;;  %v13584_v8 = vrot.slane %v10698_v7, 1 }
 0x363   : > { %v10678_v43 = vpop.permute.xlu1 %2833 }
 0x364   : > { %3083 = vrot.lane.b32.xlu0 %v10676_v29, %s8411_s19  ;;  %v10710_v22 = vsel %vm2045_vm12, %v2723_v39, %v2727_v48  ;;  %v2965_v39 = vsel %vm13592_vm11, %v2962_v49, %v13584_v8  ;;  %v2578_v8 = vsel %vm13591_vm6, %v10073_v61, 0 }
 0x365   : > { %2766 = vrot.lane.b32.xlu1 %v10676_v29, %s8412_s18  ;;  %v2822_v29 = vsel %vm13592_vm11, %v2819_v28, %v13848_v6  ;;  %13850 = vst [vmem:[#allocation71_spill] sm:$0xff] %v10710_v22  ;;  %v2729_v28 = vshrl.u32 %v9951_v23, 16  ;;  %v2733_v6 = vshll.u32 %v9981_v30, 16  ;;  %v2560_v23 = vsel %vm2188_vm5, %v9981_v30, 0 }
 0x366   : > { %v10687_v13 = vpop.permute.xlu0 %2972 }
 0x367   : > { %v10692_v21 = vpop.permute.xlu1 %2835  ;;  %v2735_v9 = vrot.slane %v2733_v6, 1  ;;  %v1849_v6 = vld [vmem:[#allocation2] sm:$0xff] }
 0x368   : > { %3047 = vrot.lane.b32.xlu0 %v2593_v45, %s8413_s23 }
 0x369   : > { %2855 = vrot.lane.b32.xlu1 %v2822_v29, %s8413_s23  ;;  %v2731_v29 = vor.u32 %v2729_v28, %v2727_v48  ;;  %v3271_v48 = vsel %vm449_vm1, %v10297_v33, %v2971_v42  ;;  %v2737_v28 = vshrl.u32 %v9981_v30, 16  ;;  %v2170_v33 = vshrl.u32 %v10658_v2, 16 }
 0x36a   : > { %v10704_v52 = vpop.permute.xlu0 %2974  ;;  %v2594_v30 = vsel %vm2188_vm5, %v10061_v38, 0  ;;  %v2190_v2 = vsel %vm13853_vm9, %v1849_v6, 0 }
 0x36b   : > { %v10713_v45 = vpop.permute.xlu1 %2837  ;;  %v10739_v19 = vsel %vm2045_vm12, %v2731_v29, %v2735_v9 }
 0x36c   : > { %3085 = vrot.lane.b32.xlu0 %v10710_v22, %s8411_s19  ;;  %13851 = vst [vmem:[#allocation72_spill] sm:$0xff] %v10739_v19 }
 0x36d   : > { %2768 = vrot.lane.b32.xlu1 %v10710_v22, %s8412_s18  ;;  %v3268_v22 = vsel %vm449_vm1, %v10251_v10, %v2969_v14  ;;  %v2911_v14 = vshll.u32 %v10061_v38, 16 }
 0x36e   : > { %v10722_v57 = vpop.permute.xlu0 %2976  ;;  %v3318_v10 = vsel %vm3196_vm3, %v3268_v22, %v10467_v36  ;;  %v2739_v36 = vor.u32 %v2737_v28, %v2735_v9  ;;  %v3320_v22 = vsel %vm3196_vm3, %v3271_v48, %v10417_v53  ;;  %v10773_v9 = vor.u32 %v2170_v33, %v2168_v50 }
 0x36f   : > { %v10727_v11 = vpop.permute.xlu1 %2839  ;;  %v3352_v42 = vsel %vm13611_vm14, %v3318_v10, %v3062_v58  ;;  %v2913_v62 = vrot.slane %v2911_v14, 1  ;;  %v2966_v48 = vrot.slane %v2578_v8, 1  ;;  %v3147_v14 = vsel %vm449_vm1, %v2190_v2, %v10442_v18 }
 0x370   : > { %2998 = vrot.lane.b32.xlu0 %v2965_v39, %s8412_s18  ;;  %v2544_v39 = vsel %vm13591_vm6, %v10061_v38, 0  ;;  %13854 = vst [vmem:[#allocation74_spill] sm:$0xff] %v10773_v9  ;;  %v13855_v50 = vrot.slane %v10671_v35, 1  ;;  %vm13610_vm9 = vcmp.ne.s16.totalorder %v10773_v9, 0  ;;  %v13856_v18 = vrot.slane %v10698_v7, 1 }
 0x371   : > { %2906 = vrot.lane.b32.xlu1 %v2560_v23, %s8411_s19  ;;  %v2823_v10 = vrot.slane %v2544_v39, 1  ;;  %v10778_v28 = vsel %vm2045_vm12, %v2739_v36, %v2913_v62  ;;  %v3054_v39 = vshll.u32 %v10073_v61, 16  ;;  %vm13857_vm6 = vcmp.ne.s16.totalorder %v13740_v24, 0 }
 0x372   : > { %v10736_v1 = vpop.permute.xlu0 %2978  ;;  %v2561_v7 = vsel %vm13610_vm9, %v10061_v38, 0 }
 0x373   : > { %v10741_v49 = vpop.permute.xlu1 %2841  ;;  %v2824_v8 = vsel %vm13592_vm11, %v13855_v50, %v2823_v10  ;;  %v3056_v35 = vrot.slane %v3054_v39, 1  ;;  %v2191_v10 = vsel %vm13857_vm6, %v10259_v17, 0 }
 0x374   : > { %13852 = vst [vmem:[#allocation73_spill] sm:$0xff] %v10741_v49  ;;  %3087 = vrot.lane.b32.xlu0 %v10739_v19, %s8411_s19 }
 0x375   : > { %2770 = vrot.lane.b32.xlu1 %v10739_v19, %s8412_s18  ;;  %v3438_v19 = vshrl.u32 %v3352_v42, 16 }
 0x376   : > { %v10758_v29 = vpop.permute.xlu0 %2980 }
 0x377   : > { %v3064_v23 = vpop.permute.xlu1 %3063  ;;  %v3440_v33 = vrot.slane %v3438_v19, 7 }
 0x378   : > { %3049 = vrot.lane.b32.xlu0 %v2594_v30, %s8413_s23  ;;  %v3354_v58 = vsel %vm13611_vm14, %v3320_v22, %v3064_v23  ;;  %v2967_v22 = vsel %vm13592_vm11, %v13856_v18, %v2966_v48  ;;  %vm13858_vm11 = vcmp.ne.s16.totalorder %v13745_v59, 0 }
 0x379   : > { %v3441_v49 = vshrl.u32 %v3354_v58, 16  ;;  %2772 = vrot.lane.b32.xlu1 %v2739_v36, %s8412_s18  ;;  %v3444_v6 = vshll.u32 %v3354_v58, 16  ;;  %v3198_v58 = vsel %vm3196_vm3, %v3147_v14, %v10388_v46 }
 0x37a   : > { %v10775_v53 = vpop.permute.xlu0 %2982  ;;  %v3233_v39 = vsel %vm13611_vm14, %v3198_v58, %v10367_v32 }
 0x37b   : > { %v10780_v55 = vrot.slane %v3441_v49, 7  ;;  %v10782_v30 = vpop.permute.xlu1 %2843  ;;  %v2915_v49 = vshrl.u32 %v10061_v38, 16 }
 0x37c   : > { %3089 = vrot.lane.b32.xlu0 %v10778_v28, %s8411_s19 }
 0x37d   : > { %v3446_v42 = vor.u32 %v3444_v6, %v10780_v55  ;;  %2857 = vrot.lane.b32.xlu1 %v2824_v8, %s8413_s23  ;;  %v10801_v23 = vor.u32 %v2915_v49, %v2913_v62  ;;  %v8282_v62 = vld [vmem:[#allocation2 + $0x10] sm:$0xff]  ;;  %v3058_v8 = vshrl.u32 %v10073_v61, 16  ;;  %v3428_v49 = vshrl.u32 %v3233_v39, 16 }
 0x37e   : > { %v10796_v36 = vpop.permute.xlu0 %2984  ;;  %v2192_v48 = vsel %vm13858_vm11, %v8282_v62, 0  ;;  %vm13859_vm11 = vcmp.ne.s16.totalorder %v13772_v4, 0 }
 0x37f   : > { %v2745_v2 = vpop.permute.xlu1 %2744  ;;  %v3447_v19 = vsel %vm2383_vm7, %v3440_v33, %v3446_v42  ;;  %v3057_v17 = vsel %vm2045_vm12, %v10801_v23, %v3056_v35  ;;  %v2595_v42 = vsel %vm13610_vm9, %v10073_v61, 0 }
 0x380   : > { %3000 = vrot.lane.b32.xlu0 %v2967_v22, %s8412_s18  ;;  %4010 = vmatprep.mubr.bf16.mxu0 %v3447_v19  ;;  %v3153_v46 = vsel %vm449_vm1, %v2192_v48, %v2745_v2 }
 0x381   : > { %2908 = vrot.lane.b32.xlu1 %v2561_v7, %s8411_s19  ;;  %v3202_v32 = vsel %vm3196_vm3, %v3153_v46, %v10639_v3  ;;  %v3430_v7 = vrot.slane %v3428_v49, 7  ;;  %v8284_v49 = vld [vmem:[%s13430_s8 + $0x88] sm:$0xff]  }
 0x382   : > { %v2743_v6 = vpop.permute.xlu0 %2742  ;;  %v3237_v58 = vsel %vm13611_vm14, %v3202_v32, %v10475_v44  ;;  %v3274_v44 = vsel %vm449_vm1, %v10249_v34, %v10687_v13 }
 0x383   : > { %v3150_v14 = vsel %vm449_vm1, %v2191_v10, %v2743_v6  ;;  %v10822_v50 = vpop.permute.xlu1 %2894  ;;  %v10840_v10 = vld [vmem:[#allocation2 + $0x18] sm:$0xff] }
 0x384   : > { %v3200_v38 = vsel %vm3196_vm3, %v3150_v14, %v10623_v5  ;;  %3091 = vrot.lane.b32.xlu0 %v3057_v17, %s8411_s19  ;;  %v2193_v3 = vsel %vm13859_vm11, %v10840_v10, 0 }
 0x385   : > { %v3235_v33 = vsel %vm13611_vm14, %v3200_v38, %v10444_v31  ;;  %v3060_v31 = vor.u32 %v3058_v8, %v3056_v35  ;;  %v3460_v35 = vshrl.u32 %v3237_v58, 16 }
 0x386   : > { %v3431_v18 = vshrl.u32 %v3235_v33, 16  ;;  %v10835_v22 = vpop.permute.xlu0 %2986  ;;  %v3434_v19 = vshll.u32 %v3235_v33, 16  ;;  %v3322_v33 = vsel %vm3196_vm3, %v3274_v44, %v10498_v37  ;;  %v13860_v37 = vld [vmem:[#allocation49_spill] sm:$0xff] }
 0x387   : > { %v2747_v2 = vpop.permute.xlu1 %2746  ;;  %v3462_v34 = vrot.slane %v3460_v35, 7  ;;  %vm13861_vm6 = vcmp.ne.s16.totalorder %v13860_v37, 0 }
 0x388   : > { %v3433_v5 = vrot.slane %v3431_v18, 7  ;;  %3051 = vrot.lane.b32.xlu0 %v2595_v42, %s8413_s23  ;;  %v10845_v61 = vpop.f32.mrb[4].mxu1  ;;  %v3156_v6 = vsel %vm449_vm1, %v2193_v3, %v2747_v2 }
 0x389   : > { %v10850_v46 = vpop.f32.mrb[5].mxu1  ;;  %v3204_v8 = vsel %vm3196_vm3, %v3156_v6, %v10661_v60  ;;  %v3463_v60 = vshll.u32 %v3237_v58, 16 }
 0x38a   : > { %v10847_v62 = vpop.permute.xlu0 %3037  ;;  %v3436_v48 = vor.u32 %v3434_v19, %v3433_v5  ;;  %v10857_v14 = vpop.f32.mrb[6].mxu1  ;;  %v3239_v2 = vsel %vm13611_vm14, %v3204_v8, %v10500_v12  ;;  %v10874_v19 = vld [vmem:[#allocation2 + $0x20] sm:$0xff]  ;;  %v3277_v12 = vsel %vm449_vm1, %v10349_v47, %v10704_v52 }
 0x38b   : > { %v10855_v39 = vpop.permute.xlu1 %2845  ;;  %v10861_v38 = vpop.f32.mrb[7].mxu1  ;;  %v3482_v58 = vshrl.u32 %v3239_v2, 16  ;;  %v3465_v35 = vor.u32 %v3463_v60, %v3462_v34 }
 0x38c   : > { %3093 = vrot.lane.b32.xlu0 %v3060_v31, %s8411_s19  ;;  %v3437_v17 = vsel %vm2383_vm7, %v3430_v7, %v3436_v48 }
 0x38d   : > { %4011 = vmatmul.mubr.bf16.vlgmr.msra.gmra.mrb[4].mxu0 %v3437_v17  ;;  %v3484_v47 = vrot.slane %v3482_v58, 7  ;;  %v3466_v60 = vsel %vm2383_vm7, %v3433_v5, %v3465_v35  ;;  %v3280_v5 = vsel %vm449_vm1, %v10377_v56, %v10722_v57 }
 0x38e   : > { %v3066_v32 = vpop.permute.xlu0 %3065  ;;  %7750 = vmatpush3.bf16.msra.mxu0 %v10314_v51  ;;  %v2194_v51 = vsel %vm13861_vm6, %v10874_v19, 0 }
 0x38f   : > { %v3356_v13 = vsel %vm13611_vm14, %v3322_v33, %v3066_v32  ;;  %v2749_v42 = vpop.permute.xlu1 %2748  ;;  %7751 = vmatprep.subr.bf16.mxu0 %v8284_v49 }
 0x390   : > { %v3467_v18 = vshrl.u32 %v3356_v13, 16  ;;  %v10879_v31 = vpop.f32.mrb[8].mxu1  ;;  %v3470_v7 = vshll.u32 %v3356_v13, 16  ;;  %v3159_v6 = vsel %vm449_vm1, %v2194_v51, %v2749_v42  ;;  %v3324_v42 = vsel %vm3196_vm3, %v3277_v12, %v10517_v25  ;;  %v13862_v25 = vld [vmem:[#allocation34_spill] sm:$0xff] }
 0x391   : > { %v10884_v44 = vpop.f32.mrb[9].mxu1  ;;  %v3206_v13 = vsel %vm3196_vm3, %v3159_v6, %v10678_v43  ;;  %v3485_v43 = vshll.u32 %v3239_v2, 16  ;;  %v10905_v6 = vld [vmem:[#allocation2 + $0x28] sm:$0xff]  ;;  %vm13863_vm11 = vcmp.ne.s16.totalorder %v13862_v25, 0 }
 0x392   : > { %v3469_v3 = vrot.slane %v3467_v18, 7  ;;  %v10881_v48 = vpop.permute.xlu0 %2988  ;;  %7752 = vmatpush3.bf16.msra.mxu0 %v8284_v49  ;;  %v10891_v8 = vpop.f32.mrb[10].mxu1  ;;  %v3241_v37 = vsel %vm13611_vm14, %v3206_v13, %v10519_v20  ;;  %v2195_v12 = vsel %vm13863_vm11, %v10905_v6, 0 }
 0x393   : > { %v10889_v17 = vpop.permute.xlu1 %2896  ;;  %v10893_v32 = vpop.f32.mrb[11].mxu1  ;;  %v3504_v35 = vshrl.u32 %v3241_v37, 16  ;;  %v3487_v20 = vor.u32 %v3485_v43, %v3484_v47 }
 0x394   : > { %v3472_v33 = vor.u32 %v3470_v7, %v3469_v3 }
 0x395   : > { %v3506_v56 = vrot.slane %v3504_v35, 7  ;;  %v3488_v43 = vsel %vm2383_vm7, %v3462_v34, %v3487_v20  ;;  %v3283_v34 = vsel %vm449_vm1, %v10412_v41, %v10736_v1 }
 0x396   : > { %v3068_v49 = vpop.permute.xlu0 %3067  ;;  %v3473_v18 = vsel %vm2383_vm7, %v10780_v55, %v3472_v33 }
 0x397   : > { %v3358_v52 = vsel %vm13611_vm14, %v3324_v42, %v3068_v49  ;;  %4018 = vmatprep.mubr.bf16.mxu0 %v3473_v18  ;;  %v2751_v51 = vpop.permute.xlu1 %2750 }
 0x398   : > { %v3489_v7 = vshrl.u32 %v3358_v52, 16  ;;  %4019 = vmatmul.mubr.bf16.gmra.mrb[8].mxu0 %v3466_v60  ;;  %v3492_v58 = vshll.u32 %v3358_v52, 16  ;;  %v3162_v42 = vsel %vm449_vm1, %v2195_v12, %v2751_v51  ;;  %v3326_v52 = vsel %vm3196_vm3, %v3280_v5, %v10535_v63  ;;  %v13864_v5 = vld [vmem:[#allocation37_spill] sm:$0xff] }
 0x399   : > { %v3208_v18 = vsel %vm3196_vm3, %v3162_v42, %v10692_v21  ;;  %v3507_v63 = vshll.u32 %v3241_v37, 16  ;;  %vm13865_vm6 = vcmp.ne.s16.totalorder %v13864_v5, 0 }
 0x39a   : > { %v3491_v55 = vrot.slane %v3489_v7, 7  ;;  %v10910_v33 = vpop.permute.xlu0 %3039  ;;  %v3243_v42 = vsel %vm13611_vm14, %v3208_v18, %v10537_v16 }
 0x39b   : > { %v10916_v13 = vpop.permute.xlu1 %2847  ;;  %v3526_v20 = vshrl.u32 %v3243_v42, 16 }
 0x39c   : > { %v3494_v2 = vor.u32 %v3492_v58, %v3491_v55  ;;  %v10918_v49 = vpop.f32.mrb[12].mxu1 }
 0x39d   : > { %v10922_v60 = vpop.f32.mrb[13].mxu1 }
 0x39e   : > { %v3070_v51 = vpop.permute.xlu0 %3069  ;;  %v3495_v7 = vsel %vm2383_vm7, %v3469_v3, %v3494_v2  ;;  %v10927_v12 = vpop.f32.mrb[14].mxu1  ;;  %v2196_v3 = vsel %vm13865_vm6, %v10354_v40, 0  ;;  %v3328_v40 = vsel %vm3196_vm3, %v3283_v34, %v10556_v54 }
 0x39f   : > { %v3360_v57 = vsel %vm13611_vm14, %v3326_v52, %v3070_v51  ;;  %4026 = vmatprep.mubr.bf16.mxu0 %v3495_v7  ;;  %v2753_v58 = vpop.permute.xlu1 %2752  ;;  %v10931_v25 = vpop.f32.mrb[15].mxu1  ;;  %v3509_v51 = vor.u32 %v3507_v63, %v3506_v56 }
 0x3a0   : > { %v3511_v21 = vshrl.u32 %v3360_v57, 16  ;;  %4027 = vmatmul.mubr.bf16.gmra.mrb[12].mxu0 %v3488_v43  ;;  %v3514_v35 = vshll.u32 %v3360_v57, 16  ;;  %v3165_v52 = vsel %vm449_vm1, %v2196_v3, %v2753_v58  ;;  %v3528_v43 = vrot.slane %v3526_v20, 7 }
 0x3a1   : > { %v3210_v37 = vsel %vm3196_vm3, %v3165_v52, %v10713_v45  ;;  %v3510_v41 = vsel %vm2383_vm7, %v3484_v47, %v3509_v51  ;;  %v3529_v3 = vshll.u32 %v3243_v42, 16  ;;  %v13866_v45 = vld [vmem:[#allocation38_spill] sm:$0xff]  ;;  %v3286_v47 = vsel %vm449_vm1, %v10447_v15, %v10758_v29 }
 0x3a2   : > { %v3513_v2 = vrot.slane %v3511_v21, 7  ;;  %v10938_v4 = vpop.permute.xlu0 %2990  ;;  %v3245_v63 = vsel %vm13611_vm14, %v3210_v37, %v10558_v27  ;;  %vm13867_vm11 = vcmp.ne.s16.totalorder %v13866_v45, 0  ;;  %v13868_v37 = vld [vmem:[#allocation59_spill] sm:$0xff] }
 0x3a3   : > { %v10944_v7 = vpop.permute.xlu1 %2898  ;;  %v2197_v54 = vsel %vm13867_vm11, %v10383_v26, 0  ;;  %v3548_v20 = vshrl.u32 %v3245_v63, 16  ;;  %v3531_v51 = vor.u32 %v3529_v3, %v3528_v43  ;;  %v3330_v26 = vsel %vm3196_vm3, %v3286_v47, %v13868_v37  ;;  %v13869_v3 = vld [vmem:[#allocation60_spill] sm:$0xff] }
 0x3a4   : > { %v3516_v16 = vor.u32 %v3514_v35, %v3513_v2 }
 0x3a5   : > { %v3532_v15 = vsel %vm2383_vm7, %v3506_v56, %v3531_v51 }
 0x3a6   : > { %v3072_v18 = vpop.permute.xlu0 %3071  ;;  %v3517_v57 = vsel %vm2383_vm7, %v3491_v55, %v3516_v16 }
 0x3a7   : > { %v3362_v58 = vsel %vm13611_vm14, %v3328_v40, %v3072_v18  ;;  %4034 = vmatprep.mubr.bf16.mxu0 %v3517_v57  ;;  %v2755_v1 = vpop.permute.xlu1 %2754 }
 0x3a8   : > { %v3533_v21 = vshrl.u32 %v3362_v58, 16  ;;  %4035 = vmatmul.mubr.bf16.gmra.mrb[16].mxu0 %v3510_v41  ;;  %v3536_v52 = vshll.u32 %v3362_v58, 16  ;;  %v3168_v34 = vsel %vm449_vm1, %v2197_v54, %v2755_v1  ;;  %v3550_v58 = vrot.slane %v3548_v20, 7 }
 0x3a9   : > { %v3212_v42 = vsel %vm3196_vm3, %v3168_v34, %v10727_v11  ;;  %v13874_v34 = vld [vmem:[#allocation61_spill] sm:$0xff] }
 0x3aa   : > { %v3535_v35 = vrot.slane %v3533_v21, 7  ;;  %v10958_v55 = vpop.permute.xlu0 %3041  ;;  %v3247_v11 = vsel %vm13611_vm14, %v3212_v42, %v13869_v3  ;;  %v13873_v3 = vld [vmem:[#allocation73_spill] sm:$0xff] }
 0x3ab   : > { %v10964_v16 = vpop.permute.xlu1 %2849  ;;  %v3573_v59 = vshll.u32 %v3247_v11, 16 }
 0x3ac   : > { %v3538_v27 = vor.u32 %v3536_v52, %v3535_v35  ;;  %v3551_v52 = vshll.u32 %v3245_v63, 16 }
 0x3ae   : > { %v3074_v40 = vpop.permute.xlu0 %3073  ;;  %v3539_v18 = vsel %vm2383_vm7, %v3513_v2, %v3538_v27  ;;  %v13870_v2 = vld [vmem:[#allocation18_spill] sm:$0xff] }
 0x3af   : > { %v3364_v41 = vsel %vm13611_vm14, %v3330_v26, %v3074_v40  ;;  %4042 = vmatprep.mubr.bf16.mxu0 %v3539_v18  ;;  %v2757_v29 = vpop.permute.xlu1 %2756  ;;  %v2198_v47 = vsel %vm2181_vm0, %v13870_v2, 0  ;;  %v13872_v26 = vld [vmem:[#allocation52_spill] sm:$0xff]  ;;  %v3570_v40 = vshrl.u32 %v3247_v11, 16  ;;  %v3553_v18 = vor.u32 %v3551_v52, %v3550_v58 }
 0x3b0   : > { %v10971_v57 = vpop.f32.mrb[16].mxu1  ;;  %v3555_v21 = vshrl.u32 %v3364_v41, 16  ;;  %4043 = vmatmul.mubr.bf16.gmra.mrb[20].mxu0 %v3532_v15  ;;  %v3558_v37 = vshll.u32 %v3364_v41, 16  ;;  %v3171_v51 = vsel %vm449_vm1, %v2198_v47, %v2757_v29  ;;  %v3289_v42 = vsel %vm449_vm1, %v13872_v26, %v10775_v53  ;;  %v13875_v26 = vld [vmem:[#allocation62_spill] sm:$0xff] }
 0x3b1   : > { %v10975_v1 = vpop.f32.mrb[17].mxu1  ;;  %v3214_v2 = vsel %vm3196_vm3, %v3171_v51, %v13873_v3  ;;  %v3572_v5 = vrot.slane %v3570_v40, 7  ;;  %v3554_v53 = vsel %vm2383_vm7, %v3528_v43, %v3553_v18  ;;  %v13876_v51 = vld [vmem:[#allocation20_spill] sm:$0xff] }
 0x3b2   : > { %v10979_v54 = vpop.f32.mrb[18].mxu1  ;;  %v3557_v27 = vrot.slane %v3555_v21, 7  ;;  %v10986_v56 = vpop.permute.xlu0 %2992  ;;  %v3332_v21 = vsel %vm3196_vm3, %v3289_v42, %v13874_v34  ;;  %v2199_v34 = vsel %vm2182_vm2, %v13876_v51, 0 }
 0x3b3   : > { %v10984_v20 = vpop.f32.mrb[19].mxu1  ;;  %v10992_v15 = vpop.permute.xlu1 %2900 }
 0x3b4   : > { %v3560_v63 = vor.u32 %v3558_v37, %v3557_v27  ;;  %v3249_v37 = vsel %vm13611_vm14, %v3214_v2, %v13875_v26 }
 0x3b5   : > { %v3592_v18 = vshrl.u32 %v3249_v37, 16 }
 0x3b6   : > { %v3076_v41 = vpop.permute.xlu0 %3075  ;;  %v3561_v45 = vsel %vm2383_vm7, %v3535_v35, %v3560_v63  ;;  %v3575_v63 = vor.u32 %v3573_v59, %v3572_v5 }
 0x3b7   : > { %v3366_v29 = vsel %vm13611_vm14, %v3332_v21, %v3076_v41  ;;  %4050 = vmatprep.mubr.bf16.mxu0 %v3561_v45  ;;  %v2759_v47 = vpop.permute.xlu1 %2758  ;;  %v13878_v45 = vld [vmem:[#allocation54_spill] sm:$0xff]  ;;  %v13879_v41 = vld [vmem:[#allocation65_spill] sm:$0xff]  ;;  %v3594_v26 = vrot.slane %v3592_v18, 7 }
 0x3b8   : > { %v3577_v52 = vshrl.u32 %v3366_v29, 16  ;;  %4051 = vmatmul.mubr.bf16.gmra.mrb[24].mxu0 %v3554_v53  ;;  %v3580_v24 = vshll.u32 %v3366_v29, 16  ;;  %v3174_v40 = vsel %vm449_vm1, %v2199_v34, %v2759_v47  ;;  %v3292_v43 = vsel %vm449_vm1, %v13878_v45, %v10796_v36  ;;  %v13880_v45 = vld [vmem:[#allocation53_spill] sm:$0xff] }
 0x3b9   : > { %v3216_v11 = vsel %vm3196_vm3, %v3174_v40, %v10782_v30  ;;  %v3334_v53 = vsel %vm3196_vm3, %v3292_v43, %v13879_v41  ;;  %v3576_v36 = vsel %vm2383_vm7, %v3550_v58, %v3575_v63  ;;  %v3595_v40 = vshll.u32 %v3249_v37, 16  ;;  %v13882_v37 = vld [vmem:[#allocation57_spill] sm:$0xff] }
 0x3ba   : > { %v3579_v42 = vrot.slane %v3577_v52, 7  ;;  %v11006_v35 = vpop.permute.xlu0 %3043 }
 0x3bb   : > { %v11012_v21 = vpop.permute.xlu1 %2851 }
 0x3bc   : > { %v3582_v2 = vor.u32 %v3580_v24, %v3579_v42  ;;  %v3251_v24 = vsel %vm13611_vm14, %v3216_v11, %v10822_v50  ;;  %v3597_v50 = vor.u32 %v3595_v40, %v3594_v26 }
 0x3be   : > { %v3078_v29 = vpop.permute.xlu0 %3077  ;;  %v3583_v52 = vsel %vm2383_vm7, %v3557_v27, %v3582_v2  ;;  %v2200_v27 = vsel %vm2183_vm8, %v13880_v45, 0  ;;  %v3598_v40 = vsel %vm2383_vm7, %v3572_v5, %v3597_v50 }
 0x3bf   : > { %v3368_v47 = vsel %vm13611_vm14, %v3334_v53, %v3078_v29  ;;  %4058 = vmatprep.mubr.bf16.mxu0 %v3583_v52  ;;  %v11021_v51 = vpop.f32.mrb[20].mxu1  ;;  %v2761_v59 = vpop.permute.xlu1 %2760  ;;  %v3614_v29 = vshrl.u32 %v3251_v24, 16 }
 0x3c0   : > { %v3599_v34 = vshrl.u32 %v3368_v47, 16  ;;  %4059 = vmatmul.mubr.bf16.gmra.mrb[28].mxu0 %v3576_v36  ;;  %v11025_v30 = vpop.f32.mrb[21].mxu1  ;;  %v3602_v41 = vshll.u32 %v3368_v47, 16  ;;  %v3177_v63 = vsel %vm449_vm1, %v2200_v27, %v2761_v59  ;;  %v3295_v36 = vsel %vm449_vm1, %v13882_v37, %v10835_v22 }
 0x3c1   : > { %v11030_v18 = vpop.f32.mrb[22].mxu1  ;;  %v3218_v45 = vsel %vm3196_vm3, %v3177_v63, %v10855_v39  ;;  %v3336_v47 = vsel %vm3196_vm3, %v3295_v36, %v10847_v62  ;;  %v3616_v27 = vrot.slane %v3614_v29, 7  ;;  %v3617_v62 = vshll.u32 %v3251_v24, 16  ;;  %v13884_v63 = vld [vmem:[#allocation55_spill] sm:$0xff] }
 0x3c2   : > { %v3601_v2 = vrot.slane %v3599_v34, 7  ;;  %v11032_v58 = vpop.permute.xlu0 %2994  ;;  %v11035_v53 = vpop.f32.mrb[23].mxu1  ;;  %v3253_v22 = vsel %vm13611_vm14, %v3218_v45, %v10889_v17  ;;  %v13887_v24 = vld [vmem:[#allocation63_spill] sm:$0xff] }
 0x3c3   : > { %v11037_v11 = vpop.permute.xlu1 %2902  ;;  %v3619_v17 = vor.u32 %v3617_v62, %v3616_v27 }
 0x3c4   : > { %v3604_v52 = vor.u32 %v3602_v41, %v3601_v2 }
 0x3c5   : > { %v3620_v62 = vsel %vm2383_vm7, %v3594_v26, %v3619_v17 }
 0x3c6   : > { %v3080_v34 = vpop.permute.xlu0 %3079  ;;  %v3605_v59 = vsel %vm2383_vm7, %v3579_v42, %v3604_v52  ;;  %v2201_v42 = vsel %vm2184_vm10, %v13884_v63, 0 }
 0x3c7   : > { %v3370_v43 = vsel %vm13611_vm14, %v3336_v47, %v3080_v34  ;;  %4066 = vmatprep.mubr.bf16.mxu0 %v3605_v59  ;;  %v11049_v41 = vpop.f32.mrb[24].mxu1  ;;  %v2763_v3 = vpop.permute.xlu1 %2762  ;;  %v3636_v34 = vshrl.u32 %v3253_v22, 16 }
 0x3c8   : > { %13883 = vst [vmem:[#allocation59_spill] sm:$0xff] %v11049_v41  ;;  %v3621_v0 = vshrl.u32 %v3370_v43, 16  ;;  %4067 = vmatmul.mubr.bf16.gmra.mrb[32].mxu0 %v3598_v40  ;;  %v11053_v39 = vpop.f32.mrb[25].mxu1  ;;  %v3624_v36 = vshll.u32 %v3370_v43, 16  ;;  %v3180_v50 = vsel %vm449_vm1, %v2201_v42, %v2763_v3  ;;  %v3298_v40 = vsel %vm449_vm1, %v13887_v24, %v10881_v48 }
 0x3c9   : > { %v11058_v29 = vpop.f32.mrb[26].mxu1  ;;  %v3220_v63 = vsel %vm3196_vm3, %v3180_v50, %v10916_v13  ;;  %v3638_v42 = vrot.slane %v3636_v34, 7  ;;  %v3639_v24 = vshll.u32 %v3253_v22, 16  ;;  %v13888_v13 = vld [vmem:[#allocation58_spill] sm:$0xff] }
 0x3ca   : > { %13886 = vst [vmem:[#allocation60_spill] sm:$0xff] %v11058_v29  ;;  %v3623_v52 = vrot.slane %v3621_v0, 7  ;;  %v11060_v5 = vpop.permute.xlu0 %3045  ;;  %v11063_v47 = vpop.f32.mrb[27].mxu1  ;;  %v3338_v0 = vsel %vm3196_vm3, %v3298_v40, %v10910_v33  ;;  %v3255_v48 = vsel %vm13611_vm14, %v3220_v63, %v10944_v7  ;;  %v2202_v33 = vsel %vm2185_vm13, %v13888_v13, 0 }
 0x3cb   : > { %v11065_v45 = vpop.permute.xlu1 %2853  ;;  %v3661_v13 = vshll.u32 %v3255_v48, 16 }
 0x3cc   : > { %v3626_v59 = vor.u32 %v3624_v36, %v3623_v52 }
 0x3ce   : > { %v3082_v43 = vpop.permute.xlu0 %3081  ;;  %v3627_v3 = vsel %vm2383_vm7, %v3601_v2, %v3626_v59  ;;  %v3658_v59 = vshrl.u32 %v3255_v48, 16 }
 0x3cf   : > { %v3372_v37 = vsel %vm13611_vm14, %v3338_v0, %v3082_v43  ;;  %4074 = vmatprep.mubr.bf16.mxu0 %v3627_v3  ;;  %v2765_v36 = vpop.permute.xlu1 %2764  ;;  %v3641_v0 = vor.u32 %v3639_v24, %v3638_v42  ;;  %v13890_v43 = vld [vmem:[#allocation67_spill] sm:$0xff] }
 0x3d0   : > { %v3643_v29 = vshrl.u32 %v3372_v37, 16  ;;  %4075 = vmatmul.mubr.bf16.gmra.mrb[36].mxu0 %v3620_v62  ;;  %v3646_v41 = vshll.u32 %v3372_v37, 16  ;;  %v3183_v34 = vsel %vm449_vm1, %v2202_v33, %v2765_v36  ;;  %v3301_v7 = vsel %vm449_vm1, %v13890_v43, %v10938_v4 }
 0x3d1   : > { %v3222_v22 = vsel %vm3196_vm3, %v3183_v34, %v10964_v16  ;;  %v3340_v63 = vsel %vm3196_vm3, %v3301_v7, %v10958_v55  ;;  %v3660_v3 = vrot.slane %v3658_v59, 7  ;;  %v3642_v36 = vsel %vm2383_vm7, %v3616_v27, %v3641_v0  ;;  %v13891_v16 = vld [vmem:[#allocation64_spill] sm:$0xff]  ;;  %v13893_v0 = vld [vmem:[#allocation69_spill] sm:$0xff] }
 0x3d2   : > { %v3645_v40 = vrot.slane %v3643_v29, 7  ;;  %v11082_v2 = vpop.permute.xlu0 %2996  ;;  %v3257_v4 = vsel %vm13611_vm14, %v3222_v22, %v10992_v15  ;;  %v2203_v55 = vsel %vm2186_vm15, %v13891_v16, 0 }
 0x3d3   : > { %v2905_v26 = vpop.permute.xlu1 %2904  ;;  %v3663_v7 = vor.u32 %v3661_v13, %v3660_v3  ;;  %v3683_v16 = vshll.u32 %v3257_v4, 16 }
 0x3d4   : > { %v3648_v17 = vor.u32 %v3646_v41, %v3645_v40 }
 0x3d6   : > { %v3084_v29 = vpop.permute.xlu0 %3083  ;;  %v3649_v37 = vsel %vm2383_vm7, %v3623_v52, %v3648_v17  ;;  %v3680_v17 = vshrl.u32 %v3257_v4, 16 }
 0x3d7   : > { %v3374_v62 = vsel %vm13611_vm14, %v3340_v63, %v3084_v29  ;;  %4082 = vmatprep.mubr.bf16.mxu0 %v3649_v37  ;;  %v2767_v41 = vpop.permute.xlu1 %2766  ;;  %v3304_v29 = vsel %vm449_vm1, %v13893_v0, %v10986_v56 }
 0x3d8   : > { %v3665_v24 = vshrl.u32 %v3374_v62, 16  ;;  %4083 = vmatmul.mubr.bf16.gmra.mrb[40].mxu0 %v3642_v36  ;;  %v3668_v43 = vshll.u32 %v3374_v62, 16  ;;  %v3186_v59 = vsel %vm449_vm1, %v2203_v55, %v2767_v41  ;;  %v3342_v48 = vsel %vm3196_vm3, %v3304_v29, %v11006_v35  ;;  %v13895_v55 = vld [vmem:[#allocation66_spill] sm:$0xff] }
 0x3d9   : > { %v3224_v15 = vsel %vm3196_vm3, %v3186_v59, %v11012_v21  ;;  %v3682_v62 = vrot.slane %v3680_v17, 7  ;;  %v3664_v41 = vsel %vm2383_vm7, %v3638_v42, %v3663_v7  ;;  %v13894_v21 = vld [vmem:[#allocation68_spill] sm:$0xff]  ;;  %vm13896_vm6 = vcmp.ne.s16.totalorder %v13895_v55, 0  ;;  %v13897_v7 = vld [vmem:[#allocation71_spill] sm:$0xff] }
 0x3da   : > { %v3667_v34 = vrot.slane %v3665_v24, 7  ;;  %v3048_v52 = vpop.permute.xlu0 %3047  ;;  %v3259_v56 = vsel %vm13611_vm14, %v3224_v15, %v11037_v11  ;;  %v2204_v35 = vsel %vm13896_vm6, %v13894_v21, 0  ;;  %v8287_v21 = vld [vmem:[#allocation2 + $0x78] sm:$0xff] }
 0x3db   : > { %v2856_v63 = vpop.permute.xlu1 %2855  ;;  %v3685_v0 = vor.u32 %v3683_v16, %v3682_v62 }
 0x3dc   : > { %v3670_v27 = vor.u32 %v3668_v43, %v3667_v34 }
 0x3de   : > { %v3086_v22 = vpop.permute.xlu0 %3085  ;;  %v3671_v37 = vsel %vm2383_vm7, %v3645_v40, %v3670_v27  ;;  %v3702_v27 = vshrl.u32 %v3259_v56, 16 }
 0x3df   : > { %v3376_v36 = vsel %vm13611_vm14, %v3342_v48, %v3086_v22  ;;  %4090 = vmatprep.mubr.bf16.mxu0 %v3671_v37  ;;  %v2769_v24 = vpop.permute.xlu1 %2768  ;;  %v3307_v48 = vsel %vm449_vm1, %v13897_v7, %v11032_v58  ;;  %v3705_v58 = vshll.u32 %v3259_v56, 16 }
 0x3e0   : > { %v3687_v13 = vshrl.u32 %v3376_v36, 16  ;;  %4091 = vmatmul.mubr.bf16.gmra.mrb[44].mxu0 %v3664_v41  ;;  %v3690_v59 = vshll.u32 %v3376_v36, 16  ;;  %v3189_v17 = vsel %vm449_vm1, %v2204_v35, %v2769_v24  ;;  %v3344_v4 = vsel %vm3196_vm3, %v3307_v48, %v11060_v5 }
 0x3e1   : > { %v3226_v11 = vsel %vm3196_vm3, %v3189_v17, %v11065_v45  ;;  %v3704_v37 = vrot.slane %v3702_v27, 7  ;;  %v3686_v41 = vsel %vm2383_vm7, %v3660_v3, %v3685_v0  ;;  %v2205_v35 = vsel %vm2188_vm5, %v8287_v21, 0  ;;  %v13899_v3 = vld [vmem:[#allocation72_spill] sm:$0xff] }
 0x3e2   : > { %v3689_v43 = vrot.slane %v3687_v13, 7  ;;  %v2999_v40 = vpop.permute.xlu0 %2998  ;;  %v3261_v16 = vsel %vm13611_vm14, %v3226_v11, %v2905_v26  ;;  %v3310_v0 = vsel %vm449_vm1, %v13899_v3, %v11082_v2 }
 0x3e3   : > { %v2907_v29 = vpop.permute.xlu1 %2906  ;;  %v3724_v27 = vshrl.u32 %v3261_v16, 16  ;;  %v3346_v56 = vsel %vm3196_vm3, %v3310_v0, %v3048_v52  ;;  %v13900_v52 = vld [vmem:[#allocation19_spill] sm:$0xff] }
 0x3e4   : > { %v3692_v42 = vor.u32 %v3690_v59, %v3689_v43  ;;  %vm13901_vm11 = vcmp.ne.s16.totalorder %v13900_v52, 0 }
 0x3e6   : > { %v3088_v15 = vpop.permute.xlu0 %3087  ;;  %v3693_v22 = vsel %vm2383_vm7, %v3667_v34, %v3692_v42  ;;  %v3707_v42 = vor.u32 %v3705_v58, %v3704_v37  ;;  %v3727_v58 = vshll.u32 %v3261_v16, 16 }
 0x3e7   : > { %v3378_v36 = vsel %vm13611_vm14, %v3344_v4, %v3088_v15  ;;  %4098 = vmatprep.mubr.bf16.mxu0 %v3693_v22  ;;  %v2771_v24 = vpop.permute.xlu1 %2770  ;;  %v3726_v15 = vrot.slane %v3724_v27, 7 }
 0x3e8   : > { %v3709_v13 = vshrl.u32 %v3378_v36, 16  ;;  %4099 = vmatmul.mubr.bf16.gmra.mrb[48].mxu0 %v3686_v41  ;;  %v3712_v59 = vshll.u32 %v3378_v36, 16  ;;  %v3192_v34 = vsel %vm449_vm1, %v2205_v35, %v2771_v24  ;;  %v3708_v36 = vsel %vm2383_vm7, %v3682_v62, %v3707_v42 }
 0x3e9   : > { %v3228_v26 = vsel %vm3196_vm3, %v3192_v34, %v2856_v63  ;;  %v2596_v35 = vsel %vm13901_vm11, %v10840_v10, 0  ;;  %v3729_v27 = vor.u32 %v3727_v58, %v3726_v15  ;;  %v3313_v42 = vsel %vm449_vm1, %v10778_v28, %v2999_v40 }
 0x3ea   : > { %v3711_v5 = vrot.slane %v3709_v13, 7  ;;  %v3050_v17 = vpop.permute.xlu0 %3049  ;;  %v3263_v13 = vsel %vm13611_vm14, %v3228_v26, %v2907_v29  ;;  %v8288_v29 = vld [vmem:[#allocation2 + $0x80] sm:$0xff]  ;;  %v3112_v3 = vrot.slane %v2596_v35, 1  ;;  %vm13904_vm11 = vcmask 1046528  }
 0x3eb   : > { %v2773_v7 = vpop.permute.xlu1 %2772  ;;  %v3746_v34 = vshrl.u32 %v3263_v13, 16  ;;  %v2206_v16 = vsel %vm13610_vm9, %v8288_v29, 0  ;;  %v3348_v26 = vsel %vm3196_vm3, %v3313_v42, %v3050_v17  ;;  %v3730_v28 = vsel %vm2383_vm7, %v3704_v37, %v3729_v27 }
 0x3ec   : > { %v3714_v48 = vor.u32 %v3712_v59, %v3711_v5  ;;  %v3195_v10 = vsel %vm449_vm1, %v2206_v16, %v2773_v7  ;;  %v13905_v7 = vld [vmem:[#allocation43_spill] sm:$0xff] }
 0x3ee   : > { %v3090_v11 = vpop.permute.xlu0 %3089  ;;  %v3715_v4 = vsel %vm2383_vm7, %v3689_v43, %v3714_v48  ;;  %v13902_v43 = vld [vmem:[#allocation41_spill] sm:$0xff] }
 0x3ef   : > { %v3380_v22 = vsel %vm13611_vm14, %v3346_v56, %v3090_v11  ;;  %4106 = vmatprep.mubr.bf16.mxu0 %v3715_v4  ;;  %v2858_v41 = vpop.permute.xlu1 %2857  ;;  %vm13903_vm6 = vcmp.ne.s16.totalorder %v13902_v43, 0  ;;  %v3748_v11 = vrot.slane %v3746_v34, 7 }
 0x3f0   : > { %v3731_v24 = vshrl.u32 %v3380_v22, 16  ;;  %4107 = vmatmul.mubr.bf16.gmra.mrb[52].mxu0 %v3708_v36  ;;  %v3734_v21 = vshll.u32 %v3380_v22, 16  ;;  %v2597_v59 = vsel %vm13903_vm6, %v10874_v19, 0  ;;  %v3230_v22 = vsel %vm3196_vm3, %v3195_v10, %v2858_v41 }
 0x3f1   : > { %v3113_v0 = vrot.slane %v2597_v59, 1  ;;  %vm13906_vm6 = vcmp.ne.s16.totalorder %v13905_v7, 0 }
 0x3f2   : > { %v3733_v2 = vrot.slane %v3731_v24, 7  ;;  %v3001_v63 = vpop.permute.xlu0 %3000  ;;  %v3749_v24 = vshll.u32 %v3263_v13, 16  ;;  %v2598_v58 = vsel %vm13906_vm6, %v10905_v6, 0  ;;  %vm13909_vm6 = vmmov %vm13904_vm11 }
 0x3f3   : > { %v2909_v48 = vpop.permute.xlu1 %2908  ;;  %v3114_v17 = vsel %vm13904_vm11, %v3112_v3, %v3113_v0  ;;  %v3115_v42 = vrot.slane %v2598_v58, 1  ;;  %v3316_v37 = vsel %vm449_vm1, %v10801_v23, %v3001_v63 }
 0x3f4   : > { %v3736_v62 = vor.u32 %v3734_v21, %v3733_v2  ;;  %v3265_v36 = vsel %vm13611_vm14, %v3230_v22, %v2909_v48  ;;  %v3751_v34 = vor.u32 %v3749_v24, %v3748_v11 }
 0x3f5   : > { %v3768_v59 = vshrl.u32 %v3265_v36, 16 }
 0x3f6   : > { %v3092_v56 = vpop.permute.xlu0 %3091  ;;  %v3737_v19 = vsel %vm2383_vm7, %v3711_v5, %v3736_v62  ;;  %v3453_v62 = vshrl.u32 %v3114_v17, 16  ;;  %v3752_v6 = vsel %vm2383_vm7, %v3726_v15, %v3751_v34 }
 0x3f7   : > { %v3382_v4 = vsel %vm13611_vm14, %v3348_v26, %v3092_v56  ;;  %4114 = vmatprep.mubr.bf16.mxu0 %v3737_v19  ;;  %v3770_v16 = vrot.slane %v3768_v59, 7  ;;  %v3116_v56 = vsel %vm13904_vm11, %v3113_v0, %v3115_v42  ;;  %v3771_v19 = vshll.u32 %v3265_v36, 16 }
 0x3f8   : > { %v3753_v40 = vshrl.u32 %v3382_v4, 16  ;;  %4115 = vmatmul.mubr.bf16.gmra.mrb[56].mxu0 %v3730_v28  ;;  %v3756_v21 = vshll.u32 %v3382_v4, 16  ;;  %v3455_v10 = vrot.slane %v3453_v62, 7  ;;  %v13907_v4 = vld [vmem:[#allocation31_spill] sm:$0xff]  ;;  %v3475_v58 = vshrl.u32 %v3116_v56, 16 }
 0x3f9   : > { %v13908_v22 = vrot.slane %v13907_v4, 1  ;;  %v3773_v24 = vor.u32 %v3771_v19, %v3770_v16  ;;  %vm13920_vm11 = vcmp.ne.s16.totalorder %v13900_v52, 0 }
 0x3fa   : > { %v3755_v5 = vrot.slane %v3753_v40, 7  ;;  %v3052_v35 = vpop.permute.xlu0 %3051  ;;  %v3449_v40 = vshrl.u32 %v3112_v3, 16  ;;  %v3477_v36 = vrot.slane %v3475_v58, 7  ;;  %v3478_v3 = vshll.u32 %v3116_v56, 16 }
 0x3fb   : > { %v3350_v27 = vsel %vm3196_vm3, %v3316_v37, %v3052_v35  ;;  %v3118_v23 = vsel %vm13909_vm6, %v3115_v42, %v13908_v22  ;;  %v3774_v0 = vsel %vm2383_vm7, %v3748_v11, %v3773_v24  ;;  %v13910_v11 = vld [vmem:[#allocation32_spill] sm:$0xff] }
 0x3fc   : > { %v3758_v41 = vor.u32 %v3756_v21, %v3755_v5  ;;  %v3497_v59 = vshrl.u32 %v3118_v23, 16  ;;  %v3451_v34 = vrot.slane %v3449_v40, 7  ;;  %v3480_v42 = vor.u32 %v3478_v3, %v3477_v36 }
 0x3fe   : > { %v3094_v13 = vpop.permute.xlu0 %3093  ;;  %v3759_v29 = vsel %vm2383_vm7, %v3733_v2, %v3758_v41  ;;  %v3456_v2 = vshll.u32 %v3114_v17, 16  ;;  %v3499_v62 = vrot.slane %v3497_v59, 7  ;;  %v3500_v17 = vshll.u32 %v3118_v23, 16 }
 0x3ff   : > { %v3384_v48 = vsel %vm13611_vm14, %v3350_v27, %v3094_v13  ;;  %4122 = vmatprep.mubr.bf16.mxu0 %v3759_v29  ;;  %v3481_v27 = vsel %vm2383_vm7, %v3455_v10, %v3480_v42  ;;  %v3522_v13 = vshll.u32 %v13910_v11, 16  ;;  %v13911_v29 = vld [vmem:[#allocation33_spill] sm:$0xff]  ;;  %vm13982_vm14 = vcmp.ne.s16.totalorder %v13902_v43, 0 }
 0x400   : > { %v3775_v26 = vshrl.u32 %v3384_v48, 16  ;;  %4123 = vmatmul.mubr.bf16.gmra.mrb[60].mxu0 %v3752_v6  ;;  %v3778_v28 = vshll.u32 %v3384_v48, 16  ;;  %v3458_v35 = vor.u32 %v3456_v2, %v3455_v10  ;;  %v3502_v37 = vor.u32 %v3500_v17, %v3499_v62 }
 0x401   : > { %v3524_v16 = vor.u32 %v3522_v13, %v13911_v29 }
 0x402   : > { %v3777_v63 = vrot.slane %v3775_v26, 7  ;;  %v3459_v41 = vsel %vm2383_vm7, %v3451_v34, %v3458_v35 }
 0x403   : > { %v3525_v48 = vsel %vm2383_vm7, %v3499_v62, %v3524_v16 }
 0x404   : > { %v3780_v21 = vor.u32 %v3778_v28, %v3777_v63 }
 0x406   : > { %v3781_v15 = vsel %vm2383_vm7, %v3755_v5, %v3780_v21  ;;  %v3503_v5 = vsel %vm2383_vm7, %v3477_v36, %v3502_v37 }
 0x407   : > { %4130 = vmatprep.mubr.bf16.mxu0 %v3781_v15 }
 0x408   : > { %4131 = vmatmul.mubr.bf16.gmra.mrb[64].mxu0 %v3774_v0 }
 0x409   : > { %7753 = vmatprep.mubr.msk.bf16.mxu0 %vm449_vm1, %v3459_v41 }
 0x410   : > { %7754 = vmatmul.mubr.msk.bf16.vlgmr.msra.gmra.mrb[68].mxu0 %vm449_vm1, %v3481_v27 }
 0x411   : > { %7757 = vmatprep.mubr.msk.bf16.mxu0 %vm449_vm1, %v3503_v5  ;;  %v11202_v5 = vld [vmem:[%s13431_s9] ss:$0 sm:$0xff] }
 0x418   : > { %7758 = vmatmul.mubr.msk.bf16.gmra.mrb[72].mxu0 %vm449_vm1, %v3525_v48 }
 0x460   : > { %v7441_v6 = vpop.f32.mrb[4].mxu0 }
 0x461   : > { %v7442_v26 = vpop.f32.mrb[5].mxu0 }
 0x462   : > { %v11183_v56 = vadd.f32 %v7442_v26, %v7441_v6  ;;  %v7444_v19 = vpop.f32.mrb[6].mxu0 }
 0x463   : > { %v7445_v10 = vpop.f32.mrb[7].mxu0 }
 0x464   : > { %v11185_v4 = vadd.f32 %v7445_v10, %v7444_v19 }
 0x46b   : > { %v7447_v22 = vpop.f32.mrb[8].mxu0 }
 0x46c   : > { %v7448_v23 = vpop.f32.mrb[9].mxu0 }
 0x46d   : > { %v11187_v63 = vadd.f32 %v7448_v23, %v7447_v22  ;;  %v7450_v28 = vpop.f32.mrb[10].mxu0 }
 0x46e   : > { %v7451_v40 = vpop.f32.mrb[11].mxu0 }
 0x46f   : > { %v11189_v2 = vadd.f32 %v7451_v40, %v7450_v28 }
 0x473   : > { %v7453_v24 = vpop.f32.mrb[12].mxu0 }
 0x474   : > { %v7454_v58 = vpop.f32.mrb[13].mxu0 }
 0x475   : > { %v11191_v21 = vadd.f32 %v7454_v58, %v7453_v24  ;;  %v7456_v35 = vpop.f32.mrb[14].mxu0 }
 0x476   : > { %v7457_v59 = vpop.f32.mrb[15].mxu0 }
 0x477   : > { %v11193_v15 = vadd.f32 %v7457_v59, %v7456_v35 }
 0x47b   : > { %v7459_v34 = vpop.f32.mrb[16].mxu0 }
 0x47c   : > { %v7460_v0 = vpop.f32.mrb[17].mxu0 }
 0x47d   : > { %v11195_v36 = vadd.f32 %v7460_v0, %v7459_v34  ;;  %v7462_v41 = vpop.f32.mrb[18].mxu0 }
 0x47e   : > { %v7463_v62 = vpop.f32.mrb[19].mxu0 }
 0x47f   : > { %v11197_v3 = vadd.f32 %v7463_v62, %v7462_v41 }
 0x483   : > { %v7465_v17 = vpop.f32.mrb[20].mxu0 }
 0x484   : > { %v7466_v42 = vpop.f32.mrb[21].mxu0 }
 0x485   : > { %v7467_v37 = vadd.f32 %v7466_v42, %v7465_v17  ;;  %v7468_v27 = vpop.f32.mrb[22].mxu0 }
 0x486   : > { %v7469_v11 = vpop.f32.mrb[23].mxu0 }
 0x487   : > { %v4045_v13 = vadd.f32 %v7467_v37, %v11202_v5  ;;  %v7470_v29 = vadd.f32 %v7469_v11, %v7468_v27 }
 0x489   : > { %v11206_v16 = vadd.f32 %v10850_v46, %v4045_v13  ;;  %v4048_v48 = vadd.f32 %v7470_v29, %v11202_v5 }
 0x48b   : > { %v11210_v6 = vadd.f32 %v10861_v38, %v4048_v48  ;;  %v7471_v26 = vpop.f32.mrb[24].mxu0 }
 0x48c   : > { %v7472_v19 = vpop.f32.mrb[25].mxu0 }
 0x48d   : > { %v7473_v10 = vadd.f32 %v7472_v19, %v7471_v26  ;;  %v7474_v22 = vpop.f32.mrb[26].mxu0 }
 0x48e   : > { %v7475_v23 = vpop.f32.mrb[27].mxu0 }
 0x48f   : > { %v4053_v28 = vadd.f32 %v7473_v10, %v11202_v5  ;;  %v7476_v40 = vadd.f32 %v7475_v23, %v7474_v22 }
 0x491   : > { %v11214_v24 = vadd.f32 %v10845_v61, %v4053_v28  ;;  %v4056_v58 = vadd.f32 %v7476_v40, %v11202_v5 }
 0x493   : > { %v7477_v46 = vpop.f32.mrb[28].mxu0  ;;  %v11218_v35 = vadd.f32 %v10857_v14, %v4056_v58 }
 0x494   : > { %v7478_v59 = vpop.f32.mrb[29].mxu0 }
 0x495   : > { %v7479_v38 = vadd.f32 %v7478_v59, %v7477_v46  ;;  %v7480_v34 = vpop.f32.mrb[30].mxu0 }
 0x496   : > { %v7481_v0 = vpop.f32.mrb[31].mxu0 }
 0x497   : > { %v4061_v41 = vadd.f32 %v7479_v38, %v11202_v5  ;;  %v7482_v62 = vadd.f32 %v7481_v0, %v7480_v34 }
 0x499   : > { %v11222_v17 = vadd.f32 %v10884_v44, %v4061_v41  ;;  %v4064_v42 = vadd.f32 %v7482_v62, %v11202_v5 }
 0x49b   : > { %v11226_v61 = vadd.f32 %v10893_v32, %v4064_v42  ;;  %v7483_v37 = vpop.f32.mrb[32].mxu0 }
 0x49c   : > { %v7484_v27 = vpop.f32.mrb[33].mxu0 }
 0x49d   : > { %v7485_v11 = vadd.f32 %v7484_v27, %v7483_v37  ;;  %v7486_v14 = vpop.f32.mrb[34].mxu0 }
 0x49e   : > { %v7487_v13 = vpop.f32.mrb[35].mxu0 }
 0x49f   : > { %v4069_v29 = vadd.f32 %v7485_v11, %v11202_v5  ;;  %v7488_v48 = vadd.f32 %v7487_v13, %v7486_v14 }
 0x4a1   : > { %v11230_v26 = vadd.f32 %v10879_v31, %v4069_v29  ;;  %v4072_v19 = vadd.f32 %v7488_v48, %v11202_v5 }
 0x4a3   : > { %v7489_v44 = vpop.f32.mrb[36].mxu0  ;;  %v11234_v10 = vadd.f32 %v10891_v8, %v4072_v19 }
 0x4a4   : > { %v7490_v22 = vpop.f32.mrb[37].mxu0 }
 0x4a5   : > { %v7491_v32 = vadd.f32 %v7490_v22, %v7489_v44  ;;  %v7492_v23 = vpop.f32.mrb[38].mxu0 }
 0x4a6   : > { %v7493_v28 = vpop.f32.mrb[39].mxu0 }
 0x4a7   : > { %v4077_v40 = vadd.f32 %v7491_v32, %v11202_v5  ;;  %v7494_v58 = vadd.f32 %v7493_v28, %v7492_v23 }
 0x4a9   : > { %v11238_v46 = vadd.f32 %v10922_v60, %v4077_v40  ;;  %v4080_v59 = vadd.f32 %v7494_v58, %v11202_v5 }
 0x4ab   : > { %v11242_v31 = vadd.f32 %v10931_v25, %v4080_v59  ;;  %v7495_v38 = vpop.f32.mrb[40].mxu0 }
 0x4ac   : > { %v7496_v34 = vpop.f32.mrb[41].mxu0 }
 0x4ad   : > { %v7497_v0 = vadd.f32 %v7496_v34, %v7495_v38  ;;  %v7498_v8 = vpop.f32.mrb[42].mxu0 }
 0x4ae   : > { %v7499_v41 = vpop.f32.mrb[43].mxu0 }
 0x4af   : > { %v4085_v62 = vadd.f32 %v7497_v0, %v11202_v5  ;;  %v7500_v42 = vadd.f32 %v7499_v41, %v7498_v8 }
 0x4b1   : > { %v11246_v37 = vadd.f32 %v10918_v49, %v4085_v62  ;;  %v4088_v27 = vadd.f32 %v7500_v42, %v11202_v5 }
 0x4b3   : > { %v7501_v60 = vpop.f32.mrb[44].mxu0  ;;  %v11250_v11 = vadd.f32 %v10927_v12, %v4088_v27 }
 0x4b4   : > { %v7502_v14 = vpop.f32.mrb[45].mxu0 }
 0x4b5   : > { %v7503_v25 = vadd.f32 %v7502_v14, %v7501_v60  ;;  %v7504_v13 = vpop.f32.mrb[46].mxu0 }
 0x4b6   : > { %v7505_v29 = vpop.f32.mrb[47].mxu0 }
 0x4b7   : > { %v4093_v48 = vadd.f32 %v7503_v25, %v11202_v5  ;;  %v7506_v19 = vadd.f32 %v7505_v29, %v7504_v13 }
 0x4b9   : > { %v11254_v44 = vadd.f32 %v10975_v1, %v4093_v48  ;;  %v4096_v22 = vadd.f32 %v7506_v19, %v11202_v5 }
 0x4bb   : > { %v11258_v49 = vadd.f32 %v10984_v20, %v4096_v22  ;;  %v7507_v32 = vpop.f32.mrb[48].mxu0 }
 0x4bc   : > { %v7508_v23 = vpop.f32.mrb[49].mxu0 }
 0x4bd   : > { %v7509_v28 = vadd.f32 %v7508_v23, %v7507_v32  ;;  %v7510_v12 = vpop.f32.mrb[50].mxu0 }
 0x4be   : > { %v7511_v40 = vpop.f32.mrb[51].mxu0 }
 0x4bf   : > { %v4101_v58 = vadd.f32 %v7509_v28, %v11202_v5  ;;  %v7512_v59 = vadd.f32 %v7511_v40, %v7510_v12 }
 0x4c1   : > { %v11262_v38 = vadd.f32 %v10971_v57, %v4101_v58  ;;  %v4104_v34 = vadd.f32 %v7512_v59, %v11202_v5 }
 0x4c3   : > { %v7513_v1 = vpop.f32.mrb[52].mxu0  ;;  %v11266_v0 = vadd.f32 %v10979_v54, %v4104_v34 }
 0x4c4   : > { %v7514_v8 = vpop.f32.mrb[53].mxu0 }
 0x4c5   : > { %v7515_v20 = vadd.f32 %v7514_v8, %v7513_v1  ;;  %v7516_v41 = vpop.f32.mrb[54].mxu0 }
 0x4c6   : > { %v7517_v62 = vpop.f32.mrb[55].mxu0 }
 0x4c7   : > { %v4109_v42 = vadd.f32 %v7515_v20, %v11202_v5  ;;  %v7518_v27 = vadd.f32 %v7517_v62, %v7516_v41 }
 0x4c9   : > { %v11270_v60 = vadd.f32 %v11025_v30, %v4109_v42  ;;  %v4112_v14 = vadd.f32 %v7518_v27, %v11202_v5 }
 0x4cb   : > { %v11274_v57 = vadd.f32 %v11035_v53, %v4112_v14  ;;  %v7519_v25 = vpop.f32.mrb[56].mxu0 }
 0x4cc   : > { %v7520_v13 = vpop.f32.mrb[57].mxu0 }
 0x4cd   : > { %v7521_v29 = vadd.f32 %v7520_v13, %v7519_v25  ;;  %v7522_v54 = vpop.f32.mrb[58].mxu0  ;;  %v13912_v25 = vld [vmem:[#allocation59_spill] sm:$0xff] }
 0x4ce   : > { %v7523_v48 = vpop.f32.mrb[59].mxu0 }
 0x4cf   : > { %v4117_v19 = vadd.f32 %v7521_v29, %v11202_v5  ;;  %v7524_v22 = vadd.f32 %v7523_v48, %v7522_v54  ;;  %v4021_v29 = vadd.f32 %v11187_v63, %v11202_v5  ;;  %v4013_v54 = vadd.f32 %v11183_v56, %v11202_v5  ;;  %v13913_v48 = vld [vmem:[#allocation60_spill] sm:$0xff] }
 0x4d0   : > { %v4016_v63 = vadd.f32 %v11185_v4, %v11202_v5  ;;  %v4037_v4 = vadd.f32 %v11195_v36, %v11202_v5 }
 0x4d1   : > { %v11278_v32 = vadd.f32 %v11021_v51, %v4117_v19  ;;  %v4120_v30 = vadd.f32 %v7524_v22, %v11202_v5 }
 0x4d3   : > { %v7525_v23 = vpop.f32.mrb[60].mxu0  ;;  %v11282_v28 = vadd.f32 %v11030_v18, %v4120_v30 }
 0x4d4   : > { %v7526_v53 = vpop.f32.mrb[61].mxu0 }
 0x4d5   : > { %v7527_v12 = vadd.f32 %v7526_v53, %v7525_v23  ;;  %v7528_v40 = vpop.f32.mrb[62].mxu0  ;;  %v4024_v23 = vadd.f32 %v11189_v2, %v11202_v5 }
 0x4d6   : > { %v7529_v58 = vpop.f32.mrb[63].mxu0 }
 0x4d7   : > { %v4125_v59 = vadd.f32 %v7527_v12, %v11202_v5  ;;  %v7530_v34 = vadd.f32 %v7529_v58, %v7528_v40  ;;  %v11313_v40 = vld [vmem:[%s445_s30] ss:$0 sm:$0xff] }
 0x4d9   : > { %v11286_v1 = vadd.f32 %v11053_v39, %v4125_v59  ;;  %v4128_v51 = vadd.f32 %v7530_v34, %v11202_v5 }
 0x4db   : > { %v11291_v8 = vadd.f32 %v11063_v47, %v4128_v51  ;;  %v7531_v20 = vpop.f32.mrb[64].mxu0 }
 0x4dc   : > { %v7532_v18 = vpop.f32.mrb[65].mxu0 }
 0x4dd   : > { %v7533_v41 = vadd.f32 %v7532_v18, %v7531_v20  ;;  %v7534_v62 = vpop.f32.mrb[66].mxu0 }
 0x4de   : > { %v7535_v42 = vpop.f32.mrb[67].mxu0 }
 0x4df   : > { %v4133_v27 = vadd.f32 %v7533_v41, %v11202_v5  ;;  %v7536_v14 = vadd.f32 %v7535_v42, %v7534_v62 }
 0x4e1   : > { %v11296_v13 = vadd.f32 %v13912_v25, %v4133_v27  ;;  %v4136_v39 = vadd.f32 %v7536_v14, %v11202_v5  ;;  %v4029_v27 = vadd.f32 %v11191_v21, %v11202_v5  ;;  %v4040_v14 = vadd.f32 %v11197_v3, %v11202_v5 }
 0x4e2   : > { %v4032_v21 = vadd.f32 %v11193_v15, %v11202_v5 }
 0x4e3   : > { %v7755_v47 = vpop.f32.mrb[68].mxu0  ;;  %v11307_v19 = vadd.f32 %v13913_v48, %v4136_v39 }
 0x4e4   : > { %v4182_v22 = vadd.f32 %v7755_v47, %v4021_v29  ;;  %v4173_v30 = vpop.f32.mrb[69].mxu0 }
 0x4e5   : > { %v4174_v53 = vadd.f32 %v4173_v30, %v4013_v54  ;;  %v7756_v12 = vpop.f32.mrb[70].mxu0 }
 0x4e6   : > { %v4185_v58 = vadd.f32 %v7756_v12, %v4024_v23  ;;  %v4176_v59 = vpop.f32.mrb[71].mxu0  ;;  %v11319_v51 = vadd.f32 %v11313_v40, %v4182_v22 }
 0x4e7   : > { %v11316_v34 = vadd.f32 %v11313_v40, %v4174_v53  ;;  %v4177_v56 = vadd.f32 %v4176_v59, %v4016_v63 }
 0x4e8   : > { %v11327_v18 = vadd.f32 %v11313_v40, %v4185_v58  ;;  %v4412_v25 = vmul.f32 %v11319_v51, %v11319_v51  ;;  %v4344_v54 = vsel %vm449_vm1, %v11319_v51, 0.0 }
 0x4e9   : > { %v4410_v20 = vmul.f32 %v11316_v34, %v11316_v34  ;;  %v11324_v2 = vadd.f32 %v11313_v40, %v4177_v56  ;;  %v4341_v41 = vsel %vm449_vm1, %v11316_v34, 0.0 }
 0x4ea   : > { %v4413_v3 = vmul.f32 %v11327_v18, %v11327_v18  ;;  %v4346_v58 = vsel %vm449_vm1, %v11327_v18, 0.0 }
 0x4eb   : > { %v4342_v62 = vsel %vm449_vm1, %v11324_v2, 0.0  ;;  %v7759_v42 = vpop.f32.mrb[72].mxu0  ;;  %v4411_v36 = vmul.f32 %v11324_v2, %v11324_v2  ;;  %v4442_v48 = vsel %vm449_vm1, %v4410_v20, 0.0 }
 0x4ec   : > { %v4343_v39 = vadd.f32 %v4342_v62, %v4341_v41  ;;  %v4198_v29 = vadd.f32 %v7759_v42, %v4037_v4  ;;  %v4189_v47 = vpop.f32.mrb[73].mxu0  ;;  %v4445_v4 = vsel %vm449_vm1, %v4412_v25, 0.0 }
 0x4ed   : > { %v4190_v22 = vadd.f32 %v4189_v47, %v4029_v27  ;;  %v7760_v30 = vpop.f32.mrb[74].mxu0  ;;  %v4443_v53 = vsel %vm449_vm1, %v4411_v36, 0.0 }
 0x4ee   : > { %v4345_v23 = vadd.f32 %v4344_v54, %v4343_v39  ;;  %v4201_v12 = vadd.f32 %v7760_v30, %v4040_v14  ;;  %v4192_v63 = vpop.f32.mrb[75].mxu0  ;;  %v4444_v59 = vadd.f32 %v4443_v53, %v4442_v48  ;;  %v11358_v15 = vadd.f32 %v11313_v40, %v4198_v29 }
 0x4ef   : > { %v11354_v56 = vadd.f32 %v11313_v40, %v4190_v22  ;;  %v4193_v20 = vadd.f32 %v4192_v63, %v4032_v21  ;;  %v4447_v14 = vsel %vm449_vm1, %v4413_v3, 0.0  ;;  %v11378_v48 = vadd.f32 %v11313_v40, %v11206_v16 }
 0x4f0   : > { %v4347_v5 = vadd.f32 %v4346_v58, %v4345_v23  ;;  %v4446_v41 = vadd.f32 %v4445_v4, %v4444_v59  ;;  %v11369_v36 = vadd.f32 %v11313_v40, %v4201_v12  ;;  %v4416_v22 = vmul.f32 %v11358_v15, %v11358_v15 }
 0x4f1   : > { %v4348_v62 = vsel %vm449_vm1, %v11354_v56, 0.0  ;;  %v4414_v42 = vmul.f32 %v11354_v56, %v11354_v56  ;;  %v11365_v27 = vadd.f32 %v11313_v40, %v4193_v20  ;;  %v4352_v21 = vsel %vm449_vm1, %v11358_v15, 0.0 }
 0x4f2   : > { %v4349_v39 = vadd.f32 %v4348_v62, %v4347_v5  ;;  %v4448_v25 = vadd.f32 %v4447_v14, %v4446_v41  ;;  %v11387_v53 = vadd.f32 %v11313_v40, %v11210_v6  ;;  %v4417_v12 = vmul.f32 %v11369_v36, %v11369_v36 }
 0x4f3   : > { %v4449_v29 = vsel %vm449_vm1, %v4414_v42, 0.0  ;;  %v4350_v47 = vsel %vm449_vm1, %v11365_v27, 0.0  ;;  %v4415_v54 = vmul.f32 %v11365_v27, %v11365_v27  ;;  %v4354_v16 = vsel %vm449_vm1, %v11369_v36, 0.0 }
 0x4f4   : > { %v4351_v30 = vadd.f32 %v4350_v47, %v4349_v39  ;;  %v4450_v3 = vadd.f32 %v4449_v29, %v4448_v25  ;;  %v4418_v59 = vmul.f32 %v11378_v48, %v11378_v48  ;;  %v11397_v20 = vadd.f32 %v11313_v40, %v11214_v24 }
 0x4f5   : > { %v4451_v23 = vsel %vm449_vm1, %v4415_v54, 0.0  ;;  %v4453_v4 = vsel %vm449_vm1, %v4416_v22, 0.0  ;;  %v4356_v6 = vsel %vm449_vm1, %v11378_v48, 0.0  ;;  %v4419_v62 = vmul.f32 %v11387_v53, %v11387_v53 }
 0x4f6   : > { %v4353_v63 = vadd.f32 %v4352_v21, %v4351_v30  ;;  %v4452_v58 = vadd.f32 %v4451_v23, %v4450_v3  ;;  %v11406_v42 = vadd.f32 %v11313_v40, %v11218_v35  ;;  %v4455_v14 = vsel %vm449_vm1, %v4417_v12, 0.0 }
 0x4f7   : > { %v4358_v24 = vsel %vm449_vm1, %v11387_v53, 0.0  ;;  %v4457_v29 = vsel %vm449_vm1, %v4418_v59, 0.0  ;;  %v4420_v47 = vmul.f32 %v11397_v20, %v11397_v20  ;;  %v11416_v54 = vadd.f32 %v11313_v40, %v11222_v17 }
 0x4f8   : > { %v4355_v5 = vadd.f32 %v4354_v16, %v4353_v63  ;;  %v4454_v41 = vadd.f32 %v4453_v4, %v4452_v58  ;;  %v4360_v35 = vsel %vm449_vm1, %v11397_v20, 0.0  ;;  %v4459_v21 = vsel %vm449_vm1, %v4419_v62, 0.0 }
 0x4f9   : > { %v4421_v3 = vmul.f32 %v11406_v42, %v11406_v42  ;;  %v11425_v23 = vadd.f32 %v11313_v40, %v11226_v61  ;;  %v4362_v63 = vsel %vm449_vm1, %v11406_v42, 0.0  ;;  %v4461_v16 = vsel %vm449_vm1, %v4420_v47, 0.0 }
 0x4fa   : > { %v4357_v39 = vadd.f32 %v4356_v6, %v4355_v5  ;;  %v4456_v25 = vadd.f32 %v4455_v14, %v4454_v41  ;;  %v4422_v58 = vmul.f32 %v11416_v54, %v11416_v54  ;;  %v11434_v59 = vadd.f32 %v11313_v40, %v11230_v26 }
 0x4fb   : > { %v4364_v5 = vsel %vm449_vm1, %v11416_v54, 0.0  ;;  %v4463_v6 = vsel %vm449_vm1, %v4421_v3, 0.0  ;;  %v4423_v41 = vmul.f32 %v11425_v23, %v11425_v23  ;;  %v11443_v62 = vadd.f32 %v11313_v40, %v11234_v10 }
 0x4fc   : > { %v4359_v22 = vadd.f32 %v4358_v24, %v4357_v39  ;;  %v4458_v30 = vadd.f32 %v4457_v29, %v4456_v25  ;;  %v4366_v39 = vsel %vm449_vm1, %v11425_v23, 0.0  ;;  %v4465_v24 = vsel %vm449_vm1, %v4422_v58, 0.0 }
 0x4fd   : > { %v4424_v25 = vmul.f32 %v11434_v59, %v11434_v59  ;;  %v11452_v29 = vadd.f32 %v11313_v40, %v11238_v46 }
 0x4fe   : > { %v4361_v12 = vadd.f32 %v4360_v35, %v4359_v22  ;;  %v4460_v17 = vadd.f32 %v4459_v21, %v4458_v30  ;;  %v4368_v22 = vsel %vm449_vm1, %v11434_v59, 0.0  ;;  %v4467_v35 = vsel %vm449_vm1, %v4423_v41, 0.0 }
 0x4ff   : > { %v4425_v30 = vmul.f32 %v11443_v62, %v11443_v62  ;;  %v11461_v21 = vadd.f32 %v11313_v40, %v11242_v31 }
 0x500   : > { %v4363_v4 = vadd.f32 %v4362_v63, %v4361_v12  ;;  %v4462_v61 = vadd.f32 %v4461_v16, %v4460_v17  ;;  %v4370_v12 = vsel %vm449_vm1, %v11443_v62, 0.0  ;;  %v4469_v63 = vsel %vm449_vm1, %v4424_v25, 0.0 }
 0x501   : > { %v4426_v17 = vmul.f32 %v11452_v29, %v11452_v29  ;;  %v11470_v16 = vadd.f32 %v11313_v40, %v11246_v37 }
 0x502   : > { %v4365_v14 = vadd.f32 %v4364_v5, %v4363_v4  ;;  %v4464_v26 = vadd.f32 %v4463_v6, %v4462_v61  ;;  %v4372_v4 = vsel %vm449_vm1, %v11452_v29, 0.0  ;;  %v4471_v5 = vsel %vm449_vm1, %v4425_v30, 0.0 }
 0x503   : > { %v4427_v61 = vmul.f32 %v11461_v21, %v11461_v21  ;;  %v11479_v6 = vadd.f32 %v11313_v40, %v11250_v11 }
 0x504   : > { %v4367_v47 = vadd.f32 %v4366_v39, %v4365_v14  ;;  %v4466_v10 = vadd.f32 %v4465_v24, %v4464_v26  ;;  %v4374_v14 = vsel %vm449_vm1, %v11461_v21, 0.0  ;;  %v4473_v39 = vsel %vm449_vm1, %v4426_v17, 0.0 }
 0x505   : > { %v4428_v26 = vmul.f32 %v11470_v16, %v11470_v16  ;;  %v11488_v24 = vadd.f32 %v11313_v40, %v11254_v44 }
 0x506   : > { %v4369_v3 = vadd.f32 %v4368_v22, %v4367_v47  ;;  %v4468_v46 = vadd.f32 %v4467_v35, %v4466_v10  ;;  %v4376_v47 = vsel %vm449_vm1, %v11470_v16, 0.0  ;;  %v4475_v22 = vsel %vm449_vm1, %v4427_v61, 0.0 }
 0x507   : > { %v4429_v10 = vmul.f32 %v11479_v6, %v11479_v6  ;;  %v11497_v35 = vadd.f32 %v11313_v40, %v11258_v49 }
 0x508   : > { %v4371_v58 = vadd.f32 %v4370_v12, %v4369_v3  ;;  %v4470_v31 = vadd.f32 %v4469_v63, %v4468_v46  ;;  %v4378_v3 = vsel %vm449_vm1, %v11479_v6, 0.0  ;;  %v4477_v12 = vsel %vm449_vm1, %v4428_v26, 0.0 }
 0x509   : > { %v4430_v46 = vmul.f32 %v11488_v24, %v11488_v24  ;;  %v11506_v63 = vadd.f32 %v11313_v40, %v11262_v38 }
 0x50a   : > { %v4373_v41 = vadd.f32 %v4372_v4, %v4371_v58  ;;  %v4472_v37 = vadd.f32 %v4471_v5, %v4470_v31  ;;  %v4380_v58 = vsel %vm449_vm1, %v11488_v24, 0.0  ;;  %v4479_v4 = vsel %vm449_vm1, %v4429_v10, 0.0 }
 0x50b   : > { %v4431_v31 = vmul.f32 %v11497_v35, %v11497_v35  ;;  %v11515_v5 = vadd.f32 %v11313_v40, %v11266_v0 }
 0x50c   : > { %v4375_v25 = vadd.f32 %v4374_v14, %v4373_v41  ;;  %v4474_v11 = vadd.f32 %v4473_v39, %v4472_v37  ;;  %v4382_v41 = vsel %vm449_vm1, %v11497_v35, 0.0  ;;  %v4481_v14 = vsel %vm449_vm1, %v4430_v46, 0.0 }
 0x50d   : > { %v4432_v37 = vmul.f32 %v11506_v63, %v11506_v63  ;;  %v11524_v39 = vadd.f32 %v11313_v40, %v11270_v60 }
 0x50e   : > { %v4377_v30 = vadd.f32 %v4376_v47, %v4375_v25  ;;  %v4476_v44 = vadd.f32 %v4475_v22, %v4474_v11  ;;  %v4384_v25 = vsel %vm449_vm1, %v11506_v63, 0.0  ;;  %v4483_v47 = vsel %vm449_vm1, %v4431_v31, 0.0 }
 0x50f   : > { %v4433_v11 = vmul.f32 %v11515_v5, %v11515_v5  ;;  %v11533_v22 = vadd.f32 %v11313_v40, %v11274_v57 }
 0x510   : > { %v4379_v17 = vadd.f32 %v4378_v3, %v4377_v30  ;;  %v4478_v49 = vadd.f32 %v4477_v12, %v4476_v44  ;;  %v4386_v30 = vsel %vm449_vm1, %v11515_v5, 0.0  ;;  %v4485_v3 = vsel %vm449_vm1, %v4432_v37, 0.0 }
 0x511   : > { %v4434_v44 = vmul.f32 %v11524_v39, %v11524_v39  ;;  %v11542_v12 = vadd.f32 %v11313_v40, %v11278_v32 }
 0x512   : > { %v4381_v61 = vadd.f32 %v4380_v58, %v4379_v17  ;;  %v4480_v38 = vadd.f32 %v4479_v4, %v4478_v49  ;;  %v4388_v17 = vsel %vm449_vm1, %v11524_v39, 0.0  ;;  %v4487_v58 = vsel %vm449_vm1, %v4433_v11, 0.0 }
 0x513   : > { %v4435_v49 = vmul.f32 %v11533_v22, %v11533_v22  ;;  %v11551_v4 = vadd.f32 %v11313_v40, %v11282_v28 }
 0x514   : > { %v4383_v26 = vadd.f32 %v4382_v41, %v4381_v61  ;;  %v4482_v0 = vadd.f32 %v4481_v14, %v4480_v38  ;;  %v4390_v61 = vsel %vm449_vm1, %v11533_v22, 0.0  ;;  %v4489_v41 = vsel %vm449_vm1, %v4434_v44, 0.0 }
 0x515   : > { %v4436_v38 = vmul.f32 %v11542_v12, %v11542_v12  ;;  %v11560_v14 = vadd.f32 %v11313_v40, %v11286_v1 }
 0x516   : > { %v4385_v10 = vadd.f32 %v4384_v25, %v4383_v26  ;;  %v4484_v60 = vadd.f32 %v4483_v47, %v4482_v0  ;;  %v4392_v26 = vsel %vm449_vm1, %v11542_v12, 0.0  ;;  %v4491_v25 = vsel %vm449_vm1, %v4435_v49, 0.0 }
 0x517   : > { %v4437_v0 = vmul.f32 %v11551_v4, %v11551_v4  ;;  %v11569_v47 = vadd.f32 %v11313_v40, %v11291_v8 }
 0x518   : > { %v4387_v46 = vadd.f32 %v4386_v30, %v4385_v10  ;;  %v4486_v57 = vadd.f32 %v4485_v3, %v4484_v60  ;;  %v4394_v10 = vsel %vm449_vm1, %v11551_v4, 0.0  ;;  %v4493_v30 = vsel %vm449_vm1, %v4436_v38, 0.0 }
 0x519   : > { %v4438_v60 = vmul.f32 %v11560_v14, %v11560_v14  ;;  %v11578_v3 = vadd.f32 %v11313_v40, %v11296_v13 }
 0x51a   : > { %v4389_v31 = vadd.f32 %v4388_v17, %v4387_v46  ;;  %v4488_v32 = vadd.f32 %v4487_v58, %v4486_v57  ;;  %v4396_v46 = vsel %vm449_vm1, %v11560_v14, 0.0  ;;  %v4495_v17 = vsel %vm449_vm1, %v4437_v0, 0.0 }
 0x51b   : > { %v4439_v57 = vmul.f32 %v11569_v47, %v11569_v47  ;;  %v11587_v58 = vadd.f32 %v11313_v40, %v11307_v19  ;;  %v4400_v38 = vsel %vm449_vm1, %v11578_v3, 0.0 }
 0x51c   : > { %v4391_v37 = vadd.f32 %v4390_v61, %v4389_v31  ;;  %v4490_v28 = vadd.f32 %v4489_v41, %v4488_v32  ;;  %v4398_v31 = vsel %vm449_vm1, %v11569_v47, 0.0  ;;  %v4497_v61 = vsel %vm449_vm1, %v4438_v60, 0.0 }
 0x51d   : > { %v4440_v32 = vmul.f32 %v11578_v3, %v11578_v3  ;;  %v4441_v19 = vmul.f32 %v11587_v58, %v11587_v58 }
 0x51e   : > { %v4393_v11 = vadd.f32 %v4392_v26, %v4391_v37  ;;  %v4492_v1 = vadd.f32 %v4491_v25, %v4490_v28  ;;  %v4499_v26 = vsel %vm449_vm1, %v4439_v57, 0.0  ;;  %v4402_v28 = vsel %vm449_vm1, %v11587_v58, 0.0 }
 0x51f   : > { %v4501_v0 = vsel %vm449_vm1, %v4440_v32, 0.0  ;;  %v13915_v32 = vmov 0.0  }
 0x520   : > { %v4395_v44 = vadd.f32 %v4394_v10, %v4393_v11  ;;  %v4494_v8 = vadd.f32 %v4493_v30, %v4492_v1  ;;  %v4503_v1 = vsel %vm449_vm1, %v4441_v19, 0.0 }
 0x522   : > { %v4397_v49 = vadd.f32 %v4396_v46, %v4395_v44  ;;  %v4496_v13 = vadd.f32 %v4495_v17, %v4494_v8 }
 0x524   : > { %v4399_v41 = vadd.f32 %v4398_v31, %v4397_v49  ;;  %v4498_v37 = vadd.f32 %v4497_v61, %v4496_v13 }
 0x526   : > { %v4401_v40 = vadd.f32 %v4400_v38, %v4399_v41  ;;  %v4500_v25 = vadd.f32 %v4499_v26, %v4498_v37  ;;  %v13914_v41 = vld [vmem:[#allocation12_spill] sm:$0xff]  ;;  %v13916_v38 = vmov 0.0|0.0   ;;  %v13917_v26 = vld [vmem:[#allocation13_spill] sm:$0xff] }
 0x528   : > { %v4403_v11 = vadd.f32 %v4402_v28, %v4401_v40  ;;  %v4502_v10 = vadd.f32 %v4501_v0, %v4500_v25  ;;  %v13918_v40 = vld [vmem:[#allocation14_spill] sm:$0xff]  ;;  %v13919_v28 = vld [vmem:[#allocation15_spill] sm:$0xff] }
 0x52a   : > { %v4404_v30 = vrot.slane %v4403_v11, 4  ;;  %v4504_v60 = vadd.f32 %v4503_v1, %v4502_v10 }
 0x52c   : > { %v4405_v44 = vadd.f32 %v4404_v30, %v4403_v11  ;;  %v4505_v46 = vrot.slane %v4504_v60, 4 }
 0x52e   : > { %v4406_v8 = vrot.slane %v4405_v44, 2  ;;  %v4506_v17 = vadd.f32 %v4505_v46, %v4504_v60  ;;  %v5213_v46 = vld [vmem:[#allocation2 + $0x8] sm:$0xff] }
 0x530   : > { %v4407_v57 = vadd.f32 %v4406_v8, %v4405_v44  ;;  %v4507_v49 = vrot.slane %v4506_v17, 2  ;;  %v11626_v8 = vsel %vm13920_vm11, %v5213_v46, 0 }
 0x531   : > { %13921 = vst [vmem:[#allocation18_spill] sm:$0xff] %v11626_v8 }
 0x532   : > { %v4408_v31 = vrot.slane %v4407_v57, 1  ;;  %v4508_v61 = vadd.f32 %v4507_v49, %v4506_v17  ;;  %v13597_v17 = vrot.slane %v11626_v8, 1 }
 0x534   : > { %v4409_v13 = vadd.f32 %v4408_v31, %v4407_v57  ;;  %v4509_v37 = vrot.slane %v4508_v61, 1  ;;  %5545 = vrot.lane.b32.xlu1 %v13597_v17, %s8413_s23  ;;  %v5335_v57 = vshll.u32 %v5213_v46, 16  ;;  %v13923_v31 = vld [vmem:[#allocation16_spill] sm:$0xff] }
 0x536   : > { %7794 = vmatmul.mubr.msk.f32.vlgmr.msra.gmra.mrb[28].mxu1 %vm449_vm1, %v4409_v13  ;;  %v4510_v19 = vadd.f32 %v4509_v37, %v4508_v61  ;;  %v11632_v49 = vrot.slane %v5335_v57, 1  ;;  %v7993_v61 = vld [vmem:[%s13432_s10 + $0x80] sm:$0xff]  }
 0x537   : > { %7897 = vmatpush3.bf16.msra.mxu1 %v13914_v41  ;;  %7804 = vmatprep.mubr.msk.f32.mxu1 %vm13798_vm4, %v13915_v32 }
 0x538   : > { %7898 = vmatprep.subr.bf16.mxu1 %v13916_v38  ;;  %13922 = vst [vmem:[#allocation52_spill] sm:$0xff] %v11632_v49  ;;  %5461 = vrot.lane.b32.xlu0 %v11632_v49, %s8412_s18 }
 0x539   : > { %7829 = vmatprep.subr.bf16.mxu0 %v7993_v61 }
 0x53a   : > { %7830 = vmatpush3.bf16.msra.mxu0 %v7993_v61 }
 0x53b   : > { %7900 = vmatpush3.bf16.msra.mxu1 %v13917_v26 }
 0x53c   : > { %7901 = vmatprep.subr.bf16.mxu1 %v13916_v38 }
 0x53e   : > { %7805 = vmatmul.mubr.msk.f32.vlgmr.msra.gmra.mrb[30].mxu1 %vm449_vm1, %v4510_v19 }
 0x53f   : > { %7903 = vmatpush3.bf16.msra.mxu1 %v13918_v40  ;;  %7815 = vmatprep.mubr.msk.f32.mxu1 %vm13798_vm4, %v13915_v32 }
 0x540   : > { %7904 = vmatprep.subr.bf16.mxu1 %v13916_v38 }
 0x543   : > { %7906 = vmatpush3.bf16.msra.mxu1 %v13919_v28 }
 0x544   : > { %7907 = vmatprep.subr.bf16.mxu1 %v13916_v38 }
 0x609   : > { %v4580_v25 = vpop.f32.mrb[28].mxu1 }
 0x60a   : > { %v4584_v0 = vmul.f32 0.00390625, %v4580_v25  ;;  %v7795_v11 = vpop.f32.mrb[29].mxu1 }
 0x60c   : > { %7816 = vmatmul.mubr.msk.f32.vlgmr.msra.gmra.mrb[32].mxu1 %vm449_vm1, %v4584_v0  ;;  %v4659_v1 = vmul.f32 %v4584_v0, %v4584_v0 }
 0x60d   : > { %7909 = vmatpush3.bf16.msra.mxu1 %v13918_v40  ;;  %7826 = vmatprep.mubr.msk.f32.mxu1 %vm13798_vm4, %v13915_v32  ;;  %vm13924_vm4 = vcmp.ne.s16.totalorder %v13923_v31, 0  ;;  %v13925_v40 = vld [vmem:[#allocation21_spill] sm:$0xff] }
 0x60e   : > { %7910 = vmatprep.subr.bf16.mxu1 %v13916_v38  ;;  %v5266_v13 = vsel %vm13924_vm4, %v5213_v46, 0  ;;  %v7994_v38 = vld [vmem:[%s13432_s10 + $0x88] sm:$0xff]   ;;  %vm13938_vm4 = vcmp.ne.s16.totalorder %v13900_v52, 0 }
 0x60f   : > { %5596 = vrot.lane.b32.xlu1 %v5266_v13, %s8411_s19  ;;  %7831 = vmatprep.subr.bf16.mxu0 %v7994_v38 }
 0x610   : > { %7832 = vmatpush3.bf16.msra.mxu0 %v7994_v38 }
 0x611   : > { %v4654_v10 = vpop.f32.mrb[30].mxu1  ;;  %7912 = vmatpush3.bf16.msra.mxu1 %v13919_v28 }
 0x612   : > { %v4658_v30 = vmul.f32 0.00390625, %v4654_v10  ;;  %v7806_v60 = vpop.f32.mrb[31].mxu1 }
 0x614   : > { %v4660_v44 = vsub.f32 %v4658_v30, %v4659_v1 }
 0x616   : > { %7827 = vmatmul.mubr.msk.f32.vlgmr.msra.gmra.mrb[34].mxu1 %vm449_vm1, %v4660_v44 }
 0x6df   : > { %v4730_v41 = vpop.f32.mrb[32].mxu1 }
 0x6e0   : > { %v7817_v32 = vpop.f32.mrb[33].mxu1  ;;  %v11646_v28 = vrot.slane %v4730_v41, %v13925_v40 }
 0x6e2   : > { %v4738_v25 = vsub.f32 %v11316_v34, %v11646_v28  ;;  %v4739_v0 = vsub.f32 %v11324_v2, %v11646_v28  ;;  %v4740_v11 = vsub.f32 %v11319_v51, %v11646_v28  ;;  %v4741_v10 = vsub.f32 %v11327_v18, %v11646_v28 }
 0x6e3   : > { %v4742_v1 = vsub.f32 %v11354_v56, %v11646_v28  ;;  %v4743_v30 = vsub.f32 %v11365_v27, %v11646_v28  ;;  %v4744_v60 = vsub.f32 %v11358_v15, %v11646_v28  ;;  %v4745_v34 = vsub.f32 %v11369_v36, %v11646_v28 }
 0x6e4   : > { %v4746_v2 = vsub.f32 %v11378_v48, %v11646_v28  ;;  %v4747_v51 = vsub.f32 %v11387_v53, %v11646_v28  ;;  %v4748_v18 = vsub.f32 %v11397_v20, %v11646_v28  ;;  %v4749_v56 = vsub.f32 %v11406_v42, %v11646_v28 }
 0x6e5   : > { %v4750_v27 = vsub.f32 %v11416_v54, %v11646_v28  ;;  %v4751_v15 = vsub.f32 %v11425_v23, %v11646_v28  ;;  %v4752_v36 = vsub.f32 %v11434_v59, %v11646_v28  ;;  %v4753_v48 = vsub.f32 %v11443_v62, %v11646_v28 }
 0x6e6   : > { %v4754_v53 = vsub.f32 %v11452_v29, %v11646_v28  ;;  %v4755_v20 = vsub.f32 %v11461_v21, %v11646_v28  ;;  %v4756_v42 = vsub.f32 %v11470_v16, %v11646_v28  ;;  %v4757_v54 = vsub.f32 %v11479_v6, %v11646_v28 }
 0x6e7   : > { %v4758_v23 = vsub.f32 %v11488_v24, %v11646_v28  ;;  %v4759_v59 = vsub.f32 %v11497_v35, %v11646_v28  ;;  %v4760_v62 = vsub.f32 %v11506_v63, %v11646_v28  ;;  %v4761_v29 = vsub.f32 %v11515_v5, %v11646_v28 }
 0x6e8   : > { %v4762_v21 = vsub.f32 %v11524_v39, %v11646_v28  ;;  %v4763_v16 = vsub.f32 %v11533_v22, %v11646_v28  ;;  %v4764_v6 = vsub.f32 %v11542_v12, %v11646_v28  ;;  %v4765_v24 = vsub.f32 %v11551_v4, %v11646_v28 }
 0x6e9   : > { %v4839_v37 = vpop.f32.mrb[34].mxu1  ;;  %v4766_v63 = vsub.f32 %v11560_v14, %v11646_v28  ;;  %v4767_v5 = vsub.f32 %v11569_v47, %v11646_v28  ;;  %v4768_v39 = vsub.f32 %v11578_v3, %v11646_v28  ;;  %v4769_v22 = vsub.f32 %v11587_v58, %v11646_v28 }
 0x6ea   : > { %v4840_v26 = vadd.f32 1e-05, %v4839_v37  ;;  %v7828_v19 = vpop.f32.mrb[35].mxu1 }
 0x6ec   : > { %8141 = vrsqrt.f32 %v4840_v26 }
 0x6f6   : > { %v8142_v44 = vpop.eup %8141 }
 0x6f7   : > { %v4847_v35 = vrot.slane %v8142_v44, %v13925_v40 }
 0x6f9   : > { %v4848_v46 = vmul.f32 %v4847_v35, %v4738_v25  ;;  %v4849_v57 = vmul.f32 %v4847_v35, %v4739_v0  ;;  %v4850_v12 = vmul.f32 %v4847_v35, %v4740_v11  ;;  %v4851_v13 = vmul.f32 %v4847_v35, %v4741_v10 }
 0x6fa   : > { %v4852_v61 = vmul.f32 %v4847_v35, %v4742_v1  ;;  %v4853_v4 = vmul.f32 %v4847_v35, %v4743_v30  ;;  %v4854_v41 = vmul.f32 %v4847_v35, %v4744_v60  ;;  %v4855_v32 = vmul.f32 %v4847_v35, %v4745_v34 }
 0x6fb   : > { %v4856_v38 = vmul.f32 %v4847_v35, %v4746_v2  ;;  %v4857_v37 = vmul.f32 %v4847_v35, %v4747_v51  ;;  %v4858_v14 = vmul.f32 %v4847_v35, %v4748_v18  ;;  %v4859_v26 = vmul.f32 %v4847_v35, %v4749_v56  ;;  %v11744_v56 = vld [vmem:[%s13426_s4] ss:$0 sm:$0xff] }
 0x6fc   : > { %v4860_v19 = vmul.f32 %v4847_v35, %v4750_v27  ;;  %v4861_v47 = vmul.f32 %v4847_v35, %v4751_v15  ;;  %v4862_v40 = vmul.f32 %v4847_v35, %v4752_v36  ;;  %v4863_v44 = vmul.f32 %v4847_v35, %v4753_v48  ;;  %v11752_v48 = vld [vmem:[%s13427_s5] ss:$0 sm:$0xff] }
 0x6fd   : > { %v4864_v3 = vmul.f32 %v4847_v35, %v4754_v53  ;;  %v4865_v17 = vmul.f32 %v4847_v35, %v4755_v20  ;;  %v11713_v9 = vmul.f32 %v4847_v35, %v4756_v42  ;;  %v11715_v58 = vmul.f32 %v4847_v35, %v4757_v54 }
 0x6fe   : > { %v11717_v28 = vmul.f32 %v4847_v35, %v4758_v23  ;;  %v11719_v25 = vmul.f32 %v4847_v35, %v4759_v59  ;;  %v11721_v0 = vmul.f32 %v4847_v35, %v4760_v62  ;;  %v11723_v11 = vmul.f32 %v4847_v35, %v4761_v29 }
 0x6ff   : > { %v11725_v10 = vmul.f32 %v4847_v35, %v4762_v21  ;;  %v11727_v1 = vmul.f32 %v4847_v35, %v4763_v16  ;;  %v11729_v30 = vmul.f32 %v4847_v35, %v4764_v6  ;;  %v11731_v60 = vmul.f32 %v4847_v35, %v4765_v24 }
 0x700   : > { %v11733_v34 = vmul.f32 %v4847_v35, %v4766_v63  ;;  %v11735_v2 = vmul.f32 %v4847_v35, %v4767_v5  ;;  %v11737_v51 = vmul.f32 %v4847_v35, %v4768_v39  ;;  %v11739_v18 = vmul.f32 %v4847_v35, %v4769_v22 }
 0x701   : > { %v4886_v27 = vmul.f32 %v11744_v56, %v4848_v46  ;;  %v4887_v15 = vmul.f32 %v11744_v56, %v4849_v57  ;;  %v4888_v36 = vmul.f32 %v11744_v56, %v4850_v12  ;;  %v4889_v53 = vmul.f32 %v11744_v56, %v4851_v13 }
 0x702   : > { %v4890_v20 = vmul.f32 %v11744_v56, %v4852_v61  ;;  %v4891_v42 = vmul.f32 %v11744_v56, %v4853_v4  ;;  %v4892_v54 = vmul.f32 %v11744_v56, %v4854_v41  ;;  %v4893_v29 = vmul.f32 %v11744_v56, %v4855_v32 }
 0x703   : > { %v11759_v23 = vadd.f32 %v11752_v48, %v4886_v27  ;;  %v11762_v59 = vadd.f32 %v11752_v48, %v4887_v15  ;;  %v11765_v62 = vadd.f32 %v11752_v48, %v4888_v36  ;;  %v11769_v21 = vadd.f32 %v11752_v48, %v4889_v53 }
 0x704   : > { %v4894_v16 = vmul.f32 %v11744_v56, %v4856_v38  ;;  %v11773_v6 = vadd.f32 %v11752_v48, %v4890_v20  ;;  %v4895_v24 = vmul.f32 %v11744_v56, %v4857_v37  ;;  %v4896_v35 = vmul.f32 %v11744_v56, %v4858_v14 }
 0x705   : > { %v11778_v63 = vadd.f32 %v11752_v48, %v4891_v42  ;;  %v11781_v5 = vadd.f32 %v11752_v48, %v4892_v54  ;;  %v7331_v39 = vmul.f32 -1.442695, %v11759_v23  ;;  %v7332_v22 = vmul.f32 -1.442695, %v11762_v59 }
 0x706   : > { %v7333_v46 = vmul.f32 -1.442695, %v11765_v62  ;;  %v4897_v57 = vmul.f32 %v11744_v56, %v4859_v26  ;;  %v11788_v12 = vadd.f32 %v11752_v48, %v4893_v29  ;;  %v7334_v13 = vmul.f32 -1.442695, %v11769_v21 }
 0x707   : > { %v4898_v61 = vmul.f32 %v11744_v56, %v4860_v19  ;;  %v11793_v4 = vadd.f32 %v11752_v48, %v4894_v16  ;;  %v7335_v41 = vmul.f32 -1.442695, %v11773_v6  ;;  %8143 = vpow2.f32 %v7331_v39 }
 0x708   : > { %v4899_v32 = vmul.f32 %v11744_v56, %v4861_v47  ;;  %v11798_v38 = vadd.f32 %v11752_v48, %v4895_v24  ;;  %v7336_v37 = vmul.f32 -1.442695, %v11778_v63  ;;  %8145 = vpow2.f32 %v7332_v22 }
 0x709   : > { %v4900_v14 = vmul.f32 %v11744_v56, %v4862_v40  ;;  %v11803_v26 = vadd.f32 %v11752_v48, %v4896_v35  ;;  %v7337_v19 = vmul.f32 -1.442695, %v11781_v5  ;;  %8147 = vpow2.f32 %v7333_v46 }
 0x70a   : > { %v4901_v27 = vmul.f32 %v11744_v56, %v4863_v44  ;;  %v11808_v15 = vadd.f32 %v11752_v48, %v4897_v57  ;;  %v7338_v47 = vmul.f32 -1.442695, %v11788_v12  ;;  %8149 = vpow2.f32 %v7334_v13 }
 0x70b   : > { %v4902_v36 = vmul.f32 %v11744_v56, %v4864_v3  ;;  %v11813_v53 = vadd.f32 %v11752_v48, %v4898_v61  ;;  %v7339_v40 = vmul.f32 -1.442695, %v11793_v4  ;;  %8151 = vpow2.f32 %v7335_v41 }
 0x70c   : > { %v4903_v20 = vmul.f32 %v11744_v56, %v4865_v17  ;;  %v11818_v42 = vadd.f32 %v11752_v48, %v4899_v32  ;;  %v7340_v44 = vmul.f32 -1.442695, %v11798_v38  ;;  %8153 = vpow2.f32 %v7336_v37 }
 0x70d   : > { %v4904_v54 = vmul.f32 %v11744_v56, %v11713_v9  ;;  %v11824_v29 = vadd.f32 %v11752_v48, %v4900_v14  ;;  %v7341_v3 = vmul.f32 -1.442695, %v11803_v26  ;;  %8155 = vpow2.f32 %v7337_v19 }
 0x70e   : > { %v4905_v16 = vmul.f32 %v11744_v56, %v11715_v58  ;;  %v11830_v17 = vadd.f32 %v11752_v48, %v4901_v27  ;;  %v7342_v24 = vmul.f32 -1.442695, %v11808_v15  ;;  %8157 = vpow2.f32 %v7338_v47 }
 0x70f   : > { %v4906_v35 = vmul.f32 %v11744_v56, %v11717_v28  ;;  %v11836_v9 = vadd.f32 %v11752_v48, %v4902_v36  ;;  %v7343_v39 = vmul.f32 -1.442695, %v11813_v53  ;;  %8159 = vpow2.f32 %v7339_v40 }
 0x710   : > { %v4907_v22 = vmul.f32 %v11744_v56, %v11719_v25  ;;  %v11842_v58 = vadd.f32 %v11752_v48, %v4903_v20  ;;  %v7344_v46 = vmul.f32 -1.442695, %v11818_v42  ;;  %8161 = vpow2.f32 %v7340_v44 }
 0x711   : > { %v11845_v57 = vpop.eup %8143  ;;  %v4908_v28 = vmul.f32 %v11744_v56, %v11721_v0  ;;  %v11850_v13 = vadd.f32 %v11752_v48, %v4904_v54  ;;  %v7345_v61 = vmul.f32 -1.442695, %v11824_v29  ;;  %8163 = vpow2.f32 %v7341_v3 }
 0x712   : > { %v11853_v41 = vpop.eup %8145  ;;  %v4909_v25 = vmul.f32 %v11744_v56, %v11723_v11  ;;  %v11858_v32 = vadd.f32 %v11752_v48, %v4905_v16  ;;  %v7346_v37 = vmul.f32 -1.442695, %v11830_v17  ;;  %8165 = vpow2.f32 %v7342_v24 }
 0x713   : > { %v11861_v14 = vpop.eup %8147  ;;  %v4910_v0 = vmul.f32 %v11744_v56, %v11725_v10  ;;  %v11866_v19 = vadd.f32 %v11752_v48, %v4906_v35  ;;  %v7347_v27 = vmul.f32 -1.442695, %v11836_v9  ;;  %8167 = vpow2.f32 %v7343_v39 }
 0x714   : > { %v11869_v47 = vpop.eup %8149  ;;  %v4911_v11 = vmul.f32 %v11744_v56, %v11727_v1  ;;  %v11874_v36 = vadd.f32 %v11752_v48, %v4907_v22  ;;  %v7348_v40 = vmul.f32 -1.442695, %v11842_v58  ;;  %8169 = vpow2.f32 %v7344_v46 }
 0x715   : > { %v11877_v20 = vpop.eup %8151  ;;  %v4912_v10 = vmul.f32 %v11744_v56, %v11729_v30  ;;  %v11882_v44 = vadd.f32 %v11752_v48, %v4908_v28  ;;  %v7349_v54 = vmul.f32 -1.442695, %v11850_v13  ;;  %8171 = vpow2.f32 %v7345_v61 }
 0x716   : > { %v11885_v3 = vpop.eup %8153  ;;  %v4913_v1 = vmul.f32 %v11744_v56, %v11731_v60  ;;  %v11890_v16 = vadd.f32 %v11752_v48, %v4909_v25  ;;  %v7350_v24 = vmul.f32 -1.442695, %v11858_v32  ;;  %8173 = vpow2.f32 %v7346_v37 }
 0x717   : > { %v11893_v35 = vpop.eup %8155  ;;  %v4914_v30 = vmul.f32 %v11744_v56, %v11733_v34  ;;  %v11898_v39 = vadd.f32 %v11752_v48, %v4910_v0  ;;  %v7351_v22 = vmul.f32 -1.442695, %v11866_v19  ;;  %8175 = vpow2.f32 %v7347_v27 }
 0x718   : > { %v11901_v46 = vpop.eup %8157  ;;  %v4915_v60 = vmul.f32 %v11744_v56, %v11735_v2  ;;  %v11906_v28 = vadd.f32 %v11752_v48, %v4911_v11  ;;  %v7352_v61 = vmul.f32 -1.442695, %v11874_v36  ;;  %8177 = vpow2.f32 %v7348_v40 }
 0x719   : > { %13926 = vst [vmem:[#allocation73_spill] sm:$0xff] %v11898_v39  ;;  %v8160_v25 = vpop.eup %8159  ;;  %v4916_v34 = vmul.f32 %v11744_v56, %v11737_v51  ;;  %v11912_v37 = vadd.f32 %v11752_v48, %v4912_v10  ;;  %v7353_v0 = vmul.f32 -1.442695, %v11882_v44  ;;  %8179 = vpow2.f32 %v7349_v54 }
 0x71a   : > { %13927 = vst [vmem:[#allocation61_spill] sm:$0xff] %v11906_v28  ;;  %v8162_v27 = vpop.eup %8161  ;;  %v4917_v2 = vmul.f32 %v11744_v56, %v11739_v18  ;;  %v11918_v11 = vadd.f32 %v11752_v48, %v4913_v1  ;;  %v7354_v45 = vmul.f32 -1.442695, %v11890_v16  ;;  %8181 = vpow2.f32 %v7350_v24 }
 0x71b   : > { %13928 = vst [vmem:[#allocation62_spill] sm:$0xff] %v11912_v37  ;;  %v8164_v40 = vpop.eup %8163  ;;  %v11922_v55 = vadd.f32 %v11752_v48, %v4914_v30  ;;  %v7355_v51 = vmul.f32 -1.442695, %v11898_v39  ;;  %8183 = vpow2.f32 %v7351_v22  ;;  %v11926_v54 = vadd.f32 %v11752_v48, %v4915_v60 }
 0x71c   : > { %13929 = vst [vmem:[#allocation20_spill] sm:$0xff] %v11918_v11  ;;  %v8166_v10 = vpop.eup %8165  ;;  %v7356_v33 = vmul.f32 -1.442695, %v11906_v28  ;;  %8185 = vpow2.f32 %v7352_v61  ;;  %v11930_v56 = vadd.f32 %v11752_v48, %v4916_v34  ;;  %v7357_v1 = vmul.f32 -1.442695, %v11912_v37 }
 0x71d   : > { %13930 = vst [vmem:[#allocation54_spill] sm:$0xff] %v11922_v55  ;;  %13931 = vst [vmem:[#allocation65_spill] sm:$0xff] %v11926_v54  ;;  %v8168_v18 = vpop.eup %8167  ;;  %8187 = vpow2.f32 %v7353_v0  ;;  %v11934_v30 = vadd.f32 %v11752_v48, %v4917_v2  ;;  %v7358_v22 = vmul.f32 -1.442695, %v11918_v11  ;;  %v7359_v60 = vmul.f32 -1.442695, %v11922_v55 }
 0x71e   : > { %13932 = vst [vmem:[#allocation53_spill] sm:$0xff] %v11930_v56  ;;  %v8170_v24 = vpop.eup %8169  ;;  %8189 = vpow2.f32 %v7354_v45  ;;  %v7360_v61 = vmul.f32 -1.442695, %v11926_v54  ;;  %v7361_v8 = vmul.f32 -1.442695, %v11930_v56  ;;  %v5054_v45 = vadd.f32 1.0, %v11861_v14 }
 0x71f   : > { %13933 = vst [vmem:[#allocation57_spill] sm:$0xff] %v11934_v30  ;;  %v8172_v50 = vpop.eup %8171  ;;  %8191 = vpow2.f32 %v7355_v51  ;;  %v7362_v37 = vmul.f32 -1.442695, %v11934_v30  ;;  %v5055_v51 = vadd.f32 1.0, %v11869_v47  ;;  %v5057_v14 = vadd.f32 1.0, %v11885_v3 }
 0x720   : > { %v8174_v49 = vpop.eup %8173  ;;  %8193 = vpow2.f32 %v7356_v33  ;;  %v5052_v33 = vadd.f32 1.0, %v11845_v57  ;;  %v5058_v47 = vadd.f32 1.0, %v11893_v35  ;;  %v5059_v57 = vadd.f32 1.0, %v11901_v46 }
 0x721   : > { %v8176_v34 = vpop.eup %8175  ;;  %8195 = vpow2.f32 %v7357_v1  ;;  %v5053_v1 = vadd.f32 1.0, %v11853_v41  ;;  %v5060_v41 = vadd.f32 1.0, %v8160_v25  ;;  %v5062_v3 = vadd.f32 1.0, %v8164_v40 }
 0x722   : > { %v8178_v0 = vpop.eup %8177  ;;  %8197 = vpow2.f32 %v7358_v22  ;;  %v5056_v22 = vadd.f32 1.0, %v11877_v20  ;;  %v5061_v20 = vadd.f32 1.0, %v8162_v27  ;;  %v5063_v35 = vadd.f32 1.0, %v8166_v10 }
 0x723   : > { %v8180_v48 = vpop.eup %8179  ;;  %8199 = vpow2.f32 %v7359_v60  ;;  %v5064_v46 = vadd.f32 1.0, %v8168_v18  ;;  %v5065_v25 = vadd.f32 1.0, %v8170_v24  ;;  %v5066_v11 = vadd.f32 1.0, %v8172_v50 }
 0x724   : > { %v8182_v2 = vpop.eup %8181  ;;  %8201 = vpow2.f32 %v7360_v61  ;;  %v5067_v40 = vadd.f32 1.0, %v8174_v49  ;;  %v5069_v18 = vadd.f32 1.0, %v8178_v0  ;;  %v5070_v39 = vadd.f32 1.0, %v8180_v48 }
 0x725   : > { %v8184_v55 = vpop.eup %8183  ;;  %8203 = vpow2.f32 %v7361_v8 }
 0x726   : > { %v11944_v54 = vpop.eup %8185  ;;  %8205 = vpow2.f32 %v7362_v37 }
 0x727   : > { %v8188_v56 = vpop.eup %8187  ;;  %8207 = vrcp.f32 %v5054_v45 }
 0x728   : > { %v8190_v60 = vpop.eup %8189  ;;  %8209 = vrcp.f32 %v5055_v51  ;;  %v5074_v48 = vadd.f32 1.0, %v8188_v56 }
 0x729   : > { %v11949_v61 = vpop.eup %8191  ;;  %8211 = vrcp.f32 %v5052_v33 }
 0x72a   : > { %v11952_v8 = vpop.eup %8193  ;;  %8213 = vrcp.f32 %v5053_v1 }
 0x72b   : > { %v11955_v37 = vpop.eup %8195  ;;  %8215 = vrcp.f32 %v5056_v22 }
 0x72c   : > { %v11957_v45 = vpop.eup %8197  ;;  %8217 = vrcp.f32 %v5057_v14 }
 0x72d   : > { %v11959_v51 = vpop.eup %8199  ;;  %8219 = vrcp.f32 %v5058_v47 }
 0x72e   : > { %v11961_v30 = vpop.eup %8201  ;;  %8221 = vrcp.f32 %v5059_v57  ;;  %v5068_v57 = vadd.f32 1.0, %v8176_v34 }
 0x72f   : > { %v11963_v33 = vpop.eup %8203  ;;  %8223 = vrcp.f32 %v5060_v41 }
 0x730   : > { %v11965_v1 = vpop.eup %8205  ;;  %8225 = vrcp.f32 %v5061_v20 }
 0x731   : > { %v8208_v22 = vpop.eup %8207  ;;  %8227 = vrcp.f32 %v5062_v3 }
 0x732   : > { %v8210_v27 = vpop.eup %8209  ;;  %v5150_v14 = vmul.f32 %v8208_v22, %v11765_v62  ;;  %8229 = vrcp.f32 %v5063_v35  ;;  %v5071_v62 = vadd.f32 1.0, %v8182_v2  ;;  %v5078_v22 = vadd.f32 1.0, %v11955_v37 }
 0x733   : > { %v8212_v47 = vpop.eup %8211  ;;  %v5151_v10 = vmul.f32 %v8210_v27, %v11769_v21  ;;  %8231 = vrcp.f32 %v5064_v46  ;;  %v5072_v21 = vadd.f32 1.0, %v8184_v55  ;;  %v5073_v46 = vadd.f32 1.0, %v11944_v54 }
 0x734   : > { %v8214_v28 = vpop.eup %8213  ;;  %v5148_v41 = vmul.f32 %v8212_v47, %v11759_v23  ;;  %8233 = vrcp.f32 %v5065_v25  ;;  %v5076_v25 = vadd.f32 1.0, %v11949_v61  ;;  %v5080_v27 = vadd.f32 1.0, %v11959_v51 }
 0x735   : > { %v8216_v24 = vpop.eup %8215  ;;  %v5181_v20 = vpack.c.bf16 %v5151_v10, %v5150_v14  ;;  %v5149_v50 = vmul.f32 %v8214_v28, %v11762_v59  ;;  %8235 = vrcp.f32 %v5066_v11  ;;  %v5075_v11 = vadd.f32 1.0, %v8190_v60  ;;  %v13934_v10 = vld [vmem:[#allocation22_spill] sm:$0xff] }
 0x736   : > { %v8218_v3 = vpop.eup %8217  ;;  %8237 = vrcp.f32 %v5067_v40  ;;  %v5152_v49 = vmul.f32 %v8216_v24, %v11773_v6  ;;  %v5082_v47 = vadd.f32 1.0, %v11963_v33  ;;  %vm13935_vm6 = vcmp.ne.s16.totalorder %v13934_v10, 0 }
 0x737   : > { %v8220_v35 = vpop.eup %8219  ;;  %5197 = vst.msk [vmem:[#allocation2 + $0x18] sm:$0xff] %vm449_vm1, %v5181_v20  ;;  %v5180_v34 = vpack.c.bf16 %v5149_v50, %v5148_v41  ;;  %8239 = vrcp.f32 %v5068_v57  ;;  %v5153_v23 = vmul.f32 %v8218_v3, %v11778_v63  ;;  %v5077_v63 = vadd.f32 1.0, %v11952_v8 }
 0x738   : > { %v8222_v0 = vpop.eup %8221  ;;  %8241 = vrcp.f32 %v5069_v18  ;;  %v5154_v59 = vmul.f32 %v8220_v35, %v11781_v5 }
 0x739   : > { %v8224_v28 = vpop.eup %8223  ;;  %5196 = vst.msk [vmem:[#allocation2 + $0x10] sm:$0xff] %vm449_vm1, %v5180_v34  ;;  %8243 = vrcp.f32 %v5070_v39  ;;  %v5155_v6 = vmul.f32 %v8222_v0, %v11788_v12  ;;  %v5182_v2 = vpack.c.bf16 %v5153_v23, %v5152_v49  ;;  %v5079_v12 = vadd.f32 1.0, %v11957_v45 }
 0x73a   : > { %v8226_v55 = vpop.eup %8225  ;;  %8245 = vrcp.f32 %v5071_v62  ;;  %v5156_v54 = vmul.f32 %v8224_v28, %v11793_v4  ;;  %v5081_v4 = vadd.f32 1.0, %v11961_v30  ;;  %v5083_v45 = vadd.f32 1.0, %v11965_v1 }
 0x73b   : > { %v8228_v56 = vpop.eup %8227  ;;  %8247 = vrcp.f32 %v5072_v21  ;;  %v5157_v5 = vmul.f32 %v8226_v55, %v11798_v38  ;;  %v5183_v60 = vpack.c.bf16 %v5155_v6, %v5154_v59  ;;  %5198 = vst.msk [vmem:[#allocation2 + $0x20] sm:$0xff] %vm449_vm1, %v5182_v2 }
 0x73c   : > { %v8230_v39 = vpop.eup %8229  ;;  %8249 = vrcp.f32 %v5073_v46  ;;  %v5158_v61 = vmul.f32 %v8228_v56, %v11803_v26 }
 0x73d   : > { %v8232_v8 = vpop.eup %8231  ;;  %8251 = vrcp.f32 %v5074_v48  ;;  %v5159_v37 = vmul.f32 %v8230_v39, %v11808_v15  ;;  %v5184_v14 = vpack.c.bf16 %v5157_v5, %v5156_v54  ;;  %5199 = vst.msk [vmem:[#allocation2 + $0x28] sm:$0xff] %vm449_vm1, %v5183_v60  ;;  %v13941_v48 = vld [vmem:[#allocation26_spill] sm:$0xff] }
 0x73e   : > { %v8234_v38 = vpop.eup %8233  ;;  %v11990_v40 = vld [vmem:[#allocation2 + $0x18] sm:$0xff]  ;;  %8253 = vrcp.f32 %v5075_v11  ;;  %v5160_v51 = vmul.f32 %v8232_v8, %v11813_v53  ;;  %v13936_v53 = vld [vmem:[#allocation25_spill] sm:$0xff] }
 0x73f   : > { %v8236_v26 = vpop.eup %8235  ;;  %v5301_v30 = vsel %vm13935_vm6, %v11990_v40, 0  ;;  %8255 = vrcp.f32 %v5076_v25  ;;  %v5161_v15 = vmul.f32 %v8234_v38, %v11818_v42  ;;  %v5185_v57 = vpack.c.bf16 %v5159_v37, %v5158_v61  ;;  %5200 = vst.msk [vmem:[#allocation2 + $0x30] sm:$0xff] %vm449_vm1, %v5184_v14  ;;  %v13947_v38 = vld [vmem:[#allocation27_spill] sm:$0xff] }
 0x740   : > { %v8238_v18 = vpop.eup %8237  ;;  %5741 = vrot.lane.b32.xlu0 %v5301_v30, %s8413_s23  ;;  %v12001_v33 = vld [vmem:[#allocation2 + $0x10] sm:$0xff]  ;;  %8257 = vrcp.f32 %v5077_v63  ;;  %v5162_v1 = vmul.f32 %v8236_v26, %v11824_v29  ;;  %vm13937_vm11 = vcmp.ne.s16.totalorder %v13936_v53, 0  ;;  %v5317_v24 = vsel %vm13938_vm4, %v11990_v40, 0 }
 0x741   : > { %v5268_v41 = vsel %vm13937_vm11, %v11990_v40, 0  ;;  %v8240_v42 = vpop.eup %8239  ;;  %v5267_v20 = vsel %vm13935_vm6, %v12001_v33, 0  ;;  %8259 = vrcp.f32 %v5078_v22  ;;  %v5163_v50 = vmul.f32 %v8238_v18, %v11830_v17  ;;  %5201 = vst.msk [vmem:[#allocation2 + $0x38] sm:$0xff] %vm449_vm1, %v5185_v57  ;;  %v13950_v18 = vld [vmem:[#allocation61_spill] sm:$0xff] }
 0x742   : > { %v5186_v3 = vpack.c.bf16 %v5161_v15, %v5160_v51  ;;  %v8242_v29 = vpop.eup %8241  ;;  %5598 = vrot.lane.b32.xlu1 %v5267_v20, %s8411_s19  ;;  %8261 = vrcp.f32 %v5079_v12  ;;  %v5164_v62 = vmul.f32 %v8240_v42, %v11836_v9  ;;  %vm13939_vm11 = vcmp.ne.s16.totalorder %v13923_v31, 0  ;;  %v12020_v35 = vld [vmem:[#allocation2 + $0x20] sm:$0xff]  ;;  %v13949_v51 = vld [vmem:[#allocation73_spill] sm:$0xff]  ;;  %v13952_v20 = vld [vmem:[#allocation62_spill] sm:$0xff] }
 0x743   : > { %v5300_v49 = vsel %vm13939_vm11, %v12001_v33, 0  ;;  %v5832_v21 = vrot.slane %v5317_v24, 1  ;;  %v8244_v34 = vpop.eup %8243  ;;  %8263 = vrcp.f32 %v5080_v27  ;;  %v5165_v17 = vmul.f32 %v8242_v29, %v11842_v58 }
 0x744   : > { %v5187_v23 = vpack.c.bf16 %v5163_v50, %v5162_v1  ;;  %5202 = vst.msk [vmem:[#allocation2 + $0x40] sm:$0xff] %vm449_vm1, %v5186_v3  ;;  %vm13940_vm4 = vcmp.ne.s16.totalorder %v13936_v53, 0  ;;  %v8246_v46 = vpop.eup %8245  ;;  %8265 = vrcp.f32 %v5081_v4  ;;  %v5166_v9 = vmul.f32 %v8244_v34, %v11850_v13  ;;  %5739 = vrot.lane.b32.xlu0 %v5300_v49, %s8413_s23  ;;  %v12035_v28 = vld [vmem:[#allocation2 + $0x28] sm:$0xff]  ;;  %v13955_v34 = vld [vmem:[#allocation20_spill] sm:$0xff] }
 0x745   : > { %v5302_v0 = vsel %vm13940_vm4, %v12020_v35, 0  ;;  %vm13942_vm6 = vcmp.ne.s16.totalorder %v13941_v48, 0  ;;  %vm13943_vm11 = vcmp.ne.s16.totalorder %v13902_v43, 0  ;;  %v8248_v11 = vpop.eup %8247  ;;  %8267 = vrcp.f32 %v5082_v47 }
 0x746   : > { %v5269_v59 = vsel %vm13942_vm6, %v12020_v35, 0  ;;  %v5318_v58 = vsel %vm13943_vm11, %v12020_v35, 0  ;;  %v5167_v6 = vmul.f32 %v8246_v46, %v11858_v32  ;;  %v5188_v2 = vpack.c.bf16 %v5165_v17, %v5164_v62  ;;  %5203 = vst.msk [vmem:[#allocation2 + $0x48] sm:$0xff] %vm449_vm1, %v5187_v23  ;;  %v8250_v55 = vpop.eup %8249  ;;  %5600 = vrot.lane.b32.xlu1 %v5268_v41, %s8411_s19  ;;  %v12044_v56 = vld [vmem:[#allocation2 + $0x30] sm:$0xff]  ;;  %v13953_v62 = vld [vmem:[#allocation49_spill] sm:$0xff] }
 0x747   : > { %v5833_v13 = vrot.slane %v5318_v58, 1  ;;  %8269 = vrcp.f32 %v5083_v45  ;;  %v5168_v25 = vmul.f32 %v8248_v11, %v11866_v19  ;;  %v6167_v63 = vshrl.u32 %v5832_v21, 16  ;;  %v8252_v22 = vpop.eup %8251  ;;  %v13958_v58 = vld [vmem:[#allocation54_spill] sm:$0xff] }
 0x748   : > { %vm13944_vm4 = vcmp.ne.s16.totalorder %v13905_v7, 0  ;;  %v5169_v32 = vmul.f32 %v8250_v55, %v11874_v36  ;;  %v5189_v5 = vpack.c.bf16 %v5167_v6, %v5166_v9  ;;  %5204 = vst.msk [vmem:[#allocation2 + $0x50] sm:$0xff] %vm449_vm1, %v5188_v2  ;;  %vm13945_vm6 = vcmask 1046528   ;;  %v8254_v12 = vpop.eup %8253  ;;  %5743 = vrot.lane.b32.xlu0 %v5302_v0, %s8413_s23  ;;  %v12075_v9 = vld [vmem:[#allocation2 + $0x38] sm:$0xff] }
 0x749   : > { %v5319_v54 = vsel %vm13944_vm4, %v12035_v28, 0  ;;  %v5834_v60 = vsel %vm13945_vm6, %v5832_v21, %v5833_v13  ;;  %v5170_v19 = vmul.f32 %v8252_v22, %v11882_v44  ;;  %v6169_v27 = vrot.slane %v6167_v63, 7  ;;  %v8256_v4 = vpop.eup %8255  ;;  %vm13946_vm11 = vmmov %vm13945_vm6  ;;  %v13959_v63 = vld [vmem:[#allocation65_spill] sm:$0xff] }
 0x74a   : > { %v5835_v39 = vrot.slane %v5319_v54, 1  ;;  %v6171_v61 = vshrl.u32 %v5834_v60, 16  ;;  %v6174_v8 = vshll.u32 %v5834_v60, 16  ;;  %v5171_v37 = vmul.f32 %v8254_v12, %v11890_v16  ;;  %5205 = vst.msk [vmem:[#allocation2 + $0x58] sm:$0xff] %vm449_vm1, %v5189_v5  ;;  %v8258_v45 = vpop.eup %8257  ;;  %5602 = vrot.lane.b32.xlu1 %v5269_v59, %s8411_s19  ;;  %v13960_v5 = vld [vmem:[#allocation34_spill] sm:$0xff]  ;;  %v13962_v12 = vld [vmem:[#allocation53_spill] sm:$0xff] }
 0x74b   : > { %v5190_v14 = vpack.c.bf16 %v5169_v32, %v5168_v25  ;;  %vm13948_vm4 = vcmp.ne.s16.totalorder %v13947_v38, 0  ;;  %v5172_v44 = vmul.f32 %v8256_v4, %v13949_v51  ;;  %v8260_v57 = vpop.eup %8259  ;;  %v5173_v16 = vmul.f32 %v8258_v45, %v13950_v18  ;;  %v12080_v55 = vld [vmem:[#allocation2 + $0x40] sm:$0xff]  ;;  %v13966_v45 = vld [vmem:[#allocation29_spill] sm:$0xff] }
 0x74c   : > { %v5836_v36 = vsel %vm13946_vm11, %v5833_v13, %v5835_v39  ;;  %v5320_v47 = vsel %vm13948_vm4, %v12044_v56, 0  ;;  %v6173_v26 = vrot.slane %v6171_v61, 7  ;;  %v5191_v1 = vpack.c.bf16 %v5171_v37, %v5170_v19  ;;  %v8262_v42 = vpop.eup %8261  ;;  %v13965_v37 = vld [vmem:[#allocation57_spill] sm:$0xff] }
 0x74d   : > { %v6193_v30 = vshrl.u32 %v5836_v36, 16  ;;  %v6196_v15 = vshll.u32 %v5836_v36, 16  ;;  %5206 = vst.msk [vmem:[#allocation2 + $0x60] sm:$0xff] %vm449_vm1, %v5190_v14  ;;  %v5837_v41 = vrot.slane %v5320_v47, 1  ;;  %vm13951_vm6 = vcmp.ne.s16.totalorder %v13941_v48, 0  ;;  %v8264_v21 = vpop.eup %8263 }
 0x74e   : > { %v5303_v24 = vsel %vm13951_vm6, %v12035_v28, 0  ;;  %v5174_v50 = vmul.f32 %v8260_v57, %v13952_v20  ;;  %v6176_v3 = vor.u32 %v6174_v8, %v6173_v26  ;;  %vm13954_vm11 = vcmp.ne.s16.totalorder %v13953_v62, 0  ;;  %5207 = vst.msk [vmem:[#allocation2 + $0x68] sm:$0xff] %vm449_vm1, %v5191_v1  ;;  %v8266_v59 = vpop.eup %8265  ;;  %v13963_v8 = vld [vmem:[#allocation28_spill] sm:$0xff] }
 0x74f   : > { %v6195_v29 = vrot.slane %v6193_v30, 7  ;;  %5745 = vrot.lane.b32.xlu0 %v5303_v24, %s8413_s23  ;;  %v5270_v49 = vsel %vm13954_vm11, %v12035_v28, 0  ;;  %v5175_v17 = vmul.f32 %v8262_v42, %v13955_v34  ;;  %v5192_v23 = vpack.c.bf16 %v5173_v16, %v5172_v44  ;;  %vm13957_vm6 = vmmov %vm13954_vm11  ;;  %v8268_v25 = vpop.eup %8267  ;;  %v12101_v30 = vld [vmem:[#allocation2 + $0x48] sm:$0xff] }
 0x750   : > { %vm13956_vm4 = vcmask 1046528   ;;  %v5304_v46 = vsel %vm13957_vm6, %v12044_v56, 0  ;;  %v5176_v11 = vmul.f32 %v8264_v21, %v13958_v58  ;;  %v6177_v6 = vsel %vm2383_vm7, %v6169_v27, %v6176_v3  ;;  %5604 = vrot.lane.b32.xlu1 %v5270_v49, %s8411_s19  ;;  %v13973_v3 = vld [vmem:[#allocation30_spill] sm:$0xff] }
 0x751   : > { %v5838_v0 = vsel %vm13956_vm4, %v5835_v39, %v5837_v41  ;;  %v6198_v2 = vor.u32 %v6196_v15, %v6195_v29  ;;  %v5177_v54 = vmul.f32 %v8266_v59, %v13959_v63  ;;  %v5193_v22 = vpack.c.bf16 %v5175_v17, %v5174_v50  ;;  %5208 = vst.msk [vmem:[#allocation2 + $0x70] sm:$0xff] %vm449_vm1, %v5192_v23  ;;  %v8270_v39 = vpop.eup %8269  ;;  %v12103_v15 = vld [vmem:[#allocation2 + $0x50] sm:$0xff]  ;;  %v13971_v50 = vld [vmem:[#allocation37_spill] sm:$0xff] }
 0x752   : > { %v6215_v13 = vshrl.u32 %v5838_v0, 16  ;;  %7833 = vmatprep.mubr.msk.bf16.mxu0 %vm449_vm1, %v6177_v6  ;;  %v6218_v32 = vshll.u32 %v5838_v0, 16  ;;  %vm13961_vm11 = vcmp.ne.s16.totalorder %v13960_v5, 0  ;;  %v5178_v19 = vmul.f32 %v8268_v25, %v13962_v12 }
 0x753   : > { %v5271_v60 = vsel %vm13961_vm11, %v12044_v56, 0  ;;  %v6199_v27 = vsel %vm2383_vm7, %v6173_v26, %v6198_v2  ;;  %5747 = vrot.lane.b32.xlu0 %v5304_v46, %s8413_s23  ;;  %vm13964_vm4 = vcmp.ne.s16.totalorder %v13963_v8, 0  ;;  %v5179_v14 = vmul.f32 %v8270_v39, %v13965_v37  ;;  %5209 = vst.msk [vmem:[#allocation2 + $0x78] sm:$0xff] %vm449_vm1, %v5193_v22  ;;  %v13978_v2 = vld [vmem:[#allocation38_spill] sm:$0xff] }
 0x754   : > { %v6217_v61 = vrot.slane %v6215_v13, 7  ;;  %v5321_v4 = vsel %vm13964_vm4, %v12075_v9, 0  ;;  %v5194_v36 = vpack.c.bf16 %v5177_v54, %v5176_v11  ;;  %7834 = vmatmul.mubr.msk.bf16.vlgmr.msra.gmra.mrb[76].mxu0 %vm449_vm1, %v6199_v27  ;;  %vm13967_vm6 = vcmp.ne.s16.totalorder %v13966_v45, 0  ;;  %5606 = vrot.lane.b32.xlu1 %v5271_v60, %s8411_s19  ;;  %v12128_v11 = vld [vmem:[#allocation2 + $0x58] sm:$0xff]  ;;  %v12139_v39 = vld [vmem:[#allocation2 + $0x60] sm:$0xff]  ;;  %v13984_v27 = vld [vmem:[#allocation50_spill] sm:$0xff] }
 0x755   : > { %v5839_v47 = vrot.slane %v5321_v4, 1  ;;  %v5322_v51 = vsel %vm13967_vm6, %v12080_v55, 0  ;;  %v5195_v57 = vpack.c.bf16 %v5179_v14, %v5178_v19  ;;  %vm13968_vm11 = vcmask 1046528  }
 0x756   : > { %v6220_v44 = vor.u32 %v6218_v32, %v6217_v61  ;;  %v5841_v26 = vrot.slane %v5322_v51, 1  ;;  %5210 = vst.msk [vmem:[#allocation2 + $0x80] sm:$0xff] %vm449_vm1, %v5194_v36  ;;  %vm13969_vm4 = vcmp.ne.s16.totalorder %v13960_v5, 0  ;;  %vm13970_vm6 = vmmov %vm13968_vm11  ;;  %vm13972_vm9 = vcmp.ne.s16.totalorder %v13971_v50, 0  ;;  %v14024_v5 = vld [vmem:[#allocation44_spill] sm:$0xff] }
 0x757   : > { %v5840_v18 = vsel %vm13968_vm11, %v5837_v41, %v5839_v47  ;;  %v5305_v16 = vsel %vm13969_vm4, %v12075_v9, 0  ;;  %5211 = vst.msk [vmem:[#allocation2 + $0x88] sm:$0xff] %vm449_vm1, %v5195_v57  ;;  %v5272_v41 = vsel %vm13972_vm9, %v12075_v9, 0  ;;  %vm13974_vm11 = vcmp.ne.s16.totalorder %v13973_v3, 0 }
 0x758   : > { %v6221_v1 = vsel %vm2383_vm7, %v6195_v29, %v6220_v44  ;;  %v6237_v24 = vshrl.u32 %v5840_v18, 16  ;;  %v5842_v42 = vsel %vm13970_vm6, %v5839_v47, %v5841_v26  ;;  %5749 = vrot.lane.b32.xlu0 %v5305_v16, %s8413_s23  ;;  %v5323_v49 = vsel %vm13974_vm11, %v12101_v30, 0  ;;  %v13975_v29 = vld [vmem:[#allocation48_spill] sm:$0xff]  ;;  %5608 = vrot.lane.b32.xlu1 %v5272_v41, %s8411_s19  ;;  %vm13977_vm6 = vmmov %vm13972_vm9  ;;  %v13986_v44 = vld [vmem:[#allocation51_spill] sm:$0xff] }
 0x759   : > { %7837 = vmatprep.mubr.msk.bf16.mxu0 %vm449_vm1, %v6221_v1  ;;  %v6259_v20 = vshrl.u32 %v5842_v42, 16  ;;  %vm13976_vm4 = vcmp.ne.s16.totalorder %v13975_v29, 0  ;;  %v6240_v17 = vshll.u32 %v5840_v18, 16  ;;  %v5843_v23 = vrot.slane %v5323_v49, 1  ;;  %v12166_v49 = vld [vmem:[#allocation2 + $0x68] sm:$0xff] }
 0x75a   : > { %v5324_v21 = vsel %vm13976_vm4, %v12103_v15, 0  ;;  %v6239_v34 = vrot.slane %v6237_v24, 7  ;;  %v6262_v59 = vshll.u32 %v5842_v42, 16  ;;  %v5306_v58 = vsel %vm13977_vm6, %v12080_v55, 0 }
 0x75b   : > { %v5845_v0 = vrot.slane %v5324_v21, 1  ;;  %v6261_v46 = vrot.slane %v6259_v20, 7  ;;  %vm13979_vm9 = vcmp.ne.s16.totalorder %v13978_v2, 0  ;;  %vm13980_vm11 = vcmask 1046528   ;;  %v12168_v21 = vld [vmem:[#allocation2 + $0x70] sm:$0xff] }
 0x75c   : > { %v6242_v6 = vor.u32 %v6240_v17, %v6239_v34  ;;  %5751 = vrot.lane.b32.xlu0 %v5306_v58, %s8413_s23  ;;  %v5273_v13 = vsel %vm13979_vm9, %v12080_v55, 0  ;;  %v5844_v25 = vsel %vm13980_vm11, %v5841_v26, %v5843_v23  ;;  %vm13981_vm4 = vmmov %vm13980_vm11  ;;  %v5250_v60 = vsel %vm13982_vm14, %v12001_v33, 0 }
 0x75d   : > { %v5846_v63 = vsel %vm13981_vm4, %v5843_v23, %v5845_v0  ;;  %v6264_v54 = vor.u32 %v6262_v59, %v6261_v46  ;;  %v6281_v22 = vshrl.u32 %v5844_v25, 16  ;;  %5610 = vrot.lane.b32.xlu1 %v5273_v13, %s8411_s19  ;;  %vm13983_vm6 = vmmov %vm13979_vm9  ;;  %vm13985_vm9 = vcmp.ne.s16.totalorder %v13984_v27, 0  ;;  %v7995_v13 = vld [vmem:[%s13432_s10 + $0x40] sm:$0xff]  }
 0x75e   : > { %v6303_v32 = vshrl.u32 %v5846_v63, 16  ;;  %v6243_v12 = vsel %vm2383_vm7, %v6217_v61, %v6242_v6  ;;  %v5307_v19 = vsel %vm13983_vm6, %v12101_v30, 0  ;;  %v5325_v4 = vsel %vm13985_vm9, %v12128_v11, 0  ;;  %vm13989_vm11 = vmmov %vm13981_vm4  ;;  %7575 = vmatprep.subr.bf16.mxu1 %v7995_v13 }
 0x75f   : > { %7838 = vmatmul.mubr.msk.bf16.gmra.mrb[80].mxu0 %vm449_vm1, %v6243_v12  ;;  %v6265_v37 = vsel %vm2383_vm7, %v6239_v34, %v6264_v54  ;;  %v6283_v14 = vrot.slane %v6281_v22, 7  ;;  %v5847_v47 = vrot.slane %v5325_v4, 1  ;;  %v6284_v61 = vshll.u32 %v5844_v25, 16  ;;  %vm13991_vm6 = vmmov %vm13989_vm11  ;;  %v13996_v54 = vld [vmem:[#allocation35_spill] sm:$0xff] }
 0x760   : > { %v12151_v36 = vrot.slane %v6303_v32, 7  ;;  %7841 = vmatprep.mubr.msk.bf16.mxu0 %vm449_vm1, %v6265_v37  ;;  %5753 = vrot.lane.b32.xlu0 %v5307_v19, %s8413_s23  ;;  %v5513_v51 = vrot.slane %v5250_v60, 1  ;;  %vm13987_vm14 = vcmp.ne.s16.totalorder %v13986_v44, 0  ;;  %v6306_v57 = vshll.u32 %v5846_v63, 16  ;;  %vm13994_vm9 = vmmov %vm13991_vm6  ;;  %v13998_v32 = vld [vmem:[#allocation36_spill] sm:$0xff] }
 0x761   : > { %v5326_v26 = vsel %vm13987_vm14, %v12139_v39, 0  ;;  %v5274_v16 = vsel %vm2181_vm0, %v12101_v30, 0  ;;  %v5848_v1 = vsel %vm13989_vm11, %v5845_v0, %v5847_v47  ;;  %v6286_v42 = vor.u32 %v6284_v61, %v6283_v14  ;;  %v13992_v0 = vld [vmem:[#allocation18_spill] sm:$0xff] }
 0x762   : > { %v5849_v24 = vrot.slane %v5326_v26, 1  ;;  %5612 = vrot.lane.b32.xlu1 %v5274_v16, %s8411_s19  ;;  %v6325_v20 = vshrl.u32 %v5848_v1, 16  ;;  %vm13990_vm4 = vcmp.ne.s16.totalorder %v13905_v7, 0  ;;  %v6308_v34 = vor.u32 %v6306_v57, %v12151_v36 }
 0x763   : > { %v5251_v41 = vsel %vm13990_vm4, %v11990_v40, 0  ;;  %v5308_v17 = vsel %vm2181_vm0, %v12103_v15, 0  ;;  %v13993_v59 = vrot.slane %v13992_v0, 1  ;;  %vm13995_vm14 = vcmp.ne.s16.totalorder %v13947_v38, 0 }
 0x764   : > { %v5850_v23 = vsel %vm13991_vm6, %v5847_v47, %v5849_v24  ;;  %5755 = vrot.lane.b32.xlu0 %v5308_v17, %s8413_s23  ;;  %v5515_v25 = vrot.slane %v5251_v41, 1  ;;  %v12185_v63 = vsel %vm13995_vm14, %v12020_v35, 0  ;;  %vm13997_vm11 = vcmp.ne.s16.totalorder %v13996_v54, 0  ;;  %v7996_v47 = vld [vmem:[%s13432_s10] sm:$0xff]  }
 0x765   : > { %v5514_v58 = vsel %vm13994_vm9, %v13993_v59, %v5513_v51  ;;  %v6347_v6 = vshrl.u32 %v5850_v23, 16  ;;  %v5327_v22 = vsel %vm13997_vm11, %v12166_v49, 0  ;;  %vm13999_vm4 = vcmp.ne.s16.totalorder %v13998_v32, 0  ;;  %vm14003_vm11 = vmmov %vm13994_vm9  ;;  %7576 = vmatpush3.bf16.msra.mxu1 %v7996_v47  ;;  %v14009_v47 = vld [vmem:[#allocation40_spill] sm:$0xff] }
 0x766   : > { %v5328_v60 = vsel %vm13999_vm4, %v12168_v21, 0  ;;  %v6287_v12 = vsel %vm2383_vm7, %v6261_v46, %v6286_v42  ;;  %5547 = vrot.lane.b32.xlu1 %v5514_v58, %s8413_s23  ;;  %v6327_v19 = vrot.slane %v6325_v20, 7  ;;  %v5851_v4 = vrot.slane %v5327_v22, 1  ;;  %vm14004_vm4 = vmmov %vm13994_vm9  ;;  %v14006_v22 = vld [vmem:[#allocation39_spill] sm:$0xff] }
 0x767   : > { %v5853_v37 = vrot.slane %v5328_v60, 1  ;;  %7842 = vmatmul.mubr.msk.bf16.gmra.mrb[84].mxu0 %vm449_vm1, %v6287_v12  ;;  %v6309_v61 = vsel %vm2383_vm7, %v6283_v14, %v6308_v34  ;;  %v12200_v26 = vrot.slane %v6347_v6, 7  ;;  %v5309_v46 = vsel %vm2182_vm2, %v12128_v11, 0  ;;  %v12217_v34 = vld [vmem:[#allocation2 + $0x78] sm:$0xff] }
 0x768   : > { %vm14001_vm6 = vcmp.ne.s16.totalorder %v13900_v52, 0  ;;  %7845 = vmatprep.mubr.msk.bf16.mxu0 %vm449_vm1, %v6309_v61  ;;  %v6328_v42 = vshll.u32 %v5848_v1, 16  ;;  %5757 = vrot.lane.b32.xlu0 %v5309_v46, %s8413_s23  ;;  %v5517_v20 = vrot.slane %v12185_v63, 1  ;;  %v5852_v41 = vsel %vm13994_vm9, %v5849_v24, %v5851_v4  ;;  %v12221_v1 = vld [vmem:[#allocation2 + $0x80] sm:$0xff]  ;;  %v7999_v46 = vld [vmem:[%s13432_s10 + $0x50] sm:$0xff]  }
 0x769   : > { %v5283_v16 = vsel %vm14001_vm6, %v12001_v33, 0  ;;  %vm14002_vm14 = vcmp.ne.s16.totalorder %v13902_v43, 0  ;;  %v6350_v17 = vshll.u32 %v5850_v23, 16  ;;  %v5516_v52 = vsel %vm14003_vm11, %v5513_v51, %v5515_v25  ;;  %v7997_v23 = vld [vmem:[%s13432_s10 + $0x48] sm:$0xff]   ;;  %v12250_v63 = vld [vmem:[#allocation2 + $0x90] sm:$0xff] }
 0x76a   : > { %v12215_v14 = vsel %vm14002_vm14, %v11990_v40, 0  ;;  %v6369_v0 = vshrl.u32 %v5852_v41, 16  ;;  %v5854_v59 = vsel %vm14004_vm4, %v5851_v4, %v5853_v37  ;;  %v6330_v58 = vor.u32 %v6328_v42, %v6327_v19  ;;  %5549 = vrot.lane.b32.xlu1 %v5516_v52, %s8413_s23  ;;  %v7998_v51 = vld [vmem:[%s13432_s10 + $0x8] sm:$0xff]   ;;  %vm14008_vm14 = vmmov %vm14004_vm4  ;;  %7577 = vmatprep.subr.bf16.mxu1 %v7997_v23 }
 0x76b   : > { %v5655_v24 = vrot.slane %v5283_v16, 1  ;;  %v6391_v6 = vshrl.u32 %v5854_v59, 16  ;;  %vm14005_vm6 = vcmp.ne.s16.totalorder %v13963_v8, 0  ;;  %v6352_v13 = vor.u32 %v6350_v17, %v12200_v26  ;;  %7578 = vmatpush3.bf16.msra.mxu1 %v7998_v51 }
 0x76c   : > { %v5253_v43 = vsel %vm14005_vm6, %v12035_v28, 0  ;;  %vm14007_vm9 = vcmp.ne.s16.totalorder %v14006_v22, 0  ;;  %v5518_v12 = vsel %vm14008_vm14, %v5515_v25, %v5517_v20  ;;  %vm14010_vm11 = vcmp.ne.s16.totalorder %v14009_v47, 0  ;;  %7579 = vmatprep.subr.bf16.mxu1 %v7999_v46  ;;  %vm14013_vm6 = vmmov %vm14008_vm14 }
 0x76d   : > { %v5329_v60 = vsel %vm14007_vm9, %v12217_v34, 0  ;;  %5688 = vrot.lane.b32.xlu0 %v5655_v24, %s8412_s18  ;;  %v12243_v61 = vsel %vm14010_vm11, %v12221_v1, 0  ;;  %v6371_v16 = vrot.slane %v6369_v0, 7  ;;  %v5519_v42 = vrot.slane %v5253_v43, 1  ;;  %v8000_v0 = vld [vmem:[%s13432_s10 + $0x10] sm:$0xff]   ;;  %vm14014_vm9 = vmmov %vm14013_vm6 }
 0x76e   : > { %v5855_v4 = vrot.slane %v5329_v60, 1  ;;  %v5350_v17 = vshll.u32 %v11990_v40, 16  ;;  %v5857_v52 = vrot.slane %v12243_v61, 1  ;;  %v6331_v25 = vsel %vm2383_vm7, %v12151_v36, %v6330_v58  ;;  %5551 = vrot.lane.b32.xlu1 %v5518_v12, %s8413_s23  ;;  %v12269_v12 = vld [vmem:[#allocation2 + $0x88] sm:$0xff]  ;;  %vm14015_vm14 = vmmov %vm14013_vm6 }
 0x76f   : > { %v12255_v60 = vrot.slane %v6391_v6, 7  ;;  %vm14011_vm4 = vcmp.ne.s16.totalorder %v13966_v45, 0  ;;  %7846 = vmatmul.mubr.msk.bf16.gmra.mrb[88].mxu0 %vm449_vm1, %v6331_v25  ;;  %v6353_v43 = vsel %vm2383_vm7, %v6327_v19, %v6352_v13  ;;  %v6372_v51 = vshll.u32 %v5852_v41, 16  ;;  %v14017_v41 = vld [vmem:[#allocation46_spill] sm:$0xff]  ;;  %7580 = vmatpush3.bf16.msra.mxu1 %v8000_v0 }
 0x770   : > { %v5254_v23 = vsel %vm14011_vm4, %v12044_v56, 0  ;;  %v14012_v36 = vrot.slane %v12215_v14, 1  ;;  %v5856_v6 = vsel %vm14014_vm9, %v5853_v37, %v5855_v4  ;;  %7849 = vmatprep.mubr.msk.bf16.mxu0 %vm449_vm1, %v6353_v43  ;;  %v6394_v61 = vshll.u32 %v5854_v59, 16  ;;  %v8001_v37 = vld [vmem:[%s13432_s10 + $0x58] sm:$0xff]  }
 0x771   : > { %v5858_v46 = vsel %vm14015_vm14, %v5855_v4, %v5857_v52  ;;  %vm14016_vm11 = vcmp.ne.s16.totalorder %v13905_v7, 0  ;;  %vm14018_vm4 = vcmp.ne.s16.totalorder %v14017_v41, 0  ;;  %v5520_v59 = vsel %vm14013_vm6, %v5517_v20, %v5519_v42  ;;  %7581 = vmatprep.subr.bf16.mxu1 %v8001_v37  ;;  %v8002_v20 = vld [vmem:[%s13432_s10 + $0x18] sm:$0xff]  }
 0x772   : > { %v5657_v58 = vsel %vm14013_vm6, %v5655_v24, %v14012_v36  ;;  %v5285_v19 = vsel %vm14016_vm11, %v12020_v35, 0  ;;  %v12280_v13 = vsel %vm14018_vm4, %v12250_v63, 0  ;;  %v6374_v24 = vor.u32 %v6372_v51, %v6371_v16  ;;  %5553 = vrot.lane.b32.xlu1 %v5520_v59, %s8413_s23  ;;  %v5231_v51 = vld [vmem:[#allocation2 + $0x98] sm:$0xff]  ;;  %v8003_v59 = vld [vmem:[%s13432_s10 + $0x60] sm:$0xff]   ;;  %vm14023_vm4 = vmmov %vm14013_vm6 }
 0x773   : > { %5690 = vrot.lane.b32.xlu0 %v5657_v58, %s8412_s18  ;;  %v12286_v25 = vrot.slane %v5350_v17, 1  ;;  %v5521_v43 = vrot.slane %v5254_v23, 1  ;;  %v6396_v4 = vor.u32 %v6394_v61, %v12255_v60  ;;  %v6413_v7 = vshrl.u32 %v5856_v6, 16  ;;  %v14020_v58 = vld [vmem:[#allocation45_spill] sm:$0xff]  ;;  %7582 = vmatpush3.bf16.msra.mxu1 %v8002_v20 }
 0x774   : > { %vm14019_vm9 = vcmp.ne.s16.totalorder %v13973_v3, 0  ;;  %vm14021_vm14 = vcmp.ne.s16.totalorder %v14020_v58, 0  ;;  %v6435_v17 = vshrl.u32 %v5858_v46, 16  ;;  %v5658_v23 = vrot.slane %v5285_v19, 1  ;;  %7583 = vmatprep.subr.bf16.mxu1 %v8003_v59 }
 0x775   : > { %v5255_v36 = vsel %vm14019_vm9, %v12075_v9, 0  ;;  %v5331_v18 = vsel %vm14021_vm14, %v12269_v12, 0  ;;  %vm14022_vm11 = vcmp.ne.s16.totalorder %v13947_v38, 0  ;;  %v5522_v37 = vsel %vm14023_vm4, %v5519_v42, %v5521_v43  ;;  %v8004_v42 = vld [vmem:[%s13432_s10 + $0x20] sm:$0xff]   ;;  %vm14028_vm14 = vmmov %vm14023_vm4 }
 0x776   : > { %v5859_v0 = vrot.slane %v5331_v18, 1  ;;  %v5286_v61 = vsel %vm14022_vm11, %v12035_v28, 0  ;;  %v5523_v2 = vrot.slane %v5255_v36, 1  ;;  %v5861_v50 = vrot.slane %v12280_v13, 1  ;;  %5555 = vrot.lane.b32.xlu1 %v5522_v37, %s8413_s23  ;;  %vm14029_vm11 = vmmov %vm14023_vm4 }
 0x777   : > { %5781 = vrot.lane.b32.xlu0 %v12286_v25, %s8411_s19  ;;  %vm14025_vm6 = vcmp.ne.s16.totalorder %v14024_v5, 0  ;;  %v6375_v18 = vsel %vm2383_vm7, %v12200_v26, %v6374_v24  ;;  %v6397_v62 = vsel %vm2383_vm7, %v6371_v16, %v6396_v4  ;;  %v6415_v38 = vrot.slane %v6413_v7, 7  ;;  %7584 = vmatpush3.bf16.msra.mxu1 %v8004_v42 }
 0x778   : > { %v5333_v19 = vsel %vm14025_vm6, %v5231_v51, 0  ;;  %vm14026_vm9 = vcmp.ne.s16.totalorder %v13975_v29, 0  ;;  %7850 = vmatmul.mubr.msk.bf16.gmra.mrb[92].mxu0 %vm449_vm1, %v6375_v18  ;;  %v12322_v13 = vrot.slane %v6435_v17, 7  ;;  %v14027_v26 = vrot.slane %v12215_v14, 1  ;;  %v12349_v18 = vld [vmem:[#allocation2 + $0x8] sm:$0xff] }
 0x779   : > { %v5256_v48 = vsel %vm14026_vm9, %v12080_v55, 0  ;;  %v5660_v24 = vrot.slane %v5286_v61, 1  ;;  %v5860_v4 = vsel %vm14029_vm11, %v5857_v52, %v5859_v0  ;;  %7853 = vmatprep.mubr.msk.bf16.mxu0 %vm449_vm1, %v6397_v62  ;;  %v6416_v7 = vshll.u32 %v5856_v6, 16  ;;  %vm14031_vm9 = vmmov %vm14023_vm4 }
 0x77a   : > { %v5659_v16 = vsel %vm14028_vm14, %v14027_v26, %v5658_v23  ;;  %v5862_v36 = vsel %vm14023_vm4, %v5859_v0, %v5861_v50  ;;  %vm14030_vm6 = vcmp.ne.s16.totalorder %v13963_v8, 0  ;;  %v6438_v20 = vshll.u32 %v5858_v46, 16  ;;  %vm14033_vm11 = vmmov %vm14023_vm4 }
 0x77b   : > { %5692 = vrot.lane.b32.xlu0 %v5659_v16, %s8412_s18  ;;  %v5287_v51 = vsel %vm14030_vm6, %v12044_v56, 0  ;;  %v5524_v17 = vsel %vm14031_vm9, %v5521_v43, %v5523_v2  ;;  %v5525_v14 = vrot.slane %v5256_v48, 1  ;;  %v6418_v59 = vor.u32 %v6416_v7, %v6415_v38  ;;  %vm14035_vm6 = vmmov %vm14031_vm9 }
 0x77c   : > { %5557 = vrot.lane.b32.xlu1 %v5524_v17, %s8413_s23  ;;  %v6457_v52 = vshrl.u32 %v5860_v4, 16  ;;  %vm14032_vm14 = vcmp.ne.s16.totalorder %v13984_v27, 0  ;;  %v5863_v6 = vrot.slane %v5333_v19, 1  ;;  %v6440_v0 = vor.u32 %v6438_v20, %v12322_v13  ;;  %vm14036_vm9 = vmmov %vm14035_vm6 }
 0x77d   : > { %v12339_v62 = vsel %vm14032_vm14, %v12101_v30, 0  ;;  %v5661_v8 = vsel %vm14033_vm11, %v5658_v23, %v5660_v24  ;;  %v6479_v61 = vshrl.u32 %v5862_v36, 16  ;;  %v5662_v46 = vrot.slane %v5287_v51, 1  ;;  %vm14037_vm14 = vmmov %vm14035_vm6 }
 0x77e   : > { %vm14034_vm4 = vcmp.ne.s16.totalorder %v13966_v45, 0  ;;  %v5526_v43 = vsel %vm14035_vm6, %v5523_v2, %v5525_v14  ;;  %v5527_v37 = vrot.slane %v12339_v62, 1  ;;  %v5338_v19 = vshrl.u32 %v12349_v18, 16  ;;  %v8005_v45 = vld [vmem:[%s13432_s10 + $0x68] sm:$0xff]  }
 0x77f   : > { %5694 = vrot.lane.b32.xlu0 %v5661_v8, %s8412_s18  ;;  %v5288_v48 = vsel %vm14034_vm4, %v12075_v9, 0  ;;  %v5342_v42 = vshll.u32 %v12001_v33, 16  ;;  %v6419_v23 = vsel %vm2383_vm7, %v12255_v60, %v6418_v59  ;;  %v6459_v26 = vrot.slane %v6457_v52, 7  ;;  %v8006_v2 = vld [vmem:[%s13432_s10 + $0x28] sm:$0xff]   ;;  %vm14039_vm4 = vmmov %vm14035_vm6  ;;  %7585 = vmatprep.subr.bf16.mxu1 %v8005_v45 }
 0x780   : > { %5559 = vrot.lane.b32.xlu1 %v5526_v43, %s8413_s23  ;;  %v5864_v16 = vsel %vm14036_vm9, %v5861_v50, %v5863_v6  ;;  %7854 = vmatmul.mubr.msk.bf16.gmra.mrb[96].mxu0 %vm449_vm1, %v6419_v23  ;;  %v6441_v7 = vsel %vm2383_vm7, %v6415_v38, %v6440_v0  ;;  %v6481_v51 = vrot.slane %v6479_v61, 7  ;;  %v5663_v60 = vsel %vm14037_vm14, %v5660_v24, %v5662_v46  ;;  %v14040_v6 = vld [vmem:[#allocation52_spill] sm:$0xff]  ;;  %vm14041_vm6 = vmmov %vm14039_vm4 }
 0x781   : > { %v5664_v20 = vrot.slane %v5288_v48, 1  ;;  %7857 = vmatprep.mubr.msk.bf16.mxu0 %vm449_vm1, %v6441_v7  ;;  %v6460_v17 = vshll.u32 %v5860_v4, 16  ;;  %vm14038_vm11 = vcmp.ne.s16.totalorder %v13973_v3, 0  ;;  %v6482_v59 = vshll.u32 %v5862_v36, 16  ;;  %7586 = vmatpush3.bf16.msra.mxu1 %v8006_v2  ;;  %v8007_v3 = vld [vmem:[%s13432_s10 + $0x70] sm:$0xff]  }
 0x782   : > { %v5289_v50 = vsel %vm14038_vm11, %v12080_v55, 0  ;;  %v5528_v52 = vsel %vm14039_vm4, %v5525_v14, %v5527_v37  ;;  %v5340_v38 = vor.u32 %v5338_v19, %v14040_v6  ;;  %v12375_v0 = vrot.slane %v5342_v42, 1  ;;  %v8008_v36 = vld [vmem:[%s13432_s10 + $0x30] sm:$0xff]   ;;  %v8009_v19 = vld [vmem:[%s13432_s10 + $0x78] sm:$0xff]   ;;  %7587 = vmatprep.subr.bf16.mxu1 %v8007_v3  ;;  %vm14044_vm11 = vmmov %vm14039_vm4 }
 0x783   : > { %5696 = vrot.lane.b32.xlu0 %v5663_v60, %s8412_s18  ;;  %v6462_v24 = vor.u32 %v6460_v17, %v6459_v26  ;;  %v6501_v4 = vshrl.u32 %v5864_v16, 16  ;;  %v5354_v8 = vshrl.u32 %v11990_v40, 16  ;;  %v6484_v14 = vor.u32 %v6482_v59, %v6481_v51 }
 0x784   : > { %5561 = vrot.lane.b32.xlu1 %v5528_v52, %s8413_s23  ;;  %v5665_v61 = vsel %vm14041_vm6, %v5662_v46, %v5664_v20  ;;  %v5666_v48 = vrot.slane %v5289_v50, 1  ;;  %v5358_v43 = vshll.u32 %v12020_v35, 16  ;;  %vm14042_vm9 = vcmp.ne.s16.totalorder %v13975_v29, 0  ;;  %v8010_v29 = vld [vmem:[%s13432_s10 + $0x38] sm:$0xff]  }
 0x785   : > { %v5290_v40 = vsel %vm14042_vm9, %v12101_v30, 0  ;;  %v5345_v42 = vsel %vm2045_vm12, %v5340_v38, %v12375_v0  ;;  %v5356_v23 = vor.u32 %v5354_v8, %v12286_v25  ;;  %v6463_v46 = vsel %vm2383_vm7, %v12322_v13, %v6462_v24  ;;  %7588 = vmatpush3.bf16.msra.mxu1 %v8008_v36 }
 0x786   : > { %v6503_v45 = vrot.slane %v6501_v4, 7  ;;  %v6504_v2 = vshll.u32 %v5864_v16, 16  ;;  %vm14043_vm14 = vcmp.ne.s16.totalorder %v13986_v44, 0  ;;  %v6485_v60 = vsel %vm2383_vm7, %v6459_v26, %v6484_v14  ;;  %7589 = vmatprep.subr.bf16.mxu1 %v8009_v19 }
 0x787   : > { %5698 = vrot.lane.b32.xlu0 %v5665_v61, %s8412_s18  ;;  %v12403_v7 = vsel %vm14043_vm14, %v12103_v15, 0  ;;  %v5667_v13 = vsel %vm14044_vm11, %v5664_v20, %v5666_v48  ;;  %v5360_v17 = vrot.slane %v5358_v43, 1  ;;  %v5668_v50 = vrot.slane %v5290_v40, 1  ;;  %vm14046_vm9 = vmmov %vm14043_vm14 }
 0x788   : > { %5463 = vrot.lane.b32.xlu1 %v5345_v42, %s8412_s18  ;;  %7858 = vmatmul.mubr.msk.bf16.gmra.mrb[100].mxu0 %vm449_vm1, %v6463_v46  ;;  %vm14045_vm4 = vcmp.ne.s16.totalorder %v13984_v27, 0  ;;  %v5529_v52 = vrot.slane %v12403_v7, 1  ;;  %v6506_v6 = vor.u32 %v6504_v2, %v6503_v45  ;;  %v5346_v26 = vshrl.u32 %v12001_v33, 16 }
 0x789   : > { %7861 = vmatprep.mubr.msk.bf16.mxu0 %vm449_vm1, %v6485_v60  ;;  %v5291_v16 = vsel %vm14045_vm4, %v12103_v15, 0  ;;  %v12417_v59 = vsel %vm2045_vm12, %v5356_v23, %v5360_v17  ;;  %7590 = vmatpush3.bf16.msra.mxu1 %v8010_v29  ;;  %v5669_v20 = vsel %vm14041_vm6, %v5666_v48, %v5668_v50  ;;  %v12427_v27 = vsel %vm14046_vm9, %v12128_v11, 0  ;;  %vm14049_vm4 = vmmov %vm14041_vm6 }
 0x78a   : > { %v5670_v38 = vrot.slane %v5291_v16, 1  ;;  %vm14047_vm14 = vcmp.ne.s16.totalorder %v14006_v22, 0  ;;  %v5530_v44 = vsel %vm14049_vm4, %v5527_v37, %v5529_v52  ;;  %v5348_v4 = vor.u32 %v5346_v26, %v12375_v0  ;;  %vm14050_vm6 = vmmov %vm14049_vm4 }
 0x78b   : > { %5700 = vrot.lane.b32.xlu0 %v5667_v13, %s8412_s18  ;;  %v12432_v24 = vsel %vm14047_vm14, %v12168_v21, 0  ;;  %vm14048_vm11 = vmmov %vm14047_vm14  ;;  %v6507_v8 = vsel %vm2383_vm7, %v6481_v51, %v6506_v6  ;;  %v5672_v3 = vrot.slane %v12427_v27, 1  ;;  %v5366_v36 = vshll.u32 %v12035_v28, 16 }
 0x78c   : > { %5783 = vrot.lane.b32.xlu1 %v12417_v59, %s8411_s19  ;;  %v12438_v33 = vsel %vm14048_vm11, %v12166_v49, 0  ;;  %v5678_v22 = vrot.slane %v12432_v24, 1  ;;  %v5671_v14 = vsel %vm14050_vm6, %v5668_v50, %v5670_v38  ;;  %vm14051_vm9 = vcmp.ne.s16.totalorder %v14009_v47, 0 }
 0x78d   : > { %v5535_v62 = vrot.slane %v12438_v33, 1  ;;  %v5296_v37 = vsel %vm14051_vm9, %v12217_v34, 0  ;;  %vm14052_vm14 = vmmov %vm14051_vm9  ;;  %v5275_v61 = vsel %vm2182_vm2, %v12103_v15, 0  ;;  %v5362_v48 = vshrl.u32 %v12020_v35, 16 }
 0x78e   : > { %v5262_v51 = vsel %vm14052_vm14, %v12168_v21, 0  ;;  %v5680_v43 = vrot.slane %v5296_v37, 1  ;;  %v12467_v19 = vsel %vm2045_vm12, %v5348_v4, %v12286_v25  ;;  %vm14053_vm11 = vcmp.ne.s16.totalorder %v13996_v54, 0  ;;  %vm14055_vm9 = vmmov %vm14050_vm6 }
 0x78f   : > { %5702 = vrot.lane.b32.xlu0 %v5669_v20, %s8412_s18  ;;  %v12472_v40 = vsel %vm14053_vm11, %v12139_v39, 0  ;;  %vm14054_vm4 = vmmov %vm14053_vm11  ;;  %v5537_v42 = vrot.slane %v5262_v51, 1  ;;  %v5673_v35 = vsel %vm14050_vm6, %v5670_v38, %v5672_v3  ;;  %v5364_v23 = vor.u32 %v5362_v48, %v5360_v17 }
 0x790   : > { %5563 = vrot.lane.b32.xlu1 %v5530_v44, %s8413_s23  ;;  %7862 = vmatmul.mubr.msk.bf16.gmra.mrb[104].mxu0 %vm449_vm1, %v6507_v8  ;;  %v12477_v47 = vsel %vm14054_vm4, %v12128_v11, 0  ;;  %v5368_v46 = vrot.slane %v5366_v36, 1  ;;  %v12485_v25 = vsel %vm14055_vm9, %v5678_v22, %v5680_v43  ;;  %vm14056_vm14 = vmmov %vm14050_vm6  ;;  %v5430_v54 = vshll.u32 %v12166_v49, 16 }
 0x791   : > { %v12490_v45 = vsel %vm14056_vm14, %v5535_v62, %v5537_v42  ;;  %vm14057_vm11 = vcmp.ne.s16.totalorder %v14020_v58, 0  ;;  %v5674_v60 = vrot.slane %v12472_v40, 1  ;;  %v5531_v13 = vrot.slane %v12477_v47, 1  ;;  %vm14059_vm9 = vmmov %vm14050_vm6  ;;  %v12627_v40 = vpop.permute.xlu0 %5461 }
 0x792   : > { %v5297_v2 = vsel %vm14057_vm11, %v12221_v1, 0  ;;  %vm14058_vm4 = vmmov %vm14057_vm11  ;;  %v5370_v16 = vshrl.u32 %v12035_v28, 16  ;;  %v12503_v6 = vrot.slane %v5430_v54, 1  ;;  %v5434_v26 = vshrl.u32 %v12166_v49, 16 }
 0x793   : > { %5704 = vrot.lane.b32.xlu0 %v5671_v14, %s8412_s18  ;;  %v5263_v29 = vsel %vm14058_vm4, %v12217_v34, 0  ;;  %v5682_v17 = vrot.slane %v5297_v2, 1  ;;  %v5438_v20 = vshll.u32 %v12168_v21, 16  ;;  %v12509_v58 = vsel %vm2045_vm12, %v5364_v23, %v5368_v46  ;;  %vm14063_vm4 = vmmov %vm14050_vm6 }
 0x794   : > { %5465 = vrot.lane.b32.xlu1 %v12467_v19, %s8412_s18  ;;  %v5539_v50 = vrot.slane %v5263_v29, 1  ;;  %v5374_v38 = vshll.u32 %v12044_v56, 16  ;;  %v5436_v28 = vor.u32 %v5434_v26, %v12503_v6  ;;  %v5442_v8 = vshrl.u32 %v12168_v21, 16 }
 0x795   : > { %v12513_v27 = vsel %vm14050_vm6, %v5680_v43, %v5682_v17  ;;  %v5440_v4 = vrot.slane %v5438_v20, 1  ;;  %v5446_v36 = vshll.u32 %v12217_v34, 16  ;;  %vm14060_vm14 = vcmp.ne.s16.totalorder %v14017_v41, 0  ;;  %vm14065_vm6 = vmmov %vm14063_vm4 }
 0x796   : > { %v12516_v44 = vsel %vm14059_vm9, %v5537_v42, %v5539_v50  ;;  %v12526_v14 = vsel %vm14060_vm14, %v12269_v12, 0  ;;  %vm14061_vm11 = vmmov %vm14060_vm14  ;;  %v5450_v51 = vshrl.u32 %v12217_v34, 16  ;;  %v5675_v23 = vsel %vm14063_vm4, %v5672_v3, %v5674_v60 }
 0x797   : > { %5706 = vrot.lane.b32.xlu0 %v5673_v35, %s8412_s18  ;;  %v5264_v37 = vsel %vm14061_vm11, %v12221_v1, 0  ;;  %v12534_v48 = vsel %vm2045_vm12, %v5436_v28, %v5440_v4  ;;  %v5444_v43 = vor.u32 %v5442_v8, %v5440_v4  ;;  %v5448_v42 = vrot.slane %v5446_v36, 1  ;;  %vm14066_vm9 = vmmov %vm14063_vm4 }
 0x798   : > { %5614 = vrot.lane.b32.xlu1 %v5275_v61, %s8411_s19  ;;  %v5454_v61 = vshll.u32 %v12221_v1, 16  ;;  %14062 = vst [vmem:[#allocation55_spill] sm:$0xff] %v12534_v48  ;;  %v13618_v35 = vrot.slane %v12526_v14, 1  ;;  %v5541_v41 = vrot.slane %v5264_v37, 1  ;;  %v5372_v2 = vor.u32 %v5370_v16, %v5368_v46  ;;  %vm14067_vm14 = vmmov %vm14063_vm4 }
 0x799   : > { %v12543_v29 = vsel %vm2045_vm12, %v5444_v43, %v5448_v42  ;;  %v5452_v20 = vor.u32 %v5450_v51, %v5448_v42  ;;  %v5458_v4 = vshrl.u32 %v12221_v1, 16  ;;  %v5631_v3 = vshll.u32 %v12269_v12, 16 }
 0x79a   : > { %v5456_v54 = vrot.slane %v5454_v61, 1  ;;  %14064 = vst [vmem:[#allocation63_spill] sm:$0xff] %v12543_v29  ;;  %v12548_v26 = vsel %vm14065_vm6, %v5682_v17, %v13618_v35  ;;  %v12552_v28 = vsel %vm14066_vm9, %v5539_v50, %v5541_v41  ;;  %v5532_v46 = vsel %vm14067_vm14, %v5529_v52, %v5531_v13  ;;  %vm14072_vm14 = vmmov %vm14063_vm4 }
 0x79b   : > { %5785 = vrot.lane.b32.xlu0 %v12509_v58, %s8411_s19  ;;  %v5376_v16 = vrot.slane %v5374_v38, 1  ;;  %vm14068_vm11 = vcmp.ne.s16.totalorder %v14024_v5, 0  ;;  %v12570_v36 = vrot.slane %v5631_v3, 1  ;;  %v5378_v38 = vshrl.u32 %v12044_v56, 16 }
 0x79c   : > { %5467 = vrot.lane.b32.xlu1 %v12417_v59, %s8412_s18  ;;  %v12562_v17 = vsel %vm2045_vm12, %v5452_v20, %v5456_v54  ;;  %v5265_v8 = vsel %vm14068_vm11, %v12269_v12, 0  ;;  %v12568_v50 = vor.u32 %v5458_v4, %v5456_v54  ;;  %v5382_v61 = vshll.u32 %v12075_v9, 16  ;;  %vm14073_vm11 = vmmov %vm14063_vm4 }
 0x79d   : > { %v5543_v37 = vrot.slane %v5265_v8, 1  ;;  %v12573_v51 = vsel %vm2045_vm12, %v5372_v2, %v5376_v16  ;;  %v5310_v42 = vsel %vm2183_vm8, %v12139_v39, 0  ;;  %vm14070_vm6 = vcmp.ne.s16.totalorder %v13998_v32, 0 }
 0x79e   : > { %v12580_v7 = vsel %vm2045_vm12, %v12568_v50, %v12570_v36  ;;  %v5294_v54 = vsel %vm14070_vm6, %v12166_v49, 0  ;;  %v5276_v56 = vsel %vm2183_vm8, %v12128_v11, 0  ;;  %vm14071_vm9 = vmmov %vm14070_vm6 }
 0x79f   : > { %5708 = vrot.lane.b32.xlu0 %v5675_v23, %s8412_s18  ;;  %v12583_v52 = vsel %vm14063_vm4, %v5541_v41, %v5543_v37  ;;  %v5380_v23 = vor.u32 %v5378_v38, %v5376_v16  ;;  %v5384_v41 = vrot.slane %v5382_v61, 1  ;;  %v5260_v2 = vsel %vm14071_vm9, %v12139_v39, 0  ;;  %v12616_v37 = vpop.permute.xlu1 %5545  ;;  %vm14075_vm6 = vmmov %vm14063_vm4 }
 0x7a0   : > { %5565 = vrot.lane.b32.xlu1 %v5532_v46, %s8413_s23  ;;  %v5676_v4 = vrot.slane %v5294_v54, 1  ;;  %v5533_v3 = vrot.slane %v5260_v2, 1  ;;  %v5386_v46 = vshrl.u32 %v12075_v9, 16  ;;  %v5390_v16 = vshll.u32 %v12080_v55, 16 }
 0x7a1   : > { %v12604_v20 = vsel %vm2045_vm12, %v5380_v23, %v5384_v41  ;;  %v5311_v23 = vsel %vm2184_vm10, %v12166_v49, 0 }
 0x7a2   : > { %v5677_v32 = vsel %vm14072_vm14, %v5674_v60, %v5676_v4  ;;  %v5388_v8 = vor.u32 %v5386_v46, %v5384_v41  ;;  %v5534_v38 = vsel %vm14073_vm11, %v5531_v13, %v5533_v3  ;;  %v5392_v61 = vrot.slane %v5390_v16, 1 }
 0x7a3   : > { %5787 = vrot.lane.b32.xlu0 %v12573_v51, %s8411_s19  ;;  %v5394_v60 = vshrl.u32 %v12080_v55, 16  ;;  %v12633_v47 = vpop.permute.xlu1 %5596  ;;  %v5402_v16 = vshrl.u32 %v12101_v30, 16  ;;  %vm14086_vm11 = vcmp.ne.s16.totalorder %v13923_v31, 0 }
 0x7a4   : > { %5469 = vrot.lane.b32.xlu1 %v12509_v58, %s8412_s18  ;;  %v12623_v9 = vsel %vm2045_vm12, %v5388_v8, %v5392_v61 }
 0x7a5   : > { %v5396_v54 = vor.u32 %v5394_v60, %v5392_v61 }
 0x7a7   : > { %5759 = vrot.lane.b32.xlu0 %v5310_v42, %s8413_s23  ;;  %v5398_v42 = vshll.u32 %v12101_v30, 16  ;;  %v5536_v30 = vsel %vm14075_vm6, %v5533_v3, %v5535_v62  ;;  %v5312_v3 = vsel %vm2185_vm13, %v12168_v21, 0  ;;  %vm14090_vm6 = vcmp.ne.s16.totalorder %v13934_v10, 0 }
 0x7a8   : > { %5616 = vrot.lane.b32.xlu1 %v5276_v56, %s8411_s19  ;;  %v5277_v56 = vsel %vm2184_vm10, %v12139_v39, 0  ;;  %v5635_v10 = vshrl.u32 %v12269_v12, 16 }
 0x7a9   : > { %v5400_v41 = vrot.slane %v5398_v42, 1 }
 0x7ab   : > { %5789 = vrot.lane.b32.xlu0 %v12604_v20, %s8411_s19  ;;  %v12646_v2 = vsel %vm2045_vm12, %v5396_v54, %v5400_v41  ;;  %v5404_v61 = vor.u32 %v5402_v16, %v5400_v41 }
 0x7ac   : > { %5471 = vrot.lane.b32.xlu1 %v12573_v51, %s8412_s18 }
 0x7af   : > { %5710 = vrot.lane.b32.xlu0 %v5677_v32, %s8412_s18  ;;  %v5406_v32 = vshll.u32 %v12103_v15, 16 }
 0x7b0   : > { %5567 = vrot.lane.b32.xlu1 %v5534_v38, %s8413_s23  ;;  %v5679_v38 = vsel %vm14063_vm4, %v5676_v4, %v5678_v22  ;;  %v5410_v22 = vshrl.u32 %v12103_v15, 16  ;;  %v5414_v4 = vshll.u32 %v12128_v11, 16  ;;  %v5278_v15 = vsel %vm2185_vm13, %v12166_v49, 0 }
 0x7b1   : > { %v5408_v42 = vrot.slane %v5406_v32, 1  ;;  %vm14089_vm4 = vcmp.ne.s16.totalorder %v14024_v5, 0 }
 0x7b2   : > { %v12643_v55 = vpop.permute.xlu0 %5741  ;;  %v5416_v16 = vrot.slane %v5414_v4, 1 }
 0x7b3   : > { %5791 = vrot.lane.b32.xlu0 %v12623_v9, %s8411_s19  ;;  %v12671_v54 = vsel %vm2045_vm12, %v5404_v61, %v5408_v42 }
 0x7b4   : > { %5473 = vrot.lane.b32.xlu1 %v12604_v20, %s8412_s18  ;;  %v12648_v46 = vpop.permute.xlu1 %5598  ;;  %14076 = vst [vmem:[#allocation58_spill] sm:$0xff] %v12671_v54 }
 0x7b6   : > { %v12656_v8 = vpop.permute.xlu0 %5739 }
 0x7b7   : > { %5761 = vrot.lane.b32.xlu0 %v5311_v23, %s8413_s23 }
 0x7b8   : > { %5618 = vrot.lane.b32.xlu1 %v5277_v56, %s8411_s19  ;;  %v12661_v60 = vpop.permute.xlu1 %5600  ;;  %v5412_v56 = vor.u32 %v5410_v22, %v5408_v42  ;;  %v5422_v42 = vshll.u32 %v12139_v39, 16 }
 0x7ba   : > { %v12668_v23 = vpop.permute.xlu0 %5743 }
 0x7bb   : > { %5793 = vrot.lane.b32.xlu0 %v12646_v2, %s8411_s19 }
 0x7bc   : > { %5475 = vrot.lane.b32.xlu1 %v12623_v9, %s8412_s18  ;;  %v12673_v24 = vpop.permute.xlu1 %5602 }
 0x7bf   : > { %5712 = vrot.lane.b32.xlu0 %v5679_v38, %s8412_s18  ;;  %v12696_v38 = vsel %vm2045_vm12, %v5412_v56, %v5416_v16 }
 0x7c0   : > { %5569 = vrot.lane.b32.xlu1 %v5536_v30, %s8413_s23  ;;  %v5418_v30 = vshrl.u32 %v12128_v11, 16 }
 0x7c1   : > { %v12681_v33 = vpop.permute.xlu0 %5745 }
 0x7c2   : > { %v12686_v41 = vpop.permute.xlu1 %5604  ;;  %v5420_v22 = vor.u32 %v5418_v30, %v5416_v16  ;;  %v5426_v16 = vshrl.u32 %v12139_v39, 16 }
 0x7c3   : > { %5795 = vrot.lane.b32.xlu0 %v12671_v54, %s8411_s19 }
 0x7c4   : > { %5477 = vrot.lane.b32.xlu1 %v12646_v2, %s8412_s18 }
 0x7c5   : > { %v12693_v32 = vpop.permute.xlu0 %5747 }
 0x7c6   : > { %v12698_v61 = vpop.permute.xlu1 %5606 }
 0x7c7   : > { %5763 = vrot.lane.b32.xlu0 %v5312_v3, %s8413_s23  ;;  %v5424_v3 = vrot.slane %v5422_v42, 1 }
 0x7c8   : > { %5620 = vrot.lane.b32.xlu1 %v5278_v15, %s8411_s19 }
 0x7c9   : > { %v12717_v11 = vsel %vm2045_vm12, %v5420_v22, %v5424_v3  ;;  %v5428_v42 = vor.u32 %v5426_v16, %v5424_v3  ;;  %v5279_v22 = vsel %vm2186_vm15, %v12168_v21, 0 }
 0x7ca   : > { %v12706_v49 = vpop.permute.xlu0 %5749  ;;  %v12708_v4 = vpop.permute.xlu1 %5608  ;;  %14078 = vst [vmem:[#allocation67_spill] sm:$0xff] %v12717_v11 }
 0x7cb   : > { %5797 = vrot.lane.b32.xlu0 %v12696_v38, %s8411_s19  ;;  %v12742_v62 = vsel %vm2045_vm12, %v5428_v42, %v12503_v6  ;;  %v14083_v42 = vld [vmem:[#allocation66_spill] sm:$0xff] }
 0x7cc   : > { %5479 = vrot.lane.b32.xlu1 %v12671_v54, %s8412_s18  ;;  %14082 = vst [vmem:[#allocation68_spill] sm:$0xff] %v12742_v62  ;;  %vm14084_vm9 = vcmp.ne.s16.totalorder %v14083_v42, 0 }
 0x7cd   : > { %vm14085_vm14 = vmmov %vm14084_vm9 }
 0x7ce   : > { %v12714_v56 = vpop.permute.xlu0 %5751 }
 0x7cf   : > { %5714 = vrot.lane.b32.xlu0 %v12485_v25, %s8412_s18  ;;  %v12719_v15 = vpop.permute.xlu1 %5610 }
 0x7d0   : > { %5571 = vrot.lane.b32.xlu1 %v12490_v45, %s8413_s23  ;;  %v5313_v45 = vsel %vm2186_vm15, %v12217_v34, 0 }
 0x7d2   : > { %v12726_v25 = vpop.permute.xlu0 %5753 }
 0x7d3   : > { %5799 = vrot.lane.b32.xlu0 %v12717_v11, %s8411_s19 }
 0x7d4   : > { %5481 = vrot.lane.b32.xlu1 %v12696_v38, %s8412_s18  ;;  %v12731_v35 = vpop.permute.xlu1 %5612 }
 0x7d5   : > { %14080 = vst [vmem:[#allocation64_spill] sm:$0xff] %v12731_v35  ;;  %v5233_v35 = vsel %vm14090_vm6, %v12349_v18, 0 }
 0x7d6   : > { %v12738_v39 = vpop.permute.xlu0 %5755 }
 0x7d7   : > { %5765 = vrot.lane.b32.xlu0 %v5313_v45, %s8413_s23  ;;  %14081 = vst [vmem:[#allocation69_spill] sm:$0xff] %v12738_v39  ;;  %v5299_v39 = vsel %vm14089_vm4, %v12250_v63, 0 }
 0x7d8   : > { %5622 = vrot.lane.b32.xlu1 %v5279_v22, %s8411_s19  ;;  %v5548_v13 = vpop.permute.xlu1 %5547  ;;  %v5314_v22 = vsel %vm14084_vm9, %v12221_v1, 0  ;;  %v5686_v54 = vrot.slane %v5299_v39, 1  ;;  %vm14091_vm9 = vcmask 785408  }
 0x7d9   : > { %vm14095_vm4 = vmmov %vm14091_vm9 }
 0x7da   : > { %v12748_v3 = vpop.permute.xlu0 %5757  ;;  %vm14096_vm6 = vmmov %vm14095_vm4 }
 0x7db   : > { %5801 = vrot.lane.b32.xlu0 %v12742_v62, %s8411_s19 }
 0x7dc   : > { %5483 = vrot.lane.b32.xlu1 %v12717_v11, %s8412_s18  ;;  %v12750_v16 = vpop.permute.xlu1 %5549 }
 0x7df   : > { %5716 = vrot.lane.b32.xlu0 %v12513_v27, %s8412_s18  ;;  %v5689_v21 = vpop.permute.xlu0 %5688  ;;  %v5280_v27 = vsel %vm14085_vm14, %v12217_v34, 0  ;;  %vm14092_vm14 = vmmov %vm14091_vm9 }
 0x7e0   : > { %5573 = vrot.lane.b32.xlu1 %v12516_v44, %s8413_s23  ;;  %v12756_v6 = vpop.permute.xlu1 %5551  ;;  %v5986_v5 = vsel %vm449_vm1, %v12375_v0, %v5689_v21  ;;  %v12843_v21 = vor.u32 %v5635_v10, %v12570_v36  ;;  %v14097_v10 = vld [vmem:[#allocation74_spill] sm:$0xff] }
 0x7e1   : > { %v6036_v18 = vsel %vm3196_vm3, %v5986_v5, %v12656_v8 }
 0x7e3   : > { %5803 = vrot.lane.b32.xlu0 %v12534_v48, %s8411_s19 }
 0x7e4   : > { %5485 = vrot.lane.b32.xlu1 %v12742_v62, %s8412_s18  ;;  %v12765_v30 = vpop.permute.xlu1 %5553 }
 0x7e5   : > { %v5691_v45 = vpop.permute.xlu0 %5690 }
 0x7e7   : > { %5767 = vrot.lane.b32.xlu0 %v5314_v22, %s8413_s23  ;;  %v5212_v22 = vld [vmem:[#allocation2] sm:$0xff] }
 0x7e8   : > { %5624 = vrot.lane.b32.xlu1 %v5280_v27, %s8411_s19  ;;  %v12772_v11 = vpop.permute.xlu1 %5555 }
 0x7e9   : > { %v5782_v44 = vpop.permute.xlu0 %5781 }
 0x7eb   : > { %5805 = vrot.lane.b32.xlu0 %v12543_v29, %s8411_s19 }
 0x7ec   : > { %5487 = vrot.lane.b32.xlu1 %v12534_v48, %s8412_s18  ;;  %v5232_v48 = vsel %vm14086_vm11, %v5212_v22, 0  ;;  %vm14094_vm11 = vcmask 1046528  }
 0x7ed   : > { %v12778_v62 = vpop.permute.xlu0 %5692  ;;  %v5867_v31 = vsel %vm449_vm1, %v5232_v48, %v12627_v40  ;;  %v5989_v48 = vsel %vm449_vm1, %v12467_v19, %v5691_v45 }
 0x7ee   : > { %v12780_v43 = vpop.permute.xlu1 %5557  ;;  %v6038_v45 = vsel %vm3196_vm3, %v5989_v48, %v12643_v55 }
 0x7ef   : > { %5718 = vrot.lane.b32.xlu0 %v12548_v26, %s8412_s18 }
 0x7f0   : > { %5575 = vrot.lane.b32.xlu1 %v12552_v28, %s8413_s23  ;;  %v5315_v28 = vsel %vm2188_vm5, %v12269_v12, 0 }
 0x7f1   : > { %v12786_v34 = vpop.permute.xlu0 %5694 }
 0x7f2   : > { %v12788_v27 = vpop.permute.xlu1 %5559 }
 0x7f3   : > { %5807 = vrot.lane.b32.xlu0 %v12562_v17, %s8411_s19 }
 0x7f4   : > { %5489 = vrot.lane.b32.xlu1 %v12543_v29, %s8412_s18  ;;  %v5281_v29 = vsel %vm2188_vm5, %v12221_v1, 0  ;;  %v5917_v1 = vsel %vm3196_vm3, %v5867_v31, %v12616_v37  ;;  %v6070_v37 = vsel %vm14091_vm9, %v6036_v18, %v5782_v44  ;;  %vm14098_vm9 = vcmp.ne.s16.totalorder %v14097_v10, 0 }
 0x7f5   : > { %v12794_v42 = vpop.permute.xlu0 %5696  ;;  %v5316_v18 = vsel %vm14098_vm9, %v12250_v63, 0 }
 0x7f6   : > { %v12801_v57 = vpop.permute.xlu1 %5561 }
 0x7f7   : > { %14088 = vst [vmem:[#allocation71_spill] sm:$0xff] %v12801_v57  ;;  %5769 = vrot.lane.b32.xlu0 %v5315_v28, %s8413_s23  ;;  %v5774_v28 = vshll.u32 %v12250_v63, 16 }
 0x7f8   : > { %5626 = vrot.lane.b32.xlu1 %v5281_v29, %s8411_s19 }
 0x7f9   : > { %v12813_v22 = vpop.permute.xlu0 %5698  ;;  %v5776_v39 = vrot.slane %v5774_v28, 1 }
 0x7fa   : > { %v5464_v57 = vpop.permute.xlu1 %5463 }
 0x7fb   : > { %5809 = vrot.lane.b32.xlu0 %v12580_v7, %s8411_s19  ;;  %v5870_v29 = vsel %vm449_vm1, %v5233_v35, %v5464_v57  ;;  %v14093_v57 = vrot.slane %v12526_v14, 1  ;;  %v5777_v5 = vsel %vm2045_vm12, %v12843_v21, %v5776_v39  ;;  %vm14099_vm12 = vcmp.ne.s16.totalorder %v13936_v53, 0 }
 0x7fc   : > { %v5919_v0 = vsel %vm3196_vm3, %v5870_v29, %v5548_v13  ;;  %5491 = vrot.lane.b32.xlu1 %v12562_v17, %s8412_s18  ;;  %v5951_v13 = vsel %vm14095_vm4, %v5917_v1, %v12633_v47  ;;  %v5778_v29 = vshrl.u32 %v12250_v63, 16 }
 0x7fd   : > { %v12834_v40 = vpop.permute.xlu0 %5700  ;;  %v5953_v19 = vsel %vm14092_vm14, %v5919_v0, %v12648_v46  ;;  %v5687_v35 = vsel %vm14094_vm11, %v14093_v57, %v5686_v54  ;;  %v6156_v46 = vshrl.u32 %v6070_v37, 16  ;;  %v6146_v54 = vshrl.u32 %v5951_v13, 16  ;;  %v8290_v13 = vld [vmem:[#allocation2 + $0x10] sm:$0xff]  ;;  %vm14100_vm14 = vmmov %vm14098_vm9 }
 0x7fe   : > { %v6149_v8 = vshrl.u32 %v5953_v19, 16  ;;  %v5784_v31 = vpop.permute.xlu1 %5783  ;;  %v6152_v47 = vshll.u32 %v5953_v19, 16  ;;  %v5780_v63 = vor.u32 %v5778_v29, %v5776_v39  ;;  %v5992_v39 = vsel %vm449_vm1, %v12417_v59, %v12778_v62  ;;  %vm14101_vm11 = vmmov %vm14095_vm4  ;;  %v8291_v29 = vld [vmem:[#allocation2 + $0x18] sm:$0xff] }
 0x7ff   : > { %5720 = vrot.lane.b32.xlu0 %v5687_v35, %s8412_s18  ;;  %v6072_v44 = vsel %vm14096_vm6, %v6038_v45, %v5784_v31  ;;  %v6158_v0 = vrot.slane %v6156_v46, 7  ;;  %v6148_v57 = vrot.slane %v6146_v54, 7  ;;  %vm14104_vm9 = vmmov %vm14095_vm4 }
 0x800   : > { %v12851_v28 = vrot.slane %v6149_v8, 7  ;;  %v6159_v14 = vshrl.u32 %v6072_v44, 16  ;;  %5493 = vrot.lane.b32.xlu1 %v12568_v50, %s8412_s18  ;;  %v6162_v1 = vshll.u32 %v6072_v44, 16  ;;  %v5234_v8 = vsel %vm14099_vm12, %v8290_v13, 0  ;;  %vm14105_vm12 = vmmov %vm14095_vm4 }
 0x801   : > { %v12855_v36 = vpop.permute.xlu0 %5702 }
 0x802   : > { %v6161_v55 = vrot.slane %v6159_v14, 7  ;;  %v12859_v48 = vpop.permute.xlu1 %5563  ;;  %v6154_v50 = vor.u32 %v6152_v47, %v12851_v28 }
 0x803   : > { %5811 = vrot.lane.b32.xlu0 %v5777_v5, %s8411_s19  ;;  %v6040_v5 = vsel %vm3196_vm3, %v5992_v39, %v12668_v23  ;;  %v5995_v23 = vsel %vm449_vm1, %v12509_v58, %v12786_v34 }
 0x804   : > { %v6164_v37 = vor.u32 %v6162_v1, %v6161_v55  ;;  %5577 = vrot.lane.b32.xlu1 %v12583_v52, %s8413_s23  ;;  %v5282_v52 = vsel %vm14100_vm14, %v12269_v12, 0  ;;  %v6155_v44 = vsel %vm2383_vm7, %v6148_v57, %v6154_v50 }
 0x805   : > { %v12869_v19 = vpop.permute.xlu0 %5704 }
 0x806   : > { %v5466_v35 = vpop.permute.xlu1 %5465  ;;  %v6165_v45 = vsel %vm2383_vm7, %v6158_v0, %v6164_v37 }
 0x807   : > { %5771 = vrot.lane.b32.xlu0 %v5316_v18, %s8413_s23  ;;  %v5873_v31 = vsel %vm449_vm1, %v5234_v8, %v5466_v35  ;;  %6728 = vmatprep.mubr.bf16.mxu1 %v6165_v45  ;;  %v14102_v18 = vld [vmem:[#allocation26_spill] sm:$0xff]  ;;  %s13215_s23 = scalar_lea.vmem [#allocation6], %s7217_s17  ;;  %s7404_s17 = sshll.u32 %s8503_s25, 12 }
 0x808   : > { %v5921_v46 = vsel %vm3196_vm3, %v5873_v31, %v12750_v16  ;;  %5628 = vrot.lane.b32.xlu1 %v5282_v52, %s8411_s19  ;;  %6729 = vmatmul.mubr.bf16.vlgmr.msra.gmra.mrb[36].mxu1 %v6155_v44  ;;  %vm14103_vm6 = vcmp.ne.s16.totalorder %v14102_v18, 0  ;;  %v6042_v44 = vsel %vm3196_vm3, %v5995_v23, %v12681_v33  ;;  %s7128_s27 = sshll.u32 %s13215_s23, 4  ;;  %s13372_s29 = scalar_lea.hbm %s13434_s12, %s7404_s17  ;;  %s13374_s27 = int_to_ptr.vmem [resolvable:$true] %s7128_s27 }
 0x809   : > { %v5707_v53 = vpop.permute.xlu0 %5706  ;;  %v5955_v14 = vsel %vm14101_vm11, %v5921_v46, %v12661_v60  ;;  %vm14108_vm11 = vmmov %vm14095_vm4  ;;  %s7115_s25 = scalar_lea.sflag [#allocation5], %s8586_s26  ;;  %p8342_p10 = scmp.lt.s32.totalorder %s13374_s27, %s8340_s20 }
 0x80a   : > { %v6013_v54 = vsel %vm449_vm1, %v12696_v38, %v5707_v53  ;;  %v6178_v12 = vshrl.u32 %v5955_v14, 16  ;;  %v12890_v47 = vpop.permute.xlu1 %5614  ;;  %v5235_v38 = vsel %vm14103_vm6, %v8291_v29, 0  ;;  %v6181_v0 = vshll.u32 %v5955_v14, 16  ;;  %v14106_v14 = vld [vmem:[#allocation49_spill] sm:$0xff] }
 0x80b   : > { %5813 = vrot.lane.b32.xlu0 %v5780_v63, %s8411_s19  ;;  %v12895_v16 = vsel %vm3196_vm3, %v6013_v54, %v12748_v3  ;;  %vm14107_vm14 = vcmp.ne.s16.totalorder %v14106_v14, 0  ;;  %s8341_s19 = scalar_lea.vmem %s8340_s20, 8192 }
 0x80c   : > { %v6180_v59 = vrot.slane %v6178_v12, 7 }
 0x80d   : > { %v5786_v1 = vpop.permute.xlu0 %5785 }
 0x80e   : > { %v6074_v62 = vsel %vm14095_vm4, %v6040_v5, %v5786_v1  ;;  %v5468_v50 = vpop.permute.xlu1 %5467  ;;  %v6183_v45 = vor.u32 %v6181_v0, %v6180_v59 }
 0x80f   : > { %v6185_v60 = vshrl.u32 %v6074_v62, 16  ;;  %v5876_v37 = vsel %vm449_vm1, %v5235_v38, %v5468_v50  ;;  %v6188_v35 = vshll.u32 %v6074_v62, 16 }
 0x810   : > { %v5923_v3 = vsel %vm3196_vm3, %v5876_v37, %v12756_v6  ;;  %v6184_v58 = vsel %vm2383_vm7, %v12851_v28, %v6183_v45  ;;  %v5998_v28 = vsel %vm449_vm1, %v12573_v51, %v12794_v42 }
 0x811   : > { %v6187_v57 = vrot.slane %v6185_v60, 7  ;;  %v12905_v13 = vpop.permute.xlu0 %5708  ;;  %v5957_v8 = vsel %vm14104_vm9, %v5923_v3, %v12673_v24  ;;  %v8292_v24 = vld [vmem:[#allocation2 + $0x20] sm:$0xff]  ;;  %v6044_v37 = vsel %vm3196_vm3, %v5998_v28, %v12693_v32  ;;  %vm14111_vm9 = vmmov %vm14095_vm4 }
 0x812   : > { %v6200_v31 = vshrl.u32 %v5957_v8, 16  ;;  %v12912_v52 = vpop.permute.xlu1 %5565  ;;  %v5236_v54 = vsel %vm14107_vm14, %v8292_v24, 0  ;;  %v6203_v5 = vshll.u32 %v5957_v8, 16  ;;  %v8293_v8 = vld [vmem:[#allocation2 + $0x28] sm:$0xff] }
 0x813   : > { %v6190_v63 = vor.u32 %v6188_v35, %v6187_v57 }
 0x814   : > { %v6202_v53 = vrot.slane %v6200_v31, 7 }
 0x815   : > { %v5788_v46 = vpop.permute.xlu0 %5787  ;;  %v6191_v6 = vsel %vm2383_vm7, %v6161_v55, %v6190_v63 }
 0x816   : > { %v6076_v39 = vsel %vm14105_vm12, %v6042_v44, %v5788_v46  ;;  %6736 = vmatprep.mubr.bf16.mxu1 %v6191_v6  ;;  %v5470_v12 = vpop.permute.xlu1 %5469  ;;  %v6205_v18 = vor.u32 %v6203_v5, %v6202_v53  ;;  %vm14112_vm12 = vmmov %vm14095_vm4 }
 0x817   : > { %v6207_v34 = vshrl.u32 %v6076_v39, 16  ;;  %6737 = vmatmul.mubr.bf16.gmra.mrb[40].mxu1 %v6184_v58  ;;  %v5879_v33 = vsel %vm449_vm1, %v5236_v54, %v5470_v12  ;;  %v6210_v62 = vshll.u32 %v6076_v39, 16 }
 0x818   : > { %v5925_v55 = vsel %vm3196_vm3, %v5879_v33, %v12765_v30  ;;  %v6206_v51 = vsel %vm2383_vm7, %v6180_v59, %v6205_v18  ;;  %v6001_v59 = vsel %vm449_vm1, %v12604_v20, %v12813_v22 }
 0x819   : > { %v6209_v1 = vrot.slane %v6207_v34, 7  ;;  %v12925_v60 = vpop.permute.xlu0 %5759  ;;  %v5959_v29 = vsel %vm14108_vm11, %v5925_v55, %v12686_v41  ;;  %v14109_v41 = vld [vmem:[#allocation34_spill] sm:$0xff]  ;;  %v6046_v54 = vsel %vm3196_vm3, %v6001_v59, %v12706_v49  ;;  %vm14115_vm11 = vmmov %vm14095_vm4 }
 0x81a   : > { %v6222_v50 = vshrl.u32 %v5959_v29, 16  ;;  %v12932_v0 = vpop.permute.xlu1 %5616  ;;  %vm14110_vm6 = vcmp.ne.s16.totalorder %v14109_v41, 0  ;;  %v6225_v31 = vshll.u32 %v5959_v29, 16 }
 0x81b   : > { %v6212_v38 = vor.u32 %v6210_v62, %v6209_v1  ;;  %v5237_v45 = vsel %vm14110_vm6, %v8293_v8, 0  ;;  %v8294_v62 = vld [vmem:[#allocation2 + $0x30] sm:$0xff] }
 0x81c   : > { %v6224_v3 = vrot.slane %v6222_v50, 7 }
 0x81d   : > { %v5790_v35 = vpop.permute.xlu0 %5789  ;;  %v6213_v30 = vsel %vm2383_vm7, %v6187_v57, %v6212_v38 }
 0x81e   : > { %v6078_v23 = vsel %vm14095_vm4, %v6044_v37, %v5790_v35  ;;  %6744 = vmatprep.mubr.bf16.mxu1 %v6213_v30  ;;  %v5472_v63 = vpop.permute.xlu1 %5471  ;;  %v6227_v58 = vor.u32 %v6225_v31, %v6224_v3 }
 0x81f   : > { %v6229_v42 = vshrl.u32 %v6078_v23, 16  ;;  %6745 = vmatmul.mubr.bf16.gmra.mrb[44].mxu1 %v6206_v51  ;;  %v5882_v44 = vsel %vm449_vm1, %v5237_v45, %v5472_v63  ;;  %v6232_v46 = vshll.u32 %v6078_v23, 16 }
 0x820   : > { %v5927_v57 = vsel %vm3196_vm3, %v5882_v44, %v12772_v11  ;;  %v6228_v20 = vsel %vm2383_vm7, %v6202_v53, %v6227_v58  ;;  %v6004_v53 = vsel %vm449_vm1, %v12623_v9, %v12834_v40 }
 0x821   : > { %v6231_v32 = vrot.slane %v6229_v42, 7  ;;  %v12944_v6 = vpop.permute.xlu0 %5710  ;;  %v5961_v39 = vsel %vm14111_vm9, %v5927_v57, %v12698_v61  ;;  %v14113_v61 = vld [vmem:[#allocation37_spill] sm:$0xff]  ;;  %v14116_v57 = vld [vmem:[#allocation38_spill] sm:$0xff]  ;;  %vm14118_vm9 = vmmov %vm14095_vm4 }
 0x822   : > { %v6244_v24 = vshrl.u32 %v5961_v39, 16  ;;  %v12951_v14 = vpop.permute.xlu1 %5567  ;;  %vm14114_vm14 = vcmp.ne.s16.totalorder %v14113_v61, 0  ;;  %v6247_v29 = vshll.u32 %v5961_v39, 16  ;;  %vm14117_vm6 = vcmp.ne.s16.totalorder %v14116_v57, 0 }
 0x823   : > { %v6234_v34 = vor.u32 %v6232_v46, %v6231_v32  ;;  %v5238_v55 = vsel %vm14114_vm14, %v8294_v62, 0  ;;  %v8295_v46 = vld [vmem:[#allocation2 + $0x38] sm:$0xff] }
 0x824   : > { %v6246_v5 = vrot.slane %v6244_v24, 7  ;;  %v5239_v59 = vsel %vm14117_vm6, %v8295_v46, 0 }
 0x825   : > { %v5792_v12 = vpop.permute.xlu0 %5791  ;;  %v6235_v11 = vsel %vm2383_vm7, %v6209_v1, %v6234_v34 }
 0x826   : > { %v6080_v33 = vsel %vm14112_vm12, %v6046_v54, %v5792_v12  ;;  %6752 = vmatprep.mubr.bf16.mxu1 %v6235_v11  ;;  %v5474_v28 = vpop.permute.xlu1 %5473  ;;  %v6249_v35 = vor.u32 %v6247_v29, %v6246_v5  ;;  %vm14119_vm12 = vmmov %vm14095_vm4 }
 0x827   : > { %v6251_v22 = vshrl.u32 %v6080_v33, 16  ;;  %6753 = vmatmul.mubr.bf16.gmra.mrb[48].mxu1 %v6228_v20  ;;  %v5885_v18 = vsel %vm449_vm1, %v5238_v55, %v5474_v28  ;;  %v6254_v38 = vshll.u32 %v6080_v33, 16  ;;  %v12970_v30 = vpop.f32.mrb[76].mxu0 }
 0x828   : > { %v5929_v1 = vsel %vm3196_vm3, %v5885_v18, %v12780_v43  ;;  %v12974_v8 = vpop.f32.mrb[77].mxu0  ;;  %v6048_v43 = vsel %vm3196_vm3, %v6004_v53, %v12714_v56  ;;  %v6250_v31 = vsel %vm2383_vm7, %v6224_v3, %v6249_v35  ;;  %v6007_v3 = vsel %vm449_vm1, %v12646_v2, %v12855_v36 }
 0x829   : > { %v6253_v49 = vrot.slane %v6251_v22, 7  ;;  %v12963_v50 = vpop.permute.xlu0 %5761  ;;  %v5963_v37 = vsel %vm14115_vm11, %v5929_v1, %v12708_v4  ;;  %v12976_v41 = vpop.f32.mrb[78].mxu0  ;;  %v6050_v61 = vsel %vm3196_vm3, %v6007_v3, %v12726_v25 }
 0x82a   : > { %v6266_v51 = vshrl.u32 %v5963_v37, 16  ;;  %v12972_v42 = vpop.permute.xlu1 %5618  ;;  %v12981_v63 = vpop.f32.mrb[79].mxu0  ;;  %v6269_v58 = vshll.u32 %v5963_v37, 16 }
 0x82b   : > { %v6256_v23 = vor.u32 %v6254_v38, %v6253_v49  ;;  %v8296_v38 = vld [vmem:[#allocation2 + $0x40] sm:$0xff] }
 0x82c   : > { %v6268_v40 = vrot.slane %v6266_v51, 7  ;;  %v5240_v53 = vsel %vm2181_vm0, %v8296_v38, 0  ;;  %vm14124_vm0 = vmmov %vm14095_vm4 }
 0x82d   : > { %v5794_v45 = vpop.permute.xlu0 %5793  ;;  %v6257_v9 = vsel %vm2383_vm7, %v6231_v32, %v6256_v23  ;;  %vm14126_vm14 = vmmov %vm14124_vm0 }
 0x82e   : > { %v6082_v4 = vsel %vm14095_vm4, %v6048_v43, %v5794_v45  ;;  %6760 = vmatprep.mubr.bf16.mxu1 %v6257_v9  ;;  %v5476_v39 = vpop.permute.xlu1 %5475  ;;  %v6271_v11 = vor.u32 %v6269_v58, %v6268_v40  ;;  %v14121_v43 = vld [vmem:[#allocation71_spill] sm:$0xff]  ;;  %v14122_v9 = vld [vmem:[#allocation58_spill] sm:$0xff]  ;;  %vm14128_vm11 = vmmov %vm14124_vm0 }
 0x82f   : > { %v6273_v44 = vshrl.u32 %v6082_v4, 16  ;;  %6761 = vmatmul.mubr.bf16.gmra.mrb[52].mxu1 %v6250_v31  ;;  %v5888_v56 = vsel %vm449_vm1, %v5239_v59, %v5476_v39  ;;  %v6276_v32 = vshll.u32 %v6082_v4, 16  ;;  %v6010_v4 = vsel %vm449_vm1, %v14122_v9, %v12869_v19  ;;  %v14123_v31 = vld [vmem:[#allocation64_spill] sm:$0xff]  ;;  %vm14131_vm4 = vmmov %vm14124_vm0 }
 0x830   : > { %v5931_v24 = vsel %vm3196_vm3, %v5888_v56, %v12788_v27  ;;  %vm14135_vm6 = vmmov %vm14124_vm0 }
 0x831   : > { %v6275_v34 = vrot.slane %v6273_v44, 7  ;;  %v12990_v54 = vpop.permute.xlu0 %5712  ;;  %v5965_v12 = vsel %vm14118_vm9, %v5931_v24, %v12719_v15  ;;  %v6272_v15 = vsel %vm2383_vm7, %v6246_v5, %v6271_v11  ;;  %v14125_v24 = vld [vmem:[#allocation69_spill] sm:$0xff]  ;;  %vm14139_vm9 = vmmov %vm14124_vm0 }
 0x832   : > { %v6288_v20 = vshrl.u32 %v5965_v12, 16  ;;  %v12997_v22 = vpop.permute.xlu1 %5569  ;;  %v12999_v62 = vpop.f32.mrb[80].mxu0  ;;  %v6291_v25 = vshll.u32 %v5965_v12, 16  ;;  %v6052_v3 = vsel %vm3196_vm3, %v6010_v4, %v14125_v24 }
 0x833   : > { %v6278_v33 = vor.u32 %v6276_v32, %v6275_v34  ;;  %v13004_v29 = vpop.f32.mrb[81].mxu0 }
 0x834   : > { %v6290_v28 = vrot.slane %v6288_v20, 7  ;;  %v13008_v36 = vpop.f32.mrb[82].mxu0 }
 0x835   : > { %v5796_v27 = vpop.permute.xlu0 %5795  ;;  %v6279_v55 = vsel %vm2383_vm7, %v6253_v49, %v6278_v33  ;;  %v13012_v35 = vpop.f32.mrb[83].mxu0 }
 0x836   : > { %v6084_v2 = vsel %vm14119_vm12, %v6050_v61, %v5796_v27  ;;  %6768 = vmatprep.mubr.bf16.mxu1 %v6279_v55  ;;  %v5478_v37 = vpop.permute.xlu1 %5477  ;;  %v6293_v46 = vor.u32 %v6291_v25, %v6290_v28  ;;  %v8297_v55 = vld [vmem:[#allocation2 + $0x48] sm:$0xff]  ;;  %vm14143_vm12 = vmmov %vm14124_vm0 }
 0x837   : > { %v6295_v18 = vshrl.u32 %v6084_v2, 16  ;;  %6769 = vmatmul.mubr.bf16.gmra.mrb[56].mxu1 %v6272_v15  ;;  %v5891_v49 = vsel %vm449_vm1, %v5240_v53, %v5478_v37  ;;  %v6298_v51 = vshll.u32 %v6084_v2, 16  ;;  %v5241_v15 = vsel %vm2182_vm2, %v8297_v55, 0  ;;  %vm14129_vm2 = vmmov %vm14124_vm0 }
 0x838   : > { %v5933_v45 = vsel %vm3196_vm3, %v5891_v49, %v14121_v43  ;;  %v6294_v20 = vsel %vm2383_vm7, %v6268_v40, %v6293_v46 }
 0x839   : > { %v6297_v23 = vrot.slane %v6295_v18, 7  ;;  %v13017_v5 = vpop.permute.xlu0 %5763  ;;  %v5967_v44 = vsel %vm14124_vm0, %v5933_v45, %v14123_v31 }
 0x83a   : > { %v6310_v59 = vshrl.u32 %v5967_v44, 16  ;;  %v13024_v39 = vpop.permute.xlu1 %5620  ;;  %v13026_v58 = vpop.f32.mrb[84].mxu0  ;;  %v6313_v32 = vshll.u32 %v5967_v44, 16 }
 0x83b   : > { %v6300_v57 = vor.u32 %v6298_v51, %v6297_v23  ;;  %v13031_v33 = vpop.f32.mrb[85].mxu0 }
 0x83c   : > { %v6312_v56 = vrot.slane %v6310_v59, 7  ;;  %v13035_v61 = vpop.f32.mrb[86].mxu0 }
 0x83d   : > { %v5798_v12 = vpop.permute.xlu0 %5797  ;;  %v6301_v11 = vsel %vm2383_vm7, %v6275_v34, %v6300_v57  ;;  %v13039_v1 = vpop.f32.mrb[87].mxu0 }
 0x83e   : > { %v6086_v19 = vsel %vm14126_vm14, %v6052_v3, %v5798_v12  ;;  %6776 = vmatprep.mubr.bf16.mxu1 %v6301_v11  ;;  %v5480_v18 = vpop.permute.xlu1 %5479  ;;  %v6315_v38 = vor.u32 %v6313_v32, %v6312_v56  ;;  %vm14148_vm14 = vmmov %vm14129_vm2 }
 0x83f   : > { %v6317_v27 = vshrl.u32 %v6086_v19, 16  ;;  %6777 = vmatmul.mubr.bf16.gmra.mrb[60].mxu1 %v6294_v20  ;;  %v5894_v34 = vsel %vm449_vm1, %v5241_v15, %v5480_v18  ;;  %v6320_v37 = vshll.u32 %v6086_v19, 16 }
 0x840   : > { %v5935_v25 = vsel %vm3196_vm3, %v5894_v34, %v12859_v48  ;;  %v6316_v49 = vsel %vm2383_vm7, %v6290_v28, %v6315_v38  ;;  %v14132_v34 = vld [vmem:[#allocation67_spill] sm:$0xff] }
 0x841   : > { %v6319_v53 = vrot.slane %v6317_v27, 7  ;;  %v13044_v40 = vpop.permute.xlu0 %5714  ;;  %v5969_v51 = vsel %vm14128_vm11, %v5935_v25, %v12890_v47  ;;  %v8298_v47 = vld [vmem:[#allocation2 + $0x50] sm:$0xff]  ;;  %vm14149_vm11 = vmmov %vm14129_vm2 }
 0x842   : > { %v6332_v45 = vshrl.u32 %v5969_v51, 16  ;;  %v13049_v9 = vpop.permute.xlu1 %5571  ;;  %v13051_v4 = vpop.f32.mrb[88].mxu0  ;;  %v5242_v24 = vsel %vm2183_vm8, %v8298_v47, 0  ;;  %v6335_v12 = vshll.u32 %v5969_v51, 16  ;;  %vm14133_vm8 = vmmov %vm14124_vm0 }
 0x843   : > { %v6322_v43 = vor.u32 %v6320_v37, %v6319_v53  ;;  %v13054_v57 = vpop.f32.mrb[89].mxu0  ;;  %v6016_v37 = vsel %vm449_vm1, %v14132_v34, %v12905_v13  ;;  %v8299_v13 = vld [vmem:[#allocation2 + $0x58] sm:$0xff] }
 0x844   : > { %v6334_v46 = vrot.slane %v6332_v45, 7  ;;  %v13058_v28 = vpop.f32.mrb[90].mxu0  ;;  %v6056_v25 = vsel %vm3196_vm3, %v6016_v37, %v12925_v60  ;;  %v5243_v60 = vsel %vm2184_vm10, %v8299_v13, 0  ;;  %vm14137_vm10 = vmmov %vm14124_vm0 }
 0x845   : > { %v5800_v31 = vpop.permute.xlu0 %5799  ;;  %v6323_v44 = vsel %vm2383_vm7, %v6297_v23, %v6322_v43  ;;  %v13062_v11 = vpop.f32.mrb[91].mxu0 }
 0x846   : > { %v6088_v48 = vsel %vm14129_vm2, %v12895_v16, %v5800_v31  ;;  %6784 = vmatprep.mubr.bf16.mxu1 %v6323_v44  ;;  %v5482_v3 = vpop.permute.xlu1 %5481  ;;  %v6337_v2 = vor.u32 %v6335_v12, %v6334_v46 }
 0x847   : > { %v6339_v59 = vshrl.u32 %v6088_v48, 16  ;;  %6785 = vmatmul.mubr.bf16.gmra.mrb[64].mxu1 %v6316_v49  ;;  %v5897_v23 = vsel %vm449_vm1, %v5242_v24, %v5482_v3  ;;  %v6342_v20 = vshll.u32 %v6088_v48, 16 }
 0x848   : > { %v5937_v16 = vsel %vm3196_vm3, %v5897_v23, %v12912_v52  ;;  %v6338_v31 = vsel %vm2383_vm7, %v6312_v56, %v6337_v2 }
 0x849   : > { %v6341_v19 = vrot.slane %v6339_v59, 7  ;;  %v13067_v27 = vpop.permute.xlu0 %5765  ;;  %v5971_v55 = vsel %vm14131_vm4, %v5937_v16, %v12932_v0  ;;  %vm14151_vm4 = vcmp.ne.s16.totalorder %v14097_v10, 0 }
 0x84a   : > { %v6354_v18 = vshrl.u32 %v5971_v55, 16  ;;  %v13071_v38 = vpop.permute.xlu1 %5622  ;;  %v6357_v32 = vshll.u32 %v5971_v55, 16  ;;  %v14136_v55 = vld [vmem:[#allocation68_spill] sm:$0xff] }
 0x84b   : > { %v6344_v15 = vor.u32 %v6342_v20, %v6341_v19  ;;  %v13078_v49 = vpop.f32.mrb[92].mxu0  ;;  %v6019_v34 = vsel %vm449_vm1, %v14136_v55, %v12944_v6  ;;  %v8300_v6 = vld [vmem:[#allocation2 + $0x60] sm:$0xff] }
 0x84c   : > { %v6356_v43 = vrot.slane %v6354_v18, 7  ;;  %v13081_v45 = vpop.f32.mrb[93].mxu0  ;;  %v6058_v37 = vsel %vm3196_vm3, %v6019_v34, %v12963_v50  ;;  %v5244_v50 = vsel %vm2185_vm13, %v8300_v6, 0  ;;  %vm14141_vm13 = vmmov %vm14124_vm0 }
 0x84d   : > { %v5802_v52 = vpop.permute.xlu0 %5801  ;;  %v6345_v51 = vsel %vm2383_vm7, %v6319_v53, %v6344_v15  ;;  %v13085_v44 = vpop.f32.mrb[94].mxu0 }
 0x84e   : > { %v6090_v0 = vsel %vm14133_vm8, %v6056_v25, %v5802_v52  ;;  %6792 = vmatprep.mubr.bf16.mxu1 %v6345_v51  ;;  %v5484_v47 = vpop.permute.xlu1 %5483  ;;  %v13089_v24 = vpop.f32.mrb[95].mxu0  ;;  %v6359_v16 = vor.u32 %v6357_v32, %v6356_v43  ;;  %vm14152_vm8 = vmmov %vm14129_vm2 }
 0x84f   : > { %v6361_v48 = vshrl.u32 %v6090_v0, 16  ;;  %6793 = vmatmul.mubr.bf16.gmra.mrb[68].mxu1 %v6338_v31  ;;  %v5900_v53 = vsel %vm449_vm1, %v5243_v60, %v5484_v47  ;;  %v6364_v12 = vshll.u32 %v6090_v0, 16 }
 0x850   : > { %v5939_v23 = vsel %vm3196_vm3, %v5900_v53, %v12951_v14  ;;  %v6360_v31 = vsel %vm2383_vm7, %v6334_v46, %v6359_v16 }
 0x851   : > { %v6363_v3 = vrot.slane %v6361_v48, 7  ;;  %v13094_v56 = vpop.permute.xlu0 %5716  ;;  %v5973_v20 = vsel %vm14135_vm6, %v5939_v23, %v12972_v42  ;;  %vm14153_vm6 = vmmov %vm14129_vm2 }
 0x852   : > { %v6376_v15 = vshrl.u32 %v5973_v20, 16  ;;  %v13098_v18 = vpop.permute.xlu1 %5573  ;;  %v6379_v47 = vshll.u32 %v5973_v20, 16  ;;  %v14140_v20 = vld [vmem:[#allocation55_spill] sm:$0xff] }
 0x853   : > { %v6366_v2 = vor.u32 %v6364_v12, %v6363_v3  ;;  %v13105_v25 = vpop.f32.mrb[96].mxu0 }
 0x854   : > { %v6378_v51 = vrot.slane %v6376_v15, 7  ;;  %v13108_v0 = vpop.f32.mrb[97].mxu0 }
 0x855   : > { %v5804_v14 = vpop.permute.xlu0 %5803  ;;  %v6367_v52 = vsel %vm2383_vm7, %v6341_v19, %v6366_v2  ;;  %v13112_v48 = vpop.f32.mrb[98].mxu0 }
 0x856   : > { %v6092_v42 = vsel %vm14137_vm10, %v6058_v37, %v5804_v14  ;;  %6800 = vmatprep.mubr.bf16.mxu1 %v6367_v52  ;;  %v5486_v60 = vpop.permute.xlu1 %5485  ;;  %v13116_v32 = vpop.f32.mrb[99].mxu0  ;;  %v6381_v2 = vor.u32 %v6379_v47, %v6378_v51  ;;  %v6022_v37 = vsel %vm449_vm1, %v14140_v20, %v12990_v54  ;;  %v8301_v54 = vld [vmem:[#allocation2 + $0x68] sm:$0xff] }
 0x857   : > { %v6383_v13 = vshrl.u32 %v6092_v42, 16  ;;  %6801 = vmatmul.mubr.bf16.gmra.mrb[72].mxu1 %v6360_v31  ;;  %v5903_v19 = vsel %vm449_vm1, %v5244_v50, %v5486_v60  ;;  %v6386_v12 = vshll.u32 %v6092_v42, 16  ;;  %v6060_v14 = vsel %vm3196_vm3, %v6022_v37, %v13017_v5 }
 0x858   : > { %v5941_v23 = vsel %vm3196_vm3, %v5903_v19, %v12997_v22  ;;  %v6382_v6 = vsel %vm2383_vm7, %v6356_v43, %v6381_v2  ;;  %v5245_v5 = vsel %vm2186_vm15, %v8301_v54, 0  ;;  %vm14145_vm15 = vmmov %vm14124_vm0 }
 0x859   : > { %v6385_v53 = vrot.slane %v6383_v13, 7  ;;  %v13121_v46 = vpop.permute.xlu0 %5767  ;;  %v5975_v16 = vsel %vm14139_vm9, %v5941_v23, %v13024_v39 }
 0x85a   : > { %v6398_v55 = vshrl.u32 %v5975_v16, 16  ;;  %v5625_v34 = vpop.permute.xlu1 %5624  ;;  %v6401_v19 = vshll.u32 %v5975_v16, 16 }
 0x85b   : > { %v6388_v15 = vor.u32 %v6386_v12, %v6385_v53  ;;  %v13130_v52 = vpop.f32.mrb[100].mxu0 }
 0x85c   : > { %v6400_v31 = vrot.slane %v6398_v55, 7  ;;  %v13133_v13 = vpop.f32.mrb[101].mxu0 }
 0x85d   : > { %v5806_v42 = vpop.permute.xlu0 %5805  ;;  %v6389_v22 = vsel %vm2383_vm7, %v6363_v3, %v6388_v15  ;;  %v13137_v59 = vpop.f32.mrb[102].mxu0 }
 0x85e   : > { %v6094_v39 = vsel %vm14141_vm13, %v6060_v14, %v5806_v42  ;;  %6808 = vmatprep.mubr.bf16.mxu1 %v6389_v22  ;;  %v5488_v47 = vpop.permute.xlu1 %5487  ;;  %v13141_v12 = vpop.f32.mrb[103].mxu0  ;;  %v6403_v20 = vor.u32 %v6401_v19, %v6400_v31  ;;  %v14144_v22 = vld [vmem:[#allocation63_spill] sm:$0xff] }
 0x85f   : > { %v6405_v50 = vshrl.u32 %v6094_v39, 16  ;;  %6809 = vmatmul.mubr.bf16.gmra.mrb[76].mxu1 %v6382_v6  ;;  %v5906_v3 = vsel %vm449_vm1, %v5245_v5, %v5488_v47  ;;  %v6408_v15 = vshll.u32 %v6094_v39, 16  ;;  %v6025_v16 = vsel %vm449_vm1, %v14144_v22, %v13044_v40  ;;  %v8302_v40 = vld [vmem:[#allocation2 + $0x70] sm:$0xff] }
 0x860   : > { %v5943_v55 = vsel %vm3196_vm3, %v5906_v3, %v13049_v9  ;;  %v6062_v6 = vsel %vm3196_vm3, %v6025_v16, %v13067_v27  ;;  %v6404_v5 = vsel %vm2383_vm7, %v6378_v51, %v6403_v20  ;;  %v14146_v3 = vld [vmem:[#allocation66_spill] sm:$0xff] }
 0x861   : > { %v6407_v23 = vrot.slane %v6405_v50, 7  ;;  %v5719_v43 = vpop.permute.xlu0 %5718  ;;  %v5977_v2 = vsel %vm14143_vm12, %v5943_v55, %v13071_v38  ;;  %vm14147_vm0 = vcmp.ne.s16.totalorder %v14146_v3, 0 }
 0x862   : > { %v6420_v14 = vshrl.u32 %v5977_v2, 16  ;;  %v5576_v42 = vpop.permute.xlu1 %5575  ;;  %v5246_v27 = vsel %vm14147_vm0, %v8302_v40, 0  ;;  %v6423_v55 = vshll.u32 %v5977_v2, 16  ;;  %v6028_v2 = vsel %vm449_vm1, %v12562_v17, %v13094_v56 }
 0x863   : > { %v6410_v37 = vor.u32 %v6408_v15, %v6407_v23  ;;  %v13153_v50 = vpop.f32.mrb[104].mxu0  ;;  %v6031_v26 = vsel %vm449_vm1, %v12580_v7, %v5719_v43 }
 0x864   : > { %v6422_v54 = vrot.slane %v6420_v14, 7  ;;  %v13156_v60 = vpop.f32.mrb[105].mxu0 }
 0x865   : > { %v5808_v39 = vpop.permute.xlu0 %5807  ;;  %v6411_v9 = vsel %vm2383_vm7, %v6385_v53, %v6410_v37  ;;  %v13160_v47 = vpop.f32.mrb[106].mxu0 }
 0x866   : > { %v6096_v38 = vsel %vm14145_vm15, %v6062_v6, %v5808_v39  ;;  %6816 = vmatprep.mubr.bf16.mxu1 %v6411_v9  ;;  %v5490_v15 = vpop.permute.xlu1 %5489  ;;  %v13164_v22 = vpop.f32.mrb[107].mxu0  ;;  %v6425_v6 = vor.u32 %v6423_v55, %v6422_v54  ;;  %v8303_v55 = vld [vmem:[#allocation2 + $0x78] sm:$0xff] }
 0x867   : > { %v6427_v19 = vshrl.u32 %v6096_v38, 16  ;;  %6817 = vmatmul.mubr.bf16.gmra.mrb[80].mxu1 %v6404_v5  ;;  %v5909_v53 = vsel %vm449_vm1, %v5246_v27, %v5490_v15  ;;  %v6430_v14 = vshll.u32 %v6096_v38, 16  ;;  %v6064_v5 = vsel %vm3196_vm3, %v6028_v2, %v13121_v46 }
 0x868   : > { %v5945_v16 = vsel %vm3196_vm3, %v5909_v53, %v13098_v18  ;;  %v5247_v53 = vsel %vm2188_vm5, %v8303_v55, 0  ;;  %vm14150_vm5 = vmmov %vm14129_vm2 }
 0x869   : > { %v6429_v37 = vrot.slane %v6427_v19, 7  ;;  %v5770_v51 = vpop.permute.xlu0 %5769  ;;  %v5979_v20 = vsel %vm14148_vm14, %v5945_v16, %v5625_v34  ;;  %v6426_v34 = vsel %vm2383_vm7, %v6400_v31, %v6425_v6 }
 0x86a   : > { %v6442_v9 = vshrl.u32 %v5979_v20, 16  ;;  %v5627_v3 = vpop.permute.xlu1 %5626  ;;  %v6445_v19 = vshll.u32 %v5979_v20, 16 }
 0x86b   : > { %v6432_v39 = vor.u32 %v6430_v14, %v6429_v37 }
 0x86c   : > { %v6444_v40 = vrot.slane %v6442_v9, 7 }
 0x86d   : > { %v5810_v38 = vpop.permute.xlu0 %5809  ;;  %v6433_v27 = vsel %vm2383_vm7, %v6407_v23, %v6432_v39 }
 0x86e   : > { %v6098_v18 = vsel %vm14149_vm11, %v6064_v5, %v5810_v38  ;;  %6824 = vmatprep.mubr.bf16.mxu1 %v6433_v27  ;;  %v5492_v14 = vpop.permute.xlu1 %5491  ;;  %v6447_v17 = vor.u32 %v6445_v19, %v6444_v40  ;;  %v6066_v5 = vsel %vm3196_vm3, %v6031_v26, %v5770_v51 }
 0x86f   : > { %v6449_v15 = vshrl.u32 %v6098_v18, 16  ;;  %6825 = vmatmul.mubr.bf16.gmra.mrb[84].mxu1 %v6426_v34  ;;  %v5912_v56 = vsel %vm449_vm1, %v5247_v53, %v5492_v14  ;;  %v6452_v16 = vshll.u32 %v6098_v18, 16 }
 0x870   : > { %v5947_v20 = vsel %vm3196_vm3, %v5912_v56, %v5576_v42  ;;  %v6448_v39 = vsel %vm2383_vm7, %v6422_v54, %v6447_v17 }
 0x871   : > { %v6451_v46 = vrot.slane %v6449_v15, 7  ;;  %v5721_v23 = vpop.permute.xlu0 %5720  ;;  %v5981_v9 = vsel %vm14129_vm2, %v5947_v20, %v5627_v3  ;;  %v8304_v15 = vld [vmem:[#allocation2 + $0x80] sm:$0xff] }
 0x872   : > { %v6464_v6 = vshrl.u32 %v5981_v9, 16  ;;  %v5494_v2 = vpop.permute.xlu1 %5493  ;;  %v6467_v38 = vshll.u32 %v5981_v9, 16  ;;  %v5248_v55 = vsel %vm14151_vm4, %v8304_v15, 0 }
 0x873   : > { %v6454_v31 = vor.u32 %v6452_v16, %v6451_v46  ;;  %v5915_v14 = vsel %vm449_vm1, %v5248_v55, %v5494_v2  ;;  %v6034_v16 = vsel %vm449_vm1, %v12843_v21, %v5721_v23 }
 0x874   : > { %v6466_v19 = vrot.slane %v6464_v6, 7 }
 0x875   : > { %v5812_v27 = vpop.permute.xlu0 %5811  ;;  %v6455_v18 = vsel %vm2383_vm7, %v6429_v37, %v6454_v31 }
 0x876   : > { %v6100_v42 = vsel %vm14150_vm5, %v6066_v5, %v5812_v27  ;;  %6832 = vmatprep.mubr.bf16.mxu1 %v6455_v18  ;;  %v5578_v54 = vpop.permute.xlu1 %5577  ;;  %v6469_v3 = vor.u32 %v6467_v38, %v6466_v19 }
 0x877   : > { %v6471_v34 = vshrl.u32 %v6100_v42, 16  ;;  %6833 = vmatmul.mubr.bf16.gmra.mrb[88].mxu1 %v6448_v39  ;;  %v6474_v7 = vshll.u32 %v6100_v42, 16  ;;  %v5949_v37 = vsel %vm3196_vm3, %v5915_v14, %v5578_v54  ;;  %v13205_v42 = vld [vmem:[%s13433_s11] ss:$0 sm:$0xff] }
 0x878   : > { %v6470_v51 = vsel %vm2383_vm7, %v6444_v40, %v6469_v3 }
 0x879   : > { %v6473_v53 = vrot.slane %v6471_v34, 7  ;;  %v5772_v43 = vpop.permute.xlu0 %5771 }
 0x87a   : > { %v5629_v56 = vpop.permute.xlu1 %5628  ;;  %v6068_v39 = vsel %vm3196_vm3, %v6034_v16, %v5772_v43  ;;  %v7018_v43 = vld [vmem:[%s8592_s13] sm:$0xff] }
 0x87b   : > { %v6476_v17 = vor.u32 %v6474_v7, %v6473_v53  ;;  %v5983_v20 = vsel %vm14152_vm8, %v5949_v37, %v5629_v56 }
 0x87c   : > { %v6486_v10 = vshrl.u32 %v5983_v20, 16  ;;  %v6489_v2 = vshll.u32 %v5983_v20, 16 }
 0x87d   : > { %v5814_v9 = vpop.permute.xlu0 %5813  ;;  %v6477_v31 = vsel %vm2383_vm7, %v6451_v46, %v6476_v17 }
 0x87e   : > { %v6102_v6 = vsel %vm14153_vm6, %v6068_v39, %v5814_v9  ;;  %6840 = vmatprep.mubr.bf16.mxu1 %v6477_v31  ;;  %v6488_v40 = vrot.slane %v6486_v10, 7  ;;  %v7020_v9 = vld [vmem:[%s8592_s13 + $0x10] sm:$0xff] }
 0x87f   : > { %v6493_v26 = vshrl.u32 %v6102_v6, 16  ;;  %6841 = vmatmul.mubr.bf16.gmra.mrb[92].mxu1 %v6470_v51  ;;  %v6496_v27 = vshll.u32 %v6102_v6, 16  ;;  %v7019_v51 = vld [vmem:[%s8592_s13 + $0x8] sm:$0xff] }
 0x880   : > { %v6491_v5 = vor.u32 %v6489_v2, %v6488_v40  ;;  %v7021_v40 = vld [vmem:[%s8592_s13 + $0x18] sm:$0xff] }
 0x881   : > { %v6495_v38 = vrot.slane %v6493_v26, 7 }
 0x882   : > { %v6492_v23 = vsel %vm2383_vm7, %v6466_v19, %v6491_v5 }
 0x883   : > { %v6498_v21 = vor.u32 %v6496_v27, %v6495_v38 }
 0x885   : > { %v6499_v18 = vsel %vm2383_vm7, %v6473_v53, %v6498_v21 }
 0x886   : > { %6848 = vmatprep.mubr.bf16.mxu1 %v6499_v18 }
 0x887   : > { %6849 = vmatmul.mubr.bf16.gmra.mrb[96].mxu1 %v6492_v23 }
 0x8db   : > { %v7591_v46 = vpop.f32.mrb[36].mxu1 }
 0x8dc   : > { %v7592_v34 = vpop.f32.mrb[37].mxu1 }
 0x8dd   : > { %v7593_v54 = vadd.f32 %v7592_v34, %v7591_v46  ;;  %v7594_v3 = vpop.f32.mrb[38].mxu1  ;;  %v7022_v34 = vld [vmem:[%s8592_s13 + $0x20] sm:$0xff] }
 0x8de   : > { %v7595_v15 = vpop.f32.mrb[39].mxu1 }
 0x8df   : > { %v6731_v55 = vadd.f32 %v7593_v54, %v13205_v42  ;;  %v7596_v7 = vadd.f32 %v7595_v15, %v7594_v3  ;;  %v7023_v3 = vld [vmem:[%s8592_s13 + $0x28] sm:$0xff] }
 0x8e1   : > { %v6892_v19 = vadd.f32 %v12974_v8, %v6731_v55  ;;  %v6734_v53 = vadd.f32 %v7596_v7, %v13205_v42 }
 0x8e3   : > { %v7050_v14 = vadd.f32 %v7018_v43, %v6892_v19  ;;  %v6895_v17 = vadd.f32 %v12981_v63, %v6734_v53 }
 0x8e5   : > { %7082 = vst.msk [vmem:[%s13215_s23] sm:$0xff] %vm449_vm1, %v7050_v14  ;;  %v7051_v37 = vadd.f32 %v7019_v51, %v6895_v17 }
 0x8e7   : > { %7083 = vst.msk [vmem:[%s13215_s23 + $0x8] sm:$0xff] %vm449_vm1, %v7051_v37  ;;  %v7024_v37 = vld [vmem:[%s8592_s13 + $0x30] sm:$0xff] }
 0x8ea   : > { %v7597_v8 = vpop.f32.mrb[40].mxu1 }
 0x8eb   : > { %v7598_v56 = vpop.f32.mrb[41].mxu1 }
 0x8ec   : > { %v7599_v16 = vadd.f32 %v7598_v56, %v7597_v8  ;;  %v7600_v20 = vpop.f32.mrb[42].mxu1  ;;  %v7025_v56 = vld [vmem:[%s8592_s13 + $0x38] sm:$0xff] }
 0x8ed   : > { %v7601_v39 = vpop.f32.mrb[43].mxu1 }
 0x8ee   : > { %v6739_v10 = vadd.f32 %v7599_v16, %v13205_v42  ;;  %v7602_v63 = vadd.f32 %v7601_v39, %v7600_v20 }
 0x8f0   : > { %v6900_v31 = vadd.f32 %v12970_v30, %v6739_v10  ;;  %v6742_v6 = vadd.f32 %v7602_v63, %v13205_v42 }
 0x8f2   : > { %v7052_v2 = vadd.f32 %v7020_v9, %v6900_v31  ;;  %v6903_v26 = vadd.f32 %v12976_v41, %v6742_v6  ;;  %v7603_v5 = vpop.f32.mrb[44].mxu1 }
 0x8f3   : > { %v7604_v38 = vpop.f32.mrb[45].mxu1 }
 0x8f4   : > { %7084 = vst.msk [vmem:[%s13215_s23 + $0x10] sm:$0xff] %vm449_vm1, %v7052_v2  ;;  %v7053_v27 = vadd.f32 %v7021_v40, %v6903_v26  ;;  %v7605_v21 = vadd.f32 %v7604_v38, %v7603_v5  ;;  %v7606_v23 = vpop.f32.mrb[46].mxu1  ;;  %v7026_v2 = vld [vmem:[%s8592_s13 + $0x40] sm:$0xff]  ;;  %v7027_v5 = vld [vmem:[%s8592_s13 + $0x48] sm:$0xff] }
 0x8f5   : > { %v7607_v18 = vpop.f32.mrb[47].mxu1 }
 0x8f6   : > { %7085 = vst.msk [vmem:[%s13215_s23 + $0x18] sm:$0xff] %vm449_vm1, %v7053_v27  ;;  %v6747_v30 = vadd.f32 %v7605_v21, %v13205_v42  ;;  %v7608_v46 = vadd.f32 %v7607_v18, %v7606_v23 }
 0x8f8   : > { %v6908_v54 = vadd.f32 %v13004_v29, %v6747_v30  ;;  %v6750_v41 = vadd.f32 %v7608_v46, %v13205_v42 }
 0x8fa   : > { %v7054_v15 = vadd.f32 %v7022_v34, %v6908_v54  ;;  %v6911_v55 = vadd.f32 %v13012_v35, %v6750_v41  ;;  %v7609_v7 = vpop.f32.mrb[48].mxu1  ;;  %v7028_v41 = vld [vmem:[%s8592_s13 + $0x50] sm:$0xff] }
 0x8fb   : > { %v7610_v43 = vpop.f32.mrb[49].mxu1 }
 0x8fc   : > { %7086 = vst.msk [vmem:[%s13215_s23 + $0x20] sm:$0xff] %vm449_vm1, %v7054_v15  ;;  %v7055_v19 = vadd.f32 %v7023_v3, %v6911_v55  ;;  %v7611_v53 = vadd.f32 %v7610_v43, %v7609_v7  ;;  %v7612_v51 = vpop.f32.mrb[50].mxu1  ;;  %v7029_v15 = vld [vmem:[%s8592_s13 + $0x58] sm:$0xff] }
 0x8fd   : > { %v7613_v14 = vpop.f32.mrb[51].mxu1 }
 0x8fe   : > { %7087 = vst.msk [vmem:[%s13215_s23 + $0x28] sm:$0xff] %vm449_vm1, %v7055_v19  ;;  %v6755_v29 = vadd.f32 %v7611_v53, %v13205_v42  ;;  %v7614_v17 = vadd.f32 %v7613_v14, %v7612_v51 }
 0x900   : > { %v6916_v8 = vadd.f32 %v12999_v62, %v6755_v29  ;;  %v6758_v35 = vadd.f32 %v7614_v17, %v13205_v42 }
 0x902   : > { %v7056_v16 = vadd.f32 %v7024_v37, %v6916_v8  ;;  %v6919_v20 = vadd.f32 %v13008_v36, %v6758_v35  ;;  %v7615_v39 = vpop.f32.mrb[52].mxu1  ;;  %v7030_v37 = vld [vmem:[%s8592_s13 + $0x60] sm:$0xff]  ;;  %v7031_v35 = vld [vmem:[%s8592_s13 + $0x68] sm:$0xff] }
 0x903   : > { %v7616_v10 = vpop.f32.mrb[53].mxu1 }
 0x904   : > { %7088 = vst.msk [vmem:[%s13215_s23 + $0x30] sm:$0xff] %vm449_vm1, %v7056_v16  ;;  %v7057_v63 = vadd.f32 %v7025_v56, %v6919_v20  ;;  %v7617_v9 = vadd.f32 %v7616_v10, %v7615_v39  ;;  %v7618_v31 = vpop.f32.mrb[54].mxu1 }
 0x905   : > { %v7619_v6 = vpop.f32.mrb[55].mxu1 }
 0x906   : > { %7089 = vst.msk [vmem:[%s13215_s23 + $0x38] sm:$0xff] %vm449_vm1, %v7057_v63  ;;  %v6763_v62 = vadd.f32 %v7617_v9, %v13205_v42  ;;  %v7620_v40 = vadd.f32 %v7619_v6, %v7618_v31 }
 0x908   : > { %v6924_v26 = vadd.f32 %v13031_v33, %v6763_v62  ;;  %v6766_v36 = vadd.f32 %v7620_v40, %v13205_v42  ;;  %v7032_v62 = vld [vmem:[%s8592_s13 + $0x70] sm:$0xff] }
 0x90a   : > { %v7058_v38 = vadd.f32 %v7026_v2, %v6924_v26  ;;  %v6927_v27 = vadd.f32 %v13039_v1, %v6766_v36  ;;  %v7621_v21 = vpop.f32.mrb[56].mxu1  ;;  %v7033_v2 = vld [vmem:[%s8592_s13 + $0x78] sm:$0xff] }
 0x90b   : > { %v7622_v23 = vpop.f32.mrb[57].mxu1 }
 0x90c   : > { %7090 = vst.msk [vmem:[%s13215_s23 + $0x40] sm:$0xff] %vm449_vm1, %v7058_v38  ;;  %v7059_v18 = vadd.f32 %v7027_v5, %v6927_v27  ;;  %v7623_v30 = vadd.f32 %v7622_v23, %v7621_v21  ;;  %v7624_v46 = vpop.f32.mrb[58].mxu1 }
 0x90d   : > { %v7625_v34 = vpop.f32.mrb[59].mxu1 }
 0x90e   : > { %7091 = vst.msk [vmem:[%s13215_s23 + $0x48] sm:$0xff] %vm449_vm1, %v7059_v18  ;;  %v6771_v33 = vadd.f32 %v7623_v30, %v13205_v42  ;;  %v7626_v54 = vadd.f32 %v7625_v34, %v7624_v46  ;;  %v7034_v46 = vld [vmem:[%s8592_s13 + $0x80] sm:$0xff] }
 0x910   : > { %v6932_v3 = vadd.f32 %v13026_v58, %v6771_v33  ;;  %v6774_v1 = vadd.f32 %v7626_v54, %v13205_v42  ;;  %v7035_v33 = vld [vmem:[%s8592_s13 + $0x88] sm:$0xff] }
 0x912   : > { %v7060_v55 = vadd.f32 %v7028_v41, %v6932_v3  ;;  %v6935_v7 = vadd.f32 %v13035_v61, %v6774_v1  ;;  %v7627_v43 = vpop.f32.mrb[60].mxu1 }
 0x913   : > { %v7628_v19 = vpop.f32.mrb[61].mxu1 }
 0x914   : > { %7092 = vst.msk [vmem:[%s13215_s23 + $0x50] sm:$0xff] %vm449_vm1, %v7060_v55  ;;  %v7061_v53 = vadd.f32 %v7029_v15, %v6935_v7  ;;  %v7629_v51 = vadd.f32 %v7628_v19, %v7627_v43  ;;  %v7630_v14 = vpop.f32.mrb[62].mxu1 }
 0x915   : > { %v7631_v29 = vpop.f32.mrb[63].mxu1 }
 0x916   : > { %7093 = vst.msk [vmem:[%s13215_s23 + $0x58] sm:$0xff] %vm449_vm1, %v7061_v53  ;;  %v6779_v58 = vadd.f32 %v7629_v51, %v13205_v42  ;;  %v7632_v17 = vadd.f32 %v7631_v29, %v7630_v14  ;;  %v7036_v53 = vld [vmem:[%s8592_s13 + $0x90] sm:$0xff]  ;;  %v7037_v14 = vld [vmem:[%s8592_s13 + $0x98] sm:$0xff] }
 0x918   : > { %v6940_v8 = vadd.f32 %v13054_v57, %v6779_v58  ;;  %v6782_v61 = vadd.f32 %v7632_v17, %v13205_v42 }
 0x91a   : > { %v7062_v56 = vadd.f32 %v7030_v37, %v6940_v8  ;;  %v6943_v16 = vadd.f32 %v13062_v11, %v6782_v61  ;;  %v7633_v20 = vpop.f32.mrb[64].mxu1 }
 0x91b   : > { %v7634_v39 = vpop.f32.mrb[65].mxu1 }
 0x91c   : > { %7094 = vst.msk [vmem:[%s13215_s23 + $0x60] sm:$0xff] %vm449_vm1, %v7062_v56  ;;  %v7063_v10 = vadd.f32 %v7031_v35, %v6943_v16  ;;  %v7635_v63 = vadd.f32 %v7634_v39, %v7633_v20  ;;  %v7636_v9 = vpop.f32.mrb[66].mxu1  ;;  %v7038_v20 = vld [vmem:[%s8592_s13 + $0xa0] sm:$0xff] }
 0x91d   : > { %v7637_v31 = vpop.f32.mrb[67].mxu1 }
 0x91e   : > { %7095 = vst.msk [vmem:[%s13215_s23 + $0x68] sm:$0xff] %vm449_vm1, %v7063_v10  ;;  %v6787_v57 = vadd.f32 %v7635_v63, %v13205_v42  ;;  %v7638_v6 = vadd.f32 %v7637_v31, %v7636_v9  ;;  %v7039_v10 = vld [vmem:[%s8592_s13 + $0xa8] sm:$0xff] }
 0x920   : > { %v6948_v40 = vadd.f32 %v13051_v4, %v6787_v57  ;;  %v6790_v11 = vadd.f32 %v7638_v6, %v13205_v42 }
 0x922   : > { %v7064_v26 = vadd.f32 %v7032_v62, %v6948_v40  ;;  %v6951_v36 = vadd.f32 %v13058_v28, %v6790_v11  ;;  %v7639_v5 = vpop.f32.mrb[68].mxu1 }
 0x923   : > { %v7640_v38 = vpop.f32.mrb[69].mxu1 }
 0x924   : > { %7096 = vst.msk [vmem:[%s13215_s23 + $0x70] sm:$0xff] %vm449_vm1, %v7064_v26  ;;  %v7065_v27 = vadd.f32 %v7033_v2, %v6951_v36  ;;  %v7641_v21 = vadd.f32 %v7640_v38, %v7639_v5  ;;  %v7642_v23 = vpop.f32.mrb[70].mxu1  ;;  %v7040_v26 = vld [vmem:[%s8592_s13 + $0xb0] sm:$0xff]  ;;  %v7041_v5 = vld [vmem:[%s8592_s13 + $0xb8] sm:$0xff] }
 0x925   : > { %v7643_v18 = vpop.f32.mrb[71].mxu1 }
 0x926   : > { %7097 = vst.msk [vmem:[%s13215_s23 + $0x78] sm:$0xff] %vm449_vm1, %v7065_v27  ;;  %v6795_v4 = vadd.f32 %v7641_v21, %v13205_v42  ;;  %v7644_v30 = vadd.f32 %v7643_v18, %v7642_v23 }
 0x928   : > { %v6956_v34 = vadd.f32 %v13081_v45, %v6795_v4  ;;  %v6798_v28 = vadd.f32 %v7644_v30, %v13205_v42 }
 0x92a   : > { %v7066_v54 = vadd.f32 %v7034_v46, %v6956_v34  ;;  %v6959_v41 = vadd.f32 %v13089_v24, %v6798_v28  ;;  %v7645_v3 = vpop.f32.mrb[72].mxu1  ;;  %v7042_v28 = vld [vmem:[%s8592_s13 + $0xc0] sm:$0xff] }
 0x92b   : > { %v7646_v1 = vpop.f32.mrb[73].mxu1 }
 0x92c   : > { %7098 = vst.msk [vmem:[%s13215_s23 + $0x80] sm:$0xff] %vm449_vm1, %v7066_v54  ;;  %v7067_v15 = vadd.f32 %v7035_v33, %v6959_v41  ;;  %v7647_v55 = vadd.f32 %v7646_v1, %v7645_v3  ;;  %v7648_v7 = vpop.f32.mrb[74].mxu1  ;;  %v7043_v54 = vld [vmem:[%s8592_s13 + $0xc8] sm:$0xff] }
 0x92d   : > { %v7649_v43 = vpop.f32.mrb[75].mxu1 }
 0x92e   : > { %7099 = vst.msk [vmem:[%s13215_s23 + $0x88] sm:$0xff] %vm449_vm1, %v7067_v15  ;;  %v6803_v45 = vadd.f32 %v7647_v55, %v13205_v42  ;;  %v7650_v19 = vadd.f32 %v7649_v43, %v7648_v7 }
 0x930   : > { %v6964_v51 = vadd.f32 %v13078_v49, %v6803_v45  ;;  %v6806_v24 = vadd.f32 %v7650_v19, %v13205_v42 }
 0x932   : > { %v7068_v29 = vadd.f32 %v7036_v53, %v6964_v51  ;;  %v6967_v58 = vadd.f32 %v13085_v44, %v6806_v24  ;;  %v7651_v17 = vpop.f32.mrb[76].mxu1  ;;  %v7044_v53 = vld [vmem:[%s8592_s13 + $0xd0] sm:$0xff]  ;;  %v7045_v24 = vld [vmem:[%s8592_s13 + $0xd8] sm:$0xff] }
 0x933   : > { %v7652_v37 = vpop.f32.mrb[77].mxu1 }
 0x934   : > { %7100 = vst.msk [vmem:[%s13215_s23 + $0x90] sm:$0xff] %vm449_vm1, %v7068_v29  ;;  %v7069_v8 = vadd.f32 %v7037_v14, %v6967_v58  ;;  %v7653_v61 = vadd.f32 %v7652_v37, %v7651_v17  ;;  %v7654_v35 = vpop.f32.mrb[78].mxu1 }
 0x935   : > { %v7655_v56 = vpop.f32.mrb[79].mxu1 }
 0x936   : > { %7101 = vst.msk [vmem:[%s13215_s23 + $0x98] sm:$0xff] %vm449_vm1, %v7069_v8  ;;  %v6811_v49 = vadd.f32 %v7653_v61, %v13205_v42  ;;  %v7656_v16 = vadd.f32 %v7655_v56, %v7654_v35 }
 0x938   : > { %v6972_v39 = vadd.f32 %v13108_v0, %v6811_v49  ;;  %v6814_v44 = vadd.f32 %v7656_v16, %v13205_v42  ;;  %v7046_v49 = vld [vmem:[%s8592_s13 + $0xe0] sm:$0xff] }
 0x93a   : > { %v7070_v63 = vadd.f32 %v7038_v20, %v6972_v39  ;;  %v6975_v9 = vadd.f32 %v13116_v32, %v6814_v44  ;;  %v7657_v31 = vpop.f32.mrb[80].mxu1  ;;  %v7047_v20 = vld [vmem:[%s8592_s13 + $0xe8] sm:$0xff] }
 0x93b   : > { %v7658_v57 = vpop.f32.mrb[81].mxu1 }
 0x93c   : > { %7102 = vst.msk [vmem:[%s13215_s23 + $0xa0] sm:$0xff] %vm449_vm1, %v7070_v63  ;;  %v7071_v6 = vadd.f32 %v7039_v10, %v6975_v9  ;;  %v7659_v62 = vadd.f32 %v7658_v57, %v7657_v31  ;;  %v7660_v40 = vpop.f32.mrb[82].mxu1 }
 0x93d   : > { %v7661_v11 = vpop.f32.mrb[83].mxu1 }
 0x93e   : > { %7103 = vst.msk [vmem:[%s13215_s23 + $0xa8] sm:$0xff] %vm449_vm1, %v7071_v6  ;;  %v6819_v0 = vadd.f32 %v7659_v62, %v13205_v42  ;;  %v7662_v2 = vadd.f32 %v7661_v11, %v7660_v40  ;;  %v7048_v40 = vld [vmem:[%s8592_s13 + $0xf0] sm:$0xff] }
 0x940   : > { %v6980_v36 = vadd.f32 %v13105_v25, %v6819_v0  ;;  %v6822_v32 = vadd.f32 %v7662_v2, %v13205_v42  ;;  %v7049_v0 = vld [vmem:[%s8592_s13 + $0xf8] sm:$0xff]  ;;  %s8335_s13 = scalar_lea.vmem %s13374_s27, 4096 }
 0x941   : > { %p8336_p11 = scmp.ne.s32.totalorder %s13374_s27, %s8335_s13  ;;  %p8343_p0 = scmp.lt.s32.totalorder %s8341_s19, %s8335_s13 }
 0x942   : > { %v7072_v38 = vadd.f32 %v7040_v26, %v6980_v36  ;;  %v6983_v27 = vadd.f32 %v13112_v48, %v6822_v32  ;;  %v7663_v21 = vpop.f32.mrb[84].mxu1 }
 0x943   : > { %v7664_v23 = vpop.f32.mrb[85].mxu1  ;;  %p8337_p13 = pnand %p8336_p11, %p14154_p12  ;;  %p8344_p2 = por %p8343_p0, %p8342_p10 }
 0x944   : > { %7104 = vst.msk [vmem:[%s13215_s23 + $0xb0] sm:$0xff] %vm449_vm1, %v7072_v38  ;;  %v7073_v18 = vadd.f32 %v7041_v5, %v6983_v27  ;;  %v7665_v4 = vadd.f32 %v7664_v23, %v7663_v21  ;;  %v7666_v30 = vpop.f32.mrb[86].mxu1 }
 0x945   : > { %v7667_v46 = vpop.f32.mrb[87].mxu1  ;;  %p8338_p8 = pneg %p8337_p13 }
 0x946   : > { %7105 = vst.msk [vmem:[%s13215_s23 + $0xb8] sm:$0xff] %vm449_vm1, %v7073_v18  ;;  %v6827_v25 = vadd.f32 %v7665_v4, %v13205_v42  ;;  %v7668_v34 = vadd.f32 %v7667_v46, %v7666_v30 }
 0x947   : > { %p8345_p4 = pnand %p8344_p2, %p8338_p8 }
 0x948   : > { %v6988_v33 = vadd.f32 %v13133_v13, %v6827_v25  ;;  %v6830_v48 = vadd.f32 %v7668_v34, %v13205_v42 }
 0x94a   : > { %v7074_v41 = vadd.f32 %v7042_v28, %v6988_v33  ;;  %v6991_v3 = vadd.f32 %v13141_v12, %v6830_v48  ;;  %v7669_v1 = vpop.f32.mrb[88].mxu1 }
 0x94b   : > { %v7670_v15 = vpop.f32.mrb[89].mxu1 }
 0x94c   : > { %7106 = vst.msk [vmem:[%s13215_s23 + $0xc0] sm:$0xff] %vm449_vm1, %v7074_v41  ;;  %v7075_v55 = vadd.f32 %v7043_v54, %v6991_v3  ;;  %v7671_v7 = vadd.f32 %v7670_v15, %v7669_v1  ;;  %v7672_v43 = vpop.f32.mrb[90].mxu1 }
 0x94d   : > { %v7673_v45 = vpop.f32.mrb[91].mxu1 }
 0x94e   : > { %7107 = vst.msk [vmem:[%s13215_s23 + $0xc8] sm:$0xff] %vm449_vm1, %v7075_v55  ;;  %v6835_v13 = vadd.f32 %v7671_v7, %v13205_v42  ;;  %v7674_v19 = vadd.f32 %v7673_v45, %v7672_v43 }
 0x950   : > { %v6996_v51 = vadd.f32 %v13130_v52, %v6835_v13  ;;  %v6838_v12 = vadd.f32 %v7674_v19, %v13205_v42 }
 0x952   : > { %v7076_v14 = vadd.f32 %v7044_v53, %v6996_v51  ;;  %v6999_v29 = vadd.f32 %v13137_v59, %v6838_v12  ;;  %v7675_v58 = vpop.f32.mrb[92].mxu1 }
 0x953   : > { %v7676_v17 = vpop.f32.mrb[93].mxu1 }
 0x954   : > { %7108 = vst.msk [vmem:[%s13215_s23 + $0xd0] sm:$0xff] %vm449_vm1, %v7076_v14  ;;  %v7077_v37 = vadd.f32 %v7045_v24, %v6999_v29  ;;  %v7677_v8 = vadd.f32 %v7676_v17, %v7675_v58  ;;  %v7678_v61 = vpop.f32.mrb[94].mxu1 }
 0x955   : > { %v7679_v35 = vpop.f32.mrb[95].mxu1 }
 0x956   : > { %7109 = vst.msk [vmem:[%s13215_s23 + $0xd8] sm:$0xff] %vm449_vm1, %v7077_v37  ;;  %v6843_v52 = vadd.f32 %v7677_v8, %v13205_v42  ;;  %v7680_v56 = vadd.f32 %v7679_v35, %v7678_v61 }
 0x958   : > { %v7004_v16 = vadd.f32 %v13156_v60, %v6843_v52  ;;  %v6846_v59 = vadd.f32 %v7680_v56, %v13205_v42 }
 0x95a   : > { %v7078_v39 = vadd.f32 %v7046_v49, %v7004_v16  ;;  %v7007_v44 = vadd.f32 %v13164_v22, %v6846_v59  ;;  %v7681_v10 = vpop.f32.mrb[96].mxu1 }
 0x95b   : > { %v7682_v63 = vpop.f32.mrb[97].mxu1 }
 0x95c   : > { %7110 = vst.msk [vmem:[%s13215_s23 + $0xe0] sm:$0xff] %vm449_vm1, %v7078_v39  ;;  %v7079_v9 = vadd.f32 %v7047_v20, %v7007_v44  ;;  %v7683_v31 = vadd.f32 %v7682_v63, %v7681_v10  ;;  %v7684_v57 = vpop.f32.mrb[98].mxu1 }
 0x95d   : > { %v7685_v6 = vpop.f32.mrb[99].mxu1 }
 0x95e   : > { %7111 = vst.msk [vmem:[%s13215_s23 + $0xe8] sm:$0xff] %vm449_vm1, %v7079_v9  ;;  %v6851_v60 = vadd.f32 %v7683_v31, %v13205_v42  ;;  %v7686_v62 = vadd.f32 %v7685_v6, %v7684_v57 }
 0x960   : > { %v7012_v22 = vadd.f32 %v13153_v50, %v6851_v60  ;;  %v6854_v11 = vadd.f32 %v7686_v62, %v13205_v42 }
 0x962   : > { %v7080_v2 = vadd.f32 %v7048_v40, %v7012_v22  ;;  %v7015_v26 = vadd.f32 %v13160_v47, %v6854_v11 }
 0x964   : > { %7112 = vst.msk [vmem:[%s13215_s23 + $0xf0] sm:$0xff] %vm449_vm1, %v7080_v2  ;;  %v7081_v50 = vadd.f32 %v7049_v0, %v7015_v26 }
 0x966   : > { %7113 = vst.msk [vmem:[%s13215_s23 + $0xf8] sm:$0xff] %vm449_vm1, %v7081_v50 }
 0x967   : > { %8348 = shalt.err (!%p8345_p4)
}
 0x968   : > { %s8349_s18 = scalar_lea.hbm %s13372_s29, 4096  ;;  %s8353_s30 = scalar_lea.hbm %s13434_s12, 8192 }
 0x969   : > { %p8350_p5 = scmp.ne.s32.totalorder %s13372_s29, %s8349_s18  ;;  %p8354_p1 = scmp.lt.u32.totalorder %s13372_s29, %s13434_s12 }
 0x96a   : > { %p8355_p3 = scmp.lt.u32.totalorder %s8353_s30, %s8349_s18  ;;  %p8357_p11 = scmp.lt.u32.totalorder %s8349_s18, %s13372_s29 }
 0x96b   : > { %p8351_p7 = pnand %p8350_p5, %p14154_p12 }
 0x96c   : > { %p8356_p6 = por %p8355_p3, %p8354_p1 }
 0x96d   : > { %p8352_p9 = pneg %p8351_p7 }
 0x96e   : > { %p8358_p13 = por %p8357_p11, %p8356_p6 }
 0x970   : > { %p8359_p8 = pnand %p8358_p13, %p8352_p9 }
 0x972   : > { %8362 = shalt.err (!%p8359_p8)
}
 0x973   : > { %s8415_s13 = smov 128   ;;  %s8416_s20 = smov 8  }
 0x974   : > { %7919 = dma.vmem_to_hbm [thread:$0]  (%p14154_p12), %s13374_s27, 4096, %s13372_s29, %s7115_s25, %s8415_s13, %s8415_s13, %s8416_s20  }
 0x975 PF: > { %s7143_s19 = sand.u32 1, %s8389_s21   ;;  %p14155_p10 = scmp.ne.s32.totalorder %s13636_s16, 0 }
 0x976   : > { %p14156_p0 = scmp.ge.s32.totalorder %s8401_s24, 2  ;;  %s7144_s18 = scalar_lea.sflag [#allocation5], %s7143_s19 }
 0x978   : > { %p7926_p2 = pnand %p14156_p0, %p14155_p10 }
 0x97a   : > { %8384 = dma.done.wait (!%p7926_p2), %s7144_s18, 4096  }
 0x97b   : > { %8386 = vsyncadd (!%p7926_p2), %s7144_s18, 4294963200  ;;  %s14157_s24 = sld [smem:[#allocation10_spill]]  ;;  %s14158_s23 = sld [smem:[#allocation9_spill]] }
 0x97c   : > { %s14159_s17 = sld [smem:[#allocation11_spill]]  ;;  %s14160_s21 = smov %s8393_s22 }
 0x981   : > { %p25_p4 = scmp.ge.s32.totalorder %s14157_s24, 4   ;;  %s14161_s22 = smov %s14158_s23 }
 0x982   : > { %s14162_s23 = smov %s14159_s17 }
 0x983   :  { %27 = sbr.rel (!%p25_p4) target bundleno = 5 (0x5), region = 116 }
 0x98a   :  { %7149 = vsyncpa [#allocation4], 1 }
 0x98b   :  { %7151 = vsyncpa [#allocation4 + $0x1], 1 }
 0x98c   :  { %7152 = vsyncpa [#allocation5], 1 }
 0x98d   :  { %7154 = vsyncpa [#allocation5 + $0x1], 1 }

</bundles_post_ra>
